<compile_context>
chip_gen: v5e
topology: v5e:2x2
jax: 0.10.0
libtpu: 0.0.40
codegen_flags: <defaults>
</compile_context>

<pallas_src>
import functools

import jax
import jax.numpy as jnp
import numpy as np
from jax import lax
from jax.experimental import pallas as pl
from jax.experimental.pallas import tpu as pltpu


# ---------------------------------------------------------------------------
# Fused Pallas kernel: c1 + d1/d2/d3 + folded final BN + PReLU
# ---------------------------------------------------------------------------
def fused_down_c3_kernel(*refs, cin, cmid, ho, wo, ds, couts):
    """One batch image per grid step.

    refs layout:
      [x_ph, w_c1,
       (wv, b1, a1, wh, b2, wd, wp, sh, al) * 3 branches,
       o_ref, acc_ref(scratch)]
    """
    H, W, C = ho, wo, cmid
    HW = H * W

    xph_ref, wc1_ref = refs[0], refs[1]
    nb = len(ds)
    brefs = [refs[2 + 9 * i:2 + 9 * (i + 1)] for i in range(nb)]
    o_ref = refs[2 + 9 * nb]
    acc_ref = refs[2 + 9 * nb + 1]

    # ---- c1: 3x3 stride-2 conv, accumulated from the 2x2 phase-split input --
    x_ph = xph_ref[0]                       # (4, Ho+1, Wo+1, Cin); phase p = 2*(kh%2)+(kw%2)
    wc1 = wc1_ref[...]                      # (3, 3, Cin, C)
    o1f = jnp.zeros((HW, C), jnp.float32)
    for kh in range(3):
        for kw in range(3):
            p = 2 * (kh % 2) + (kw % 2)
            sl = x_ph[p, kh // 2:kh // 2 + H, kw // 2:kw // 2 + W, :]
            o1f = o1f + jnp.dot(sl.reshape(HW, cin), wc1[kh, kw],
                                preferred_element_type=jnp.float32)
    o1 = o1f.reshape(H, W, C)               # stays resident for all three branches

    # ---- three C3block branches -> channel slices of the (nOut, H*W) output -
    coff = 0
    for bi in range(nb):
        (wv_ref, b1_ref, a1_ref, wh_ref, b2_ref,
         wd_ref, wp_ref, sh_ref, al_ref) = brefs[bi]
        d = ds[bi]
        Co = couts[bi]
        kv = 2 * d - 1
        pad = d - 1

        # hoisted per-tap weight views (a single reshape per weight tensor)
        wv_b = wv_ref[...].reshape(kv, 1, 1, C)   # BN1 scale already folded in
        wh_b = wh_ref[...].reshape(kv, 1, 1, C)   # BN2 scale already folded in
        wd_b = wd_ref[...].reshape(3, 3, 1, 1, C)
        b1 = b1_ref[...]
        a1 = a1_ref[...]
        b2 = b2_ref[...]

        # (2d-1, 1) depthwise conv: shifts along the leading H axis; boundaries
        # via static range-limited accumulation (no zero-pad copies).
        acc_ref[...] = jnp.zeros_like(acc_ref)
        for k in range(kv):
            off = k - pad
            lo, hi = max(0, -off), min(H, H - off)
            if hi > lo:
                acc_ref[lo:hi] = acc_ref[lo:hi] + o1[lo + off:hi + off] * wv_b[k]
        y = acc_ref[...] + b1                      # folded BN1 bias
        y = jnp.where(y > 0, y, a1 * y)            # PReLU

        # (1, 2d-1) depthwise conv: shifts along W.
        # NOTE: these slice the sublane axis; at production widths a transposed
        # pass / pltpu.roll would move the shifts onto the idle XLU.
        acc_ref[...] = jnp.zeros_like(acc_ref)
        for k in range(kv):
            off = k - pad
            lo, hi = max(0, -off), min(W, W - off)
            if hi > lo:
                acc_ref[:, lo:hi, :] = (acc_ref[:, lo:hi, :]
                                        + y[:, lo + off:hi + off, :] * wh_b[k])
        z = acc_ref[...] + b2                      # folded BN2 bias

        # 3x3 depthwise conv, dilation d (out-of-image taps statically skipped).
        acc_ref[...] = jnp.zeros_like(acc_ref)
        for i in range(3):
            oh = (i - 1) * d
            lh, hh = max(0, -oh), min(H, H - oh)
            if hh <= lh:
                continue
            for j in range(3):
                ow = (j - 1) * d
                lw, hw = max(0, -ow), min(W, W - ow)
                if hw <= lw:
                    continue
                acc_ref[lh:hh, lw:hw, :] = (
                    acc_ref[lh:hh, lw:hw, :]
                    + z[lh + oh:hh + oh, lw + ow:hw + ow, :] * wd_b[i, j])
        u = acc_ref[...]

        # pointwise 1x1 conv (final BN scale folded into wp columns) + final BN
        # shift + PReLU epilogue, stored as an NC(HW) channel slice (lane-dense).
        out = jnp.dot(u.reshape(HW, C), wp_ref[...],
                      preferred_element_type=jnp.float32)        # (HW, Co)
        out = out + sh_ref[...]
        al = al_ref[...]
        out = jnp.where(out > 0, out, al * out)
        o_ref[0, coff:coff + Co, :] = out.T                       # (Co, HW)
        coff += Co


# ---------------------------------------------------------------------------
# Parameter prep: fold eval-mode BN affines into adjacent conv weights
# ---------------------------------------------------------------------------
def prepare_fused_params(params, nOut, ratio):
    n = nOut // 3
    n1 = nOut - 3 * n
    couts = (n + n1, n, n)
    bn_s = params['bn_scale'].reshape(-1)
    bn_b = params['bn_shift'].reshape(-1)
    alpha = params['alpha'].reshape(-1)

    arrays = []
    off = 0
    for name, Co in zip(('d1', 'd2', 'd3'), couts):
        p = params[name]
        C = p['wv'].shape[1]
        s1 = p['s1'].reshape(1, C)
        s2 = p['s2'].reshape(1, C)
        arrays += [
            p['wv'] * s1,                                   # BN1 scale -> wv
            p['b1'],                                        # (1,1,C) BN1 shift
            p['a1'],                                        # (1,1,C) PReLU alpha
            p['wh'] * s2,                                   # BN2 scale -> wh
            p['b2'],                                        # (1,1,C) BN2 shift
            p['wd'],                                        # (3,3,C)
            p['wp'] * bn_s[off:off + Co].reshape(1, Co),    # final BN scale -> wp
            bn_b[off:off + Co].reshape(1, Co),              # final BN shift
            alpha[off:off + Co].reshape(1, Co),             # final PReLU alpha
        ]
        off += Co
    return arrays, couts


# ---------------------------------------------------------------------------
# Wrapper
# ---------------------------------------------------------------------------
def down_advanced_c3_forward(x_nchw, params, nOut, ratio=(2, 4, 8)):
    """Pallas implementation of Down_advancedC3.forward (NCHW in/out)."""
    N, Cin, H, W = x_nchw.shape
    assert H % 2 == 0 and W % 2 == 0, "even spatial dims expected"
    n = nOut // 3
    Ho, Wo = H // 2, W // 2
    HW = Ho * Wo
    Ph, Pw = Ho + 1, Wo + 1

    x = jnp.transpose(x_nchw, (0, 2, 3, 1)).astype(jnp.float32)   # NCHW -> NHWC
    xp = jnp.pad(x, ((0, 0), (1, 1), (1, 1), (0, 0)))
    # size-preserving 2x2 phase split of the padded input (NOT a 9x im2col):
    # x_ph[n, 2r+c, i, j, :] == xp[n, 2i+r, 2j+c, :]
    x_ph = xp.reshape(N, Ph, 2, Pw, 2, Cin).transpose(0, 2, 4, 1, 3, 5)
    x_ph = x_ph.reshape(N, 4, Ph, Pw, Cin)

    branch_arrays, couts = prepare_fused_params(params, nOut, ratio)
    inputs = [x_ph, params['w_c1']] + branch_arrays

    def _rep(a):
        nd = a.ndim
        return pl.BlockSpec(a.shape, lambda b, _nd=nd: (0,) * _nd)

    in_specs = ([pl.BlockSpec((1, 4, Ph, Pw, Cin), lambda b: (b, 0, 0, 0, 0))]
                + [_rep(a) for a in inputs[1:]])

    kern = functools.partial(
        fused_down_c3_kernel,
        cin=Cin, cmid=n, ho=Ho, wo=Wo, ds=tuple(ratio), couts=tuple(couts))

    out = pl.pallas_call(
        kern,
        out_shape=jax.ShapeDtypeStruct((N, nOut, HW), jnp.float32),
        grid=(N,),
        in_specs=in_specs,
        out_specs=pl.BlockSpec((1, nOut, HW), lambda b: (b, 0, 0)),
        scratch_shapes=[pltpu.VMEM((Ho, Wo, n), jnp.float32)],
        compiler_params=pltpu.CompilerParams(
            dimension_semantics=("parallel",),
            vmem_limit_bytes=32 * 1024 * 1024),
    )(*inputs)
    # kernel emits NCHW-flat (N, nOut, Ho*Wo); only a reshape is needed.
    return out.reshape(N, nOut, Ho, Wo)


# ---------------------------------------------------------------------------
# Deterministic parameter initialization (synthetic weights)
# ---------------------------------------------------------------------------
def init_params(key, nIn, nOut, ratio=(2, 4, 8)):
    n = nOut // 3
    n1 = nOut - 3 * n
    keys = iter(jax.random.split(key, 64))

    def nrm(shape, scale=0.2):
        return scale * jax.random.normal(next(keys), shape, jnp.float32)

    def bn_affine(C, eps):
        gamma = 1.0 + nrm((C,), 0.1)
        beta = nrm((C,), 0.1)
        mean = nrm((C,), 0.1)
        var = jax.random.uniform(next(keys), (C,), jnp.float32, 0.5, 1.5)
        scale = gamma / jnp.sqrt(var + eps)
        shift = beta - mean * scale
        return scale.reshape(1, 1, C), shift.reshape(1, 1, C)

    def block(C, Co, d):
        kv = 2 * d - 1
        s1, b1 = bn_affine(C, 1e-5)
        s2, b2 = bn_affine(C, 1e-5)
        return dict(wv=nrm((kv, C), 0.3), s1=s1, b1=b1,
                    a1=(0.25 + nrm((C,), 0.05)).reshape(1, 1, C),
                    wh=nrm((kv, C), 0.3), s2=s2, b2=b2,
                    wd=nrm((3, 3, C), 0.3), wp=nrm((C, Co), 0.3))

    params = dict(w_c1=nrm((3, 3, nIn, n), 0.2))     # HWIO
    params['d1'] = block(n, n + n1, ratio[0])
    params['d2'] = block(n, n, ratio[1])
    params['d3'] = block(n, n, ratio[2])
    sf, bf = bn_affine(nOut, 1e-3)                   # top-level BN has eps=0.001
    params['bn_scale'] = sf
    params['bn_shift'] = bf
    params['alpha'] = (0.25 + nrm((nOut,), 0.05)).reshape(1, 1, nOut)
    return params


# ---------------------------------------------------------------------------
# Pure-JAX reference (same semantics) for a correctness check
# ---------------------------------------------------------------------------
def conv_ref(x, w, stride, pad_h, pad_w, dil=1, groups=1):
    return lax.conv_general_dilated(
        x, w, (stride, stride), ((pad_h, pad_h), (pad_w, pad_w)),
        rhs_dilation=(dil, dil),
        dimension_numbers=('NHWC', 'HWIO', 'NHWC'),
        feature_group_count=groups,
        precision=lax.Precision.HIGHEST)


def ref_forward(x_nchw, params, nOut, ratio=(2, 4, 8)):
    n = nOut // 3
    n1 = nOut - 3 * n
    x = jnp.transpose(x_nchw, (0, 2, 3, 1)).astype(jnp.float32)
    o1 = conv_ref(x, params['w_c1'], 2, 1, 1)

    def blk(xin, p, d, Co):
        C = xin.shape[-1]
        kv = 2 * d - 1
        y = conv_ref(xin, p['wv'].reshape(kv, 1, 1, C), 1, d - 1, 0, groups=C)
        y = y * p['s1'] + p['b1']
        y = jnp.where(y > 0, y, p['a1'] * y)
        z = conv_ref(y, p['wh'].reshape(1, kv, 1, C), 1, 0, d - 1, groups=C)
        z = z * p['s2'] + p['b2']
        u = conv_ref(z, p['wd'].reshape(3, 3, 1, C), 1, d, d, dil=d, groups=C)
        return conv_ref(u, p['wp'].reshape(1, 1, C, Co), 1, 0, 0)

    d1 = blk(o1, params['d1'], ratio[0], n + n1)
    d2 = blk(o1, params['d2'], ratio[1], n)
    d3 = blk(o1, params['d3'], ratio[2], n)
    comb = jnp.concatenate([d1, d2, d3], axis=-1)
    y = comb * params['bn_scale'] + params['bn_shift']
    y = jnp.where(y > 0, y, params['alpha'] * y)
    return jnp.transpose(y, (0, 3, 1, 2))


# ---------------------------------------------------------------------------
if __name__ == "__main__":
    nIn, nOut = 4, 12
    N, H, W = 2, 16, 16

    key = jax.random.PRNGKey(0)
    kx, kp = jax.random.split(key)
    x = jax.random.normal(kx, (N, nIn, H, W), jnp.float32)    # NCHW, like torch

    params = init_params(kp, nIn, nOut)

    fwd = jax.jit(lambda xi, pi: down_advanced_c3_forward(xi, pi, nOut))
    out = jax.block_until_ready(fwd(x, params))

    ref = jax.block_until_ready(ref_forward(x, params, nOut))
    assert out.shape == (N, nOut, H // 2, W // 2), out.shape
    # default (bf16-pass) MXU precision in the kernel vs HIGHEST in the
    # reference -> slightly relaxed tolerance.
    np.testing.assert_allclose(np.asarray(out), np.asarray(ref),
                               rtol=2e-2, atol=2e-2)
    print("KERNEL_OK")
</pallas_src>

<mosaic_0001>
module attributes {stable_mosaic.version = 11 : i64} {
  func.func @fused_down_c3_kernel(%arg0: i32, %arg1: memref<1x4x9x9x4xf32, #tpu.memory_space<vmem>>, %arg2: memref<3x3x4x4xf32, #tpu.memory_space<vmem>>, %arg3: memref<3x4xf32, #tpu.memory_space<vmem>>, %arg4: memref<1x1x4xf32, #tpu.memory_space<vmem>>, %arg5: memref<1x1x4xf32, #tpu.memory_space<vmem>>, %arg6: memref<3x4xf32, #tpu.memory_space<vmem>>, %arg7: memref<1x1x4xf32, #tpu.memory_space<vmem>>, %arg8: memref<3x3x4xf32, #tpu.memory_space<vmem>>, %arg9: memref<4x4xf32, #tpu.memory_space<vmem>>, %arg10: memref<1x4xf32, #tpu.memory_space<vmem>>, %arg11: memref<1x4xf32, #tpu.memory_space<vmem>>, %arg12: memref<7x4xf32, #tpu.memory_space<vmem>>, %arg13: memref<1x1x4xf32, #tpu.memory_space<vmem>>, %arg14: memref<1x1x4xf32, #tpu.memory_space<vmem>>, %arg15: memref<7x4xf32, #tpu.memory_space<vmem>>, %arg16: memref<1x1x4xf32, #tpu.memory_space<vmem>>, %arg17: memref<3x3x4xf32, #tpu.memory_space<vmem>>, %arg18: memref<4x4xf32, #tpu.memory_space<vmem>>, %arg19: memref<1x4xf32, #tpu.memory_space<vmem>>, %arg20: memref<1x4xf32, #tpu.memory_space<vmem>>, %arg21: memref<15x4xf32, #tpu.memory_space<vmem>>, %arg22: memref<1x1x4xf32, #tpu.memory_space<vmem>>, %arg23: memref<1x1x4xf32, #tpu.memory_space<vmem>>, %arg24: memref<15x4xf32, #tpu.memory_space<vmem>>, %arg25: memref<1x1x4xf32, #tpu.memory_space<vmem>>, %arg26: memref<3x3x4xf32, #tpu.memory_space<vmem>>, %arg27: memref<4x4xf32, #tpu.memory_space<vmem>>, %arg28: memref<1x4xf32, #tpu.memory_space<vmem>>, %arg29: memref<1x4xf32, #tpu.memory_space<vmem>>, %arg30: memref<1x12x64xf32, #tpu.memory_space<vmem>>, %arg31: memref<8x8x4xf32, #tpu.memory_space<vmem>>) attributes {dimension_semantics = [#tpu.dimension_semantics<parallel>], iteration_bounds = array<i64: 2>, scalar_prefetch = 0 : i64, scratch_operands = 1 : i64, tpu.core_type = #tpu.core_type<tc>, window_params = [{transform_indices = @transform_0, window_bounds = array<i64: 1, 4, 9, 9, 4>}, {pipeline_mode = #tpu.pipeline_mode<synchronous>, transform_indices = @transform_1, window_bounds = array<i64: 3, 3, 4, 4>}, {pipeline_mode = #tpu.pipeline_mode<synchronous>, transform_indices = @transform_2, window_bounds = array<i64: 3, 4>}, {pipeline_mode = #tpu.pipeline_mode<synchronous>, transform_indices = @transform_3, window_bounds = array<i64: 1, 1, 4>}, {pipeline_mode = #tpu.pipeline_mode<synchronous>, transform_indices = @transform_4, window_bounds = array<i64: 1, 1, 4>}, {pipeline_mode = #tpu.pipeline_mode<synchronous>, transform_indices = @transform_5, window_bounds = array<i64: 3, 4>}, {pipeline_mode = #tpu.pipeline_mode<synchronous>, transform_indices = @transform_6, window_bounds = array<i64: 1, 1, 4>}, {pipeline_mode = #tpu.pipeline_mode<synchronous>, transform_indices = @transform_7, window_bounds = array<i64: 3, 3, 4>}, {pipeline_mode = #tpu.pipeline_mode<synchronous>, transform_indices = @transform_8, window_bounds = array<i64: 4, 4>}, {pipeline_mode = #tpu.pipeline_mode<synchronous>, transform_indices = @transform_9, window_bounds = array<i64: 1, 4>}, {pipeline_mode = #tpu.pipeline_mode<synchronous>, transform_indices = @transform_10, window_bounds = array<i64: 1, 4>}, {pipeline_mode = #tpu.pipeline_mode<synchronous>, transform_indices = @transform_11, window_bounds = array<i64: 7, 4>}, {pipeline_mode = #tpu.pipeline_mode<synchronous>, transform_indices = @transform_12, window_bounds = array<i64: 1, 1, 4>}, {pipeline_mode = #tpu.pipeline_mode<synchronous>, transform_indices = @transform_13, window_bounds = array<i64: 1, 1, 4>}, {pipeline_mode = #tpu.pipeline_mode<synchronous>, transform_indices = @transform_14, window_bounds = array<i64: 7, 4>}, {pipeline_mode = #tpu.pipeline_mode<synchronous>, transform_indices = @transform_15, window_bounds = array<i64: 1, 1, 4>}, {pipeline_mode = #tpu.pipeline_mode<synchronous>, transform_indices = @transform_16, window_bounds = array<i64: 3, 3, 4>}, {pipeline_mode = #tpu.pipeline_mode<synchronous>, transform_indices = @transform_17, window_bounds = array<i64: 4, 4>}, {pipeline_mode = #tpu.pipeline_mode<synchronous>, transform_indices = @transform_18, window_bounds = array<i64: 1, 4>}, {pipeline_mode = #tpu.pipeline_mode<synchronous>, transform_indices = @transform_19, window_bounds = array<i64: 1, 4>}, {pipeline_mode = #tpu.pipeline_mode<synchronous>, transform_indices = @transform_20, window_bounds = array<i64: 15, 4>}, {pipeline_mode = #tpu.pipeline_mode<synchronous>, transform_indices = @transform_21, window_bounds = array<i64: 1, 1, 4>}, {pipeline_mode = #tpu.pipeline_mode<synchronous>, transform_indices = @transform_22, window_bounds = array<i64: 1, 1, 4>}, {pipeline_mode = #tpu.pipeline_mode<synchronous>, transform_indices = @transform_23, window_bounds = array<i64: 15, 4>}, {pipeline_mode = #tpu.pipeline_mode<synchronous>, transform_indices = @transform_24, window_bounds = array<i64: 1, 1, 4>}, {pipeline_mode = #tpu.pipeline_mode<synchronous>, transform_indices = @transform_25, window_bounds = array<i64: 3, 3, 4>}, {pipeline_mode = #tpu.pipeline_mode<synchronous>, transform_indices = @transform_26, window_bounds = array<i64: 4, 4>}, {pipeline_mode = #tpu.pipeline_mode<synchronous>, transform_indices = @transform_27, window_bounds = array<i64: 1, 4>}, {pipeline_mode = #tpu.pipeline_mode<synchronous>, transform_indices = @transform_28, window_bounds = array<i64: 1, 4>}, {transform_indices = @transform_29, window_bounds = array<i64: 1, 12, 64>}]} {
    %c0 = arith.constant 0 : index
    %c0_0 = arith.constant 0 : index
    %c0_1 = arith.constant 0 : index
    %c0_2 = arith.constant 0 : index
    %c0_3 = arith.constant 0 : index
    %0 = vector.load %arg1[%c0, %c0_0, %c0_1, %c0_2, %c0_3] : memref<1x4x9x9x4xf32, #tpu.memory_space<vmem>>, vector<1x4x9x9x4xf32>
    %1 = vector.shape_cast %0 : vector<1x4x9x9x4xf32> to vector<4x9x9x4xf32>
    %c0_4 = arith.constant 0 : index
    %c0_5 = arith.constant 0 : index
    %c0_6 = arith.constant 0 : index
    %c0_7 = arith.constant 0 : index
    %2 = vector.load %arg2[%c0_4, %c0_5, %c0_6, %c0_7] : memref<3x3x4x4xf32, #tpu.memory_space<vmem>>, vector<3x3x4x4xf32>
    %cst = arith.constant 0.000000e+00 : f32
    %3 = vector.broadcast %cst : f32 to vector<64x4xf32>
    %4 = vector.extract_strided_slice %1 {offsets = [0, 0, 0, 0], sizes = [1, 8, 8, 4], strides = [1, 1, 1, 1]} : vector<4x9x9x4xf32> to vector<1x8x8x4xf32>
    %5 = vector.shape_cast %4 : vector<1x8x8x4xf32> to vector<8x8x4xf32>
    %6 = vector.shape_cast %5 : vector<8x8x4xf32> to vector<64x4xf32>
    %7 = vector.extract_strided_slice %2 {offsets = [0, 0, 0, 0], sizes = [1, 1, 4, 4], strides = [1, 1, 1, 1]} : vector<3x3x4x4xf32> to vector<1x1x4x4xf32>
    %8 = vector.shape_cast %7 : vector<1x1x4x4xf32> to vector<4x4xf32>
    %cst_8 = arith.constant dense<0.000000e+00> : vector<64x4xf32>
    %9 = tpu.matmul %6, %8, %cst_8 {dimension_numbers = #tpu.dot_dimension_numbers<[1], [0], [0], [1], [0, 0, 1, 1], [], []>} : vector<64x4xf32>, vector<4x4xf32>, vector<64x4xf32> -> vector<64x4xf32>
    %10 = arith.addf %3, %9 : vector<64x4xf32>
    %11 = vector.extract_strided_slice %1 {offsets = [1, 0, 0, 0], sizes = [1, 8, 8, 4], strides = [1, 1, 1, 1]} : vector<4x9x9x4xf32> to vector<1x8x8x4xf32>
    %12 = vector.shape_cast %11 : vector<1x8x8x4xf32> to vector<8x8x4xf32>
    %13 = vector.shape_cast %12 : vector<8x8x4xf32> to vector<64x4xf32>
    %14 = vector.extract_strided_slice %2 {offsets = [0, 1, 0, 0], sizes = [1, 1, 4, 4], strides = [1, 1, 1, 1]} : vector<3x3x4x4xf32> to vector<1x1x4x4xf32>
    %15 = vector.shape_cast %14 : vector<1x1x4x4xf32> to vector<4x4xf32>
    %cst_9 = arith.constant dense<0.000000e+00> : vector<64x4xf32>
    %16 = tpu.matmul %13, %15, %cst_9 {dimension_numbers = #tpu.dot_dimension_numbers<[1], [0], [0], [1], [0, 0, 1, 1], [], []>} : vector<64x4xf32>, vector<4x4xf32>, vector<64x4xf32> -> vector<64x4xf32>
    %17 = arith.addf %10, %16 : vector<64x4xf32>
    %18 = vector.extract_strided_slice %1 {offsets = [0, 0, 1, 0], sizes = [1, 8, 8, 4], strides = [1, 1, 1, 1]} : vector<4x9x9x4xf32> to vector<1x8x8x4xf32>
    %19 = vector.shape_cast %18 : vector<1x8x8x4xf32> to vector<8x8x4xf32>
    %20 = vector.shape_cast %19 : vector<8x8x4xf32> to vector<64x4xf32>
    %21 = vector.extract_strided_slice %2 {offsets = [0, 2, 0, 0], sizes = [1, 1, 4, 4], strides = [1, 1, 1, 1]} : vector<3x3x4x4xf32> to vector<1x1x4x4xf32>
    %22 = vector.shape_cast %21 : vector<1x1x4x4xf32> to vector<4x4xf32>
    %cst_10 = arith.constant dense<0.000000e+00> : vector<64x4xf32>
    %23 = tpu.matmul %20, %22, %cst_10 {dimension_numbers = #tpu.dot_dimension_numbers<[1], [0], [0], [1], [0, 0, 1, 1], [], []>} : vector<64x4xf32>, vector<4x4xf32>, vector<64x4xf32> -> vector<64x4xf32>
    %24 = arith.addf %17, %23 : vector<64x4xf32>
    %25 = vector.extract_strided_slice %1 {offsets = [2, 0, 0, 0], sizes = [1, 8, 8, 4], strides = [1, 1, 1, 1]} : vector<4x9x9x4xf32> to vector<1x8x8x4xf32>
    %26 = vector.shape_cast %25 : vector<1x8x8x4xf32> to vector<8x8x4xf32>
    %27 = vector.shape_cast %26 : vector<8x8x4xf32> to vector<64x4xf32>
    %28 = vector.extract_strided_slice %2 {offsets = [1, 0, 0, 0], sizes = [1, 1, 4, 4], strides = [1, 1, 1, 1]} : vector<3x3x4x4xf32> to vector<1x1x4x4xf32>
    %29 = vector.shape_cast %28 : vector<1x1x4x4xf32> to vector<4x4xf32>
    %cst_11 = arith.constant dense<0.000000e+00> : vector<64x4xf32>
    %30 = tpu.matmul %27, %29, %cst_11 {dimension_numbers = #tpu.dot_dimension_numbers<[1], [0], [0], [1], [0, 0, 1, 1], [], []>} : vector<64x4xf32>, vector<4x4xf32>, vector<64x4xf32> -> vector<64x4xf32>
    %31 = arith.addf %24, %30 : vector<64x4xf32>
    %32 = vector.extract_strided_slice %1 {offsets = [3, 0, 0, 0], sizes = [1, 8, 8, 4], strides = [1, 1, 1, 1]} : vector<4x9x9x4xf32> to vector<1x8x8x4xf32>
    %33 = vector.shape_cast %32 : vector<1x8x8x4xf32> to vector<8x8x4xf32>
    %34 = vector.shape_cast %33 : vector<8x8x4xf32> to vector<64x4xf32>
    %35 = vector.extract_strided_slice %2 {offsets = [1, 1, 0, 0], sizes = [1, 1, 4, 4], strides = [1, 1, 1, 1]} : vector<3x3x4x4xf32> to vector<1x1x4x4xf32>
    %36 = vector.shape_cast %35 : vector<1x1x4x4xf32> to vector<4x4xf32>
    %cst_12 = arith.constant dense<0.000000e+00> : vector<64x4xf32>
    %37 = tpu.matmul %34, %36, %cst_12 {dimension_numbers = #tpu.dot_dimension_numbers<[1], [0], [0], [1], [0, 0, 1, 1], [], []>} : vector<64x4xf32>, vector<4x4xf32>, vector<64x4xf32> -> vector<64x4xf32>
    %38 = arith.addf %31, %37 : vector<64x4xf32>
    %39 = vector.extract_strided_slice %1 {offsets = [2, 0, 1, 0], sizes = [1, 8, 8, 4], strides = [1, 1, 1, 1]} : vector<4x9x9x4xf32> to vector<1x8x8x4xf32>
    %40 = vector.shape_cast %39 : vector<1x8x8x4xf32> to vector<8x8x4xf32>
    %41 = vector.shape_cast %40 : vector<8x8x4xf32> to vector<64x4xf32>
    %42 = vector.extract_strided_slice %2 {offsets = [1, 2, 0, 0], sizes = [1, 1, 4, 4], strides = [1, 1, 1, 1]} : vector<3x3x4x4xf32> to vector<1x1x4x4xf32>
    %43 = vector.shape_cast %42 : vector<1x1x4x4xf32> to vector<4x4xf32>
    %cst_13 = arith.constant dense<0.000000e+00> : vector<64x4xf32>
    %44 = tpu.matmul %41, %43, %cst_13 {dimension_numbers = #tpu.dot_dimension_numbers<[1], [0], [0], [1], [0, 0, 1, 1], [], []>} : vector<64x4xf32>, vector<4x4xf32>, vector<64x4xf32> -> vector<64x4xf32>
    %45 = arith.addf %38, %44 : vector<64x4xf32>
    %46 = vector.extract_strided_slice %1 {offsets = [0, 1, 0, 0], sizes = [1, 8, 8, 4], strides = [1, 1, 1, 1]} : vector<4x9x9x4xf32> to vector<1x8x8x4xf32>
    %47 = vector.shape_cast %46 : vector<1x8x8x4xf32> to vector<8x8x4xf32>
    %48 = vector.shape_cast %47 : vector<8x8x4xf32> to vector<64x4xf32>
    %49 = vector.extract_strided_slice %2 {offsets = [2, 0, 0, 0], sizes = [1, 1, 4, 4], strides = [1, 1, 1, 1]} : vector<3x3x4x4xf32> to vector<1x1x4x4xf32>
    %50 = vector.shape_cast %49 : vector<1x1x4x4xf32> to vector<4x4xf32>
    %cst_14 = arith.constant dense<0.000000e+00> : vector<64x4xf32>
    %51 = tpu.matmul %48, %50, %cst_14 {dimension_numbers = #tpu.dot_dimension_numbers<[1], [0], [0], [1], [0, 0, 1, 1], [], []>} : vector<64x4xf32>, vector<4x4xf32>, vector<64x4xf32> -> vector<64x4xf32>
    %52 = arith.addf %45, %51 : vector<64x4xf32>
    %53 = vector.extract_strided_slice %1 {offsets = [1, 1, 0, 0], sizes = [1, 8, 8, 4], strides = [1, 1, 1, 1]} : vector<4x9x9x4xf32> to vector<1x8x8x4xf32>
    %54 = vector.shape_cast %53 : vector<1x8x8x4xf32> to vector<8x8x4xf32>
    %55 = vector.shape_cast %54 : vector<8x8x4xf32> to vector<64x4xf32>
    %56 = vector.extract_strided_slice %2 {offsets = [2, 1, 0, 0], sizes = [1, 1, 4, 4], strides = [1, 1, 1, 1]} : vector<3x3x4x4xf32> to vector<1x1x4x4xf32>
    %57 = vector.shape_cast %56 : vector<1x1x4x4xf32> to vector<4x4xf32>
    %cst_15 = arith.constant dense<0.000000e+00> : vector<64x4xf32>
    %58 = tpu.matmul %55, %57, %cst_15 {dimension_numbers = #tpu.dot_dimension_numbers<[1], [0], [0], [1], [0, 0, 1, 1], [], []>} : vector<64x4xf32>, vector<4x4xf32>, vector<64x4xf32> -> vector<64x4xf32>
    %59 = arith.addf %52, %58 : vector<64x4xf32>
    %60 = vector.extract_strided_slice %1 {offsets = [0, 1, 1, 0], sizes = [1, 8, 8, 4], strides = [1, 1, 1, 1]} : vector<4x9x9x4xf32> to vector<1x8x8x4xf32>
    %61 = vector.shape_cast %60 : vector<1x8x8x4xf32> to vector<8x8x4xf32>
    %62 = vector.shape_cast %61 : vector<8x8x4xf32> to vector<64x4xf32>
    %63 = vector.extract_strided_slice %2 {offsets = [2, 2, 0, 0], sizes = [1, 1, 4, 4], strides = [1, 1, 1, 1]} : vector<3x3x4x4xf32> to vector<1x1x4x4xf32>
    %64 = vector.shape_cast %63 : vector<1x1x4x4xf32> to vector<4x4xf32>
    %cst_16 = arith.constant dense<0.000000e+00> : vector<64x4xf32>
    %65 = tpu.matmul %62, %64, %cst_16 {dimension_numbers = #tpu.dot_dimension_numbers<[1], [0], [0], [1], [0, 0, 1, 1], [], []>} : vector<64x4xf32>, vector<4x4xf32>, vector<64x4xf32> -> vector<64x4xf32>
    %66 = arith.addf %59, %65 : vector<64x4xf32>
    %67 = vector.shape_cast %66 : vector<64x4xf32> to vector<8x8x4xf32>
    %c0_17 = arith.constant 0 : index
    %c0_18 = arith.constant 0 : index
    %68 = vector.load %arg3[%c0_17, %c0_18] : memref<3x4xf32, #tpu.memory_space<vmem>>, vector<3x4xf32>
    %69 = vector.shape_cast %68 : vector<3x4xf32> to vector<3x1x1x4xf32>
    %c0_19 = arith.constant 0 : index
    %c0_20 = arith.constant 0 : index
    %70 = vector.load %arg6[%c0_19, %c0_20] : memref<3x4xf32, #tpu.memory_space<vmem>>, vector<3x4xf32>
    %71 = vector.shape_cast %70 : vector<3x4xf32> to vector<3x1x1x4xf32>
    %c0_21 = arith.constant 0 : index
    %c0_22 = arith.constant 0 : index
    %c0_23 = arith.constant 0 : index
    %72 = vector.load %arg8[%c0_21, %c0_22, %c0_23] : memref<3x3x4xf32, #tpu.memory_space<vmem>>, vector<3x3x4xf32>
    %73 = vector.shape_cast %72 : vector<3x3x4xf32> to vector<3x3x1x1x4xf32>
    %c0_24 = arith.constant 0 : index
    %c0_25 = arith.constant 0 : index
    %c0_26 = arith.constant 0 : index
    %74 = vector.load %arg4[%c0_24, %c0_25, %c0_26] : memref<1x1x4xf32, #tpu.memory_space<vmem>>, vector<1x1x4xf32>
    %c0_27 = arith.constant 0 : index
    %c0_28 = arith.constant 0 : index
    %c0_29 = arith.constant 0 : index
    %75 = vector.load %arg5[%c0_27, %c0_28, %c0_29] : memref<1x1x4xf32, #tpu.memory_space<vmem>>, vector<1x1x4xf32>
    %c0_30 = arith.constant 0 : index
    %c0_31 = arith.constant 0 : index
    %c0_32 = arith.constant 0 : index
    %76 = vector.load %arg7[%c0_30, %c0_31, %c0_32] : memref<1x1x4xf32, #tpu.memory_space<vmem>>, vector<1x1x4xf32>
    %cst_33 = arith.constant 0.000000e+00 : f32
    %77 = vector.broadcast %cst_33 : f32 to vector<8x8x4xf32>
    %c0_34 = arith.constant 0 : index
    %c0_35 = arith.constant 0 : index
    %c0_36 = arith.constant 0 : index
    %78 = vector.load %arg31[%c0_34, %c0_35, %c0_36] : memref<8x8x4xf32, #tpu.memory_space<vmem>>, vector<8x8x4xf32>
    tpu.vector_store %arg31[%c0_34, %c0_35, %c0_36], %77 {strides = array<i32>} : memref<8x8x4xf32, #tpu.memory_space<vmem>>, vector<8x8x4xf32>,
    %c1 = arith.constant 1 : index
    %c0_37 = arith.constant 0 : index
    %c0_38 = arith.constant 0 : index
    %79 = vector.load %arg31[%c1, %c0_37, %c0_38] : memref<8x8x4xf32, #tpu.memory_space<vmem>>, vector<7x8x4xf32>
    %80 = vector.extract_strided_slice %67 {offsets = [0, 0, 0], sizes = [7, 8, 4], strides = [1, 1, 1]} : vector<8x8x4xf32> to vector<7x8x4xf32>
    %81 = vector.extract_strided_slice %69 {offsets = [0, 0, 0, 0], sizes = [1, 1, 1, 4], strides = [1, 1, 1, 1]} : vector<3x1x1x4xf32> to vector<1x1x1x4xf32>
    %82 = vector.shape_cast %81 : vector<1x1x1x4xf32> to vector<1x1x4xf32>
    %83 = vector.broadcast %82 : vector<1x1x4xf32> to vector<7x8x4xf32>
    %84 = arith.mulf %80, %83 : vector<7x8x4xf32>
    %85 = arith.addf %79, %84 : vector<7x8x4xf32>
    %c1_39 = arith.constant 1 : index
    %c0_40 = arith.constant 0 : index
    %c0_41 = arith.constant 0 : index
    %86 = vector.load %arg31[%c1_39, %c0_40, %c0_41] : memref<8x8x4xf32, #tpu.memory_space<vmem>>, vector<7x8x4xf32>
    tpu.vector_store %arg31[%c1_39, %c0_40, %c0_41], %85 {strides = array<i32>} : memref<8x8x4xf32, #tpu.memory_space<vmem>>, vector<7x8x4xf32>,
    %c0_42 = arith.constant 0 : index
    %c0_43 = arith.constant 0 : index
    %c0_44 = arith.constant 0 : index
    %87 = vector.load %arg31[%c0_42, %c0_43, %c0_44] : memref<8x8x4xf32, #tpu.memory_space<vmem>>, vector<8x8x4xf32>
    %88 = vector.extract_strided_slice %69 {offsets = [1, 0, 0, 0], sizes = [1, 1, 1, 4], strides = [1, 1, 1, 1]} : vector<3x1x1x4xf32> to vector<1x1x1x4xf32>
    %89 = vector.shape_cast %88 : vector<1x1x1x4xf32> to vector<1x1x4xf32>
    %90 = vector.broadcast %89 : vector<1x1x4xf32> to vector<8x8x4xf32>
    %91 = arith.mulf %67, %90 : vector<8x8x4xf32>
    %92 = arith.addf %87, %91 : vector<8x8x4xf32>
    %c0_45 = arith.constant 0 : index
    %c0_46 = arith.constant 0 : index
    %c0_47 = arith.constant 0 : index
    %93 = vector.load %arg31[%c0_45, %c0_46, %c0_47] : memref<8x8x4xf32, #tpu.memory_space<vmem>>, vector<8x8x4xf32>
    tpu.vector_store %arg31[%c0_45, %c0_46, %c0_47], %92 {strides = array<i32>} : memref<8x8x4xf32, #tpu.memory_space<vmem>>, vector<8x8x4xf32>,
    %c0_48 = arith.constant 0 : index
    %c0_49 = arith.constant 0 : index
    %c0_50 = arith.constant 0 : index
    %94 = vector.load %arg31[%c0_48, %c0_49, %c0_50] : memref<8x8x4xf32, #tpu.memory_space<vmem>>, vector<7x8x4xf32>
    %95 = vector.extract_strided_slice %67 {offsets = [1, 0, 0], sizes = [7, 8, 4], strides = [1, 1, 1]} : vector<8x8x4xf32> to vector<7x8x4xf32>
    %96 = vector.extract_strided_slice %69 {offsets = [2, 0, 0, 0], sizes = [1, 1, 1, 4], strides = [1, 1, 1, 1]} : vector<3x1x1x4xf32> to vector<1x1x1x4xf32>
    %97 = vector.shape_cast %96 : vector<1x1x1x4xf32> to vector<1x1x4xf32>
    %98 = vector.broadcast %97 : vector<1x1x4xf32> to vector<7x8x4xf32>
    %99 = arith.mulf %95, %98 : vector<7x8x4xf32>
    %100 = arith.addf %94, %99 : vector<7x8x4xf32>
    %c0_51 = arith.constant 0 : index
    %c0_52 = arith.constant 0 : index
    %c0_53 = arith.constant 0 : index
    %101 = vector.load %arg31[%c0_51, %c0_52, %c0_53] : memref<8x8x4xf32, #tpu.memory_space<vmem>>, vector<7x8x4xf32>
    tpu.vector_store %arg31[%c0_51, %c0_52, %c0_53], %100 {strides = array<i32>} : memref<8x8x4xf32, #tpu.memory_space<vmem>>, vector<7x8x4xf32>,
    %c0_54 = arith.constant 0 : index
    %c0_55 = arith.constant 0 : index
    %c0_56 = arith.constant 0 : index
    %102 = vector.load %arg31[%c0_54, %c0_55, %c0_56] : memref<8x8x4xf32, #tpu.memory_space<vmem>>, vector<8x8x4xf32>
    %103 = vector.broadcast %74 : vector<1x1x4xf32> to vector<8x8x4xf32>
    %104 = arith.addf %102, %103 : vector<8x8x4xf32>
    %cst_57 = arith.constant 0.000000e+00 : f32
    %105 = vector.broadcast %cst_57 : f32 to vector<8x8x4xf32>
    %106 = arith.cmpf ogt, %104, %105 : vector<8x8x4xf32>
    %107 = vector.broadcast %75 : vector<1x1x4xf32> to vector<8x8x4xf32>
    %108 = arith.mulf %107, %104 : vector<8x8x4xf32>
    %109 = arith.select %106, %104, %108 : vector<8x8x4xi1>, vector<8x8x4xf32>
    %cst_58 = arith.constant 0.000000e+00 : f32
    %110 = vector.broadcast %cst_58 : f32 to vector<8x8x4xf32>
    %c0_59 = arith.constant 0 : index
    %c0_60 = arith.constant 0 : index
    %c0_61 = arith.constant 0 : index
    %111 = vector.load %arg31[%c0_59, %c0_60, %c0_61] : memref<8x8x4xf32, #tpu.memory_space<vmem>>, vector<8x8x4xf32>
    tpu.vector_store %arg31[%c0_59, %c0_60, %c0_61], %110 {strides = array<i32>} : memref<8x8x4xf32, #tpu.memory_space<vmem>>, vector<8x8x4xf32>,
    %c0_62 = arith.constant 0 : index
    %c1_63 = arith.constant 1 : index
    %c0_64 = arith.constant 0 : index
    %112 = vector.load %arg31[%c0_62, %c1_63, %c0_64] : memref<8x8x4xf32, #tpu.memory_space<vmem>>, vector<8x7x4xf32>
    %113 = vector.extract_strided_slice %109 {offsets = [0, 0, 0], sizes = [8, 7, 4], strides = [1, 1, 1]} : vector<8x8x4xf32> to vector<8x7x4xf32>
    %114 = vector.extract_strided_slice %71 {offsets = [0, 0, 0, 0], sizes = [1, 1, 1, 4], strides = [1, 1, 1, 1]} : vector<3x1x1x4xf32> to vector<1x1x1x4xf32>
    %115 = vector.shape_cast %114 : vector<1x1x1x4xf32> to vector<1x1x4xf32>
    %116 = vector.broadcast %115 : vector<1x1x4xf32> to vector<8x7x4xf32>
    %117 = arith.mulf %113, %116 : vector<8x7x4xf32>
    %118 = arith.addf %112, %117 : vector<8x7x4xf32>
    %c0_65 = arith.constant 0 : index
    %c1_66 = arith.constant 1 : index
    %c0_67 = arith.constant 0 : index
    %119 = vector.load %arg31[%c0_65, %c1_66, %c0_67] : memref<8x8x4xf32, #tpu.memory_space<vmem>>, vector<8x7x4xf32>
    tpu.vector_store %arg31[%c0_65, %c1_66, %c0_67], %118 {strides = array<i32>} : memref<8x8x4xf32, #tpu.memory_space<vmem>>, vector<8x7x4xf32>,
    %c0_68 = arith.constant 0 : index
    %c0_69 = arith.constant 0 : index
    %c0_70 = arith.constant 0 : index
    %120 = vector.load %arg31[%c0_68, %c0_69, %c0_70] : memref<8x8x4xf32, #tpu.memory_space<vmem>>, vector<8x8x4xf32>
    %121 = vector.extract_strided_slice %71 {offsets = [1, 0, 0, 0], sizes = [1, 1, 1, 4], strides = [1, 1, 1, 1]} : vector<3x1x1x4xf32> to vector<1x1x1x4xf32>
    %122 = vector.shape_cast %121 : vector<1x1x1x4xf32> to vector<1x1x4xf32>
    %123 = vector.broadcast %122 : vector<1x1x4xf32> to vector<8x8x4xf32>
    %124 = arith.mulf %109, %123 : vector<8x8x4xf32>
    %125 = arith.addf %120, %124 : vector<8x8x4xf32>
    %c0_71 = arith.constant 0 : index
    %c0_72 = arith.constant 0 : index
    %c0_73 = arith.constant 0 : index
    %126 = vector.load %arg31[%c0_71, %c0_72, %c0_73] : memref<8x8x4xf32, #tpu.memory_space<vmem>>, vector<8x8x4xf32>
    tpu.vector_store %arg31[%c0_71, %c0_72, %c0_73], %125 {strides = array<i32>} : memref<8x8x4xf32, #tpu.memory_space<vmem>>, vector<8x8x4xf32>,
    %c0_74 = arith.constant 0 : index
    %c0_75 = arith.constant 0 : index
    %c0_76 = arith.constant 0 : index
    %127 = vector.load %arg31[%c0_74, %c0_75, %c0_76] : memref<8x8x4xf32, #tpu.memory_space<vmem>>, vector<8x7x4xf32>
    %128 = vector.extract_strided_slice %109 {offsets = [0, 1, 0], sizes = [8, 7, 4], strides = [1, 1, 1]} : vector<8x8x4xf32> to vector<8x7x4xf32>
    %129 = vector.extract_strided_slice %71 {offsets = [2, 0, 0, 0], sizes = [1, 1, 1, 4], strides = [1, 1, 1, 1]} : vector<3x1x1x4xf32> to vector<1x1x1x4xf32>
    %130 = vector.shape_cast %129 : vector<1x1x1x4xf32> to vector<1x1x4xf32>
    %131 = vector.broadcast %130 : vector<1x1x4xf32> to vector<8x7x4xf32>
    %132 = arith.mulf %128, %131 : vector<8x7x4xf32>
    %133 = arith.addf %127, %132 : vector<8x7x4xf32>
    %c0_77 = arith.constant 0 : index
    %c0_78 = arith.constant 0 : index
    %c0_79 = arith.constant 0 : index
    %134 = vector.load %arg31[%c0_77, %c0_78, %c0_79] : memref<8x8x4xf32, #tpu.memory_space<vmem>>, vector<8x7x4xf32>
    tpu.vector_store %arg31[%c0_77, %c0_78, %c0_79], %133 {strides = array<i32>} : memref<8x8x4xf32, #tpu.memory_space<vmem>>, vector<8x7x4xf32>,
    %c0_80 = arith.constant 0 : index
    %c0_81 = arith.constant 0 : index
    %c0_82 = arith.constant 0 : index
    %135 = vector.load %arg31[%c0_80, %c0_81, %c0_82] : memref<8x8x4xf32, #tpu.memory_space<vmem>>, vector<8x8x4xf32>
    %136 = vector.broadcast %76 : vector<1x1x4xf32> to vector<8x8x4xf32>
    %137 = arith.addf %135, %136 : vector<8x8x4xf32>
    %cst_83 = arith.constant 0.000000e+00 : f32
    %138 = vector.broadcast %cst_83 : f32 to vector<8x8x4xf32>
    %c0_84 = arith.constant 0 : index
    %c0_85 = arith.constant 0 : index
    %c0_86 = arith.constant 0 : index
    %139 = vector.load %arg31[%c0_84, %c0_85, %c0_86] : memref<8x8x4xf32, #tpu.memory_space<vmem>>, vector<8x8x4xf32>
    tpu.vector_store %arg31[%c0_84, %c0_85, %c0_86], %138 {strides = array<i32>} : memref<8x8x4xf32, #tpu.memory_space<vmem>>, vector<8x8x4xf32>,
    %c2 = arith.constant 2 : index
    %c2_87 = arith.constant 2 : index
    %c0_88 = arith.constant 0 : index
    %140 = vector.load %arg31[%c2, %c2_87, %c0_88] : memref<8x8x4xf32, #tpu.memory_space<vmem>>, vector<6x6x4xf32>
    %141 = vector.extract_strided_slice %137 {offsets = [0, 0, 0], sizes = [6, 6, 4], strides = [1, 1, 1]} : vector<8x8x4xf32> to vector<6x6x4xf32>
    %142 = vector.extract_strided_slice %73 {offsets = [0, 0, 0, 0, 0], sizes = [1, 1, 1, 1, 4], strides = [1, 1, 1, 1, 1]} : vector<3x3x1x1x4xf32> to vector<1x1x1x1x4xf32>
    %143 = vector.shape_cast %142 : vector<1x1x1x1x4xf32> to vector<1x1x4xf32>
    %144 = vector.broadcast %143 : vector<1x1x4xf32> to vector<6x6x4xf32>
    %145 = arith.mulf %141, %144 : vector<6x6x4xf32>
    %146 = arith.addf %140, %145 : vector<6x6x4xf32>
    %c2_89 = arith.constant 2 : index
    %c2_90 = arith.constant 2 : index
    %c0_91 = arith.constant 0 : index
    %147 = vector.load %arg31[%c2_89, %c2_90, %c0_91] : memref<8x8x4xf32, #tpu.memory_space<vmem>>, vector<6x6x4xf32>
    tpu.vector_store %arg31[%c2_89, %c2_90, %c0_91], %146 {strides = array<i32>} : memref<8x8x4xf32, #tpu.memory_space<vmem>>, vector<6x6x4xf32>,
    %c2_92 = arith.constant 2 : index
    %c0_93 = arith.constant 0 : index
    %c0_94 = arith.constant 0 : index
    %148 = vector.load %arg31[%c2_92, %c0_93, %c0_94] : memref<8x8x4xf32, #tpu.memory_space<vmem>>, vector<6x8x4xf32>
    %149 = vector.extract_strided_slice %137 {offsets = [0, 0, 0], sizes = [6, 8, 4], strides = [1, 1, 1]} : vector<8x8x4xf32> to vector<6x8x4xf32>
    %150 = vector.extract_strided_slice %73 {offsets = [0, 1, 0, 0, 0], sizes = [1, 1, 1, 1, 4], strides = [1, 1, 1, 1, 1]} : vector<3x3x1x1x4xf32> to vector<1x1x1x1x4xf32>
    %151 = vector.shape_cast %150 : vector<1x1x1x1x4xf32> to vector<1x1x4xf32>
    %152 = vector.broadcast %151 : vector<1x1x4xf32> to vector<6x8x4xf32>
    %153 = arith.mulf %149, %152 : vector<6x8x4xf32>
    %154 = arith.addf %148, %153 : vector<6x8x4xf32>
    %c2_95 = arith.constant 2 : index
    %c0_96 = arith.constant 0 : index
    %c0_97 = arith.constant 0 : index
    %155 = vector.load %arg31[%c2_95, %c0_96, %c0_97] : memref<8x8x4xf32, #tpu.memory_space<vmem>>, vector<6x8x4xf32>
    tpu.vector_store %arg31[%c2_95, %c0_96, %c0_97], %154 {strides = array<i32>} : memref<8x8x4xf32, #tpu.memory_space<vmem>>, vector<6x8x4xf32>,
    %c2_98 = arith.constant 2 : index
    %c0_99 = arith.constant 0 : index
    %c0_100 = arith.constant 0 : index
    %156 = vector.load %arg31[%c2_98, %c0_99, %c0_100] : memref<8x8x4xf32, #tpu.memory_space<vmem>>, vector<6x6x4xf32>
    %157 = vector.extract_strided_slice %137 {offsets = [0, 2, 0], sizes = [6, 6, 4], strides = [1, 1, 1]} : vector<8x8x4xf32> to vector<6x6x4xf32>
    %158 = vector.extract_strided_slice %73 {offsets = [0, 2, 0, 0, 0], sizes = [1, 1, 1, 1, 4], strides = [1, 1, 1, 1, 1]} : vector<3x3x1x1x4xf32> to vector<1x1x1x1x4xf32>
    %159 = vector.shape_cast %158 : vector<1x1x1x1x4xf32> to vector<1x1x4xf32>
    %160 = vector.broadcast %159 : vector<1x1x4xf32> to vector<6x6x4xf32>
    %161 = arith.mulf %157, %160 : vector<6x6x4xf32>
    %162 = arith.addf %156, %161 : vector<6x6x4xf32>
    %c2_101 = arith.constant 2 : index
    %c0_102 = arith.constant 0 : index
    %c0_103 = arith.constant 0 : index
    %163 = vector.load %arg31[%c2_101, %c0_102, %c0_103] : memref<8x8x4xf32, #tpu.memory_space<vmem>>, vector<6x6x4xf32>
    tpu.vector_store %arg31[%c2_101, %c0_102, %c0_103], %162 {strides = array<i32>} : memref<8x8x4xf32, #tpu.memory_space<vmem>>, vector<6x6x4xf32>,
    %c0_104 = arith.constant 0 : index
    %c2_105 = arith.constant 2 : index
    %c0_106 = arith.constant 0 : index
    %164 = vector.load %arg31[%c0_104, %c2_105, %c0_106] : memref<8x8x4xf32, #tpu.memory_space<vmem>>, vector<8x6x4xf32>
    %165 = vector.extract_strided_slice %137 {offsets = [0, 0, 0], sizes = [8, 6, 4], strides = [1, 1, 1]} : vector<8x8x4xf32> to vector<8x6x4xf32>
    %166 = vector.extract_strided_slice %73 {offsets = [1, 0, 0, 0, 0], sizes = [1, 1, 1, 1, 4], strides = [1, 1, 1, 1, 1]} : vector<3x3x1x1x4xf32> to vector<1x1x1x1x4xf32>
    %167 = vector.shape_cast %166 : vector<1x1x1x1x4xf32> to vector<1x1x4xf32>
    %168 = vector.broadcast %167 : vector<1x1x4xf32> to vector<8x6x4xf32>
    %169 = arith.mulf %165, %168 : vector<8x6x4xf32>
    %170 = arith.addf %164, %169 : vector<8x6x4xf32>
    %c0_107 = arith.constant 0 : index
    %c2_108 = arith.constant 2 : index
    %c0_109 = arith.constant 0 : index
    %171 = vector.load %arg31[%c0_107, %c2_108, %c0_109] : memref<8x8x4xf32, #tpu.memory_space<vmem>>, vector<8x6x4xf32>
    tpu.vector_store %arg31[%c0_107, %c2_108, %c0_109], %170 {strides = array<i32>} : memref<8x8x4xf32, #tpu.memory_space<vmem>>, vector<8x6x4xf32>,
    %c0_110 = arith.constant 0 : index
    %c0_111 = arith.constant 0 : index
    %c0_112 = arith.constant 0 : index
    %172 = vector.load %arg31[%c0_110, %c0_111, %c0_112] : memref<8x8x4xf32, #tpu.memory_space<vmem>>, vector<8x8x4xf32>
    %173 = vector.extract_strided_slice %73 {offsets = [1, 1, 0, 0, 0], sizes = [1, 1, 1, 1, 4], strides = [1, 1, 1, 1, 1]} : vector<3x3x1x1x4xf32> to vector<1x1x1x1x4xf32>
    %174 = vector.shape_cast %173 : vector<1x1x1x1x4xf32> to vector<1x1x4xf32>
    %175 = vector.broadcast %174 : vector<1x1x4xf32> to vector<8x8x4xf32>
    %176 = arith.mulf %137, %175 : vector<8x8x4xf32>
    %177 = arith.addf %172, %176 : vector<8x8x4xf32>
    %c0_113 = arith.constant 0 : index
    %c0_114 = arith.constant 0 : index
    %c0_115 = arith.constant 0 : index
    %178 = vector.load %arg31[%c0_113, %c0_114, %c0_115] : memref<8x8x4xf32, #tpu.memory_space<vmem>>, vector<8x8x4xf32>
    tpu.vector_store %arg31[%c0_113, %c0_114, %c0_115], %177 {strides = array<i32>} : memref<8x8x4xf32, #tpu.memory_space<vmem>>, vector<8x8x4xf32>,
    %c0_116 = arith.constant 0 : index
    %c0_117 = arith.constant 0 : index
    %c0_118 = arith.constant 0 : index
    %179 = vector.load %arg31[%c0_116, %c0_117, %c0_118] : memref<8x8x4xf32, #tpu.memory_space<vmem>>, vector<8x6x4xf32>
    %180 = vector.extract_strided_slice %137 {offsets = [0, 2, 0], sizes = [8, 6, 4], strides = [1, 1, 1]} : vector<8x8x4xf32> to vector<8x6x4xf32>
    %181 = vector.extract_strided_slice %73 {offsets = [1, 2, 0, 0, 0], sizes = [1, 1, 1, 1, 4], strides = [1, 1, 1, 1, 1]} : vector<3x3x1x1x4xf32> to vector<1x1x1x1x4xf32>
    %182 = vector.shape_cast %181 : vector<1x1x1x1x4xf32> to vector<1x1x4xf32>
    %183 = vector.broadcast %182 : vector<1x1x4xf32> to vector<8x6x4xf32>
    %184 = arith.mulf %180, %183 : vector<8x6x4xf32>
    %185 = arith.addf %179, %184 : vector<8x6x4xf32>
    %c0_119 = arith.constant 0 : index
    %c0_120 = arith.constant 0 : index
    %c0_121 = arith.constant 0 : index
    %186 = vector.load %arg31[%c0_119, %c0_120, %c0_121] : memref<8x8x4xf32, #tpu.memory_space<vmem>>, vector<8x6x4xf32>
    tpu.vector_store %arg31[%c0_119, %c0_120, %c0_121], %185 {strides = array<i32>} : memref<8x8x4xf32, #tpu.memory_space<vmem>>, vector<8x6x4xf32>,
    %c0_122 = arith.constant 0 : index
    %c2_123 = arith.constant 2 : index
    %c0_124 = arith.constant 0 : index
    %187 = vector.load %arg31[%c0_122, %c2_123, %c0_124] : memref<8x8x4xf32, #tpu.memory_space<vmem>>, vector<6x6x4xf32>
    %188 = vector.extract_strided_slice %137 {offsets = [2, 0, 0], sizes = [6, 6, 4], strides = [1, 1, 1]} : vector<8x8x4xf32> to vector<6x6x4xf32>
    %189 = vector.extract_strided_slice %73 {offsets = [2, 0, 0, 0, 0], sizes = [1, 1, 1, 1, 4], strides = [1, 1, 1, 1, 1]} : vector<3x3x1x1x4xf32> to vector<1x1x1x1x4xf32>
    %190 = vector.shape_cast %189 : vector<1x1x1x1x4xf32> to vector<1x1x4xf32>
    %191 = vector.broadcast %190 : vector<1x1x4xf32> to vector<6x6x4xf32>
    %192 = arith.mulf %188, %191 : vector<6x6x4xf32>
    %193 = arith.addf %187, %192 : vector<6x6x4xf32>
    %c0_125 = arith.constant 0 : index
    %c2_126 = arith.constant 2 : index
    %c0_127 = arith.constant 0 : index
    %194 = vector.load %arg31[%c0_125, %c2_126, %c0_127] : memref<8x8x4xf32, #tpu.memory_space<vmem>>, vector<6x6x4xf32>
    tpu.vector_store %arg31[%c0_125, %c2_126, %c0_127], %193 {strides = array<i32>} : memref<8x8x4xf32, #tpu.memory_space<vmem>>, vector<6x6x4xf32>,
    %c0_128 = arith.constant 0 : index
    %c0_129 = arith.constant 0 : index
    %c0_130 = arith.constant 0 : index
    %195 = vector.load %arg31[%c0_128, %c0_129, %c0_130] : memref<8x8x4xf32, #tpu.memory_space<vmem>>, vector<6x8x4xf32>
    %196 = vector.extract_strided_slice %137 {offsets = [2, 0, 0], sizes = [6, 8, 4], strides = [1, 1, 1]} : vector<8x8x4xf32> to vector<6x8x4xf32>
    %197 = vector.extract_strided_slice %73 {offsets = [2, 1, 0, 0, 0], sizes = [1, 1, 1, 1, 4], strides = [1, 1, 1, 1, 1]} : vector<3x3x1x1x4xf32> to vector<1x1x1x1x4xf32>
    %198 = vector.shape_cast %197 : vector<1x1x1x1x4xf32> to vector<1x1x4xf32>
    %199 = vector.broadcast %198 : vector<1x1x4xf32> to vector<6x8x4xf32>
    %200 = arith.mulf %196, %199 : vector<6x8x4xf32>
    %201 = arith.addf %195, %200 : vector<6x8x4xf32>
    %c0_131 = arith.constant 0 : index
    %c0_132 = arith.constant 0 : index
    %c0_133 = arith.constant 0 : index
    %202 = vector.load %arg31[%c0_131, %c0_132, %c0_133] : memref<8x8x4xf32, #tpu.memory_space<vmem>>, vector<6x8x4xf32>
    tpu.vector_store %arg31[%c0_131, %c0_132, %c0_133], %201 {strides = array<i32>} : memref<8x8x4xf32, #tpu.memory_space<vmem>>, vector<6x8x4xf32>,
    %c0_134 = arith.constant 0 : index
    %c0_135 = arith.constant 0 : index
    %c0_136 = arith.constant 0 : index
    %203 = vector.load %arg31[%c0_134, %c0_135, %c0_136] : memref<8x8x4xf32, #tpu.memory_space<vmem>>, vector<6x6x4xf32>
    %204 = vector.extract_strided_slice %137 {offsets = [2, 2, 0], sizes = [6, 6, 4], strides = [1, 1, 1]} : vector<8x8x4xf32> to vector<6x6x4xf32>
    %205 = vector.extract_strided_slice %73 {offsets = [2, 2, 0, 0, 0], sizes = [1, 1, 1, 1, 4], strides = [1, 1, 1, 1, 1]} : vector<3x3x1x1x4xf32> to vector<1x1x1x1x4xf32>
    %206 = vector.shape_cast %205 : vector<1x1x1x1x4xf32> to vector<1x1x4xf32>
    %207 = vector.broadcast %206 : vector<1x1x4xf32> to vector<6x6x4xf32>
    %208 = arith.mulf %204, %207 : vector<6x6x4xf32>
    %209 = arith.addf %203, %208 : vector<6x6x4xf32>
    %c0_137 = arith.constant 0 : index
    %c0_138 = arith.constant 0 : index
    %c0_139 = arith.constant 0 : index
    %210 = vector.load %arg31[%c0_137, %c0_138, %c0_139] : memref<8x8x4xf32, #tpu.memory_space<vmem>>, vector<6x6x4xf32>
    tpu.vector_store %arg31[%c0_137, %c0_138, %c0_139], %209 {strides = array<i32>} : memref<8x8x4xf32, #tpu.memory_space<vmem>>, vector<6x6x4xf32>,
    %c0_140 = arith.constant 0 : index
    %c0_141 = arith.constant 0 : index
    %c0_142 = arith.constant 0 : index
    %211 = vector.load %arg31[%c0_140, %c0_141, %c0_142] : memref<8x8x4xf32, #tpu.memory_space<vmem>>, vector<8x8x4xf32>
    %212 = vector.shape_cast %211 : vector<8x8x4xf32> to vector<64x4xf32>
    %c0_143 = arith.constant 0 : index
    %c0_144 = arith.constant 0 : index
    %213 = vector.load %arg9[%c0_143, %c0_144] : memref<4x4xf32, #tpu.memory_space<vmem>>, vector<4x4xf32>
    %cst_145 = arith.constant dense<0.000000e+00> : vector<64x4xf32>
    %214 = tpu.matmul %212, %213, %cst_145 {dimension_numbers = #tpu.dot_dimension_numbers<[1], [0], [0], [1], [0, 0, 1, 1], [], []>} : vector<64x4xf32>, vector<4x4xf32>, vector<64x4xf32> -> vector<64x4xf32>
    %c0_146 = arith.constant 0 : index
    %c0_147 = arith.constant 0 : index
    %215 = vector.load %arg10[%c0_146, %c0_147] : memref<1x4xf32, #tpu.memory_space<vmem>>, vector<1x4xf32>
    %216 = vector.broadcast %215 : vector<1x4xf32> to vector<64x4xf32>
    %217 = arith.addf %214, %216 : vector<64x4xf32>
    %c0_148 = arith.constant 0 : index
    %c0_149 = arith.constant 0 : index
    %218 = vector.load %arg11[%c0_148, %c0_149] : memref<1x4xf32, #tpu.memory_space<vmem>>, vector<1x4xf32>
    %cst_150 = arith.constant 0.000000e+00 : f32
    %219 = vector.broadcast %cst_150 : f32 to vector<64x4xf32>
    %220 = arith.cmpf ogt, %217, %219 : vector<64x4xf32>
    %221 = vector.broadcast %218 : vector<1x4xf32> to vector<64x4xf32>
    %222 = arith.mulf %221, %217 : vector<64x4xf32>
    %223 = arith.select %220, %217, %222 : vector<64x4xi1>, vector<64x4xf32>
    %224 = tpu.transpose %223, [1, 0] : vector<64x4xf32> -> vector<4x64xf32>
    %c0_151 = arith.constant 0 : index
    %c0_152 = arith.constant 0 : index
    %c0_153 = arith.constant 0 : index
    %225 = vector.load %arg30[%c0_151, %c0_152, %c0_153] : memref<1x12x64xf32, #tpu.memory_space<vmem>>, vector<1x4x64xf32>
    %226 = vector.shape_cast %225 : vector<1x4x64xf32> to vector<4x64xf32>
    %227 = vector.shape_cast %224 : vector<4x64xf32> to vector<1x4x64xf32>
    tpu.vector_store %arg30[%c0_151, %c0_152, %c0_153], %227 {strides = array<i32>} : memref<1x12x64xf32, #tpu.memory_space<vmem>>, vector<1x4x64xf32>,
    %c0_154 = arith.constant 0 : index
    %c0_155 = arith.constant 0 : index
    %228 = vector.load %arg12[%c0_154, %c0_155] : memref<7x4xf32, #tpu.memory_space<vmem>>, vector<7x4xf32>
    %229 = vector.shape_cast %228 : vector<7x4xf32> to vector<7x1x1x4xf32>
    %c0_156 = arith.constant 0 : index
    %c0_157 = arith.constant 0 : index
    %230 = vector.load %arg15[%c0_156, %c0_157] : memref<7x4xf32, #tpu.memory_space<vmem>>, vector<7x4xf32>
    %231 = vector.shape_cast %230 : vector<7x4xf32> to vector<7x1x1x4xf32>
    %c0_158 = arith.constant 0 : index
    %c0_159 = arith.constant 0 : index
    %c0_160 = arith.constant 0 : index
    %232 = vector.load %arg17[%c0_158, %c0_159, %c0_160] : memref<3x3x4xf32, #tpu.memory_space<vmem>>, vector<3x3x4xf32>
    %233 = vector.shape_cast %232 : vector<3x3x4xf32> to vector<3x3x1x1x4xf32>
    %c0_161 = arith.constant 0 : index
    %c0_162 = arith.constant 0 : index
    %c0_163 = arith.constant 0 : index
    %234 = vector.load %arg13[%c0_161, %c0_162, %c0_163] : memref<1x1x4xf32, #tpu.memory_space<vmem>>, vector<1x1x4xf32>
    %c0_164 = arith.constant 0 : index
    %c0_165 = arith.constant 0 : index
    %c0_166 = arith.constant 0 : index
    %235 = vector.load %arg14[%c0_164, %c0_165, %c0_166] : memref<1x1x4xf32, #tpu.memory_space<vmem>>, vector<1x1x4xf32>
    %c0_167 = arith.constant 0 : index
    %c0_168 = arith.constant 0 : index
    %c0_169 = arith.constant 0 : index
    %236 = vector.load %arg16[%c0_167, %c0_168, %c0_169] : memref<1x1x4xf32, #tpu.memory_space<vmem>>, vector<1x1x4xf32>
    %cst_170 = arith.constant 0.000000e+00 : f32
    %237 = vector.broadcast %cst_170 : f32 to vector<8x8x4xf32>
    %c0_171 = arith.constant 0 : index
    %c0_172 = arith.constant 0 : index
    %c0_173 = arith.constant 0 : index
    %238 = vector.load %arg31[%c0_171, %c0_172, %c0_173] : memref<8x8x4xf32, #tpu.memory_space<vmem>>, vector<8x8x4xf32>
    tpu.vector_store %arg31[%c0_171, %c0_172, %c0_173], %237 {strides = array<i32>} : memref<8x8x4xf32, #tpu.memory_space<vmem>>, vector<8x8x4xf32>,
    %c3 = arith.constant 3 : index
    %c0_174 = arith.constant 0 : index
    %c0_175 = arith.constant 0 : index
    %239 = vector.load %arg31[%c3, %c0_174, %c0_175] : memref<8x8x4xf32, #tpu.memory_space<vmem>>, vector<5x8x4xf32>
    %240 = vector.extract_strided_slice %67 {offsets = [0, 0, 0], sizes = [5, 8, 4], strides = [1, 1, 1]} : vector<8x8x4xf32> to vector<5x8x4xf32>
    %241 = vector.extract_strided_slice %229 {offsets = [0, 0, 0, 0], sizes = [1, 1, 1, 4], strides = [1, 1, 1, 1]} : vector<7x1x1x4xf32> to vector<1x1x1x4xf32>
    %242 = vector.shape_cast %241 : vector<1x1x1x4xf32> to vector<1x1x4xf32>
    %243 = vector.broadcast %242 : vector<1x1x4xf32> to vector<5x8x4xf32>
    %244 = arith.mulf %240, %243 : vector<5x8x4xf32>
    %245 = arith.addf %239, %244 : vector<5x8x4xf32>
    %c3_176 = arith.constant 3 : index
    %c0_177 = arith.constant 0 : index
    %c0_178 = arith.constant 0 : index
    %246 = vector.load %arg31[%c3_176, %c0_177, %c0_178] : memref<8x8x4xf32, #tpu.memory_space<vmem>>, vector<5x8x4xf32>
    tpu.vector_store %arg31[%c3_176, %c0_177, %c0_178], %245 {strides = array<i32>} : memref<8x8x4xf32, #tpu.memory_space<vmem>>, vector<5x8x4xf32>,
    %c2_179 = arith.constant 2 : index
    %c0_180 = arith.constant 0 : index
    %c0_181 = arith.constant 0 : index
    %247 = vector.load %arg31[%c2_179, %c0_180, %c0_181] : memref<8x8x4xf32, #tpu.memory_space<vmem>>, vector<6x8x4xf32>
    %248 = vector.extract_strided_slice %67 {offsets = [0, 0, 0], sizes = [6, 8, 4], strides = [1, 1, 1]} : vector<8x8x4xf32> to vector<6x8x4xf32>
    %249 = vector.extract_strided_slice %229 {offsets = [1, 0, 0, 0], sizes = [1, 1, 1, 4], strides = [1, 1, 1, 1]} : vector<7x1x1x4xf32> to vector<1x1x1x4xf32>
    %250 = vector.shape_cast %249 : vector<1x1x1x4xf32> to vector<1x1x4xf32>
    %251 = vector.broadcast %250 : vector<1x1x4xf32> to vector<6x8x4xf32>
    %252 = arith.mulf %248, %251 : vector<6x8x4xf32>
    %253 = arith.addf %247, %252 : vector<6x8x4xf32>
    %c2_182 = arith.constant 2 : index
    %c0_183 = arith.constant 0 : index
    %c0_184 = arith.constant 0 : index
    %254 = vector.load %arg31[%c2_182, %c0_183, %c0_184] : memref<8x8x4xf32, #tpu.memory_space<vmem>>, vector<6x8x4xf32>
    tpu.vector_store %arg31[%c2_182, %c0_183, %c0_184], %253 {strides = array<i32>} : memref<8x8x4xf32, #tpu.memory_space<vmem>>, vector<6x8x4xf32>,
    %c1_185 = arith.constant 1 : index
    %c0_186 = arith.constant 0 : index
    %c0_187 = arith.constant 0 : index
    %255 = vector.load %arg31[%c1_185, %c0_186, %c0_187] : memref<8x8x4xf32, #tpu.memory_space<vmem>>, vector<7x8x4xf32>
    %256 = vector.extract_strided_slice %67 {offsets = [0, 0, 0], sizes = [7, 8, 4], strides = [1, 1, 1]} : vector<8x8x4xf32> to vector<7x8x4xf32>
    %257 = vector.extract_strided_slice %229 {offsets = [2, 0, 0, 0], sizes = [1, 1, 1, 4], strides = [1, 1, 1, 1]} : vector<7x1x1x4xf32> to vector<1x1x1x4xf32>
    %258 = vector.shape_cast %257 : vector<1x1x1x4xf32> to vector<1x1x4xf32>
    %259 = vector.broadcast %258 : vector<1x1x4xf32> to vector<7x8x4xf32>
    %260 = arith.mulf %256, %259 : vector<7x8x4xf32>
    %261 = arith.addf %255, %260 : vector<7x8x4xf32>
    %c1_188 = arith.constant 1 : index
    %c0_189 = arith.constant 0 : index
    %c0_190 = arith.constant 0 : index
    %262 = vector.load %arg31[%c1_188, %c0_189, %c0_190] : memref<8x8x4xf32, #tpu.memory_space<vmem>>, vector<7x8x4xf32>
    tpu.vector_store %arg31[%c1_188, %c0_189, %c0_190], %261 {strides = array<i32>} : memref<8x8x4xf32, #tpu.memory_space<vmem>>, vector<7x8x4xf32>,
    %c0_191 = arith.constant 0 : index
    %c0_192 = arith.constant 0 : index
    %c0_193 = arith.constant 0 : index
    %263 = vector.load %arg31[%c0_191, %c0_192, %c0_193] : memref<8x8x4xf32, #tpu.memory_space<vmem>>, vector<8x8x4xf32>
    %264 = vector.extract_strided_slice %229 {offsets = [3, 0, 0, 0], sizes = [1, 1, 1, 4], strides = [1, 1, 1, 1]} : vector<7x1x1x4xf32> to vector<1x1x1x4xf32>
    %265 = vector.shape_cast %264 : vector<1x1x1x4xf32> to vector<1x1x4xf32>
    %266 = vector.broadcast %265 : vector<1x1x4xf32> to vector<8x8x4xf32>
    %267 = arith.mulf %67, %266 : vector<8x8x4xf32>
    %268 = arith.addf %263, %267 : vector<8x8x4xf32>
    %c0_194 = arith.constant 0 : index
    %c0_195 = arith.constant 0 : index
    %c0_196 = arith.constant 0 : index
    %269 = vector.load %arg31[%c0_194, %c0_195, %c0_196] : memref<8x8x4xf32, #tpu.memory_space<vmem>>, vector<8x8x4xf32>
    tpu.vector_store %arg31[%c0_194, %c0_195, %c0_196], %268 {strides = array<i32>} : memref<8x8x4xf32, #tpu.memory_space<vmem>>, vector<8x8x4xf32>,
    %c0_197 = arith.constant 0 : index
    %c0_198 = arith.constant 0 : index
    %c0_199 = arith.constant 0 : index
    %270 = vector.load %arg31[%c0_197, %c0_198, %c0_199] : memref<8x8x4xf32, #tpu.memory_space<vmem>>, vector<7x8x4xf32>
    %271 = vector.extract_strided_slice %67 {offsets = [1, 0, 0], sizes = [7, 8, 4], strides = [1, 1, 1]} : vector<8x8x4xf32> to vector<7x8x4xf32>
    %272 = vector.extract_strided_slice %229 {offsets = [4, 0, 0, 0], sizes = [1, 1, 1, 4], strides = [1, 1, 1, 1]} : vector<7x1x1x4xf32> to vector<1x1x1x4xf32>
    %273 = vector.shape_cast %272 : vector<1x1x1x4xf32> to vector<1x1x4xf32>
    %274 = vector.broadcast %273 : vector<1x1x4xf32> to vector<7x8x4xf32>
    %275 = arith.mulf %271, %274 : vector<7x8x4xf32>
    %276 = arith.addf %270, %275 : vector<7x8x4xf32>
    %c0_200 = arith.constant 0 : index
    %c0_201 = arith.constant 0 : index
    %c0_202 = arith.constant 0 : index
    %277 = vector.load %arg31[%c0_200, %c0_201, %c0_202] : memref<8x8x4xf32, #tpu.memory_space<vmem>>, vector<7x8x4xf32>
    tpu.vector_store %arg31[%c0_200, %c0_201, %c0_202], %276 {strides = array<i32>} : memref<8x8x4xf32, #tpu.memory_space<vmem>>, vector<7x8x4xf32>,
    %c0_203 = arith.constant 0 : index
    %c0_204 = arith.constant 0 : index
    %c0_205 = arith.constant 0 : index
    %278 = vector.load %arg31[%c0_203, %c0_204, %c0_205] : memref<8x8x4xf32, #tpu.memory_space<vmem>>, vector<6x8x4xf32>
    %279 = vector.extract_strided_slice %67 {offsets = [2, 0, 0], sizes = [6, 8, 4], strides = [1, 1, 1]} : vector<8x8x4xf32> to vector<6x8x4xf32>
    %280 = vector.extract_strided_slice %229 {offsets = [5, 0, 0, 0], sizes = [1, 1, 1, 4], strides = [1, 1, 1, 1]} : vector<7x1x1x4xf32> to vector<1x1x1x4xf32>
    %281 = vector.shape_cast %280 : vector<1x1x1x4xf32> to vector<1x1x4xf32>
    %282 = vector.broadcast %281 : vector<1x1x4xf32> to vector<6x8x4xf32>
    %283 = arith.mulf %279, %282 : vector<6x8x4xf32>
    %284 = arith.addf %278, %283 : vector<6x8x4xf32>
    %c0_206 = arith.constant 0 : index
    %c0_207 = arith.constant 0 : index
    %c0_208 = arith.constant 0 : index
    %285 = vector.load %arg31[%c0_206, %c0_207, %c0_208] : memref<8x8x4xf32, #tpu.memory_space<vmem>>, vector<6x8x4xf32>
    tpu.vector_store %arg31[%c0_206, %c0_207, %c0_208], %284 {strides = array<i32>} : memref<8x8x4xf32, #tpu.memory_space<vmem>>, vector<6x8x4xf32>,
    %c0_209 = arith.constant 0 : index
    %c0_210 = arith.constant 0 : index
    %c0_211 = arith.constant 0 : index
    %286 = vector.load %arg31[%c0_209, %c0_210, %c0_211] : memref<8x8x4xf32, #tpu.memory_space<vmem>>, vector<5x8x4xf32>
    %287 = vector.extract_strided_slice %67 {offsets = [3, 0, 0], sizes = [5, 8, 4], strides = [1, 1, 1]} : vector<8x8x4xf32> to vector<5x8x4xf32>
    %288 = vector.extract_strided_slice %229 {offsets = [6, 0, 0, 0], sizes = [1, 1, 1, 4], strides = [1, 1, 1, 1]} : vector<7x1x1x4xf32> to vector<1x1x1x4xf32>
    %289 = vector.shape_cast %288 : vector<1x1x1x4xf32> to vector<1x1x4xf32>
    %290 = vector.broadcast %289 : vector<1x1x4xf32> to vector<5x8x4xf32>
    %291 = arith.mulf %287, %290 : vector<5x8x4xf32>
    %292 = arith.addf %286, %291 : vector<5x8x4xf32>
    %c0_212 = arith.constant 0 : index
    %c0_213 = arith.constant 0 : index
    %c0_214 = arith.constant 0 : index
    %293 = vector.load %arg31[%c0_212, %c0_213, %c0_214] : memref<8x8x4xf32, #tpu.memory_space<vmem>>, vector<5x8x4xf32>
    tpu.vector_store %arg31[%c0_212, %c0_213, %c0_214], %292 {strides = array<i32>} : memref<8x8x4xf32, #tpu.memory_space<vmem>>, vector<5x8x4xf32>,
    %c0_215 = arith.constant 0 : index
    %c0_216 = arith.constant 0 : index
    %c0_217 = arith.constant 0 : index
    %294 = vector.load %arg31[%c0_215, %c0_216, %c0_217] : memref<8x8x4xf32, #tpu.memory_space<vmem>>, vector<8x8x4xf32>
    %295 = vector.broadcast %234 : vector<1x1x4xf32> to vector<8x8x4xf32>
    %296 = arith.addf %294, %295 : vector<8x8x4xf32>
    %cst_218 = arith.constant 0.000000e+00 : f32
    %297 = vector.broadcast %cst_218 : f32 to vector<8x8x4xf32>
    %298 = arith.cmpf ogt, %296, %297 : vector<8x8x4xf32>
    %299 = vector.broadcast %235 : vector<1x1x4xf32> to vector<8x8x4xf32>
    %300 = arith.mulf %299, %296 : vector<8x8x4xf32>
    %301 = arith.select %298, %296, %300 : vector<8x8x4xi1>, vector<8x8x4xf32>
    %cst_219 = arith.constant 0.000000e+00 : f32
    %302 = vector.broadcast %cst_219 : f32 to vector<8x8x4xf32>
    %c0_220 = arith.constant 0 : index
    %c0_221 = arith.constant 0 : index
    %c0_222 = arith.constant 0 : index
    %303 = vector.load %arg31[%c0_220, %c0_221, %c0_222] : memref<8x8x4xf32, #tpu.memory_space<vmem>>, vector<8x8x4xf32>
    tpu.vector_store %arg31[%c0_220, %c0_221, %c0_222], %302 {strides = array<i32>} : memref<8x8x4xf32, #tpu.memory_space<vmem>>, vector<8x8x4xf32>,
    %c0_223 = arith.constant 0 : index
    %c3_224 = arith.constant 3 : index
    %c0_225 = arith.constant 0 : index
    %304 = vector.load %arg31[%c0_223, %c3_224, %c0_225] : memref<8x8x4xf32, #tpu.memory_space<vmem>>, vector<8x5x4xf32>
    %305 = vector.extract_strided_slice %301 {offsets = [0, 0, 0], sizes = [8, 5, 4], strides = [1, 1, 1]} : vector<8x8x4xf32> to vector<8x5x4xf32>
    %306 = vector.extract_strided_slice %231 {offsets = [0, 0, 0, 0], sizes = [1, 1, 1, 4], strides = [1, 1, 1, 1]} : vector<7x1x1x4xf32> to vector<1x1x1x4xf32>
    %307 = vector.shape_cast %306 : vector<1x1x1x4xf32> to vector<1x1x4xf32>
    %308 = vector.broadcast %307 : vector<1x1x4xf32> to vector<8x5x4xf32>
    %309 = arith.mulf %305, %308 : vector<8x5x4xf32>
    %310 = arith.addf %304, %309 : vector<8x5x4xf32>
    %c0_226 = arith.constant 0 : index
    %c3_227 = arith.constant 3 : index
    %c0_228 = arith.constant 0 : index
    %311 = vector.load %arg31[%c0_226, %c3_227, %c0_228] : memref<8x8x4xf32, #tpu.memory_space<vmem>>, vector<8x5x4xf32>
    tpu.vector_store %arg31[%c0_226, %c3_227, %c0_228], %310 {strides = array<i32>} : memref<8x8x4xf32, #tpu.memory_space<vmem>>, vector<8x5x4xf32>,
    %c0_229 = arith.constant 0 : index
    %c2_230 = arith.constant 2 : index
    %c0_231 = arith.constant 0 : index
    %312 = vector.load %arg31[%c0_229, %c2_230, %c0_231] : memref<8x8x4xf32, #tpu.memory_space<vmem>>, vector<8x6x4xf32>
    %313 = vector.extract_strided_slice %301 {offsets = [0, 0, 0], sizes = [8, 6, 4], strides = [1, 1, 1]} : vector<8x8x4xf32> to vector<8x6x4xf32>
    %314 = vector.extract_strided_slice %231 {offsets = [1, 0, 0, 0], sizes = [1, 1, 1, 4], strides = [1, 1, 1, 1]} : vector<7x1x1x4xf32> to vector<1x1x1x4xf32>
    %315 = vector.shape_cast %314 : vector<1x1x1x4xf32> to vector<1x1x4xf32>
    %316 = vector.broadcast %315 : vector<1x1x4xf32> to vector<8x6x4xf32>
    %317 = arith.mulf %313, %316 : vector<8x6x4xf32>
    %318 = arith.addf %312, %317 : vector<8x6x4xf32>
    %c0_232 = arith.constant 0 : index
    %c2_233 = arith.constant 2 : index
    %c0_234 = arith.constant 0 : index
    %319 = vector.load %arg31[%c0_232, %c2_233, %c0_234] : memref<8x8x4xf32, #tpu.memory_space<vmem>>, vector<8x6x4xf32>
    tpu.vector_store %arg31[%c0_232, %c2_233, %c0_234], %318 {strides = array<i32>} : memref<8x8x4xf32, #tpu.memory_space<vmem>>, vector<8x6x4xf32>,
    %c0_235 = arith.constant 0 : index
    %c1_236 = arith.constant 1 : index
    %c0_237 = arith.constant 0 : index
    %320 = vector.load %arg31[%c0_235, %c1_236, %c0_237] : memref<8x8x4xf32, #tpu.memory_space<vmem>>, vector<8x7x4xf32>
    %321 = vector.extract_strided_slice %301 {offsets = [0, 0, 0], sizes = [8, 7, 4], strides = [1, 1, 1]} : vector<8x8x4xf32> to vector<8x7x4xf32>
    %322 = vector.extract_strided_slice %231 {offsets = [2, 0, 0, 0], sizes = [1, 1, 1, 4], strides = [1, 1, 1, 1]} : vector<7x1x1x4xf32> to vector<1x1x1x4xf32>
    %323 = vector.shape_cast %322 : vector<1x1x1x4xf32> to vector<1x1x4xf32>
    %324 = vector.broadcast %323 : vector<1x1x4xf32> to vector<8x7x4xf32>
    %325 = arith.mulf %321, %324 : vector<8x7x4xf32>
    %326 = arith.addf %320, %325 : vector<8x7x4xf32>
    %c0_238 = arith.constant 0 : index
    %c1_239 = arith.constant 1 : index
    %c0_240 = arith.constant 0 : index
    %327 = vector.load %arg31[%c0_238, %c1_239, %c0_240] : memref<8x8x4xf32, #tpu.memory_space<vmem>>, vector<8x7x4xf32>
    tpu.vector_store %arg31[%c0_238, %c1_239, %c0_240], %326 {strides = array<i32>} : memref<8x8x4xf32, #tpu.memory_space<vmem>>, vector<8x7x4xf32>,
    %c0_241 = arith.constant 0 : index
    %c0_242 = arith.constant 0 : index
    %c0_243 = arith.constant 0 : index
    %328 = vector.load %arg31[%c0_241, %c0_242, %c0_243] : memref<8x8x4xf32, #tpu.memory_space<vmem>>, vector<8x8x4xf32>
    %329 = vector.extract_strided_slice %231 {offsets = [3, 0, 0, 0], sizes = [1, 1, 1, 4], strides = [1, 1, 1, 1]} : vector<7x1x1x4xf32> to vector<1x1x1x4xf32>
    %330 = vector.shape_cast %329 : vector<1x1x1x4xf32> to vector<1x1x4xf32>
    %331 = vector.broadcast %330 : vector<1x1x4xf32> to vector<8x8x4xf32>
    %332 = arith.mulf %301, %331 : vector<8x8x4xf32>
    %333 = arith.addf %328, %332 : vector<8x8x4xf32>
    %c0_244 = arith.constant 0 : index
    %c0_245 = arith.constant 0 : index
    %c0_246 = arith.constant 0 : index
    %334 = vector.load %arg31[%c0_244, %c0_245, %c0_246] : memref<8x8x4xf32, #tpu.memory_space<vmem>>, vector<8x8x4xf32>
    tpu.vector_store %arg31[%c0_244, %c0_245, %c0_246], %333 {strides = array<i32>} : memref<8x8x4xf32, #tpu.memory_space<vmem>>, vector<8x8x4xf32>,
    %c0_247 = arith.constant 0 : index
    %c0_248 = arith.constant 0 : index
    %c0_249 = arith.constant 0 : index
    %335 = vector.load %arg31[%c0_247, %c0_248, %c0_249] : memref<8x8x4xf32, #tpu.memory_space<vmem>>, vector<8x7x4xf32>
    %336 = vector.extract_strided_slice %301 {offsets = [0, 1, 0], sizes = [8, 7, 4], strides = [1, 1, 1]} : vector<8x8x4xf32> to vector<8x7x4xf32>
    %337 = vector.extract_strided_slice %231 {offsets = [4, 0, 0, 0], sizes = [1, 1, 1, 4], strides = [1, 1, 1, 1]} : vector<7x1x1x4xf32> to vector<1x1x1x4xf32>
    %338 = vector.shape_cast %337 : vector<1x1x1x4xf32> to vector<1x1x4xf32>
    %339 = vector.broadcast %338 : vector<1x1x4xf32> to vector<8x7x4xf32>
    %340 = arith.mulf %336, %339 : vector<8x7x4xf32>
    %341 = arith.addf %335, %340 : vector<8x7x4xf32>
    %c0_250 = arith.constant 0 : index
    %c0_251 = arith.constant 0 : index
    %c0_252 = arith.constant 0 : index
    %342 = vector.load %arg31[%c0_250, %c0_251, %c0_252] : memref<8x8x4xf32, #tpu.memory_space<vmem>>, vector<8x7x4xf32>
    tpu.vector_store %arg31[%c0_250, %c0_251, %c0_252], %341 {strides = array<i32>} : memref<8x8x4xf32, #tpu.memory_space<vmem>>, vector<8x7x4xf32>,
    %c0_253 = arith.constant 0 : index
    %c0_254 = arith.constant 0 : index
    %c0_255 = arith.constant 0 : index
    %343 = vector.load %arg31[%c0_253, %c0_254, %c0_255] : memref<8x8x4xf32, #tpu.memory_space<vmem>>, vector<8x6x4xf32>
    %344 = vector.extract_strided_slice %301 {offsets = [0, 2, 0], sizes = [8, 6, 4], strides = [1, 1, 1]} : vector<8x8x4xf32> to vector<8x6x4xf32>
    %345 = vector.extract_strided_slice %231 {offsets = [5, 0, 0, 0], sizes = [1, 1, 1, 4], strides = [1, 1, 1, 1]} : vector<7x1x1x4xf32> to vector<1x1x1x4xf32>
    %346 = vector.shape_cast %345 : vector<1x1x1x4xf32> to vector<1x1x4xf32>
    %347 = vector.broadcast %346 : vector<1x1x4xf32> to vector<8x6x4xf32>
    %348 = arith.mulf %344, %347 : vector<8x6x4xf32>
    %349 = arith.addf %343, %348 : vector<8x6x4xf32>
    %c0_256 = arith.constant 0 : index
    %c0_257 = arith.constant 0 : index
    %c0_258 = arith.constant 0 : index
    %350 = vector.load %arg31[%c0_256, %c0_257, %c0_258] : memref<8x8x4xf32, #tpu.memory_space<vmem>>, vector<8x6x4xf32>
    tpu.vector_store %arg31[%c0_256, %c0_257, %c0_258], %349 {strides = array<i32>} : memref<8x8x4xf32, #tpu.memory_space<vmem>>, vector<8x6x4xf32>,
    %c0_259 = arith.constant 0 : index
    %c0_260 = arith.constant 0 : index
    %c0_261 = arith.constant 0 : index
    %351 = vector.load %arg31[%c0_259, %c0_260, %c0_261] : memref<8x8x4xf32, #tpu.memory_space<vmem>>, vector<8x5x4xf32>
    %352 = vector.extract_strided_slice %301 {offsets = [0, 3, 0], sizes = [8, 5, 4], strides = [1, 1, 1]} : vector<8x8x4xf32> to vector<8x5x4xf32>
    %353 = vector.extract_strided_slice %231 {offsets = [6, 0, 0, 0], sizes = [1, 1, 1, 4], strides = [1, 1, 1, 1]} : vector<7x1x1x4xf32> to vector<1x1x1x4xf32>
    %354 = vector.shape_cast %353 : vector<1x1x1x4xf32> to vector<1x1x4xf32>
    %355 = vector.broadcast %354 : vector<1x1x4xf32> to vector<8x5x4xf32>
    %356 = arith.mulf %352, %355 : vector<8x5x4xf32>
    %357 = arith.addf %351, %356 : vector<8x5x4xf32>
    %c0_262 = arith.constant 0 : index
    %c0_263 = arith.constant 0 : index
    %c0_264 = arith.constant 0 : index
    %358 = vector.load %arg31[%c0_262, %c0_263, %c0_264] : memref<8x8x4xf32, #tpu.memory_space<vmem>>, vector<8x5x4xf32>
    tpu.vector_store %arg31[%c0_262, %c0_263, %c0_264], %357 {strides = array<i32>} : memref<8x8x4xf32, #tpu.memory_space<vmem>>, vector<8x5x4xf32>,
    %c0_265 = arith.constant 0 : index
    %c0_266 = arith.constant 0 : index
    %c0_267 = arith.constant 0 : index
    %359 = vector.load %arg31[%c0_265, %c0_266, %c0_267] : memref<8x8x4xf32, #tpu.memory_space<vmem>>, vector<8x8x4xf32>
    %360 = vector.broadcast %236 : vector<1x1x4xf32> to vector<8x8x4xf32>
    %361 = arith.addf %359, %360 : vector<8x8x4xf32>
    %cst_268 = arith.constant 0.000000e+00 : f32
    %362 = vector.broadcast %cst_268 : f32 to vector<8x8x4xf32>
    %c0_269 = arith.constant 0 : index
    %c0_270 = arith.constant 0 : index
    %c0_271 = arith.constant 0 : index
    %363 = vector.load %arg31[%c0_269, %c0_270, %c0_271] : memref<8x8x4xf32, #tpu.memory_space<vmem>>, vector<8x8x4xf32>
    tpu.vector_store %arg31[%c0_269, %c0_270, %c0_271], %362 {strides = array<i32>} : memref<8x8x4xf32, #tpu.memory_space<vmem>>, vector<8x8x4xf32>,
    %c4 = arith.constant 4 : index
    %c4_272 = arith.constant 4 : index
    %c0_273 = arith.constant 0 : index
    %364 = vector.load %arg31[%c4, %c4_272, %c0_273] : memref<8x8x4xf32, #tpu.memory_space<vmem>>, vector<4x4x4xf32>
    %365 = vector.extract_strided_slice %361 {offsets = [0, 0, 0], sizes = [4, 4, 4], strides = [1, 1, 1]} : vector<8x8x4xf32> to vector<4x4x4xf32>
    %366 = vector.extract_strided_slice %233 {offsets = [0, 0, 0, 0, 0], sizes = [1, 1, 1, 1, 4], strides = [1, 1, 1, 1, 1]} : vector<3x3x1x1x4xf32> to vector<1x1x1x1x4xf32>
    %367 = vector.shape_cast %366 : vector<1x1x1x1x4xf32> to vector<1x1x4xf32>
    %368 = vector.broadcast %367 : vector<1x1x4xf32> to vector<4x4x4xf32>
    %369 = arith.mulf %365, %368 : vector<4x4x4xf32>
    %370 = arith.addf %364, %369 : vector<4x4x4xf32>
    %c4_274 = arith.constant 4 : index
    %c4_275 = arith.constant 4 : index
    %c0_276 = arith.constant 0 : index
    %371 = vector.load %arg31[%c4_274, %c4_275, %c0_276] : memref<8x8x4xf32, #tpu.memory_space<vmem>>, vector<4x4x4xf32>
    tpu.vector_store %arg31[%c4_274, %c4_275, %c0_276], %370 {strides = array<i32>} : memref<8x8x4xf32, #tpu.memory_space<vmem>>, vector<4x4x4xf32>,
    %c4_277 = arith.constant 4 : index
    %c0_278 = arith.constant 0 : index
    %c0_279 = arith.constant 0 : index
    %372 = vector.load %arg31[%c4_277, %c0_278, %c0_279] : memref<8x8x4xf32, #tpu.memory_space<vmem>>, vector<4x8x4xf32>
    %373 = vector.extract_strided_slice %361 {offsets = [0, 0, 0], sizes = [4, 8, 4], strides = [1, 1, 1]} : vector<8x8x4xf32> to vector<4x8x4xf32>
    %374 = vector.extract_strided_slice %233 {offsets = [0, 1, 0, 0, 0], sizes = [1, 1, 1, 1, 4], strides = [1, 1, 1, 1, 1]} : vector<3x3x1x1x4xf32> to vector<1x1x1x1x4xf32>
    %375 = vector.shape_cast %374 : vector<1x1x1x1x4xf32> to vector<1x1x4xf32>
    %376 = vector.broadcast %375 : vector<1x1x4xf32> to vector<4x8x4xf32>
    %377 = arith.mulf %373, %376 : vector<4x8x4xf32>
    %378 = arith.addf %372, %377 : vector<4x8x4xf32>
    %c4_280 = arith.constant 4 : index
    %c0_281 = arith.constant 0 : index
    %c0_282 = arith.constant 0 : index
    %379 = vector.load %arg31[%c4_280, %c0_281, %c0_282] : memref<8x8x4xf32, #tpu.memory_space<vmem>>, vector<4x8x4xf32>
    tpu.vector_store %arg31[%c4_280, %c0_281, %c0_282], %378 {strides = array<i32>} : memref<8x8x4xf32, #tpu.memory_space<vmem>>, vector<4x8x4xf32>,
    %c4_283 = arith.constant 4 : index
    %c0_284 = arith.constant 0 : index
    %c0_285 = arith.constant 0 : index
    %380 = vector.load %arg31[%c4_283, %c0_284, %c0_285] : memref<8x8x4xf32, #tpu.memory_space<vmem>>, vector<4x4x4xf32>
    %381 = vector.extract_strided_slice %361 {offsets = [0, 4, 0], sizes = [4, 4, 4], strides = [1, 1, 1]} : vector<8x8x4xf32> to vector<4x4x4xf32>
    %382 = vector.extract_strided_slice %233 {offsets = [0, 2, 0, 0, 0], sizes = [1, 1, 1, 1, 4], strides = [1, 1, 1, 1, 1]} : vector<3x3x1x1x4xf32> to vector<1x1x1x1x4xf32>
    %383 = vector.shape_cast %382 : vector<1x1x1x1x4xf32> to vector<1x1x4xf32>
    %384 = vector.broadcast %383 : vector<1x1x4xf32> to vector<4x4x4xf32>
    %385 = arith.mulf %381, %384 : vector<4x4x4xf32>
    %386 = arith.addf %380, %385 : vector<4x4x4xf32>
    %c4_286 = arith.constant 4 : index
    %c0_287 = arith.constant 0 : index
    %c0_288 = arith.constant 0 : index
    %387 = vector.load %arg31[%c4_286, %c0_287, %c0_288] : memref<8x8x4xf32, #tpu.memory_space<vmem>>, vector<4x4x4xf32>
    tpu.vector_store %arg31[%c4_286, %c0_287, %c0_288], %386 {strides = array<i32>} : memref<8x8x4xf32, #tpu.memory_space<vmem>>, vector<4x4x4xf32>,
    %c0_289 = arith.constant 0 : index
    %c4_290 = arith.constant 4 : index
    %c0_291 = arith.constant 0 : index
    %388 = vector.load %arg31[%c0_289, %c4_290, %c0_291] : memref<8x8x4xf32, #tpu.memory_space<vmem>>, vector<8x4x4xf32>
    %389 = vector.extract_strided_slice %361 {offsets = [0, 0, 0], sizes = [8, 4, 4], strides = [1, 1, 1]} : vector<8x8x4xf32> to vector<8x4x4xf32>
    %390 = vector.extract_strided_slice %233 {offsets = [1, 0, 0, 0, 0], sizes = [1, 1, 1, 1, 4], strides = [1, 1, 1, 1, 1]} : vector<3x3x1x1x4xf32> to vector<1x1x1x1x4xf32>
    %391 = vector.shape_cast %390 : vector<1x1x1x1x4xf32> to vector<1x1x4xf32>
    %392 = vector.broadcast %391 : vector<1x1x4xf32> to vector<8x4x4xf32>
    %393 = arith.mulf %389, %392 : vector<8x4x4xf32>
    %394 = arith.addf %388, %393 : vector<8x4x4xf32>
    %c0_292 = arith.constant 0 : index
    %c4_293 = arith.constant 4 : index
    %c0_294 = arith.constant 0 : index
    %395 = vector.load %arg31[%c0_292, %c4_293, %c0_294] : memref<8x8x4xf32, #tpu.memory_space<vmem>>, vector<8x4x4xf32>
    tpu.vector_store %arg31[%c0_292, %c4_293, %c0_294], %394 {strides = array<i32>} : memref<8x8x4xf32, #tpu.memory_space<vmem>>, vector<8x4x4xf32>,
    %c0_295 = arith.constant 0 : index
    %c0_296 = arith.constant 0 : index
    %c0_297 = arith.constant 0 : index
    %396 = vector.load %arg31[%c0_295, %c0_296, %c0_297] : memref<8x8x4xf32, #tpu.memory_space<vmem>>, vector<8x8x4xf32>
    %397 = vector.extract_strided_slice %233 {offsets = [1, 1, 0, 0, 0], sizes = [1, 1, 1, 1, 4], strides = [1, 1, 1, 1, 1]} : vector<3x3x1x1x4xf32> to vector<1x1x1x1x4xf32>
    %398 = vector.shape_cast %397 : vector<1x1x1x1x4xf32> to vector<1x1x4xf32>
    %399 = vector.broadcast %398 : vector<1x1x4xf32> to vector<8x8x4xf32>
    %400 = arith.mulf %361, %399 : vector<8x8x4xf32>
    %401 = arith.addf %396, %400 : vector<8x8x4xf32>
    %c0_298 = arith.constant 0 : index
    %c0_299 = arith.constant 0 : index
    %c0_300 = arith.constant 0 : index
    %402 = vector.load %arg31[%c0_298, %c0_299, %c0_300] : memref<8x8x4xf32, #tpu.memory_space<vmem>>, vector<8x8x4xf32>
    tpu.vector_store %arg31[%c0_298, %c0_299, %c0_300], %401 {strides = array<i32>} : memref<8x8x4xf32, #tpu.memory_space<vmem>>, vector<8x8x4xf32>,
    %c0_301 = arith.constant 0 : index
    %c0_302 = arith.constant 0 : index
    %c0_303 = arith.constant 0 : index
    %403 = vector.load %arg31[%c0_301, %c0_302, %c0_303] : memref<8x8x4xf32, #tpu.memory_space<vmem>>, vector<8x4x4xf32>
    %404 = vector.extract_strided_slice %361 {offsets = [0, 4, 0], sizes = [8, 4, 4], strides = [1, 1, 1]} : vector<8x8x4xf32> to vector<8x4x4xf32>
    %405 = vector.extract_strided_slice %233 {offsets = [1, 2, 0, 0, 0], sizes = [1, 1, 1, 1, 4], strides = [1, 1, 1, 1, 1]} : vector<3x3x1x1x4xf32> to vector<1x1x1x1x4xf32>
    %406 = vector.shape_cast %405 : vector<1x1x1x1x4xf32> to vector<1x1x4xf32>
    %407 = vector.broadcast %406 : vector<1x1x4xf32> to vector<8x4x4xf32>
    %408 = arith.mulf %404, %407 : vector<8x4x4xf32>
    %409 = arith.addf %403, %408 : vector<8x4x4xf32>
    %c0_304 = arith.constant 0 : index
    %c0_305 = arith.constant 0 : index
    %c0_306 = arith.constant 0 : index
    %410 = vector.load %arg31[%c0_304, %c0_305, %c0_306] : memref<8x8x4xf32, #tpu.memory_space<vmem>>, vector<8x4x4xf32>
    tpu.vector_store %arg31[%c0_304, %c0_305, %c0_306], %409 {strides = array<i32>} : memref<8x8x4xf32, #tpu.memory_space<vmem>>, vector<8x4x4xf32>,
    %c0_307 = arith.constant 0 : index
    %c4_308 = arith.constant 4 : index
    %c0_309 = arith.constant 0 : index
    %411 = vector.load %arg31[%c0_307, %c4_308, %c0_309] : memref<8x8x4xf32, #tpu.memory_space<vmem>>, vector<4x4x4xf32>
    %412 = vector.extract_strided_slice %361 {offsets = [4, 0, 0], sizes = [4, 4, 4], strides = [1, 1, 1]} : vector<8x8x4xf32> to vector<4x4x4xf32>
    %413 = vector.extract_strided_slice %233 {offsets = [2, 0, 0, 0, 0], sizes = [1, 1, 1, 1, 4], strides = [1, 1, 1, 1, 1]} : vector<3x3x1x1x4xf32> to vector<1x1x1x1x4xf32>
    %414 = vector.shape_cast %413 : vector<1x1x1x1x4xf32> to vector<1x1x4xf32>
    %415 = vector.broadcast %414 : vector<1x1x4xf32> to vector<4x4x4xf32>
    %416 = arith.mulf %412, %415 : vector<4x4x4xf32>
    %417 = arith.addf %411, %416 : vector<4x4x4xf32>
    %c0_310 = arith.constant 0 : index
    %c4_311 = arith.constant 4 : index
    %c0_312 = arith.constant 0 : index
    %418 = vector.load %arg31[%c0_310, %c4_311, %c0_312] : memref<8x8x4xf32, #tpu.memory_space<vmem>>, vector<4x4x4xf32>
    tpu.vector_store %arg31[%c0_310, %c4_311, %c0_312], %417 {strides = array<i32>} : memref<8x8x4xf32, #tpu.memory_space<vmem>>, vector<4x4x4xf32>,
    %c0_313 = arith.constant 0 : index
    %c0_314 = arith.constant 0 : index
    %c0_315 = arith.constant 0 : index
    %419 = vector.load %arg31[%c0_313, %c0_314, %c0_315] : memref<8x8x4xf32, #tpu.memory_space<vmem>>, vector<4x8x4xf32>
    %420 = vector.extract_strided_slice %361 {offsets = [4, 0, 0], sizes = [4, 8, 4], strides = [1, 1, 1]} : vector<8x8x4xf32> to vector<4x8x4xf32>
    %421 = vector.extract_strided_slice %233 {offsets = [2, 1, 0, 0, 0], sizes = [1, 1, 1, 1, 4], strides = [1, 1, 1, 1, 1]} : vector<3x3x1x1x4xf32> to vector<1x1x1x1x4xf32>
    %422 = vector.shape_cast %421 : vector<1x1x1x1x4xf32> to vector<1x1x4xf32>
    %423 = vector.broadcast %422 : vector<1x1x4xf32> to vector<4x8x4xf32>
    %424 = arith.mulf %420, %423 : vector<4x8x4xf32>
    %425 = arith.addf %419, %424 : vector<4x8x4xf32>
    %c0_316 = arith.constant 0 : index
    %c0_317 = arith.constant 0 : index
    %c0_318 = arith.constant 0 : index
    %426 = vector.load %arg31[%c0_316, %c0_317, %c0_318] : memref<8x8x4xf32, #tpu.memory_space<vmem>>, vector<4x8x4xf32>
    tpu.vector_store %arg31[%c0_316, %c0_317, %c0_318], %425 {strides = array<i32>} : memref<8x8x4xf32, #tpu.memory_space<vmem>>, vector<4x8x4xf32>,
    %c0_319 = arith.constant 0 : index
    %c0_320 = arith.constant 0 : index
    %c0_321 = arith.constant 0 : index
    %427 = vector.load %arg31[%c0_319, %c0_320, %c0_321] : memref<8x8x4xf32, #tpu.memory_space<vmem>>, vector<4x4x4xf32>
    %428 = vector.extract_strided_slice %361 {offsets = [4, 4, 0], sizes = [4, 4, 4], strides = [1, 1, 1]} : vector<8x8x4xf32> to vector<4x4x4xf32>
    %429 = vector.extract_strided_slice %233 {offsets = [2, 2, 0, 0, 0], sizes = [1, 1, 1, 1, 4], strides = [1, 1, 1, 1, 1]} : vector<3x3x1x1x4xf32> to vector<1x1x1x1x4xf32>
    %430 = vector.shape_cast %429 : vector<1x1x1x1x4xf32> to vector<1x1x4xf32>
    %431 = vector.broadcast %430 : vector<1x1x4xf32> to vector<4x4x4xf32>
    %432 = arith.mulf %428, %431 : vector<4x4x4xf32>
    %433 = arith.addf %427, %432 : vector<4x4x4xf32>
    %c0_322 = arith.constant 0 : index
    %c0_323 = arith.constant 0 : index
    %c0_324 = arith.constant 0 : index
    %434 = vector.load %arg31[%c0_322, %c0_323, %c0_324] : memref<8x8x4xf32, #tpu.memory_space<vmem>>, vector<4x4x4xf32>
    tpu.vector_store %arg31[%c0_322, %c0_323, %c0_324], %433 {strides = array<i32>} : memref<8x8x4xf32, #tpu.memory_space<vmem>>, vector<4x4x4xf32>,
    %c0_325 = arith.constant 0 : index
    %c0_326 = arith.constant 0 : index
    %c0_327 = arith.constant 0 : index
    %435 = vector.load %arg31[%c0_325, %c0_326, %c0_327] : memref<8x8x4xf32, #tpu.memory_space<vmem>>, vector<8x8x4xf32>
    %436 = vector.shape_cast %435 : vector<8x8x4xf32> to vector<64x4xf32>
    %c0_328 = arith.constant 0 : index
    %c0_329 = arith.constant 0 : index
    %437 = vector.load %arg18[%c0_328, %c0_329] : memref<4x4xf32, #tpu.memory_space<vmem>>, vector<4x4xf32>
    %cst_330 = arith.constant dense<0.000000e+00> : vector<64x4xf32>
    %438 = tpu.matmul %436, %437, %cst_330 {dimension_numbers = #tpu.dot_dimension_numbers<[1], [0], [0], [1], [0, 0, 1, 1], [], []>} : vector<64x4xf32>, vector<4x4xf32>, vector<64x4xf32> -> vector<64x4xf32>
    %c0_331 = arith.constant 0 : index
    %c0_332 = arith.constant 0 : index
    %439 = vector.load %arg19[%c0_331, %c0_332] : memref<1x4xf32, #tpu.memory_space<vmem>>, vector<1x4xf32>
    %440 = vector.broadcast %439 : vector<1x4xf32> to vector<64x4xf32>
    %441 = arith.addf %438, %440 : vector<64x4xf32>
    %c0_333 = arith.constant 0 : index
    %c0_334 = arith.constant 0 : index
    %442 = vector.load %arg20[%c0_333, %c0_334] : memref<1x4xf32, #tpu.memory_space<vmem>>, vector<1x4xf32>
    %cst_335 = arith.constant 0.000000e+00 : f32
    %443 = vector.broadcast %cst_335 : f32 to vector<64x4xf32>
    %444 = arith.cmpf ogt, %441, %443 : vector<64x4xf32>
    %445 = vector.broadcast %442 : vector<1x4xf32> to vector<64x4xf32>
    %446 = arith.mulf %445, %441 : vector<64x4xf32>
    %447 = arith.select %444, %441, %446 : vector<64x4xi1>, vector<64x4xf32>
    %448 = tpu.transpose %447, [1, 0] : vector<64x4xf32> -> vector<4x64xf32>
    %c0_336 = arith.constant 0 : index
    %c4_337 = arith.constant 4 : index
    %c0_338 = arith.constant 0 : index
    %449 = vector.load %arg30[%c0_336, %c4_337, %c0_338] : memref<1x12x64xf32, #tpu.memory_space<vmem>>, vector<1x4x64xf32>
    %450 = vector.shape_cast %449 : vector<1x4x64xf32> to vector<4x64xf32>
    %451 = vector.shape_cast %448 : vector<4x64xf32> to vector<1x4x64xf32>
    tpu.vector_store %arg30[%c0_336, %c4_337, %c0_338], %451 {strides = array<i32>} : memref<1x12x64xf32, #tpu.memory_space<vmem>>, vector<1x4x64xf32>,
    %c0_339 = arith.constant 0 : index
    %c0_340 = arith.constant 0 : index
    %452 = vector.load %arg21[%c0_339, %c0_340] : memref<15x4xf32, #tpu.memory_space<vmem>>, vector<15x4xf32>
    %453 = vector.shape_cast %452 : vector<15x4xf32> to vector<15x1x1x4xf32>
    %c0_341 = arith.constant 0 : index
    %c0_342 = arith.constant 0 : index
    %454 = vector.load %arg24[%c0_341, %c0_342] : memref<15x4xf32, #tpu.memory_space<vmem>>, vector<15x4xf32>
    %455 = vector.shape_cast %454 : vector<15x4xf32> to vector<15x1x1x4xf32>
    %c0_343 = arith.constant 0 : index
    %c0_344 = arith.constant 0 : index
    %c0_345 = arith.constant 0 : index
    %456 = vector.load %arg26[%c0_343, %c0_344, %c0_345] : memref<3x3x4xf32, #tpu.memory_space<vmem>>, vector<3x3x4xf32>
    %457 = vector.shape_cast %456 : vector<3x3x4xf32> to vector<3x3x1x1x4xf32>
    %c0_346 = arith.constant 0 : index
    %c0_347 = arith.constant 0 : index
    %c0_348 = arith.constant 0 : index
    %458 = vector.load %arg22[%c0_346, %c0_347, %c0_348] : memref<1x1x4xf32, #tpu.memory_space<vmem>>, vector<1x1x4xf32>
    %c0_349 = arith.constant 0 : index
    %c0_350 = arith.constant 0 : index
    %c0_351 = arith.constant 0 : index
    %459 = vector.load %arg23[%c0_349, %c0_350, %c0_351] : memref<1x1x4xf32, #tpu.memory_space<vmem>>, vector<1x1x4xf32>
    %c0_352 = arith.constant 0 : index
    %c0_353 = arith.constant 0 : index
    %c0_354 = arith.constant 0 : index
    %460 = vector.load %arg25[%c0_352, %c0_353, %c0_354] : memref<1x1x4xf32, #tpu.memory_space<vmem>>, vector<1x1x4xf32>
    %cst_355 = arith.constant 0.000000e+00 : f32
    %461 = vector.broadcast %cst_355 : f32 to vector<8x8x4xf32>
    %c0_356 = arith.constant 0 : index
    %c0_357 = arith.constant 0 : index
    %c0_358 = arith.constant 0 : index
    %462 = vector.load %arg31[%c0_356, %c0_357, %c0_358] : memref<8x8x4xf32, #tpu.memory_space<vmem>>, vector<8x8x4xf32>
    tpu.vector_store %arg31[%c0_356, %c0_357, %c0_358], %461 {strides = array<i32>} : memref<8x8x4xf32, #tpu.memory_space<vmem>>, vector<8x8x4xf32>,
    %c7 = arith.constant 7 : index
    %c0_359 = arith.constant 0 : index
    %c0_360 = arith.constant 0 : index
    %463 = vector.load %arg31[%c7, %c0_359, %c0_360] : memref<8x8x4xf32, #tpu.memory_space<vmem>>, vector<1x8x4xf32>
    %464 = vector.extract_strided_slice %67 {offsets = [0, 0, 0], sizes = [1, 8, 4], strides = [1, 1, 1]} : vector<8x8x4xf32> to vector<1x8x4xf32>
    %465 = vector.extract_strided_slice %453 {offsets = [0, 0, 0, 0], sizes = [1, 1, 1, 4], strides = [1, 1, 1, 1]} : vector<15x1x1x4xf32> to vector<1x1x1x4xf32>
    %466 = vector.shape_cast %465 : vector<1x1x1x4xf32> to vector<1x1x4xf32>
    %467 = vector.broadcast %466 : vector<1x1x4xf32> to vector<1x8x4xf32>
    %468 = arith.mulf %464, %467 : vector<1x8x4xf32>
    %469 = arith.addf %463, %468 : vector<1x8x4xf32>
    %c7_361 = arith.constant 7 : index
    %c0_362 = arith.constant 0 : index
    %c0_363 = arith.constant 0 : index
    %470 = vector.load %arg31[%c7_361, %c0_362, %c0_363] : memref<8x8x4xf32, #tpu.memory_space<vmem>>, vector<1x8x4xf32>
    tpu.vector_store %arg31[%c7_361, %c0_362, %c0_363], %469 {strides = array<i32>} : memref<8x8x4xf32, #tpu.memory_space<vmem>>, vector<1x8x4xf32>,
    %c6 = arith.constant 6 : index
    %c0_364 = arith.constant 0 : index
    %c0_365 = arith.constant 0 : index
    %471 = vector.load %arg31[%c6, %c0_364, %c0_365] : memref<8x8x4xf32, #tpu.memory_space<vmem>>, vector<2x8x4xf32>
    %472 = vector.extract_strided_slice %67 {offsets = [0, 0, 0], sizes = [2, 8, 4], strides = [1, 1, 1]} : vector<8x8x4xf32> to vector<2x8x4xf32>
    %473 = vector.extract_strided_slice %453 {offsets = [1, 0, 0, 0], sizes = [1, 1, 1, 4], strides = [1, 1, 1, 1]} : vector<15x1x1x4xf32> to vector<1x1x1x4xf32>
    %474 = vector.shape_cast %473 : vector<1x1x1x4xf32> to vector<1x1x4xf32>
    %475 = vector.broadcast %474 : vector<1x1x4xf32> to vector<2x8x4xf32>
    %476 = arith.mulf %472, %475 : vector<2x8x4xf32>
    %477 = arith.addf %471, %476 : vector<2x8x4xf32>
    %c6_366 = arith.constant 6 : index
    %c0_367 = arith.constant 0 : index
    %c0_368 = arith.constant 0 : index
    %478 = vector.load %arg31[%c6_366, %c0_367, %c0_368] : memref<8x8x4xf32, #tpu.memory_space<vmem>>, vector<2x8x4xf32>
    tpu.vector_store %arg31[%c6_366, %c0_367, %c0_368], %477 {strides = array<i32>} : memref<8x8x4xf32, #tpu.memory_space<vmem>>, vector<2x8x4xf32>,
    %c5 = arith.constant 5 : index
    %c0_369 = arith.constant 0 : index
    %c0_370 = arith.constant 0 : index
    %479 = vector.load %arg31[%c5, %c0_369, %c0_370] : memref<8x8x4xf32, #tpu.memory_space<vmem>>, vector<3x8x4xf32>
    %480 = vector.extract_strided_slice %67 {offsets = [0, 0, 0], sizes = [3, 8, 4], strides = [1, 1, 1]} : vector<8x8x4xf32> to vector<3x8x4xf32>
    %481 = vector.extract_strided_slice %453 {offsets = [2, 0, 0, 0], sizes = [1, 1, 1, 4], strides = [1, 1, 1, 1]} : vector<15x1x1x4xf32> to vector<1x1x1x4xf32>
    %482 = vector.shape_cast %481 : vector<1x1x1x4xf32> to vector<1x1x4xf32>
    %483 = vector.broadcast %482 : vector<1x1x4xf32> to vector<3x8x4xf32>
    %484 = arith.mulf %480, %483 : vector<3x8x4xf32>
    %485 = arith.addf %479, %484 : vector<3x8x4xf32>
    %c5_371 = arith.constant 5 : index
    %c0_372 = arith.constant 0 : index
    %c0_373 = arith.constant 0 : index
    %486 = vector.load %arg31[%c5_371, %c0_372, %c0_373] : memref<8x8x4xf32, #tpu.memory_space<vmem>>, vector<3x8x4xf32>
    tpu.vector_store %arg31[%c5_371, %c0_372, %c0_373], %485 {strides = array<i32>} : memref<8x8x4xf32, #tpu.memory_space<vmem>>, vector<3x8x4xf32>,
    %c4_374 = arith.constant 4 : index
    %c0_375 = arith.constant 0 : index
    %c0_376 = arith.constant 0 : index
    %487 = vector.load %arg31[%c4_374, %c0_375, %c0_376] : memref<8x8x4xf32, #tpu.memory_space<vmem>>, vector<4x8x4xf32>
    %488 = vector.extract_strided_slice %67 {offsets = [0, 0, 0], sizes = [4, 8, 4], strides = [1, 1, 1]} : vector<8x8x4xf32> to vector<4x8x4xf32>
    %489 = vector.extract_strided_slice %453 {offsets = [3, 0, 0, 0], sizes = [1, 1, 1, 4], strides = [1, 1, 1, 1]} : vector<15x1x1x4xf32> to vector<1x1x1x4xf32>
    %490 = vector.shape_cast %489 : vector<1x1x1x4xf32> to vector<1x1x4xf32>
    %491 = vector.broadcast %490 : vector<1x1x4xf32> to vector<4x8x4xf32>
    %492 = arith.mulf %488, %491 : vector<4x8x4xf32>
    %493 = arith.addf %487, %492 : vector<4x8x4xf32>
    %c4_377 = arith.constant 4 : index
    %c0_378 = arith.constant 0 : index
    %c0_379 = arith.constant 0 : index
    %494 = vector.load %arg31[%c4_377, %c0_378, %c0_379] : memref<8x8x4xf32, #tpu.memory_space<vmem>>, vector<4x8x4xf32>
    tpu.vector_store %arg31[%c4_377, %c0_378, %c0_379], %493 {strides = array<i32>} : memref<8x8x4xf32, #tpu.memory_space<vmem>>, vector<4x8x4xf32>,
    %c3_380 = arith.constant 3 : index
    %c0_381 = arith.constant 0 : index
    %c0_382 = arith.constant 0 : index
    %495 = vector.load %arg31[%c3_380, %c0_381, %c0_382] : memref<8x8x4xf32, #tpu.memory_space<vmem>>, vector<5x8x4xf32>
    %496 = vector.extract_strided_slice %67 {offsets = [0, 0, 0], sizes = [5, 8, 4], strides = [1, 1, 1]} : vector<8x8x4xf32> to vector<5x8x4xf32>
    %497 = vector.extract_strided_slice %453 {offsets = [4, 0, 0, 0], sizes = [1, 1, 1, 4], strides = [1, 1, 1, 1]} : vector<15x1x1x4xf32> to vector<1x1x1x4xf32>
    %498 = vector.shape_cast %497 : vector<1x1x1x4xf32> to vector<1x1x4xf32>
    %499 = vector.broadcast %498 : vector<1x1x4xf32> to vector<5x8x4xf32>
    %500 = arith.mulf %496, %499 : vector<5x8x4xf32>
    %501 = arith.addf %495, %500 : vector<5x8x4xf32>
    %c3_383 = arith.constant 3 : index
    %c0_384 = arith.constant 0 : index
    %c0_385 = arith.constant 0 : index
    %502 = vector.load %arg31[%c3_383, %c0_384, %c0_385] : memref<8x8x4xf32, #tpu.memory_space<vmem>>, vector<5x8x4xf32>
    tpu.vector_store %arg31[%c3_383, %c0_384, %c0_385], %501 {strides = array<i32>} : memref<8x8x4xf32, #tpu.memory_space<vmem>>, vector<5x8x4xf32>,
    %c2_386 = arith.constant 2 : index
    %c0_387 = arith.constant 0 : index
    %c0_388 = arith.constant 0 : index
    %503 = vector.load %arg31[%c2_386, %c0_387, %c0_388] : memref<8x8x4xf32, #tpu.memory_space<vmem>>, vector<6x8x4xf32>
    %504 = vector.extract_strided_slice %67 {offsets = [0, 0, 0], sizes = [6, 8, 4], strides = [1, 1, 1]} : vector<8x8x4xf32> to vector<6x8x4xf32>
    %505 = vector.extract_strided_slice %453 {offsets = [5, 0, 0, 0], sizes = [1, 1, 1, 4], strides = [1, 1, 1, 1]} : vector<15x1x1x4xf32> to vector<1x1x1x4xf32>
    %506 = vector.shape_cast %505 : vector<1x1x1x4xf32> to vector<1x1x4xf32>
    %507 = vector.broadcast %506 : vector<1x1x4xf32> to vector<6x8x4xf32>
    %508 = arith.mulf %504, %507 : vector<6x8x4xf32>
    %509 = arith.addf %503, %508 : vector<6x8x4xf32>
    %c2_389 = arith.constant 2 : index
    %c0_390 = arith.constant 0 : index
    %c0_391 = arith.constant 0 : index
    %510 = vector.load %arg31[%c2_389, %c0_390, %c0_391] : memref<8x8x4xf32, #tpu.memory_space<vmem>>, vector<6x8x4xf32>
    tpu.vector_store %arg31[%c2_389, %c0_390, %c0_391], %509 {strides = array<i32>} : memref<8x8x4xf32, #tpu.memory_space<vmem>>, vector<6x8x4xf32>,
    %c1_392 = arith.constant 1 : index
    %c0_393 = arith.constant 0 : index
    %c0_394 = arith.constant 0 : index
    %511 = vector.load %arg31[%c1_392, %c0_393, %c0_394] : memref<8x8x4xf32, #tpu.memory_space<vmem>>, vector<7x8x4xf32>
    %512 = vector.extract_strided_slice %67 {offsets = [0, 0, 0], sizes = [7, 8, 4], strides = [1, 1, 1]} : vector<8x8x4xf32> to vector<7x8x4xf32>
    %513 = vector.extract_strided_slice %453 {offsets = [6, 0, 0, 0], sizes = [1, 1, 1, 4], strides = [1, 1, 1, 1]} : vector<15x1x1x4xf32> to vector<1x1x1x4xf32>
    %514 = vector.shape_cast %513 : vector<1x1x1x4xf32> to vector<1x1x4xf32>
    %515 = vector.broadcast %514 : vector<1x1x4xf32> to vector<7x8x4xf32>
    %516 = arith.mulf %512, %515 : vector<7x8x4xf32>
    %517 = arith.addf %511, %516 : vector<7x8x4xf32>
    %c1_395 = arith.constant 1 : index
    %c0_396 = arith.constant 0 : index
    %c0_397 = arith.constant 0 : index
    %518 = vector.load %arg31[%c1_395, %c0_396, %c0_397] : memref<8x8x4xf32, #tpu.memory_space<vmem>>, vector<7x8x4xf32>
    tpu.vector_store %arg31[%c1_395, %c0_396, %c0_397], %517 {strides = array<i32>} : memref<8x8x4xf32, #tpu.memory_space<vmem>>, vector<7x8x4xf32>,
    %c0_398 = arith.constant 0 : index
    %c0_399 = arith.constant 0 : index
    %c0_400 = arith.constant 0 : index
    %519 = vector.load %arg31[%c0_398, %c0_399, %c0_400] : memref<8x8x4xf32, #tpu.memory_space<vmem>>, vector<8x8x4xf32>
    %520 = vector.extract_strided_slice %453 {offsets = [7, 0, 0, 0], sizes = [1, 1, 1, 4], strides = [1, 1, 1, 1]} : vector<15x1x1x4xf32> to vector<1x1x1x4xf32>
    %521 = vector.shape_cast %520 : vector<1x1x1x4xf32> to vector<1x1x4xf32>
    %522 = vector.broadcast %521 : vector<1x1x4xf32> to vector<8x8x4xf32>
    %523 = arith.mulf %67, %522 : vector<8x8x4xf32>
    %524 = arith.addf %519, %523 : vector<8x8x4xf32>
    %c0_401 = arith.constant 0 : index
    %c0_402 = arith.constant 0 : index
    %c0_403 = arith.constant 0 : index
    %525 = vector.load %arg31[%c0_401, %c0_402, %c0_403] : memref<8x8x4xf32, #tpu.memory_space<vmem>>, vector<8x8x4xf32>
    tpu.vector_store %arg31[%c0_401, %c0_402, %c0_403], %524 {strides = array<i32>} : memref<8x8x4xf32, #tpu.memory_space<vmem>>, vector<8x8x4xf32>,
    %c0_404 = arith.constant 0 : index
    %c0_405 = arith.constant 0 : index
    %c0_406 = arith.constant 0 : index
    %526 = vector.load %arg31[%c0_404, %c0_405, %c0_406] : memref<8x8x4xf32, #tpu.memory_space<vmem>>, vector<7x8x4xf32>
    %527 = vector.extract_strided_slice %67 {offsets = [1, 0, 0], sizes = [7, 8, 4], strides = [1, 1, 1]} : vector<8x8x4xf32> to vector<7x8x4xf32>
    %528 = vector.extract_strided_slice %453 {offsets = [8, 0, 0, 0], sizes = [1, 1, 1, 4], strides = [1, 1, 1, 1]} : vector<15x1x1x4xf32> to vector<1x1x1x4xf32>
    %529 = vector.shape_cast %528 : vector<1x1x1x4xf32> to vector<1x1x4xf32>
    %530 = vector.broadcast %529 : vector<1x1x4xf32> to vector<7x8x4xf32>
    %531 = arith.mulf %527, %530 : vector<7x8x4xf32>
    %532 = arith.addf %526, %531 : vector<7x8x4xf32>
    %c0_407 = arith.constant 0 : index
    %c0_408 = arith.constant 0 : index
    %c0_409 = arith.constant 0 : index
    %533 = vector.load %arg31[%c0_407, %c0_408, %c0_409] : memref<8x8x4xf32, #tpu.memory_space<vmem>>, vector<7x8x4xf32>
    tpu.vector_store %arg31[%c0_407, %c0_408, %c0_409], %532 {strides = array<i32>} : memref<8x8x4xf32, #tpu.memory_space<vmem>>, vector<7x8x4xf32>,
    %c0_410 = arith.constant 0 : index
    %c0_411 = arith.constant 0 : index
    %c0_412 = arith.constant 0 : index
    %534 = vector.load %arg31[%c0_410, %c0_411, %c0_412] : memref<8x8x4xf32, #tpu.memory_space<vmem>>, vector<6x8x4xf32>
    %535 = vector.extract_strided_slice %67 {offsets = [2, 0, 0], sizes = [6, 8, 4], strides = [1, 1, 1]} : vector<8x8x4xf32> to vector<6x8x4xf32>
    %536 = vector.extract_strided_slice %453 {offsets = [9, 0, 0, 0], sizes = [1, 1, 1, 4], strides = [1, 1, 1, 1]} : vector<15x1x1x4xf32> to vector<1x1x1x4xf32>
    %537 = vector.shape_cast %536 : vector<1x1x1x4xf32> to vector<1x1x4xf32>
    %538 = vector.broadcast %537 : vector<1x1x4xf32> to vector<6x8x4xf32>
    %539 = arith.mulf %535, %538 : vector<6x8x4xf32>
    %540 = arith.addf %534, %539 : vector<6x8x4xf32>
    %c0_413 = arith.constant 0 : index
    %c0_414 = arith.constant 0 : index
    %c0_415 = arith.constant 0 : index
    %541 = vector.load %arg31[%c0_413, %c0_414, %c0_415] : memref<8x8x4xf32, #tpu.memory_space<vmem>>, vector<6x8x4xf32>
    tpu.vector_store %arg31[%c0_413, %c0_414, %c0_415], %540 {strides = array<i32>} : memref<8x8x4xf32, #tpu.memory_space<vmem>>, vector<6x8x4xf32>,
    %c0_416 = arith.constant 0 : index
    %c0_417 = arith.constant 0 : index
    %c0_418 = arith.constant 0 : index
    %542 = vector.load %arg31[%c0_416, %c0_417, %c0_418] : memref<8x8x4xf32, #tpu.memory_space<vmem>>, vector<5x8x4xf32>
    %543 = vector.extract_strided_slice %67 {offsets = [3, 0, 0], sizes = [5, 8, 4], strides = [1, 1, 1]} : vector<8x8x4xf32> to vector<5x8x4xf32>
    %544 = vector.extract_strided_slice %453 {offsets = [10, 0, 0, 0], sizes = [1, 1, 1, 4], strides = [1, 1, 1, 1]} : vector<15x1x1x4xf32> to vector<1x1x1x4xf32>
    %545 = vector.shape_cast %544 : vector<1x1x1x4xf32> to vector<1x1x4xf32>
    %546 = vector.broadcast %545 : vector<1x1x4xf32> to vector<5x8x4xf32>
    %547 = arith.mulf %543, %546 : vector<5x8x4xf32>
    %548 = arith.addf %542, %547 : vector<5x8x4xf32>
    %c0_419 = arith.constant 0 : index
    %c0_420 = arith.constant 0 : index
    %c0_421 = arith.constant 0 : index
    %549 = vector.load %arg31[%c0_419, %c0_420, %c0_421] : memref<8x8x4xf32, #tpu.memory_space<vmem>>, vector<5x8x4xf32>
    tpu.vector_store %arg31[%c0_419, %c0_420, %c0_421], %548 {strides = array<i32>} : memref<8x8x4xf32, #tpu.memory_space<vmem>>, vector<5x8x4xf32>,
    %c0_422 = arith.constant 0 : index
    %c0_423 = arith.constant 0 : index
    %c0_424 = arith.constant 0 : index
    %550 = vector.load %arg31[%c0_422, %c0_423, %c0_424] : memref<8x8x4xf32, #tpu.memory_space<vmem>>, vector<4x8x4xf32>
    %551 = vector.extract_strided_slice %67 {offsets = [4, 0, 0], sizes = [4, 8, 4], strides = [1, 1, 1]} : vector<8x8x4xf32> to vector<4x8x4xf32>
    %552 = vector.extract_strided_slice %453 {offsets = [11, 0, 0, 0], sizes = [1, 1, 1, 4], strides = [1, 1, 1, 1]} : vector<15x1x1x4xf32> to vector<1x1x1x4xf32>
    %553 = vector.shape_cast %552 : vector<1x1x1x4xf32> to vector<1x1x4xf32>
    %554 = vector.broadcast %553 : vector<1x1x4xf32> to vector<4x8x4xf32>
    %555 = arith.mulf %551, %554 : vector<4x8x4xf32>
    %556 = arith.addf %550, %555 : vector<4x8x4xf32>
    %c0_425 = arith.constant 0 : index
    %c0_426 = arith.constant 0 : index
    %c0_427 = arith.constant 0 : index
    %557 = vector.load %arg31[%c0_425, %c0_426, %c0_427] : memref<8x8x4xf32, #tpu.memory_space<vmem>>, vector<4x8x4xf32>
    tpu.vector_store %arg31[%c0_425, %c0_426, %c0_427], %556 {strides = array<i32>} : memref<8x8x4xf32, #tpu.memory_space<vmem>>, vector<4x8x4xf32>,
    %c0_428 = arith.constant 0 : index
    %c0_429 = arith.constant 0 : index
    %c0_430 = arith.constant 0 : index
    %558 = vector.load %arg31[%c0_428, %c0_429, %c0_430] : memref<8x8x4xf32, #tpu.memory_space<vmem>>, vector<3x8x4xf32>
    %559 = vector.extract_strided_slice %67 {offsets = [5, 0, 0], sizes = [3, 8, 4], strides = [1, 1, 1]} : vector<8x8x4xf32> to vector<3x8x4xf32>
    %560 = vector.extract_strided_slice %453 {offsets = [12, 0, 0, 0], sizes = [1, 1, 1, 4], strides = [1, 1, 1, 1]} : vector<15x1x1x4xf32> to vector<1x1x1x4xf32>
    %561 = vector.shape_cast %560 : vector<1x1x1x4xf32> to vector<1x1x4xf32>
    %562 = vector.broadcast %561 : vector<1x1x4xf32> to vector<3x8x4xf32>
    %563 = arith.mulf %559, %562 : vector<3x8x4xf32>
    %564 = arith.addf %558, %563 : vector<3x8x4xf32>
    %c0_431 = arith.constant 0 : index
    %c0_432 = arith.constant 0 : index
    %c0_433 = arith.constant 0 : index
    %565 = vector.load %arg31[%c0_431, %c0_432, %c0_433] : memref<8x8x4xf32, #tpu.memory_space<vmem>>, vector<3x8x4xf32>
    tpu.vector_store %arg31[%c0_431, %c0_432, %c0_433], %564 {strides = array<i32>} : memref<8x8x4xf32, #tpu.memory_space<vmem>>, vector<3x8x4xf32>,
    %c0_434 = arith.constant 0 : index
    %c0_435 = arith.constant 0 : index
    %c0_436 = arith.constant 0 : index
    %566 = vector.load %arg31[%c0_434, %c0_435, %c0_436] : memref<8x8x4xf32, #tpu.memory_space<vmem>>, vector<2x8x4xf32>
    %567 = vector.extract_strided_slice %67 {offsets = [6, 0, 0], sizes = [2, 8, 4], strides = [1, 1, 1]} : vector<8x8x4xf32> to vector<2x8x4xf32>
    %568 = vector.extract_strided_slice %453 {offsets = [13, 0, 0, 0], sizes = [1, 1, 1, 4], strides = [1, 1, 1, 1]} : vector<15x1x1x4xf32> to vector<1x1x1x4xf32>
    %569 = vector.shape_cast %568 : vector<1x1x1x4xf32> to vector<1x1x4xf32>
    %570 = vector.broadcast %569 : vector<1x1x4xf32> to vector<2x8x4xf32>
    %571 = arith.mulf %567, %570 : vector<2x8x4xf32>
    %572 = arith.addf %566, %571 : vector<2x8x4xf32>
    %c0_437 = arith.constant 0 : index
    %c0_438 = arith.constant 0 : index
    %c0_439 = arith.constant 0 : index
    %573 = vector.load %arg31[%c0_437, %c0_438, %c0_439] : memref<8x8x4xf32, #tpu.memory_space<vmem>>, vector<2x8x4xf32>
    tpu.vector_store %arg31[%c0_437, %c0_438, %c0_439], %572 {strides = array<i32>} : memref<8x8x4xf32, #tpu.memory_space<vmem>>, vector<2x8x4xf32>,
    %c0_440 = arith.constant 0 : index
    %c0_441 = arith.constant 0 : index
    %c0_442 = arith.constant 0 : index
    %574 = vector.load %arg31[%c0_440, %c0_441, %c0_442] : memref<8x8x4xf32, #tpu.memory_space<vmem>>, vector<1x8x4xf32>
    %575 = vector.extract_strided_slice %67 {offsets = [7, 0, 0], sizes = [1, 8, 4], strides = [1, 1, 1]} : vector<8x8x4xf32> to vector<1x8x4xf32>
    %576 = vector.extract_strided_slice %453 {offsets = [14, 0, 0, 0], sizes = [1, 1, 1, 4], strides = [1, 1, 1, 1]} : vector<15x1x1x4xf32> to vector<1x1x1x4xf32>
    %577 = vector.shape_cast %576 : vector<1x1x1x4xf32> to vector<1x1x4xf32>
    %578 = vector.broadcast %577 : vector<1x1x4xf32> to vector<1x8x4xf32>
    %579 = arith.mulf %575, %578 : vector<1x8x4xf32>
    %580 = arith.addf %574, %579 : vector<1x8x4xf32>
    %c0_443 = arith.constant 0 : index
    %c0_444 = arith.constant 0 : index
    %c0_445 = arith.constant 0 : index
    %581 = vector.load %arg31[%c0_443, %c0_444, %c0_445] : memref<8x8x4xf32, #tpu.memory_space<vmem>>, vector<1x8x4xf32>
    tpu.vector_store %arg31[%c0_443, %c0_444, %c0_445], %580 {strides = array<i32>} : memref<8x8x4xf32, #tpu.memory_space<vmem>>, vector<1x8x4xf32>,
    %c0_446 = arith.constant 0 : index
    %c0_447 = arith.constant 0 : index
    %c0_448 = arith.constant 0 : index
    %582 = vector.load %arg31[%c0_446, %c0_447, %c0_448] : memref<8x8x4xf32, #tpu.memory_space<vmem>>, vector<8x8x4xf32>
    %583 = vector.broadcast %458 : vector<1x1x4xf32> to vector<8x8x4xf32>
    %584 = arith.addf %582, %583 : vector<8x8x4xf32>
    %cst_449 = arith.constant 0.000000e+00 : f32
    %585 = vector.broadcast %cst_449 : f32 to vector<8x8x4xf32>
    %586 = arith.cmpf ogt, %584, %585 : vector<8x8x4xf32>
    %587 = vector.broadcast %459 : vector<1x1x4xf32> to vector<8x8x4xf32>
    %588 = arith.mulf %587, %584 : vector<8x8x4xf32>
    %589 = arith.select %586, %584, %588 : vector<8x8x4xi1>, vector<8x8x4xf32>
    %cst_450 = arith.constant 0.000000e+00 : f32
    %590 = vector.broadcast %cst_450 : f32 to vector<8x8x4xf32>
    %c0_451 = arith.constant 0 : index
    %c0_452 = arith.constant 0 : index
    %c0_453 = arith.constant 0 : index
    %591 = vector.load %arg31[%c0_451, %c0_452, %c0_453] : memref<8x8x4xf32, #tpu.memory_space<vmem>>, vector<8x8x4xf32>
    tpu.vector_store %arg31[%c0_451, %c0_452, %c0_453], %590 {strides = array<i32>} : memref<8x8x4xf32, #tpu.memory_space<vmem>>, vector<8x8x4xf32>,
    %c0_454 = arith.constant 0 : index
    %c7_455 = arith.constant 7 : index
    %c0_456 = arith.constant 0 : index
    %592 = vector.load %arg31[%c0_454, %c7_455, %c0_456] : memref<8x8x4xf32, #tpu.memory_space<vmem>>, vector<8x1x4xf32>
    %593 = vector.extract_strided_slice %589 {offsets = [0, 0, 0], sizes = [8, 1, 4], strides = [1, 1, 1]} : vector<8x8x4xf32> to vector<8x1x4xf32>
    %594 = vector.extract_strided_slice %455 {offsets = [0, 0, 0, 0], sizes = [1, 1, 1, 4], strides = [1, 1, 1, 1]} : vector<15x1x1x4xf32> to vector<1x1x1x4xf32>
    %595 = vector.shape_cast %594 : vector<1x1x1x4xf32> to vector<1x1x4xf32>
    %596 = vector.broadcast %595 : vector<1x1x4xf32> to vector<8x1x4xf32>
    %597 = arith.mulf %593, %596 : vector<8x1x4xf32>
    %598 = arith.addf %592, %597 : vector<8x1x4xf32>
    %c0_457 = arith.constant 0 : index
    %c7_458 = arith.constant 7 : index
    %c0_459 = arith.constant 0 : index
    %599 = vector.load %arg31[%c0_457, %c7_458, %c0_459] : memref<8x8x4xf32, #tpu.memory_space<vmem>>, vector<8x1x4xf32>
    tpu.vector_store %arg31[%c0_457, %c7_458, %c0_459], %598 {strides = array<i32>} : memref<8x8x4xf32, #tpu.memory_space<vmem>>, vector<8x1x4xf32>,
    %c0_460 = arith.constant 0 : index
    %c6_461 = arith.constant 6 : index
    %c0_462 = arith.constant 0 : index
    %600 = vector.load %arg31[%c0_460, %c6_461, %c0_462] : memref<8x8x4xf32, #tpu.memory_space<vmem>>, vector<8x2x4xf32>
    %601 = vector.extract_strided_slice %589 {offsets = [0, 0, 0], sizes = [8, 2, 4], strides = [1, 1, 1]} : vector<8x8x4xf32> to vector<8x2x4xf32>
    %602 = vector.extract_strided_slice %455 {offsets = [1, 0, 0, 0], sizes = [1, 1, 1, 4], strides = [1, 1, 1, 1]} : vector<15x1x1x4xf32> to vector<1x1x1x4xf32>
    %603 = vector.shape_cast %602 : vector<1x1x1x4xf32> to vector<1x1x4xf32>
    %604 = vector.broadcast %603 : vector<1x1x4xf32> to vector<8x2x4xf32>
    %605 = arith.mulf %601, %604 : vector<8x2x4xf32>
    %606 = arith.addf %600, %605 : vector<8x2x4xf32>
    %c0_463 = arith.constant 0 : index
    %c6_464 = arith.constant 6 : index
    %c0_465 = arith.constant 0 : index
    %607 = vector.load %arg31[%c0_463, %c6_464, %c0_465] : memref<8x8x4xf32, #tpu.memory_space<vmem>>, vector<8x2x4xf32>
    tpu.vector_store %arg31[%c0_463, %c6_464, %c0_465], %606 {strides = array<i32>} : memref<8x8x4xf32, #tpu.memory_space<vmem>>, vector<8x2x4xf32>,
    %c0_466 = arith.constant 0 : index
    %c5_467 = arith.constant 5 : index
    %c0_468 = arith.constant 0 : index
    %608 = vector.load %arg31[%c0_466, %c5_467, %c0_468] : memref<8x8x4xf32, #tpu.memory_space<vmem>>, vector<8x3x4xf32>
    %609 = vector.extract_strided_slice %589 {offsets = [0, 0, 0], sizes = [8, 3, 4], strides = [1, 1, 1]} : vector<8x8x4xf32> to vector<8x3x4xf32>
    %610 = vector.extract_strided_slice %455 {offsets = [2, 0, 0, 0], sizes = [1, 1, 1, 4], strides = [1, 1, 1, 1]} : vector<15x1x1x4xf32> to vector<1x1x1x4xf32>
    %611 = vector.shape_cast %610 : vector<1x1x1x4xf32> to vector<1x1x4xf32>
    %612 = vector.broadcast %611 : vector<1x1x4xf32> to vector<8x3x4xf32>
    %613 = arith.mulf %609, %612 : vector<8x3x4xf32>
    %614 = arith.addf %608, %613 : vector<8x3x4xf32>
    %c0_469 = arith.constant 0 : index
    %c5_470 = arith.constant 5 : index
    %c0_471 = arith.constant 0 : index
    %615 = vector.load %arg31[%c0_469, %c5_470, %c0_471] : memref<8x8x4xf32, #tpu.memory_space<vmem>>, vector<8x3x4xf32>
    tpu.vector_store %arg31[%c0_469, %c5_470, %c0_471], %614 {strides = array<i32>} : memref<8x8x4xf32, #tpu.memory_space<vmem>>, vector<8x3x4xf32>,
    %c0_472 = arith.constant 0 : index
    %c4_473 = arith.constant 4 : index
    %c0_474 = arith.constant 0 : index
    %616 = vector.load %arg31[%c0_472, %c4_473, %c0_474] : memref<8x8x4xf32, #tpu.memory_space<vmem>>, vector<8x4x4xf32>
    %617 = vector.extract_strided_slice %589 {offsets = [0, 0, 0], sizes = [8, 4, 4], strides = [1, 1, 1]} : vector<8x8x4xf32> to vector<8x4x4xf32>
    %618 = vector.extract_strided_slice %455 {offsets = [3, 0, 0, 0], sizes = [1, 1, 1, 4], strides = [1, 1, 1, 1]} : vector<15x1x1x4xf32> to vector<1x1x1x4xf32>
    %619 = vector.shape_cast %618 : vector<1x1x1x4xf32> to vector<1x1x4xf32>
    %620 = vector.broadcast %619 : vector<1x1x4xf32> to vector<8x4x4xf32>
    %621 = arith.mulf %617, %620 : vector<8x4x4xf32>
    %622 = arith.addf %616, %621 : vector<8x4x4xf32>
    %c0_475 = arith.constant 0 : index
    %c4_476 = arith.constant 4 : index
    %c0_477 = arith.constant 0 : index
    %623 = vector.load %arg31[%c0_475, %c4_476, %c0_477] : memref<8x8x4xf32, #tpu.memory_space<vmem>>, vector<8x4x4xf32>
    tpu.vector_store %arg31[%c0_475, %c4_476, %c0_477], %622 {strides = array<i32>} : memref<8x8x4xf32, #tpu.memory_space<vmem>>, vector<8x4x4xf32>,
    %c0_478 = arith.constant 0 : index
    %c3_479 = arith.constant 3 : index
    %c0_480 = arith.constant 0 : index
    %624 = vector.load %arg31[%c0_478, %c3_479, %c0_480] : memref<8x8x4xf32, #tpu.memory_space<vmem>>, vector<8x5x4xf32>
    %625 = vector.extract_strided_slice %589 {offsets = [0, 0, 0], sizes = [8, 5, 4], strides = [1, 1, 1]} : vector<8x8x4xf32> to vector<8x5x4xf32>
    %626 = vector.extract_strided_slice %455 {offsets = [4, 0, 0, 0], sizes = [1, 1, 1, 4], strides = [1, 1, 1, 1]} : vector<15x1x1x4xf32> to vector<1x1x1x4xf32>
    %627 = vector.shape_cast %626 : vector<1x1x1x4xf32> to vector<1x1x4xf32>
    %628 = vector.broadcast %627 : vector<1x1x4xf32> to vector<8x5x4xf32>
    %629 = arith.mulf %625, %628 : vector<8x5x4xf32>
    %630 = arith.addf %624, %629 : vector<8x5x4xf32>
    %c0_481 = arith.constant 0 : index
    %c3_482 = arith.constant 3 : index
    %c0_483 = arith.constant 0 : index
    %631 = vector.load %arg31[%c0_481, %c3_482, %c0_483] : memref<8x8x4xf32, #tpu.memory_space<vmem>>, vector<8x5x4xf32>
    tpu.vector_store %arg31[%c0_481, %c3_482, %c0_483], %630 {strides = array<i32>} : memref<8x8x4xf32, #tpu.memory_space<vmem>>, vector<8x5x4xf32>,
    %c0_484 = arith.constant 0 : index
    %c2_485 = arith.constant 2 : index
    %c0_486 = arith.constant 0 : index
    %632 = vector.load %arg31[%c0_484, %c2_485, %c0_486] : memref<8x8x4xf32, #tpu.memory_space<vmem>>, vector<8x6x4xf32>
    %633 = vector.extract_strided_slice %589 {offsets = [0, 0, 0], sizes = [8, 6, 4], strides = [1, 1, 1]} : vector<8x8x4xf32> to vector<8x6x4xf32>
    %634 = vector.extract_strided_slice %455 {offsets = [5, 0, 0, 0], sizes = [1, 1, 1, 4], strides = [1, 1, 1, 1]} : vector<15x1x1x4xf32> to vector<1x1x1x4xf32>
    %635 = vector.shape_cast %634 : vector<1x1x1x4xf32> to vector<1x1x4xf32>
    %636 = vector.broadcast %635 : vector<1x1x4xf32> to vector<8x6x4xf32>
    %637 = arith.mulf %633, %636 : vector<8x6x4xf32>
    %638 = arith.addf %632, %637 : vector<8x6x4xf32>
    %c0_487 = arith.constant 0 : index
    %c2_488 = arith.constant 2 : index
    %c0_489 = arith.constant 0 : index
    %639 = vector.load %arg31[%c0_487, %c2_488, %c0_489] : memref<8x8x4xf32, #tpu.memory_space<vmem>>, vector<8x6x4xf32>
    tpu.vector_store %arg31[%c0_487, %c2_488, %c0_489], %638 {strides = array<i32>} : memref<8x8x4xf32, #tpu.memory_space<vmem>>, vector<8x6x4xf32>,
    %c0_490 = arith.constant 0 : index
    %c1_491 = arith.constant 1 : index
    %c0_492 = arith.constant 0 : index
    %640 = vector.load %arg31[%c0_490, %c1_491, %c0_492] : memref<8x8x4xf32, #tpu.memory_space<vmem>>, vector<8x7x4xf32>
    %641 = vector.extract_strided_slice %589 {offsets = [0, 0, 0], sizes = [8, 7, 4], strides = [1, 1, 1]} : vector<8x8x4xf32> to vector<8x7x4xf32>
    %642 = vector.extract_strided_slice %455 {offsets = [6, 0, 0, 0], sizes = [1, 1, 1, 4], strides = [1, 1, 1, 1]} : vector<15x1x1x4xf32> to vector<1x1x1x4xf32>
    %643 = vector.shape_cast %642 : vector<1x1x1x4xf32> to vector<1x1x4xf32>
    %644 = vector.broadcast %643 : vector<1x1x4xf32> to vector<8x7x4xf32>
    %645 = arith.mulf %641, %644 : vector<8x7x4xf32>
    %646 = arith.addf %640, %645 : vector<8x7x4xf32>
    %c0_493 = arith.constant 0 : index
    %c1_494 = arith.constant 1 : index
    %c0_495 = arith.constant 0 : index
    %647 = vector.load %arg31[%c0_493, %c1_494, %c0_495] : memref<8x8x4xf32, #tpu.memory_space<vmem>>, vector<8x7x4xf32>
    tpu.vector_store %arg31[%c0_493, %c1_494, %c0_495], %646 {strides = array<i32>} : memref<8x8x4xf32, #tpu.memory_space<vmem>>, vector<8x7x4xf32>,
    %c0_496 = arith.constant 0 : index
    %c0_497 = arith.constant 0 : index
    %c0_498 = arith.constant 0 : index
    %648 = vector.load %arg31[%c0_496, %c0_497, %c0_498] : memref<8x8x4xf32, #tpu.memory_space<vmem>>, vector<8x8x4xf32>
    %649 = vector.extract_strided_slice %455 {offsets = [7, 0, 0, 0], sizes = [1, 1, 1, 4], strides = [1, 1, 1, 1]} : vector<15x1x1x4xf32> to vector<1x1x1x4xf32>
    %650 = vector.shape_cast %649 : vector<1x1x1x4xf32> to vector<1x1x4xf32>
    %651 = vector.broadcast %650 : vector<1x1x4xf32> to vector<8x8x4xf32>
    %652 = arith.mulf %589, %651 : vector<8x8x4xf32>
    %653 = arith.addf %648, %652 : vector<8x8x4xf32>
    %c0_499 = arith.constant 0 : index
    %c0_500 = arith.constant 0 : index
    %c0_501 = arith.constant 0 : index
    %654 = vector.load %arg31[%c0_499, %c0_500, %c0_501] : memref<8x8x4xf32, #tpu.memory_space<vmem>>, vector<8x8x4xf32>
    tpu.vector_store %arg31[%c0_499, %c0_500, %c0_501], %653 {strides = array<i32>} : memref<8x8x4xf32, #tpu.memory_space<vmem>>, vector<8x8x4xf32>,
    %c0_502 = arith.constant 0 : index
    %c0_503 = arith.constant 0 : index
    %c0_504 = arith.constant 0 : index
    %655 = vector.load %arg31[%c0_502, %c0_503, %c0_504] : memref<8x8x4xf32, #tpu.memory_space<vmem>>, vector<8x7x4xf32>
    %656 = vector.extract_strided_slice %589 {offsets = [0, 1, 0], sizes = [8, 7, 4], strides = [1, 1, 1]} : vector<8x8x4xf32> to vector<8x7x4xf32>
    %657 = vector.extract_strided_slice %455 {offsets = [8, 0, 0, 0], sizes = [1, 1, 1, 4], strides = [1, 1, 1, 1]} : vector<15x1x1x4xf32> to vector<1x1x1x4xf32>
    %658 = vector.shape_cast %657 : vector<1x1x1x4xf32> to vector<1x1x4xf32>
    %659 = vector.broadcast %658 : vector<1x1x4xf32> to vector<8x7x4xf32>
    %660 = arith.mulf %656, %659 : vector<8x7x4xf32>
    %661 = arith.addf %655, %660 : vector<8x7x4xf32>
    %c0_505 = arith.constant 0 : index
    %c0_506 = arith.constant 0 : index
    %c0_507 = arith.constant 0 : index
    %662 = vector.load %arg31[%c0_505, %c0_506, %c0_507] : memref<8x8x4xf32, #tpu.memory_space<vmem>>, vector<8x7x4xf32>
    tpu.vector_store %arg31[%c0_505, %c0_506, %c0_507], %661 {strides = array<i32>} : memref<8x8x4xf32, #tpu.memory_space<vmem>>, vector<8x7x4xf32>,
    %c0_508 = arith.constant 0 : index
    %c0_509 = arith.constant 0 : index
    %c0_510 = arith.constant 0 : index
    %663 = vector.load %arg31[%c0_508, %c0_509, %c0_510] : memref<8x8x4xf32, #tpu.memory_space<vmem>>, vector<8x6x4xf32>
    %664 = vector.extract_strided_slice %589 {offsets = [0, 2, 0], sizes = [8, 6, 4], strides = [1, 1, 1]} : vector<8x8x4xf32> to vector<8x6x4xf32>
    %665 = vector.extract_strided_slice %455 {offsets = [9, 0, 0, 0], sizes = [1, 1, 1, 4], strides = [1, 1, 1, 1]} : vector<15x1x1x4xf32> to vector<1x1x1x4xf32>
    %666 = vector.shape_cast %665 : vector<1x1x1x4xf32> to vector<1x1x4xf32>
    %667 = vector.broadcast %666 : vector<1x1x4xf32> to vector<8x6x4xf32>
    %668 = arith.mulf %664, %667 : vector<8x6x4xf32>
    %669 = arith.addf %663, %668 : vector<8x6x4xf32>
    %c0_511 = arith.constant 0 : index
    %c0_512 = arith.constant 0 : index
    %c0_513 = arith.constant 0 : index
    %670 = vector.load %arg31[%c0_511, %c0_512, %c0_513] : memref<8x8x4xf32, #tpu.memory_space<vmem>>, vector<8x6x4xf32>
    tpu.vector_store %arg31[%c0_511, %c0_512, %c0_513], %669 {strides = array<i32>} : memref<8x8x4xf32, #tpu.memory_space<vmem>>, vector<8x6x4xf32>,
    %c0_514 = arith.constant 0 : index
    %c0_515 = arith.constant 0 : index
    %c0_516 = arith.constant 0 : index
    %671 = vector.load %arg31[%c0_514, %c0_515, %c0_516] : memref<8x8x4xf32, #tpu.memory_space<vmem>>, vector<8x5x4xf32>
    %672 = vector.extract_strided_slice %589 {offsets = [0, 3, 0], sizes = [8, 5, 4], strides = [1, 1, 1]} : vector<8x8x4xf32> to vector<8x5x4xf32>
    %673 = vector.extract_strided_slice %455 {offsets = [10, 0, 0, 0], sizes = [1, 1, 1, 4], strides = [1, 1, 1, 1]} : vector<15x1x1x4xf32> to vector<1x1x1x4xf32>
    %674 = vector.shape_cast %673 : vector<1x1x1x4xf32> to vector<1x1x4xf32>
    %675 = vector.broadcast %674 : vector<1x1x4xf32> to vector<8x5x4xf32>
    %676 = arith.mulf %672, %675 : vector<8x5x4xf32>
    %677 = arith.addf %671, %676 : vector<8x5x4xf32>
    %c0_517 = arith.constant 0 : index
    %c0_518 = arith.constant 0 : index
    %c0_519 = arith.constant 0 : index
    %678 = vector.load %arg31[%c0_517, %c0_518, %c0_519] : memref<8x8x4xf32, #tpu.memory_space<vmem>>, vector<8x5x4xf32>
    tpu.vector_store %arg31[%c0_517, %c0_518, %c0_519], %677 {strides = array<i32>} : memref<8x8x4xf32, #tpu.memory_space<vmem>>, vector<8x5x4xf32>,
    %c0_520 = arith.constant 0 : index
    %c0_521 = arith.constant 0 : index
    %c0_522 = arith.constant 0 : index
    %679 = vector.load %arg31[%c0_520, %c0_521, %c0_522] : memref<8x8x4xf32, #tpu.memory_space<vmem>>, vector<8x4x4xf32>
    %680 = vector.extract_strided_slice %589 {offsets = [0, 4, 0], sizes = [8, 4, 4], strides = [1, 1, 1]} : vector<8x8x4xf32> to vector<8x4x4xf32>
    %681 = vector.extract_strided_slice %455 {offsets = [11, 0, 0, 0], sizes = [1, 1, 1, 4], strides = [1, 1, 1, 1]} : vector<15x1x1x4xf32> to vector<1x1x1x4xf32>
    %682 = vector.shape_cast %681 : vector<1x1x1x4xf32> to vector<1x1x4xf32>
    %683 = vector.broadcast %682 : vector<1x1x4xf32> to vector<8x4x4xf32>
    %684 = arith.mulf %680, %683 : vector<8x4x4xf32>
    %685 = arith.addf %679, %684 : vector<8x4x4xf32>
    %c0_523 = arith.constant 0 : index
    %c0_524 = arith.constant 0 : index
    %c0_525 = arith.constant 0 : index
    %686 = vector.load %arg31[%c0_523, %c0_524, %c0_525] : memref<8x8x4xf32, #tpu.memory_space<vmem>>, vector<8x4x4xf32>
    tpu.vector_store %arg31[%c0_523, %c0_524, %c0_525], %685 {strides = array<i32>} : memref<8x8x4xf32, #tpu.memory_space<vmem>>, vector<8x4x4xf32>,
    %c0_526 = arith.constant 0 : index
    %c0_527 = arith.constant 0 : index
    %c0_528 = arith.constant 0 : index
    %687 = vector.load %arg31[%c0_526, %c0_527, %c0_528] : memref<8x8x4xf32, #tpu.memory_space<vmem>>, vector<8x3x4xf32>
    %688 = vector.extract_strided_slice %589 {offsets = [0, 5, 0], sizes = [8, 3, 4], strides = [1, 1, 1]} : vector<8x8x4xf32> to vector<8x3x4xf32>
    %689 = vector.extract_strided_slice %455 {offsets = [12, 0, 0, 0], sizes = [1, 1, 1, 4], strides = [1, 1, 1, 1]} : vector<15x1x1x4xf32> to vector<1x1x1x4xf32>
    %690 = vector.shape_cast %689 : vector<1x1x1x4xf32> to vector<1x1x4xf32>
    %691 = vector.broadcast %690 : vector<1x1x4xf32> to vector<8x3x4xf32>
    %692 = arith.mulf %688, %691 : vector<8x3x4xf32>
    %693 = arith.addf %687, %692 : vector<8x3x4xf32>
    %c0_529 = arith.constant 0 : index
    %c0_530 = arith.constant 0 : index
    %c0_531 = arith.constant 0 : index
    %694 = vector.load %arg31[%c0_529, %c0_530, %c0_531] : memref<8x8x4xf32, #tpu.memory_space<vmem>>, vector<8x3x4xf32>
    tpu.vector_store %arg31[%c0_529, %c0_530, %c0_531], %693 {strides = array<i32>} : memref<8x8x4xf32, #tpu.memory_space<vmem>>, vector<8x3x4xf32>,
    %c0_532 = arith.constant 0 : index
    %c0_533 = arith.constant 0 : index
    %c0_534 = arith.constant 0 : index
    %695 = vector.load %arg31[%c0_532, %c0_533, %c0_534] : memref<8x8x4xf32, #tpu.memory_space<vmem>>, vector<8x2x4xf32>
    %696 = vector.extract_strided_slice %589 {offsets = [0, 6, 0], sizes = [8, 2, 4], strides = [1, 1, 1]} : vector<8x8x4xf32> to vector<8x2x4xf32>
    %697 = vector.extract_strided_slice %455 {offsets = [13, 0, 0, 0], sizes = [1, 1, 1, 4], strides = [1, 1, 1, 1]} : vector<15x1x1x4xf32> to vector<1x1x1x4xf32>
    %698 = vector.shape_cast %697 : vector<1x1x1x4xf32> to vector<1x1x4xf32>
    %699 = vector.broadcast %698 : vector<1x1x4xf32> to vector<8x2x4xf32>
    %700 = arith.mulf %696, %699 : vector<8x2x4xf32>
    %701 = arith.addf %695, %700 : vector<8x2x4xf32>
    %c0_535 = arith.constant 0 : index
    %c0_536 = arith.constant 0 : index
    %c0_537 = arith.constant 0 : index
    %702 = vector.load %arg31[%c0_535, %c0_536, %c0_537] : memref<8x8x4xf32, #tpu.memory_space<vmem>>, vector<8x2x4xf32>
    tpu.vector_store %arg31[%c0_535, %c0_536, %c0_537], %701 {strides = array<i32>} : memref<8x8x4xf32, #tpu.memory_space<vmem>>, vector<8x2x4xf32>,
    %c0_538 = arith.constant 0 : index
    %c0_539 = arith.constant 0 : index
    %c0_540 = arith.constant 0 : index
    %703 = vector.load %arg31[%c0_538, %c0_539, %c0_540] : memref<8x8x4xf32, #tpu.memory_space<vmem>>, vector<8x1x4xf32>
    %704 = vector.extract_strided_slice %589 {offsets = [0, 7, 0], sizes = [8, 1, 4], strides = [1, 1, 1]} : vector<8x8x4xf32> to vector<8x1x4xf32>
    %705 = vector.extract_strided_slice %455 {offsets = [14, 0, 0, 0], sizes = [1, 1, 1, 4], strides = [1, 1, 1, 1]} : vector<15x1x1x4xf32> to vector<1x1x1x4xf32>
    %706 = vector.shape_cast %705 : vector<1x1x1x4xf32> to vector<1x1x4xf32>
    %707 = vector.broadcast %706 : vector<1x1x4xf32> to vector<8x1x4xf32>
    %708 = arith.mulf %704, %707 : vector<8x1x4xf32>
    %709 = arith.addf %703, %708 : vector<8x1x4xf32>
    %c0_541 = arith.constant 0 : index
    %c0_542 = arith.constant 0 : index
    %c0_543 = arith.constant 0 : index
    %710 = vector.load %arg31[%c0_541, %c0_542, %c0_543] : memref<8x8x4xf32, #tpu.memory_space<vmem>>, vector<8x1x4xf32>
    tpu.vector_store %arg31[%c0_541, %c0_542, %c0_543], %709 {strides = array<i32>} : memref<8x8x4xf32, #tpu.memory_space<vmem>>, vector<8x1x4xf32>,
    %c0_544 = arith.constant 0 : index
    %c0_545 = arith.constant 0 : index
    %c0_546 = arith.constant 0 : index
    %711 = vector.load %arg31[%c0_544, %c0_545, %c0_546] : memref<8x8x4xf32, #tpu.memory_space<vmem>>, vector<8x8x4xf32>
    %712 = vector.broadcast %460 : vector<1x1x4xf32> to vector<8x8x4xf32>
    %713 = arith.addf %711, %712 : vector<8x8x4xf32>
    %cst_547 = arith.constant 0.000000e+00 : f32
    %714 = vector.broadcast %cst_547 : f32 to vector<8x8x4xf32>
    %c0_548 = arith.constant 0 : index
    %c0_549 = arith.constant 0 : index
    %c0_550 = arith.constant 0 : index
    %715 = vector.load %arg31[%c0_548, %c0_549, %c0_550] : memref<8x8x4xf32, #tpu.memory_space<vmem>>, vector<8x8x4xf32>
    tpu.vector_store %arg31[%c0_548, %c0_549, %c0_550], %714 {strides = array<i32>} : memref<8x8x4xf32, #tpu.memory_space<vmem>>, vector<8x8x4xf32>,
    %c0_551 = arith.constant 0 : index
    %c0_552 = arith.constant 0 : index
    %c0_553 = arith.constant 0 : index
    %716 = vector.load %arg31[%c0_551, %c0_552, %c0_553] : memref<8x8x4xf32, #tpu.memory_space<vmem>>, vector<8x8x4xf32>
    %717 = vector.extract_strided_slice %457 {offsets = [1, 1, 0, 0, 0], sizes = [1, 1, 1, 1, 4], strides = [1, 1, 1, 1, 1]} : vector<3x3x1x1x4xf32> to vector<1x1x1x1x4xf32>
    %718 = vector.shape_cast %717 : vector<1x1x1x1x4xf32> to vector<1x1x4xf32>
    %719 = vector.broadcast %718 : vector<1x1x4xf32> to vector<8x8x4xf32>
    %720 = arith.mulf %713, %719 : vector<8x8x4xf32>
    %721 = arith.addf %716, %720 : vector<8x8x4xf32>
    %c0_554 = arith.constant 0 : index
    %c0_555 = arith.constant 0 : index
    %c0_556 = arith.constant 0 : index
    %722 = vector.load %arg31[%c0_554, %c0_555, %c0_556] : memref<8x8x4xf32, #tpu.memory_space<vmem>>, vector<8x8x4xf32>
    tpu.vector_store %arg31[%c0_554, %c0_555, %c0_556], %721 {strides = array<i32>} : memref<8x8x4xf32, #tpu.memory_space<vmem>>, vector<8x8x4xf32>,
    %c0_557 = arith.constant 0 : index
    %c0_558 = arith.constant 0 : index
    %c0_559 = arith.constant 0 : index
    %723 = vector.load %arg31[%c0_557, %c0_558, %c0_559] : memref<8x8x4xf32, #tpu.memory_space<vmem>>, vector<8x8x4xf32>
    %724 = vector.shape_cast %723 : vector<8x8x4xf32> to vector<64x4xf32>
    %c0_560 = arith.constant 0 : index
    %c0_561 = arith.constant 0 : index
    %725 = vector.load %arg27[%c0_560, %c0_561] : memref<4x4xf32, #tpu.memory_space<vmem>>, vector<4x4xf32>
    %cst_562 = arith.constant dense<0.000000e+00> : vector<64x4xf32>
    %726 = tpu.matmul %724, %725, %cst_562 {dimension_numbers = #tpu.dot_dimension_numbers<[1], [0], [0], [1], [0, 0, 1, 1], [], []>} : vector<64x4xf32>, vector<4x4xf32>, vector<64x4xf32> -> vector<64x4xf32>
    %c0_563 = arith.constant 0 : index
    %c0_564 = arith.constant 0 : index
    %727 = vector.load %arg28[%c0_563, %c0_564] : memref<1x4xf32, #tpu.memory_space<vmem>>, vector<1x4xf32>
    %728 = vector.broadcast %727 : vector<1x4xf32> to vector<64x4xf32>
    %729 = arith.addf %726, %728 : vector<64x4xf32>
    %c0_565 = arith.constant 0 : index
    %c0_566 = arith.constant 0 : index
    %730 = vector.load %arg29[%c0_565, %c0_566] : memref<1x4xf32, #tpu.memory_space<vmem>>, vector<1x4xf32>
    %cst_567 = arith.constant 0.000000e+00 : f32
    %731 = vector.broadcast %cst_567 : f32 to vector<64x4xf32>
    %732 = arith.cmpf ogt, %729, %731 : vector<64x4xf32>
    %733 = vector.broadcast %730 : vector<1x4xf32> to vector<64x4xf32>
    %734 = arith.mulf %733, %729 : vector<64x4xf32>
    %735 = arith.select %732, %729, %734 : vector<64x4xi1>, vector<64x4xf32>
    %736 = tpu.transpose %735, [1, 0] : vector<64x4xf32> -> vector<4x64xf32>
    %c0_568 = arith.constant 0 : index
    %c8 = arith.constant 8 : index
    %c0_569 = arith.constant 0 : index
    %737 = vector.load %arg30[%c0_568, %c8, %c0_569] : memref<1x12x64xf32, #tpu.memory_space<vmem>>, vector<1x4x64xf32>
    %738 = vector.shape_cast %737 : vector<1x4x64xf32> to vector<4x64xf32>
    %739 = vector.shape_cast %736 : vector<4x64xf32> to vector<1x4x64xf32>
    tpu.vector_store %arg30[%c0_568, %c8, %c0_569], %739 {strides = array<i32>} : memref<1x12x64xf32, #tpu.memory_space<vmem>>, vector<1x4x64xf32>,
    return
  }
  func.func @transform_0(%arg0: i32) -> (i32, i32, i32, i32, i32) {
    %c0_i32 = arith.constant 0 : i32
    %c0_i32_0 = arith.constant 0 : i32
    %c0_i32_1 = arith.constant 0 : i32
    %c0_i32_2 = arith.constant 0 : i32
    %c0_i32_3 = arith.constant 0 : i32
    return %arg0, %c0_i32, %c0_i32_0, %c0_i32_1, %c0_i32_2 : i32, i32, i32, i32, i32
  }
  func.func @transform_1(%arg0: i32) -> (i32, i32, i32, i32) {
    %c0_i32 = arith.constant 0 : i32
    %c0_i32_0 = arith.constant 0 : i32
    %c0_i32_1 = arith.constant 0 : i32
    %c0_i32_2 = arith.constant 0 : i32
    %c0_i32_3 = arith.constant 0 : i32
    return %c0_i32, %c0_i32_0, %c0_i32_1, %c0_i32_2 : i32, i32, i32, i32
  }
  func.func @transform_2(%arg0: i32) -> (i32, i32) {
    %c0_i32 = arith.constant 0 : i32
    %c0_i32_0 = arith.constant 0 : i32
    %c0_i32_1 = arith.constant 0 : i32
    return %c0_i32, %c0_i32_0 : i32, i32
  }
  func.func @transform_3(%arg0: i32) -> (i32, i32, i32) {
    %c0_i32 = arith.constant 0 : i32
    %c0_i32_0 = arith.constant 0 : i32
    %c0_i32_1 = arith.constant 0 : i32
    %c0_i32_2 = arith.constant 0 : i32
    return %c0_i32, %c0_i32_0, %c0_i32_1 : i32, i32, i32
  }
  func.func @transform_4(%arg0: i32) -> (i32, i32, i32) {
    %c0_i32 = arith.constant 0 : i32
    %c0_i32_0 = arith.constant 0 : i32
    %c0_i32_1 = arith.constant 0 : i32
    %c0_i32_2 = arith.constant 0 : i32
    return %c0_i32, %c0_i32_0, %c0_i32_1 : i32, i32, i32
  }
  func.func @transform_5(%arg0: i32) -> (i32, i32) {
    %c0_i32 = arith.constant 0 : i32
    %c0_i32_0 = arith.constant 0 : i32
    %c0_i32_1 = arith.constant 0 : i32
    return %c0_i32, %c0_i32_0 : i32, i32
  }
  func.func @transform_6(%arg0: i32) -> (i32, i32, i32) {
    %c0_i32 = arith.constant 0 : i32
    %c0_i32_0 = arith.constant 0 : i32
    %c0_i32_1 = arith.constant 0 : i32
    %c0_i32_2 = arith.constant 0 : i32
    return %c0_i32, %c0_i32_0, %c0_i32_1 : i32, i32, i32
  }
  func.func @transform_7(%arg0: i32) -> (i32, i32, i32) {
    %c0_i32 = arith.constant 0 : i32
    %c0_i32_0 = arith.constant 0 : i32
    %c0_i32_1 = arith.constant 0 : i32
    %c0_i32_2 = arith.constant 0 : i32
    return %c0_i32, %c0_i32_0, %c0_i32_1 : i32, i32, i32
  }
  func.func @transform_8(%arg0: i32) -> (i32, i32) {
    %c0_i32 = arith.constant 0 : i32
    %c0_i32_0 = arith.constant 0 : i32
    %c0_i32_1 = arith.constant 0 : i32
    return %c0_i32, %c0_i32_0 : i32, i32
  }
  func.func @transform_9(%arg0: i32) -> (i32, i32) {
    %c0_i32 = arith.constant 0 : i32
    %c0_i32_0 = arith.constant 0 : i32
    %c0_i32_1 = arith.constant 0 : i32
    return %c0_i32, %c0_i32_0 : i32, i32
  }
  func.func @transform_10(%arg0: i32) -> (i32, i32) {
    %c0_i32 = arith.constant 0 : i32
    %c0_i32_0 = arith.constant 0 : i32
    %c0_i32_1 = arith.constant 0 : i32
    return %c0_i32, %c0_i32_0 : i32, i32
  }
  func.func @transform_11(%arg0: i32) -> (i32, i32) {
    %c0_i32 = arith.constant 0 : i32
    %c0_i32_0 = arith.constant 0 : i32
    %c0_i32_1 = arith.constant 0 : i32
    return %c0_i32, %c0_i32_0 : i32, i32
  }
  func.func @transform_12(%arg0: i32) -> (i32, i32, i32) {
    %c0_i32 = arith.constant 0 : i32
    %c0_i32_0 = arith.constant 0 : i32
    %c0_i32_1 = arith.constant 0 : i32
    %c0_i32_2 = arith.constant 0 : i32
    return %c0_i32, %c0_i32_0, %c0_i32_1 : i32, i32, i32
  }
  func.func @transform_13(%arg0: i32) -> (i32, i32, i32) {
    %c0_i32 = arith.constant 0 : i32
    %c0_i32_0 = arith.constant 0 : i32
    %c0_i32_1 = arith.constant 0 : i32
    %c0_i32_2 = arith.constant 0 : i32
    return %c0_i32, %c0_i32_0, %c0_i32_1 : i32, i32, i32
  }
  func.func @transform_14(%arg0: i32) -> (i32, i32) {
    %c0_i32 = arith.constant 0 : i32
    %c0_i32_0 = arith.constant 0 : i32
    %c0_i32_1 = arith.constant 0 : i32
    return %c0_i32, %c0_i32_0 : i32, i32
  }
  func.func @transform_15(%arg0: i32) -> (i32, i32, i32) {
    %c0_i32 = arith.constant 0 : i32
    %c0_i32_0 = arith.constant 0 : i32
    %c0_i32_1 = arith.constant 0 : i32
    %c0_i32_2 = arith.constant 0 : i32
    return %c0_i32, %c0_i32_0, %c0_i32_1 : i32, i32, i32
  }
  func.func @transform_16(%arg0: i32) -> (i32, i32, i32) {
    %c0_i32 = arith.constant 0 : i32
    %c0_i32_0 = arith.constant 0 : i32
    %c0_i32_1 = arith.constant 0 : i32
    %c0_i32_2 = arith.constant 0 : i32
    return %c0_i32, %c0_i32_0, %c0_i32_1 : i32, i32, i32
  }
  func.func @transform_17(%arg0: i32) -> (i32, i32) {
    %c0_i32 = arith.constant 0 : i32
    %c0_i32_0 = arith.constant 0 : i32
    %c0_i32_1 = arith.constant 0 : i32
    return %c0_i32, %c0_i32_0 : i32, i32
  }
  func.func @transform_18(%arg0: i32) -> (i32, i32) {
    %c0_i32 = arith.constant 0 : i32
    %c0_i32_0 = arith.constant 0 : i32
    %c0_i32_1 = arith.constant 0 : i32
    return %c0_i32, %c0_i32_0 : i32, i32
  }
  func.func @transform_19(%arg0: i32) -> (i32, i32) {
    %c0_i32 = arith.constant 0 : i32
    %c0_i32_0 = arith.constant 0 : i32
    %c0_i32_1 = arith.constant 0 : i32
    return %c0_i32, %c0_i32_0 : i32, i32
  }
  func.func @transform_20(%arg0: i32) -> (i32, i32) {
    %c0_i32 = arith.constant 0 : i32
    %c0_i32_0 = arith.constant 0 : i32
    %c0_i32_1 = arith.constant 0 : i32
    return %c0_i32, %c0_i32_0 : i32, i32
  }
  func.func @transform_21(%arg0: i32) -> (i32, i32, i32) {
    %c0_i32 = arith.constant 0 : i32
    %c0_i32_0 = arith.constant 0 : i32
    %c0_i32_1 = arith.constant 0 : i32
    %c0_i32_2 = arith.constant 0 : i32
    return %c0_i32, %c0_i32_0, %c0_i32_1 : i32, i32, i32
  }
  func.func @transform_22(%arg0: i32) -> (i32, i32, i32) {
    %c0_i32 = arith.constant 0 : i32
    %c0_i32_0 = arith.constant 0 : i32
    %c0_i32_1 = arith.constant 0 : i32
    %c0_i32_2 = arith.constant 0 : i32
    return %c0_i32, %c0_i32_0, %c0_i32_1 : i32, i32, i32
  }
  func.func @transform_23(%arg0: i32) -> (i32, i32) {
    %c0_i32 = arith.constant 0 : i32
    %c0_i32_0 = arith.constant 0 : i32
    %c0_i32_1 = arith.constant 0 : i32
    return %c0_i32, %c0_i32_0 : i32, i32
  }
  func.func @transform_24(%arg0: i32) -> (i32, i32, i32) {
    %c0_i32 = arith.constant 0 : i32
    %c0_i32_0 = arith.constant 0 : i32
    %c0_i32_1 = arith.constant 0 : i32
    %c0_i32_2 = arith.constant 0 : i32
    return %c0_i32, %c0_i32_0, %c0_i32_1 : i32, i32, i32
  }
  func.func @transform_25(%arg0: i32) -> (i32, i32, i32) {
    %c0_i32 = arith.constant 0 : i32
    %c0_i32_0 = arith.constant 0 : i32
    %c0_i32_1 = arith.constant 0 : i32
    %c0_i32_2 = arith.constant 0 : i32
    return %c0_i32, %c0_i32_0, %c0_i32_1 : i32, i32, i32
  }
  func.func @transform_26(%arg0: i32) -> (i32, i32) {
    %c0_i32 = arith.constant 0 : i32
    %c0_i32_0 = arith.constant 0 : i32
    %c0_i32_1 = arith.constant 0 : i32
    return %c0_i32, %c0_i32_0 : i32, i32
  }
  func.func @transform_27(%arg0: i32) -> (i32, i32) {
    %c0_i32 = arith.constant 0 : i32
    %c0_i32_0 = arith.constant 0 : i32
    %c0_i32_1 = arith.constant 0 : i32
    return %c0_i32, %c0_i32_0 : i32, i32
  }
  func.func @transform_28(%arg0: i32) -> (i32, i32) {
    %c0_i32 = arith.constant 0 : i32
    %c0_i32_0 = arith.constant 0 : i32
    %c0_i32_1 = arith.constant 0 : i32
    return %c0_i32, %c0_i32_0 : i32, i32
  }
  func.func @transform_29(%arg0: i32) -> (i32, i32, i32) {
    %c0_i32 = arith.constant 0 : i32
    %c0_i32_0 = arith.constant 0 : i32
    %c0_i32_1 = arith.constant 0 : i32
    return %arg0, %c0_i32, %c0_i32_0 : i32, i32, i32
  }
}

</mosaic_0001>

<bundles_post_ra>
// kernel: _lambda_.1
= control target key start
LH: loop header
LB: loop body
LE: loop exit
PB: predicated region body
PF: predicated region fallthrough
CT: control target
= control target key end

     0   :  { %s4839_s6 = smov 1   ;;  %s4840_s10 = smov 2   ;;  %s7538_s0 = inlined_call_operand.smem [shape: u32[30], index: -1, kind: input, shape index: {}] }
   0x1   :  { %s4877_s5 = sld [smem:[%s7538_s0]]   ;;  %s4841_s14 = smov 3  }
   0x2   :  { %s4882_s9 = sld [smem:[%s7538_s0 + %s4839_s6]]   ;;  %s4842_s18 = smov 4  }
   0x3   :  { %s4887_s13 = sld [smem:[%s7538_s0 + %s4840_s10]]   ;;  %s4843_s22 = smov 5  }
   0x4   :  { %s4892_s17 = sld [smem:[%s7538_s0 + %s4841_s14]]   ;;  %s4844_s26 = smov 6  }
   0x5   :  { %s4897_s21 = sld [smem:[%s7538_s0 + %s4842_s18]]   ;;  %s4845_s30 = smov 7  }
   0x6   :  { %s4902_s25 = sld [smem:[%s7538_s0 + %s4843_s22]]   ;;  %s4846_s4 = smov 8  }
   0x7   :  { %s4907_s29 = sld [smem:[%s7538_s0 + %s4844_s26]]   ;;  %s4847_s10 = smov 9  }
   0x8   :  { %s4912_s3 = sld [smem:[%s7538_s0 + %s4845_s30]]   ;;  %s4848_s15 = smov 10  }
   0x9   :  { %s4917_s8 = sld [smem:[%s7538_s0 + %s4846_s4]]   ;;  %s4849_s20 = smov 11  }
   0xa   :  { %s4922_s14 = sld [smem:[%s7538_s0 + %s4847_s10]]   ;;  %s4850_s26 = smov 12  }
   0xb   :  { %s4927_s19 = sld [smem:[%s7538_s0 + %s4848_s15]]   ;;  %s4851_s1 = smov 13  }
   0xc   :  { %s4932_s24 = sld [smem:[%s7538_s0 + %s4849_s20]]   ;;  %s4852_s7 = smov 14  }
   0xd   :  { %s4937_s30 = sld [smem:[%s7538_s0 + %s4850_s26]]   ;;  %s4853_s15 = smov 15  }
   0xe   :  { %s4942_s6 = sld [smem:[%s7538_s0 + %s4851_s1]]   ;;  %s4854_s22 = smov 16  }
   0xf   :  { %s4947_s12 = sld [smem:[%s7538_s0 + %s4852_s7]]   ;;  %s4855_s28 = smov 17  }
  0x10   :  { %7557 = sst [smem:[#allocation3_spill]] %s4922_s14  ;;  %s4856_s7 = smov 18  }
  0x11   :  { %7558 = sst [smem:[#allocation4_spill]] %s4927_s19 }
  0x12   :  { %s4952_s20 = sld [smem:[%s7538_s0 + %s4853_s15]]   ;;  %s4857_s15 = smov 19  }
  0x13   :  { %s4957_s27 = sld [smem:[%s7538_s0 + %s4854_s22]]   ;;  %s4858_s22 = smov 20  }
  0x14   :  { %s4962_s4 = sld [smem:[%s7538_s0 + %s4855_s28]]   ;;  %s4859_s28 = smov 21  }
  0x15   :  { %s4967_s19 = sld [smem:[%s7538_s0 + %s4856_s7]]   ;;  %s4860_s7 = smov 22  }
  0x18   :  { %7559 = sst [smem:[#allocation5_spill]] %s4952_s20 }
  0x19   :  { %7560 = sst [smem:[#allocation6_spill]] %s4957_s27 }
  0x1a   :  { %7561 = sst [smem:[#allocation7_spill]] %s4962_s4 }
  0x1b   :  { %7562 = sst [smem:[#allocation8_spill]] %s4967_s19 }
  0x1c   :  { %s4972_s20 = sld [smem:[%s7538_s0 + %s4857_s15]]   ;;  %s4861_s15 = smov 23  }
  0x1d   :  { %s4977_s27 = sld [smem:[%s7538_s0 + %s4858_s22]]   ;;  %s4862_s22 = smov 24  }
  0x1e   :  { %s4982_s4 = sld [smem:[%s7538_s0 + %s4859_s28]]   ;;  %s4863_s28 = smov 25  }
  0x1f   :  { %s4987_s19 = sld [smem:[%s7538_s0 + %s4860_s7]]   ;;  %s4864_s7 = smov 26  }
  0x20   :  { %s4997_s14 = sld [smem:[%s7538_s0 + %s4862_s22]]   ;;  %s4866_s22 = smov 28  }
  0x22   :  { %7563 = sst [smem:[#allocation9_spill]] %s4972_s20 }
  0x23   :  { %s4992_s20 = sld [smem:[%s7538_s0 + %s4861_s15]]   ;;  %s4865_s15 = smov 27  }
  0x24   :  { %7564 = sst [smem:[#allocation10_spill]] %s4982_s4 }
  0x25   :  { %7565 = sst [smem:[#allocation11_spill]] %s4987_s19 }
  0x26   :  { %7567 = sst [smem:[#allocation13_spill]] %s4997_s14 }
  0x27   :  { %s5002_s4 = sld [smem:[%s7538_s0 + %s4863_s28]]   ;;  %s4867_s28 = smov 29  }
  0x28   :  { %s5007_s19 = sld [smem:[%s7538_s0 + %s4864_s7]]   ;;  %s5024_s7 = smov 0  }
  0x29   :  { %7566 = sst [smem:[#allocation12_spill]] %s4992_s20 }
  0x2a   :  { %s5012_s20 = sld [smem:[%s7538_s0 + %s4865_s15]]  }
  0x2b   :  { %s5017_s14 = sld [smem:[%s7538_s0 + %s4866_s22]]  }
  0x2d   :  { %7568 = sst [smem:[#allocation14_spill]] %s5002_s4 }
  0x2e   :  { %s5022_s4 = sld [smem:[%s7538_s0 + %s4867_s28]]  }
  0x2f LB: > { %s4664_s10 = sadd.s32 4294967295, %s4837_s7   ;;  %p4668_p0 = scmp.ge.s32.totalorder %s4837_s7, 1  ;;  %s4837_s7 = sphi %s5024_s7, %s69_s7  }
  0x30   : > { %p817_p1 = scmp.lt.s32.totalorder %s4837_s7, 3 }
  0x32   : > { %p818_p2 = pnand %p4668_p0, %p817_p1 }
  0x34   : > { %821 = sbr.rel (%p818_p2) target bundleno = 1284 (0x504), region = 136 }
  0x39   : > { %v955_v0 = vld [vmem:[%s4882_s9 + $0x4] sm:$0xf]  ;;  %vm988_vm0 = vcmask 1043456   ;;  %v954_v1 = vld [vmem:[%s4882_s9] sm:$0xf]  ;;  %p893_p3 = scmp.lt.s32.totalorder %s4664_s10, 1 }
  0x3a   : > { %4672 = vmatpush.msk.msra.mxu0 %vm988_vm0, %v955_v0  ;;  %4681 = vmatpush.msk.msra.mxu1 %vm988_vm0, %v954_v1  ;;  %v958_v2 = vld [vmem:[%s4882_s9 + $0x10] sm:$0xf]  ;;  %v956_v3 = vld [vmem:[%s4882_s9 + $0x8] sm:$0xf]  ;;  %v957_v4 = vld [vmem:[%s4882_s9 + $0xc] sm:$0xf] }
  0x3b   : > { %s7639_s10 = smov (!%p893_p3, %s4664_s10), 1  ;;  %4690 = vmatpush.msk.msra.mxu2 %vm988_vm0, %v956_v3  ;;  %4699 = vmatpush.msk.msra.mxu3 %vm988_vm0, %v957_v4  ;;  %vm963_vm1 = vcmask 31744   ;;  %vm1109_vm2 = vcmask 1046528   ;;  %v960_v28 = vld [vmem:[%s4882_s9 + $0x18] sm:$0xf]  ;;  %vm1809_vm4 = vcmask 30720  }
  0x3c   : > { %4708 = vmatpush.msk.msrb.mxu0 %vm988_vm0, %v958_v2  ;;  %s4783_s0 = smul.u32 576, %s7639_s10  ;;  %v961_v34 = vld [vmem:[%s4882_s9 + $0x1c] sm:$0xf]  ;;  %v959_v35 = vld [vmem:[%s4882_s9 + $0x14] sm:$0xf]  ;;  %vm1955_vm12 = vcmask 29696  }
  0x3d   : > { %4726 = vmatpush.msk.msrb.mxu2 %vm988_vm0, %v960_v28  ;;  %4717 = vmatpush.msk.msrb.mxu1 %vm988_vm0, %v959_v35  ;;  %v962_v43 = vld [vmem:[%s4882_s9 + $0x20] sm:$0xf]  ;;  %vm2668_vm14 = vcmask 28672   ;;  %s7603_s15 = sld [smem:[#allocation3_spill]] }
  0x3e   : > { %s5046_s11 = scalar_lea.vmem %s4877_s5, %s4783_s0  ;;  %4735 = vmatpush.msk.msrb.mxu3 %vm988_vm0, %v961_v34  ;;  %s7605_s16 = sld [smem:[#allocation5_spill]] }
  0x3f   : > { %v921_v5 = vld [vmem:[%s5046_s11 + $0x90] sm:$0xff]  ;;  %v903_v6 = vld [vmem:[%s5046_s11] sm:$0xff]  ;;  %v904_v7 = vld [vmem:[%s5046_s11 + $0x8] sm:$0x1]  ;;  %s7607_s18 = sld [smem:[#allocation4_spill]] }
  0x40   : > { %4673 = vmatmul.msk.f32.vlgmr.msra.gmra.mxu0 %vm963_vm1, %v921_v5  ;;  %4682 = vmatmul.msk.f32.vlgmr.msra.gmra.mxu1 %vm963_vm1, %v903_v6  ;;  %v1110_v8 = vrot.slane %v903_v6, 1  ;;  %v1111_v9 = vrot.slane %v904_v7, 1  ;;  %v5054_v10 = vld [vmem:[%s5046_s11 + $0x120] sm:$0xff]  ;;  %v5059_v11 = vld [vmem:[%s5046_s11 + $0x10] sm:$0xff]  ;;  %v906_v12 = vld [vmem:[%s5046_s11 + $0x18] sm:$0x1] }
  0x41   : > { %4700 = vmatmul.msk.f32.vlgmr.msra.gmra.mxu3 %vm963_vm1, %v5054_v10  ;;  %v1113_v14 = vrot.slane %v5059_v11, 1  ;;  %v1114_v15 = vrot.slane %v906_v12, 1  ;;  %v5066_v16 = vld [vmem:[%s5046_s11 + $0xa0] sm:$0xff]  ;;  %v5069_v17 = vld [vmem:[%s5046_s11 + $0x130] sm:$0xff]  ;;  %v908_v20 = vld [vmem:[%s5046_s11 + $0x28] sm:$0x1]  ;;  %4744 = vmatpush.msk.msra.mxu0 %vm988_vm0, %v962_v43 }
  0x42   : > { %v1112_v13 = vsel %vm1109_vm2, %v1110_v8, %v1111_v9  ;;  %v5081_v19 = vld [vmem:[%s5046_s11 + $0x20] sm:$0xff]  ;;  %v1117_v22 = vrot.slane %v908_v20, 1  ;;  %v5088_v23 = vld [vmem:[%s5046_s11 + $0xb0] sm:$0xff]  ;;  %v910_v27 = vld [vmem:[%s5046_s11 + $0x38] sm:$0x1]  ;;  %v1362_v2 = vrot.slane %v5054_v10, 1 }
  0x43   : > { %4691 = vmatmul.msk.f32.vlgmr.msra.gmra.mxu2 %vm963_vm1, %v1112_v13  ;;  %v5076_v18 = vsel %vm1109_vm2, %v1113_v14, %v1114_v15  ;;  %v1116_v21 = vrot.slane %v5081_v19, 1  ;;  %v5091_v24 = vld [vmem:[%s5046_s11 + $0x140] sm:$0xff]  ;;  %v5103_v26 = vld [vmem:[%s5046_s11 + $0x30] sm:$0xff]  ;;  %v1120_v30 = vrot.slane %v910_v27, 1  ;;  %v912_v37 = vld [vmem:[%s5046_s11 + $0x48] sm:$0x1] }
  0x44   : > { %v1119_v29 = vrot.slane %v5103_v26, 1  ;;  %v5112_v31 = vld [vmem:[%s5046_s11 + $0xc0] sm:$0xff]  ;;  %v5115_v32 = vld [vmem:[%s5046_s11 + $0x150] sm:$0xff]  ;;  %v1123_v39 = vrot.slane %v912_v37, 1  ;;  %v914_v45 = vld [vmem:[%s5046_s11 + $0x58] sm:$0x1] }
  0x45   : > { %v5098_v25 = vsel %vm1109_vm2, %v1116_v21, %v1117_v22  ;;  %v5129_v36 = vld [vmem:[%s5046_s11 + $0x40] sm:$0xff]  ;;  %v5138_v40 = vld [vmem:[%s5046_s11 + $0xd0] sm:$0xff]  ;;  %v1126_v47 = vrot.slane %v914_v45, 1  ;;  %v916_v52 = vld [vmem:[%s5046_s11 + $0x68] sm:$0x1]  ;;  %v1365_v7 = vrot.slane %v5069_v17, 1 }
  0x46   : > { %v5122_v33 = vsel %vm1109_vm2, %v1119_v29, %v1120_v30  ;;  %v1122_v38 = vrot.slane %v5129_v36, 1  ;;  %v5141_v41 = vld [vmem:[%s5046_s11 + $0x160] sm:$0xff]  ;;  %v5154_v44 = vld [vmem:[%s5046_s11 + $0x50] sm:$0xff]  ;;  %v1129_v54 = vrot.slane %v916_v52, 1  ;;  %v918_v59 = vld [vmem:[%s5046_s11 + $0x78] sm:$0x1] }
  0x47   : > { %v1125_v46 = vrot.slane %v5154_v44, 1  ;;  %v5162_v48 = vld [vmem:[%s5046_s11 + $0xe0] sm:$0xff]  ;;  %v5165_v49 = vld [vmem:[%s5046_s11 + $0x170] sm:$0xff]  ;;  %v1132_v61 = vrot.slane %v918_v59, 1  ;;  %v931_v0 = vld [vmem:[%s5046_s11 + $0x128] sm:$0x1] }
  0x48   : > { %4674 = vmatmul.msk.f32.gmra.mxu0 %vm963_vm1, %v5066_v16  ;;  %4683 = vmatmul.msk.f32.gmra.mxu1 %vm963_vm1, %v5059_v11  ;;  %v5148_v42 = vsel %vm1109_vm2, %v1122_v38, %v1123_v39  ;;  %v5177_v51 = vld [vmem:[%s5046_s11 + $0x60] sm:$0xff]  ;;  %v5184_v55 = vld [vmem:[%s5046_s11 + $0xf0] sm:$0xff]  ;;  %v1363_v3 = vrot.slane %v931_v0, 1  ;;  %v933_v6 = vld [vmem:[%s5046_s11 + $0x138] sm:$0x1]  ;;  %v1368_v13 = vrot.slane %v5091_v24, 1 }
  0x49   : > { %4701 = vmatmul.msk.f32.gmra.mxu3 %vm963_vm1, %v5069_v17  ;;  %v5172_v50 = vsel %vm1109_vm2, %v1125_v46, %v1126_v47  ;;  %v1128_v53 = vrot.slane %v5177_v51, 1  ;;  %v5187_v56 = vld [vmem:[%s5046_s11 + $0x180] sm:$0xff]  ;;  %v5199_v58 = vld [vmem:[%s5046_s11 + $0x70] sm:$0xff]  ;;  %v1366_v8 = vrot.slane %v933_v6, 1  ;;  %v935_v12 = vld [vmem:[%s5046_s11 + $0x148] sm:$0x1] }
  0x4a   : > { %v1131_v60 = vrot.slane %v5199_v58, 1  ;;  %v5206_v62 = vld [vmem:[%s5046_s11 + $0x100] sm:$0xff]  ;;  %v5209_v63 = vld [vmem:[%s5046_s11 + $0x190] sm:$0xff]  ;;  %v1364_v5 = vsel %vm1109_vm2, %v1362_v2, %v1363_v3  ;;  %v1369_v14 = vrot.slane %v935_v12, 1  ;;  %v1371_v17 = vrot.slane %v5115_v32, 1  ;;  %s7608_s22 = sld [smem:[#allocation6_spill]] }
  0x4b   : > { %4692 = vmatmul.msk.f32.gmra.mxu2 %vm963_vm1, %v5076_v18  ;;  %v5194_v57 = vsel %vm1109_vm2, %v1128_v53, %v1129_v54  ;;  %v946_v4 = vld [vmem:[%s5046_s11 + $0x1b0] sm:$0xff]  ;;  %v947_v9 = vld [vmem:[%s5046_s11 + $0x1c0] sm:$0xff]  ;;  %v1367_v10 = vsel %vm1109_vm2, %v1365_v7, %v1366_v8  ;;  %v939_v22 = vld [vmem:[%s5046_s11 + $0x168] sm:$0x1]  ;;  %v1377_v29 = vrot.slane %v5165_v49, 1  ;;  %v1380_v35 = vrot.slane %v5187_v56, 1 }
  0x4c   : > { %v5217_v1 = vsel %vm1109_vm2, %v1131_v60, %v1132_v61  ;;  %v1370_v15 = vsel %vm1109_vm2, %v1368_v13, %v1369_v14  ;;  %v941_v28 = vld [vmem:[%s5046_s11 + $0x178] sm:$0x1]  ;;  %v943_v34 = vld [vmem:[%s5046_s11 + $0x188] sm:$0x1]  ;;  %v952_v37 = vld [vmem:[%s5046_s11 + $0x210] sm:$0xff]  ;;  %s7611_s23 = sld [smem:[#allocation7_spill]] }
  0x4d   : > { %v1378_v30 = vrot.slane %v941_v28, 1  ;;  %v945_v39 = vld [vmem:[%s5046_s11 + $0x198] sm:$0x1]  ;;  %v953_v43 = vld [vmem:[%s5046_s11 + $0x220] sm:$0xff]  ;;  %v929_v45 = vld [vmem:[%s5046_s11 + $0x110] sm:$0xff]  ;;  %s7620_s26 = sld [smem:[#allocation10_spill]] }
  0x4e   : > { %v919_v46 = vld [vmem:[%s5046_s11 + $0x80] sm:$0xff]  ;;  %v920_v61 = vld [vmem:[%s5046_s11 + $0x88] sm:$0x1]  ;;  %s7621_s28 = sld [smem:[#allocation11_spill]] }
  0x4f   : > { %s7624_s1 = sld [smem:[#allocation12_spill]] }
  0x50   : > { %4675 = vmatmul.msk.f32.gmra.mxu0 %vm963_vm1, %v5088_v23  ;;  %4684 = vmatmul.msk.f32.gmra.mxu1 %vm963_vm1, %v5081_v19  ;;  %s7633_s2 = sld [smem:[#allocation8_spill]] }
  0x51   : > { %4702 = vmatmul.msk.f32.gmra.mxu3 %vm963_vm1, %v5091_v24  ;;  %v1375_v24 = vrot.slane %v939_v22, 1  ;;  %s7634_s0 = sld [smem:[#allocation9_spill]] }
  0x53   : > { %4693 = vmatmul.msk.f32.gmra.mxu2 %vm963_vm1, %v5098_v25 }
  0x58   : > { %4676 = vmatmul.msk.f32.gmra.mxu0 %vm963_vm1, %v5112_v31  ;;  %4685 = vmatmul.msk.f32.gmra.mxu1 %vm963_vm1, %v5103_v26 }
  0x59   : > { %4703 = vmatmul.msk.f32.gmra.mxu3 %vm963_vm1, %v5115_v32  ;;  %v1379_v32 = vsel %vm1109_vm2, %v1377_v29, %v1378_v30 }
  0x5b   : > { %4694 = vmatmul.msk.f32.gmra.mxu2 %vm963_vm1, %v5122_v33 }
  0x60   : > { %4677 = vmatmul.msk.f32.gmra.mxu0 %vm963_vm1, %v5138_v40  ;;  %4686 = vmatmul.msk.f32.gmra.mxu1 %vm963_vm1, %v5129_v36 }
  0x61   : > { %4704 = vmatmul.msk.f32.gmra.mxu3 %vm963_vm1, %v5141_v41 }
  0x63   : > { %4695 = vmatmul.msk.f32.gmra.mxu2 %vm963_vm1, %v5148_v42 }
  0x68   : > { %4678 = vmatmul.msk.f32.gmra.mxu0 %vm963_vm1, %v5162_v48  ;;  %4687 = vmatmul.msk.f32.gmra.mxu1 %vm963_vm1, %v5154_v44 }
  0x69   : > { %4705 = vmatmul.msk.f32.gmra.mxu3 %vm963_vm1, %v5165_v49 }
  0x6b   : > { %4696 = vmatmul.msk.f32.gmra.mxu2 %vm963_vm1, %v5172_v50 }
  0x70   : > { %4679 = vmatmul.msk.f32.gmra.mxu0 %vm963_vm1, %v5184_v55  ;;  %4688 = vmatmul.msk.f32.gmra.mxu1 %vm963_vm1, %v5177_v51 }
  0x71   : > { %4706 = vmatmul.msk.f32.gmra.mxu3 %vm963_vm1, %v5187_v56 }
  0x73   : > { %4697 = vmatmul.msk.f32.gmra.mxu2 %vm963_vm1, %v5194_v57 }
  0x78   : > { %4680 = vmatmul.msk.f32.gmra.mxu0 %vm963_vm1, %v5206_v62  ;;  %4689 = vmatmul.msk.f32.gmra.mxu1 %vm963_vm1, %v5199_v58 }
  0x79   : > { %4707 = vmatmul.msk.f32.gmra.mxu3 %vm963_vm1, %v5209_v63 }
  0x7b   : > { %4698 = vmatmul.msk.f32.gmra.mxu2 %vm963_vm1, %v5217_v1 }
  0x80   : > { %4709 = vmatmul.msk.f32.vlgmr.msrb.gmra.mxu0 %vm963_vm1, %v946_v4  ;;  %4718 = vmatmul.msk.f32.vlgmr.msrb.gmra.mxu1 %vm963_vm1, %v1364_v5 }
  0x81   : > { %4736 = vmatmul.msk.f32.vlgmr.msrb.gmra.mxu3 %vm963_vm1, %v5066_v16  ;;  %v937_v16 = vld [vmem:[%s5046_s11 + $0x158] sm:$0x1] }
  0x82   : > { %v1372_v20 = vrot.slane %v937_v16, 1 }
  0x83   : > { %4727 = vmatmul.msk.f32.vlgmr.msrb.gmra.mxu2 %vm963_vm1, %v5059_v11  ;;  %v948_v11 = vld [vmem:[%s5046_s11 + $0x1d0] sm:$0xff] }
  0x84   : > { %v1373_v21 = vsel %vm1109_vm2, %v1371_v17, %v1372_v20  ;;  %v7541_v20 = vmov 0.0  }
  0x85   : > { %1630 = vst.msk [vmem:[#allocation2] sm:$0xff] %vm963_vm1, %v7541_v20 }
  0x86   : > { %1631 = vst.msk [vmem:[#allocation2 + $0x8] sm:$0xff] %vm963_vm1, %v7541_v20 }
  0x87   : > { %1632 = vst.msk [vmem:[#allocation2 + $0x10] sm:$0xff] %vm963_vm1, %v7541_v20 }
  0x88   : > { %4710 = vmatmul.msk.f32.gmra.mxu0 %vm963_vm1, %v947_v9  ;;  %4719 = vmatmul.msk.f32.gmra.mxu1 %vm963_vm1, %v1367_v10  ;;  %1633 = vst.msk [vmem:[#allocation2 + $0x18] sm:$0xff] %vm963_vm1, %v7541_v20 }
  0x89   : > { %4737 = vmatmul.msk.f32.gmra.mxu3 %vm963_vm1, %v5088_v23  ;;  %v1374_v23 = vrot.slane %v5141_v41, 1  ;;  %v1384_v41 = vrot.slane %v945_v39, 1  ;;  %1634 = vst.msk [vmem:[#allocation2 + $0x20] sm:$0xff] %vm963_vm1, %v7541_v20 }
  0x8a   : > { %1635 = vst.msk [vmem:[#allocation2 + $0x28] sm:$0xff] %vm963_vm1, %v7541_v20 }
  0x8b   : > { %4728 = vmatmul.msk.f32.gmra.mxu2 %vm963_vm1, %v5081_v19  ;;  %v949_v19 = vld [vmem:[%s5046_s11 + $0x1e0] sm:$0xff]  ;;  %v1376_v27 = vsel %vm1109_vm2, %v1374_v23, %v1375_v24  ;;  %1636 = vst.msk [vmem:[#allocation2 + $0x30] sm:$0xff] %vm963_vm1, %v7541_v20 }
  0x8c   : > { %1637 = vst.msk [vmem:[#allocation2 + $0x38] sm:$0xff] %vm963_vm1, %v7541_v20 }
  0x90   : > { %4711 = vmatmul.msk.f32.gmra.mxu0 %vm963_vm1, %v948_v11  ;;  %4720 = vmatmul.msk.f32.gmra.mxu1 %vm963_vm1, %v1370_v15 }
  0x91   : > { %4738 = vmatmul.msk.f32.gmra.mxu3 %vm963_vm1, %v5112_v31  ;;  %v951_v31 = vld [vmem:[%s5046_s11 + $0x200] sm:$0xff] }
  0x93   : > { %4729 = vmatmul.msk.f32.gmra.mxu2 %vm963_vm1, %v5103_v26  ;;  %v950_v26 = vld [vmem:[%s5046_s11 + $0x1f0] sm:$0xff]  ;;  %s7636_s11 = sld [smem:[#allocation13_spill]] }
  0x98   : > { %4712 = vmatmul.msk.f32.gmra.mxu0 %vm963_vm1, %v949_v19  ;;  %4721 = vmatmul.msk.f32.gmra.mxu1 %vm963_vm1, %v1373_v21 }
  0x99   : > { %4739 = vmatmul.msk.f32.gmra.mxu3 %vm963_vm1, %v5138_v40  ;;  %v1383_v40 = vrot.slane %v5209_v63, 1  ;;  %v1566_v63 = vrot.slane %v920_v61, 1 }
  0x9b   : > { %4730 = vmatmul.msk.f32.gmra.mxu2 %vm963_vm1, %v5129_v36  ;;  %v1381_v36 = vrot.slane %v943_v34, 1 }
  0x9d   : > { %v1382_v38 = vsel %vm1109_vm2, %v1380_v35, %v1381_v36 }
  0xa0   : > { %4713 = vmatmul.msk.f32.gmra.mxu0 %vm963_vm1, %v950_v26  ;;  %4722 = vmatmul.msk.f32.gmra.mxu1 %vm963_vm1, %v1376_v27 }
  0xa1   : > { %4740 = vmatmul.msk.f32.gmra.mxu3 %vm963_vm1, %v5162_v48 }
  0xa3   : > { %4731 = vmatmul.msk.f32.gmra.mxu2 %vm963_vm1, %v5154_v44  ;;  %v1385_v44 = vsel %vm1109_vm2, %v1383_v40, %v1384_v41 }
  0xa8   : > { %4714 = vmatmul.msk.f32.gmra.mxu0 %vm963_vm1, %v951_v31  ;;  %4723 = vmatmul.msk.f32.gmra.mxu1 %vm963_vm1, %v1379_v32 }
  0xa9   : > { %4741 = vmatmul.msk.f32.gmra.mxu3 %vm963_vm1, %v5184_v55 }
  0xab   : > { %4732 = vmatmul.msk.f32.gmra.mxu2 %vm963_vm1, %v5177_v51 }
  0xb0   : > { %4715 = vmatmul.msk.f32.gmra.mxu0 %vm963_vm1, %v952_v37  ;;  %4724 = vmatmul.msk.f32.gmra.mxu1 %vm963_vm1, %v1382_v38 }
  0xb1   : > { %4742 = vmatmul.msk.f32.gmra.mxu3 %vm963_vm1, %v5206_v62 }
  0xb3   : > { %4733 = vmatmul.msk.f32.gmra.mxu2 %vm963_vm1, %v5199_v58 }
  0xb8   : > { %4716 = vmatmul.msk.f32.gmra.mxu0 %vm963_vm1, %v953_v43  ;;  %4725 = vmatmul.msk.f32.gmra.mxu1 %vm963_vm1, %v1385_v44 }
  0xb9   : > { %4743 = vmatmul.msk.f32.gmra.mxu3 %vm963_vm1, %v929_v45  ;;  %v1622_v45 = vld [vmem:[%s4887_s13] sm:$0x7] }
  0xbb   : > { %4734 = vmatmul.msk.f32.gmra.mxu2 %vm963_vm1, %v919_v46 }
  0xbd   : > { %v5302_v47 = vpop.f32.mrf.mxu0  ;;  %v1077_v51 = vpop.f32.mrf.mxu1 }
  0xbe   : > { %v1078_v28 = vadd.f32 %v1077_v51, %v5302_v47 }
  0xc0   : > { %4745 = vmatmul.msk.f32.vlgmr.msra.gmra.mxu0 %vm963_vm1, %v5076_v18 }
  0xc4   : > { %v1246_v54 = vpop.f32.mrf.mxu3 }
  0xc5   : > { %v5306_v48 = vpop.f32.mrf.mxu0  ;;  %v1080_v18 = vpop.f32.mrf.mxu1 }
  0xc6   : > { %v1170_v52 = vpop.f32.mrf.mxu2  ;;  %v1081_v34 = vadd.f32 %v1080_v18, %v5306_v48  ;;  %v5403_v48 = vperm.slane %v1622_v45, 0  ;;  %v5405_v18 = vperm.slane %v1622_v45, 1 }
  0xc7   : > { %v1194_v29 = vadd.f32 %v1170_v52, %v1078_v28 }
  0xc8   : > { %4746 = vmatmul.msk.f32.gmra.mxu0 %vm963_vm1, %v5098_v25 }
  0xc9   : > { %v1270_v32 = vadd.f32 %v1246_v54, %v1194_v29 }
  0xcc   : > { %v1249_v25 = vpop.f32.mrf.mxu3 }
  0xcd   : > { %v5310_v49 = vpop.f32.mrf.mxu0  ;;  %v5322_v58 = vpop.f32.mrf.mxu1 }
  0xce   : > { %v1173_v56 = vpop.f32.mrf.mxu2 }
  0xcf   : > { %v1195_v38 = vadd.f32 %v1173_v56, %v1081_v34 }
  0xd0   : > { %4747 = vmatmul.msk.f32.gmra.mxu0 %vm963_vm1, %v5122_v33 }
  0xd1   : > { %v1271_v41 = vadd.f32 %v1249_v25, %v1195_v38  ;;  %v1639_v25 = vld [vmem:[#allocation2 + $0x8] sm:$0xff]  ;;  %v1640_v38 = vld [vmem:[#allocation2 + $0x10] sm:$0xff] }
  0xd4   : > { %v5330_v60 = vpop.f32.mrf.mxu3 }
  0xd5   : > { %v5314_v53 = vpop.f32.mrf.mxu0  ;;  %v5335_v62 = vpop.f32.mrf.mxu1 }
  0xd6   : > { %v5326_v59 = vpop.f32.mrf.mxu2 }
  0xd8   : > { %4748 = vmatmul.msk.f32.gmra.mxu0 %vm963_vm1, %v5148_v42 }
  0xdc   : > { %v5344_v4 = vpop.f32.mrf.mxu3 }
  0xdd   : > { %v5318_v55 = vpop.f32.mrf.mxu0 }
  0xde   : > { %v5339_v0 = vpop.f32.mrf.mxu2 }
  0xe0   : > { %4749 = vmatmul.msk.f32.gmra.mxu0 %vm963_vm1, %v5172_v50  ;;  %v1565_v50 = vrot.slane %v919_v46, 1  ;;  %v1084_v46 = vadd.f32 %v5322_v58, %v5310_v49 }
  0xe2   : > { %v1567_v3 = vsel %vm1109_vm2, %v1565_v50, %v1566_v63  ;;  %v1196_v51 = vadd.f32 %v5326_v59, %v1084_v46  ;;  %v1087_v59 = vadd.f32 %v5335_v62, %v5314_v53 }
  0xe4   : > { %v5351_v7 = vpop.f32.mrf.mxu3  ;;  %v1197_v28 = vadd.f32 %v5339_v0, %v1087_v59 }
  0xe5   : > { %v5324_v33 = vpop.f32.mrf.mxu0 }
  0xe6   : > { %v5349_v5 = vpop.f32.mrf.mxu2  ;;  %v1273_v53 = vadd.f32 %v5344_v4, %v1197_v28 }
  0xe8   : > { %4750 = vmatmul.msk.f32.gmra.mxu0 %vm963_vm1, %v5194_v57  ;;  %v5347_v57 = vpop.f32.mrf.mxu1 }
  0xec   : > { %v5357_v10 = vpop.f32.mrf.mxu3 }
  0xed   : > { %v5332_v42 = vpop.f32.mrf.mxu0 }
  0xee   : > { %v5355_v9 = vpop.f32.mrf.mxu2 }
  0xf0   : > { %4751 = vmatmul.msk.f32.gmra.mxu0 %vm963_vm1, %v5217_v1  ;;  %v5353_v1 = vpop.f32.mrf.mxu1 }
  0xf4   : > { %v5363_v11 = vpop.f32.mrf.mxu3 }
  0xf5   : > { %v5341_v2 = vpop.f32.mrf.mxu0 }
  0xf6   : > { %v5361_v14 = vpop.f32.mrf.mxu2 }
  0xf8   : > { %4752 = vmatmul.msk.f32.gmra.mxu0 %vm963_vm1, %v1567_v3  ;;  %v5359_v12 = vpop.f32.mrf.mxu1  ;;  %v1668_v3 = vld [vmem:[#allocation2] sm:$0xff] }
  0xfc   : > { %v5381_v21 = vpop.f32.mrf.mxu3 }
  0xfd   : > { %v1322_v6 = vpop.f32.mrf.mxu0 }
  0xfe   : > { %v5369_v17 = vpop.f32.mrf.mxu2  ;;  %v1346_v35 = vadd.f32 %v1322_v6, %v1270_v32  ;;  %v1272_v6 = vadd.f32 %v5330_v60, %v1196_v51 }
 0x100   : > { %v5367_v16 = vpop.f32.mrf.mxu1 }
 0x104   : > { %v1532_v26 = vpop.f32.mrf.mxu3 }
 0x105   : > { %v1325_v8 = vpop.f32.mrf.mxu0 }
 0x106   : > { %v1477_v23 = vpop.f32.mrf.mxu2  ;;  %v1347_v47 = vadd.f32 %v1325_v8, %v1271_v41 }
 0x108   : > { %v1422_v22 = vpop.f32.mrf.mxu1 }
 0x109   : > { %v1446_v40 = vadd.f32 %v1422_v22, %v1346_v35 }
 0x10b   : > { %v1501_v43 = vadd.f32 %v1477_v23, %v1446_v40  ;;  %v5421_v40 = vperm.slane %v1622_v45, 2 }
 0x10c   : > { %v1535_v36 = vpop.f32.mrf.mxu3 }
 0x10d   : > { %v1328_v13 = vpop.f32.mrf.mxu0  ;;  %v1556_v52 = vadd.f32 %v1532_v26, %v1501_v43 }
 0x10e   : > { %v1480_v31 = vpop.f32.mrf.mxu2  ;;  %v1348_v8 = vadd.f32 %v1328_v13, %v1272_v6  ;;  %v1090_v13 = vadd.f32 %v5347_v57, %v5318_v55 }
 0x110   : > { %v1425_v27 = vpop.f32.mrf.mxu1  ;;  %v1198_v4 = vadd.f32 %v5349_v5, %v1090_v13 }
 0x111   : > { %v1447_v50 = vadd.f32 %v1425_v27, %v1347_v47 }
 0x112   : > { %v1274_v5 = vadd.f32 %v5351_v7, %v1198_v4 }
 0x113   : > { %v1502_v22 = vadd.f32 %v1480_v31, %v1447_v50 }
 0x114   : > { %v1538_v54 = vpop.f32.mrf.mxu3 }
 0x115   : > { %v5365_v15 = vpop.f32.mrf.mxu0  ;;  %v1557_v29 = vadd.f32 %v1535_v36, %v1502_v22 }
 0x116   : > { %v1483_v44 = vpop.f32.mrf.mxu2  ;;  %v1349_v36 = vadd.f32 %v5365_v15, %v1273_v53  ;;  %v5436_v15 = vld [vmem:[%s4932_s24] sm:$0x7f] }
 0x117   : > { %v5445_v6 = vperm.slane %v5436_v15, 3  ;;  %v5448_v22 = vperm.slane %v5436_v15, 2 }
 0x118   : > { %v1428_v37 = vpop.f32.mrf.mxu1 }
 0x119   : > { %v1448_v31 = vadd.f32 %v1428_v37, %v1348_v8 }
 0x11b   : > { %v1503_v62 = vadd.f32 %v1483_v44, %v1448_v31 }
 0x11c   : > { %v1541_v32 = vpop.f32.mrf.mxu3 }
 0x11d   : > { %v5377_v19 = vpop.f32.mrf.mxu0  ;;  %v1558_v44 = vadd.f32 %v1538_v54, %v1503_v62 }
 0x11e   : > { %v1486_v23 = vpop.f32.mrf.mxu2  ;;  %v1350_v7 = vadd.f32 %v5377_v19, %v1274_v5 }
 0x120   : > { %v1431_v56 = vpop.f32.mrf.mxu1 }
 0x124   : > { %v1544_v50 = vpop.f32.mrf.mxu3 }
 0x125   : > { %v5391_v24 = vpop.f32.mrf.mxu0 }
 0x126   : > { %v1489_v46 = vpop.f32.mrf.mxu2 }
 0x128   : > { %v1434_v35 = vpop.f32.mrf.mxu1 }
 0x12d   : > { %v5394_v30 = vpop.f32.mrf.mxu0 }
 0x135   : > { %v5397_v39 = vpop.f32.mrf.mxu0 }
 0x13d   : > { %v1590_v61 = vpop.f32.mrf.mxu0 }
 0x13e   : > { %v5407_v63 = vadd.f32 %v1590_v61, %v1556_v52  ;;  %v1449_v52 = vadd.f32 %v1431_v56, %v1349_v36  ;;  %v1093_v56 = vadd.f32 %v5353_v1, %v5324_v33  ;;  %v1096_v33 = vadd.f32 %v5359_v12, %v5332_v42  ;;  %v1492_v12 = vpop.f32.mrf.mxu2 }
 0x13f   : > { %v1450_v42 = vadd.f32 %v1434_v35, %v1350_v7 }
 0x140   : > { %v1647_v49 = vmul.f32 %v5403_v48, %v5407_v63  ;;  %v1677_v58 = vmul.f32 %v5405_v18, %v5407_v63  ;;  %v1504_v54 = vadd.f32 %v1486_v23, %v1449_v52  ;;  %v1199_v1 = vadd.f32 %v5355_v9, %v1093_v56  ;;  %v5478_v9 = vld [vmem:[%s4902_s25] sm:$0x7] }
 0x141   : > { %v1505_v35 = vadd.f32 %v1489_v46, %v1450_v42  ;;  %v5502_v52 = vld [vmem:[%s4977_s27] sm:$0xff] }
 0x142   : > { %v1654_v26 = vadd.f32 %v1647_v49, %v1639_v25  ;;  %v1685_v27 = vadd.f32 %v1677_v58, %v1668_v3  ;;  %v1627_v25 = vld [vmem:[%s4892_s17] sm:$0x1]  ;;  %v1641_v3 = vld [vmem:[#allocation2 + $0x18] sm:$0xff]  ;;  %v1437_v49 = vpop.f32.mrf.mxu1 }
 0x144   : > { %1661 = vst.msk [vmem:[#allocation2 + $0x8] sm:$0xff] %vm963_vm1, %v1654_v26  ;;  %v1628_v26 = vld [vmem:[%s4897_s21] sm:$0x1] }
 0x145   : > { %1693 = vst.msk [vmem:[#allocation2] sm:$0xff] %vm963_vm1, %v1685_v27  ;;  %v1593_v60 = vpop.f32.mrf.mxu0  ;;  %v5469_v27 = vperm.slane %v1627_v25, 0  ;;  %v5480_v13 = vperm.slane %v1628_v26, 0 }
 0x146   : > { %v5419_v34 = vadd.f32 %v1593_v60, %v1557_v29  ;;  %v1559_v29 = vadd.f32 %v1541_v32, %v1504_v54  ;;  %v1560_v54 = vadd.f32 %v1544_v50, %v1505_v35 }
 0x148   : > { %v1648_v0 = vmul.f32 %v5403_v48, %v5419_v34  ;;  %v1678_v41 = vmul.f32 %v5405_v18, %v5419_v34  ;;  %v1709_v45 = vmul.f32 %v5421_v40, %v5419_v34 }
 0x14a   : > { %v1655_v37 = vadd.f32 %v1648_v0, %v1640_v38  ;;  %v1200_v38 = vadd.f32 %v5361_v14, %v1096_v33 }
 0x14b   : > { %v1669_v43 = vld [vmem:[#allocation2 + $0x8] sm:$0xff] }
 0x14c   : > { %1662 = vst.msk [vmem:[#allocation2 + $0x10] sm:$0xff] %vm963_vm1, %v1655_v37  ;;  %v1686_v47 = vadd.f32 %v1678_v41, %v1669_v43  ;;  %v1701_v51 = vld [vmem:[#allocation2] sm:$0xff]  ;;  %v1275_v37 = vadd.f32 %v5357_v10, %v1199_v1  ;;  %v5494_v10 = vperm.slane %v5478_v9, 0 }
 0x14d   : > { %v1596_v55 = vpop.f32.mrf.mxu0  ;;  %v1716_v57 = vadd.f32 %v1709_v45, %v1701_v51  ;;  %v1642_v41 = vld [vmem:[#allocation2 + $0x20] sm:$0xff]  ;;  %v1099_v45 = vadd.f32 %v5367_v16, %v5341_v2  ;;  %v1547_v51 = vpop.f32.mrf.mxu3 }
 0x14e   : > { %v5438_v61 = vadd.f32 %v1596_v55, %v1558_v44  ;;  %1694 = vst.msk [vmem:[#allocation2 + $0x8] sm:$0xff] %vm963_vm1, %v1686_v47  ;;  %v1351_v4 = vadd.f32 %v5391_v24, %v1275_v37  ;;  %v5497_v44 = vperm.slane %v5436_v15, 4  ;;  %v1276_v47 = vadd.f32 %v5363_v11, %v1200_v38 }
 0x14f   : > { %1723 = vst.msk [vmem:[#allocation2] sm:$0xff] %vm963_vm1, %v1716_v57  ;;  %v1440_v57 = vpop.f32.mrf.mxu1  ;;  %v1201_v5 = vadd.f32 %v5369_v17, %v1099_v45  ;;  %v5530_v17 = vperm.slane %v5502_v52, 7 }
 0x150   : > { %v1649_v58 = vmul.f32 %v5403_v48, %v5438_v61  ;;  %v1679_v59 = vmul.f32 %v5405_v18, %v5438_v61  ;;  %v5459_v8 = vmul.f32 %v5445_v6, %v5438_v61  ;;  %v5463_v23 = vmul.f32 %v5448_v22, %v5438_v61 }
 0x151   : > { %v1710_v31 = vmul.f32 %v5421_v40, %v5438_v61  ;;  %v1352_v7 = vadd.f32 %v5394_v30, %v1276_v47  ;;  %7569 = vst [vmem:[#allocation15_spill] sm:$0xff] %v5530_v17 }
 0x152   : > { %v1656_v19 = vadd.f32 %v1649_v58, %v1641_v3  ;;  %v1451_v58 = vadd.f32 %v1437_v49, %v1351_v4 }
 0x153   : > { %v1670_v28 = vld [vmem:[#allocation2 + $0x10] sm:$0xff]  ;;  %v1452_v42 = vadd.f32 %v1440_v57, %v1352_v7 }
 0x154   : > { %v1687_v60 = vadd.f32 %v1679_v59, %v1670_v28  ;;  %1663 = vst.msk [vmem:[#allocation2 + $0x18] sm:$0xff] %vm963_vm1, %v1656_v19  ;;  %v1644_v7 = vld [vmem:[#allocation2 + $0x30] sm:$0xff] }
 0x155   : > { %v1599_v53 = vpop.f32.mrf.mxu0  ;;  %v1702_v62 = vld [vmem:[#allocation2 + $0x8] sm:$0xff]  ;;  %v1550_v47 = vpop.f32.mrf.mxu3 }
 0x156   : > { %v5475_v0 = vadd.f32 %v1599_v53, %v1559_v29  ;;  %1695 = vst.msk [vmem:[#allocation2 + $0x10] sm:$0xff] %vm963_vm1, %v1687_v60  ;;  %v1717_v32 = vadd.f32 %v1710_v31, %v1702_v62  ;;  %v1730_v36 = vld [vmem:[#allocation2] sm:$0xff]  ;;  %v1506_v29 = vadd.f32 %v1492_v12, %v1451_v58  ;;  %v1643_v60 = vld [vmem:[#allocation2 + $0x28] sm:$0xff]  ;;  %v1495_v31 = vpop.f32.mrf.mxu2  ;;  %v1277_v62 = vadd.f32 %v5381_v21, %v1201_v5 }
 0x157   : > { %v1741_v14 = vadd.f32 %v5469_v27, %v1730_v36  ;;  %1776 = vst.msk [vmem:[#allocation2] sm:$0xff] %vm963_vm1, %v7541_v20  ;;  %v5544_v12 = vperm.slane %v5436_v15, 5  ;;  %v1507_v57 = vadd.f32 %v1495_v31, %v1452_v42 }
 0x158   : > { %v1650_v43 = vmul.f32 %v5403_v48, %v5475_v0  ;;  %1724 = vst.msk [vmem:[#allocation2 + $0x8] sm:$0xff] %vm963_vm1, %v1717_v32  ;;  %v1680_v2 = vmul.f32 %v5405_v18, %v5475_v0  ;;  %v5508_v16 = vmul.f32 %v5497_v44, %v5475_v0  ;;  %v5512_v24 = vmul.f32 %v5445_v6, %v5475_v0 }
 0x159   : > { %vm1749_vm3 = vcmp.gt.f32.partialorder %v1741_v14, 0.0  ;;  %v1760_v55 = vmul.f32 %v5480_v13, %v1741_v14  ;;  %v5516_v11 = vmul.f32 %v5448_v22, %v5475_v0  ;;  %v1711_v3 = vmul.f32 %v5421_v40, %v5475_v0 }
 0x15a   : > { %v1657_v46 = vadd.f32 %v1650_v43, %v1642_v41  ;;  %v1561_v21 = vadd.f32 %v1547_v51, %v1506_v29  ;;  %v1353_v4 = vadd.f32 %v5397_v39, %v1277_v62  ;;  %v5569_v51 = vld [vmem:[%s4977_s27 + $0x8] sm:$0x7f]  ;;  %v5603_v62 = vperm.slane %v5436_v15, 6 }
 0x15b   : > { %v1671_v25 = vld [vmem:[#allocation2 + $0x18] sm:$0xff]  ;;  %v5522_v56 = vsel %vm1749_vm3, %v1741_v14, %v1760_v55 }
 0x15c   : > { %1664 = vst.msk [vmem:[#allocation2 + $0x20] sm:$0xff] %vm963_vm1, %v1657_v46  ;;  %v1688_v33 = vadd.f32 %v1680_v2, %v1671_v25  ;;  %v1793_v26 = vmul.f32 %v5494_v10, %v5522_v56  ;;  %v1443_v2 = vpop.f32.mrf.mxu1  ;;  %v5575_v25 = vperm.slane %v5478_v9, 1 }
 0x15d   : > { %v1602_v59 = vpop.f32.mrf.mxu0  ;;  %v1703_v1 = vld [vmem:[#allocation2 + $0x10] sm:$0xff] }
 0x15e   : > { %v5527_v19 = vadd.f32 %v1602_v59, %v1560_v54  ;;  %v1718_v50 = vadd.f32 %v1711_v3, %v1703_v1  ;;  %v1784_v28 = vld [vmem:[#allocation2 + $0x1] sm:$0x7f]  ;;  %1696 = vst.msk [vmem:[#allocation2 + $0x18] sm:$0xff] %vm963_vm1, %v1688_v33  ;;  %v5583_v59 = vperm.slane %v5569_v51, 0  ;;  %v1498_v42 = vpop.f32.mrf.mxu2 }
 0x15f   : > { %v1731_v49 = vld [vmem:[#allocation2 + $0x8] sm:$0xff]  ;;  %v1801_v30 = vadd.f32 %v1793_v26, %v1784_v28 }
 0x160   : > { %v1651_v38 = vmul.f32 %v5403_v48, %v5527_v19  ;;  %v5537_v53 = vmul.f32 %v5530_v17, %v5527_v19  ;;  %1725 = vst.msk [vmem:[#allocation2 + $0x10] sm:$0xff] %vm963_vm1, %v1718_v50  ;;  %v1681_v32 = vmul.f32 %v5405_v18, %v5527_v19  ;;  %v1742_v37 = vadd.f32 %v5469_v27, %v1731_v49 }
 0x161   : > { %1777 = vst.msk [vmem:[#allocation2 + $0x8] sm:$0xff] %vm963_vm1, %v7541_v20  ;;  %v5552_v41 = vmul.f32 %v5497_v44, %v5527_v19  ;;  %v5556_v35 = vmul.f32 %v5544_v12, %v5527_v19  ;;  %v5560_v43 = vmul.f32 %v5445_v6, %v5527_v19  ;;  %v5564_v45 = vmul.f32 %v5448_v22, %v5527_v19 }
 0x162   : > { %7570 = vst [vmem:[#allocation16_spill] sm:$0xff] %v5537_v53  ;;  %v1658_v36 = vadd.f32 %v1651_v38, %v1643_v60  ;;  %vm1750_vm5 = vcmp.gt.f32.partialorder %v1742_v37, 0.0  ;;  %v1761_v55 = vmul.f32 %v5480_v13, %v1742_v37  ;;  %v1712_v54 = vmul.f32 %v5421_v40, %v5527_v19 }
 0x163   : > { %1810 = vst.msk [vmem:[#allocation2 + $0x1] sm:$0x7f] %vm1809_vm4, %v1801_v30  ;;  %v1672_v14 = vld [vmem:[#allocation2 + $0x20] sm:$0xff]  ;;  %v1453_v50 = vadd.f32 %v1443_v2, %v1353_v4  ;;  %v1562_v49 = vadd.f32 %v1550_v47, %v1507_v57  ;;  %v1827_v38 = vmul.f32 %v5575_v25, %v5522_v56 }
 0x164   : > { %1665 = vst.msk [vmem:[#allocation2 + $0x28] sm:$0xff] %vm963_vm1, %v1658_v36  ;;  %v1689_v46 = vadd.f32 %v1681_v32, %v1672_v14  ;;  %v5580_v58 = vsel %vm1750_vm5, %v1742_v37, %v1761_v55 }
 0x165   : > { %v1605_v5 = vpop.f32.mrf.mxu0  ;;  %v1704_v39 = vld [vmem:[#allocation2 + $0x18] sm:$0xff]  ;;  %7571 = vst [vmem:[#allocation17_spill] sm:$0xff] %v5583_v59  ;;  %v1794_v26 = vmul.f32 %v5494_v10, %v5580_v58 }
 0x166   : > { %v5577_v3 = vadd.f32 %v1605_v5, %v1561_v21  ;;  %1697 = vst.msk [vmem:[#allocation2 + $0x20] sm:$0xff] %vm963_vm1, %v1689_v46  ;;  %v1719_v33 = vadd.f32 %v1712_v54, %v1704_v39  ;;  %v1508_v5 = vadd.f32 %v1498_v42, %v1453_v50 }
 0x167   : > { %v1732_v1 = vld [vmem:[#allocation2 + $0x10] sm:$0xff] }
 0x168   : > { %v1652_v28 = vmul.f32 %v5403_v48, %v5577_v3  ;;  %v5591_v29 = vmul.f32 %v5530_v17, %v5577_v3  ;;  %1778 = vst.msk [vmem:[#allocation2 + $0x10] sm:$0xff] %vm963_vm1, %v7541_v20  ;;  %v1785_v60 = vld [vmem:[#allocation2 + $0x9] sm:$0x7f]  ;;  %v5597_v30 = vmul.f32 %v5583_v59, %v5577_v3  ;;  %v1682_v32 = vmul.f32 %v5405_v18, %v5577_v3 }
 0x169   : > { %1726 = vst.msk [vmem:[#allocation2 + $0x18] sm:$0xff] %vm963_vm1, %v1719_v33  ;;  %v1743_v37 = vadd.f32 %v5469_v27, %v1732_v1  ;;  %v1802_v21 = vadd.f32 %v1794_v26, %v1785_v60  ;;  %v1713_v4 = vmul.f32 %v5421_v40, %v5577_v3  ;;  %v5612_v46 = vmul.f32 %v5497_v44, %v5577_v3  ;;  %v1553_v26 = vpop.f32.mrf.mxu3 }
 0x16a   : > { %7572 = vst [vmem:[#allocation18_spill] sm:$0xff] %v5591_v29  ;;  %v1818_v31 = vld [vmem:[#allocation2] sm:$0xff]  ;;  %v1659_v36 = vadd.f32 %v1652_v28, %v1644_v7  ;;  %v5616_v15 = vmul.f32 %v5544_v12, %v5577_v3  ;;  %v5622_v2 = vmul.f32 %v5603_v62, %v5577_v3  ;;  %v5626_v7 = vperm.slane %v5478_v9, 2 }
 0x16b   : > { %7573 = vst [vmem:[#allocation19_spill] sm:$0xff] %v5597_v30  ;;  %v1673_v14 = vld [vmem:[#allocation2 + $0x28] sm:$0xff]  ;;  %v1835_v47 = vadd.f32 %v1827_v38, %v1818_v31  ;;  %vm1751_vm6 = vcmp.gt.f32.partialorder %v1743_v37, 0.0  ;;  %v1762_v57 = vmul.f32 %v5480_v13, %v1743_v37  ;;  %v5630_v33 = vmul.f32 %v5445_v6, %v5577_v3  ;;  %v1645_v31 = vld [vmem:[#allocation2 + $0x38] sm:$0xff] }
 0x16c   : > { %7574 = vst [vmem:[#allocation20_spill] sm:$0xff] %v5612_v46  ;;  %v1690_v55 = vadd.f32 %v1682_v32, %v1673_v14  ;;  %v5633_v1 = vperm.slane %v5502_v52, 6  ;;  %v5641_v9 = vperm.slane %v5569_v51, 1 }
 0x16d   : > { %7575 = vst [vmem:[#allocation21_spill] sm:$0xff] %v5616_v15  ;;  %v1608_v54 = vpop.f32.mrf.mxu0  ;;  %v1705_v39 = vld [vmem:[#allocation2 + $0x20] sm:$0xff]  ;;  %v5638_v60 = vsel %vm1751_vm6, %v1743_v37, %v1762_v57  ;;  %v1563_v37 = vadd.f32 %v1553_v26, %v1508_v5  ;;  %v1828_v5 = vmul.f32 %v5575_v25, %v5580_v58 }
 0x16e   : > { %1666 = vst.msk [vmem:[#allocation2 + $0x30] sm:$0xff] %vm963_vm1, %v1659_v36  ;;  %v5636_v28 = vadd.f32 %v1608_v54, %v1562_v49  ;;  %v1720_v50 = vadd.f32 %v1713_v4, %v1705_v39  ;;  %v1795_v38 = vmul.f32 %v5494_v10, %v5638_v60  ;;  %v5648_v42 = vmul.f32 %v5633_v1, %v5527_v19 }
 0x16f   : > { %7576 = vst [vmem:[#allocation22_spill] sm:$0xff] %v5622_v2  ;;  %v1786_v36 = vld [vmem:[#allocation2 + $0x11] sm:$0x7f]  ;;  %v1860_v4 = vmul.f32 %v5626_v7, %v5522_v56 }
 0x170   : > { %1811 = vst.msk [vmem:[#allocation2 + $0x9] sm:$0x7f] %vm1809_vm4, %v1802_v21  ;;  %v1653_v49 = vmul.f32 %v5403_v48, %v5636_v28  ;;  %v1733_v32 = vld [vmem:[#allocation2 + $0x18] sm:$0xff]  ;;  %v5655_v21 = vmul.f32 %v5583_v59, %v5636_v28  ;;  %v5659_v14 = vmul.f32 %v5641_v9, %v5636_v28  ;;  %v1714_v39 = vmul.f32 %v5421_v40, %v5636_v28 }
 0x171   : > { %7577 = vst [vmem:[#allocation23_spill] sm:$0xff] %v5630_v33  ;;  %v1744_v57 = vadd.f32 %v5469_v27, %v1733_v32  ;;  %v1803_v26 = vadd.f32 %v1795_v38, %v1786_v36  ;;  %v5676_v56 = vmul.f32 %v5497_v44, %v5636_v28  ;;  %v5700_v29 = vmul.f32 %v5633_v1, %v5636_v28 }
 0x172   : > { %7578 = vst [vmem:[#allocation24_spill] sm:$0xff] %v5633_v1  ;;  %v1660_v48 = vadd.f32 %v1653_v49, %v1645_v31 }
 0x173   : > { %1698 = vst.msk [vmem:[#allocation2 + $0x28] sm:$0xff] %vm963_vm1, %v1690_v55  ;;  %v2254_v55 = vld [vmem:[%s4917_s8] sm:$0xf]  ;;  %vm1752_vm7 = vcmp.gt.f32.partialorder %v1744_v57, 0.0  ;;  %v1763_v49 = vmul.f32 %v5480_v13, %v1744_v57 }
 0x174   : > { %7579 = vst [vmem:[#allocation25_spill] sm:$0xff] %v5641_v9  ;;  %4753 = vmatpush.msk.msra.mxu1 %vm988_vm0, %v2254_v55 }
 0x175   : > { %1843 = vst.msk [vmem:[#allocation2] sm:$0xff] %vm963_vm1, %v1835_v47  ;;  %v1683_v47 = vmul.f32 %v5405_v18, %v5636_v28  ;;  %v1674_v54 = vld [vmem:[#allocation2 + $0x30] sm:$0xff]  ;;  %v1611_v38 = vpop.f32.mrf.mxu0 }
 0x176   : > { %7580 = vst [vmem:[#allocation26_spill] sm:$0xff] %v5648_v42 }
 0x177   : > { %1727 = vst.msk [vmem:[#allocation2 + $0x20] sm:$0xff] %vm963_vm1, %v1720_v50  ;;  %v5680_v50 = vmul.f32 %v5544_v12, %v5636_v28  ;;  %v1691_v31 = vadd.f32 %v1683_v47, %v1674_v54  ;;  %v1819_v32 = vld [vmem:[#allocation2 + $0x8] sm:$0xff]  ;;  %v5696_v54 = vsel %vm1752_vm7, %v1744_v57, %v1763_v49 }
 0x178   : > { %7581 = vst [vmem:[#allocation27_spill] sm:$0xff] %v5655_v21  ;;  %v1836_v55 = vadd.f32 %v1828_v5, %v1819_v32  ;;  %v5691_v21 = vmul.f32 %v5445_v6, %v5636_v28  ;;  %v5703_v5 = vperm.slane %v5569_v51, 2 }
 0x179   : > { %7582 = vst [vmem:[#allocation28_spill] sm:$0xff] %v5659_v14  ;;  %v1876_v14 = vrot.slane %v1860_v4, 1  ;;  %v1796_v4 = vmul.f32 %v5494_v10, %v5696_v54 }
 0x17a   : > { %1779 = vst.msk [vmem:[#allocation2 + $0x18] sm:$0xff] %vm963_vm1, %v7541_v20  ;;  %v5686_v20 = vmul.f32 %v5603_v62, %v5636_v28  ;;  %v1706_v36 = vld [vmem:[#allocation2 + $0x28] sm:$0xff] }
 0x17b   : > { %7583 = vst [vmem:[#allocation29_spill] sm:$0xff] %v5676_v56  ;;  %v1721_v47 = vadd.f32 %v1714_v39, %v1706_v36 }
 0x17c   : > { %7584 = vst [vmem:[#allocation30_spill] sm:$0xff] %v5680_v50  ;;  %v1851_v30 = vld [vmem:[#allocation2] sm:$0x7f] }
 0x17d   : > { %1667 = vst.msk [vmem:[#allocation2 + $0x38] sm:$0xff] %vm963_vm1, %v1660_v48  ;;  %v5693_v48 = vadd.f32 %v1611_v38, %v1563_v37  ;;  %v1892_v37 = vadd.f32 %v1876_v14, %v1851_v30 }
 0x17e   : > { %7585 = vst [vmem:[#allocation31_spill] sm:$0xff] %v5686_v20  ;;  %v1734_v53 = vld [vmem:[#allocation2 + $0x20] sm:$0xff] }
 0x17f   : > { %1812 = vst.msk [vmem:[#allocation2 + $0x11] sm:$0x7f] %vm1809_vm4, %v1803_v26  ;;  %v1745_v57 = vadd.f32 %v5469_v27, %v1734_v53  ;;  %v5712_v39 = vmul.f32 %v5530_v17, %v5693_v48  ;;  %v5718_v51 = vmul.f32 %v5583_v59, %v5693_v48  ;;  %v5722_v49 = vmul.f32 %v5641_v9, %v5693_v48 }
 0x180   : > { %7586 = vst [vmem:[#allocation32_spill] sm:$0xff] %v5693_v48  ;;  %v5726_v30 = vmul.f32 %v5703_v5, %v5693_v48  ;;  %v1861_v53 = vmul.f32 %v5626_v7, %v5580_v58  ;;  %v1684_v14 = vmul.f32 %v5405_v18, %v5693_v48 }
 0x181   : > { %1699 = vst.msk [vmem:[#allocation2 + $0x30] sm:$0xff] %vm963_vm1, %v1691_v31  ;;  %v1787_v26 = vld [vmem:[#allocation2 + $0x19] sm:$0x7f]  ;;  %v7590_v31 = vmov 0.0   ;;  %vm1753_vm8 = vcmp.gt.f32.partialorder %v1745_v57, 0.0  ;;  %v1764_v32 = vmul.f32 %v5480_v13, %v1745_v57 }
 0x182   : > { %7587 = vst [vmem:[#allocation33_spill] sm:$0xff] %v5700_v29  ;;  %v1804_v36 = vadd.f32 %v1796_v4, %v1787_v26  ;;  %v5744_v4 = vperm.slane %v5502_v52, 5 }
 0x183   : > { %7588 = vst [vmem:[#allocation34_spill] sm:$0xff] %v5703_v5 }
 0x184   : > { %1844 = vst.msk [vmem:[#allocation2 + $0x8] sm:$0xff] %vm963_vm1, %v1836_v55  ;;  %v1675_v38 = vld [vmem:[#allocation2 + $0x38] sm:$0xff]  ;;  %v1829_v55 = vmul.f32 %v5575_v25, %v5638_v60 }
 0x185   : > { %1728 = vst.msk [vmem:[#allocation2 + $0x28] sm:$0xff] %vm963_vm1, %v1721_v47  ;;  %v1692_v47 = vadd.f32 %v1684_v14, %v1675_v38 }
 0x186   : > { %7589 = vst [vmem:[#allocation35_spill] sm:$0xff] %v5712_v39  ;;  %v1715_v39 = vmul.f32 %v5421_v40, %v5693_v48  ;;  %v1820_v58 = vld [vmem:[#allocation2 + $0x10] sm:$0xff]  ;;  %v5749_v40 = vmul.f32 %v5544_v12, %v5693_v48 }
 0x187   : > { %1780 = vst.msk [vmem:[#allocation2 + $0x20] sm:$0xff] %vm963_vm1, %v7590_v31  ;;  %v1837_v29 = vadd.f32 %v1829_v55, %v1820_v58  ;;  %v5769_v55 = vmul.f32 %v5744_v4, %v5577_v3 }
 0x188   : > { %7591 = vst [vmem:[#allocation36_spill] sm:$0xff] %v5718_v51  ;;  %v5785_v51 = vld [vmem:[%s4912_s3 + $0x4] sm:$0x7] }
 0x189   : > { %7592 = vst [vmem:[#allocation37_spill] sm:$0xff] %v5722_v49  ;;  %v1707_v49 = vld [vmem:[#allocation2 + $0x30] sm:$0xff]  ;;  %v5799_v42 = vperm.slane %v5785_v51, 0 }
 0x18a   : > { %7593 = vst [vmem:[#allocation38_spill] sm:$0xff] %v5726_v30  ;;  %v5738_v30 = vsel %vm1753_vm8, %v1745_v57, %v1764_v32  ;;  %v1722_v26 = vadd.f32 %v1715_v39, %v1707_v49  ;;  %v5753_v57 = vmul.f32 %v5603_v62, %v5693_v48  ;;  %v5757_v32 = vmul.f32 %v5497_v44, %v5693_v48 }
 0x18b   : > { %1900 = vst.msk [vmem:[#allocation2] sm:$0x7f] %vm1809_vm4, %v1892_v37  ;;  %v1797_v18 = vmul.f32 %v5494_v10, %v5738_v30  ;;  %v1877_v37 = vrot.slane %v1861_v53, 1  ;;  %v1852_v14 = vld [vmem:[#allocation2 + $0x8] sm:$0x7f]  ;;  %v5762_v39 = vmul.f32 %v5445_v6, %v5693_v48  ;;  %vm2988_vm8 = vcmask 27648  }
 0x18c   : > { %1813 = vst.msk [vmem:[#allocation2 + $0x19] sm:$0x7f] %vm1809_vm4, %v1804_v36  ;;  %v1735_v53 = vld [vmem:[#allocation2 + $0x28] sm:$0xff]  ;;  %v1629_v36 = vld [vmem:[%s4907_s29] sm:$0x1] }
 0x18d   : > { %7594 = vst [vmem:[#allocation39_spill] sm:$0xff] %v5744_v4  ;;  %v1893_v52 = vadd.f32 %v1877_v37, %v1852_v14  ;;  %v1746_v49 = vadd.f32 %v5469_v27, %v1735_v53  ;;  %v5780_v14 = vperm.slane %v1629_v36, 0 }
 0x18e   : > { %1700 = vst.msk [vmem:[#allocation2 + $0x38] sm:$0xff] %vm963_vm1, %v1692_v47  ;;  %v1788_v38 = vld [vmem:[#allocation2 + $0x21] sm:$0x7f]  ;;  %v1862_v47 = vmul.f32 %v5626_v7, %v5638_v60 }
 0x18f   : > { %7595 = vst [vmem:[#allocation40_spill] sm:$0xff] %v5749_v40  ;;  %vm1754_vm9 = vcmp.gt.f32.partialorder %v1746_v49, 0.0  ;;  %v1765_v37 = vmul.f32 %v5480_v13, %v1746_v49 }
 0x190   : > { %7596 = vst [vmem:[#allocation41_spill] sm:$0xff] %v5753_v57 }
 0x191   : > { %1845 = vst.msk [vmem:[#allocation2 + $0x10] sm:$0xff] %vm963_vm1, %v1837_v29  ;;  %v1805_v29 = vadd.f32 %v1797_v18, %v1788_v38  ;;  %v5782_v53 = vsel %vm1754_vm9, %v1746_v49, %v1765_v37 }
 0x192   : > { %1729 = vst.msk [vmem:[#allocation2 + $0x30] sm:$0xff] %vm963_vm1, %v1722_v26  ;;  %v1908_v58 = vld [vmem:[#allocation2] sm:$0xff]  ;;  %v1830_v26 = vmul.f32 %v5575_v25, %v5696_v54  ;;  %v1798_v38 = vmul.f32 %v5494_v10, %v5782_v53 }
 0x193   : > { %7597 = vst [vmem:[#allocation42_spill] sm:$0xff] %v5769_v55  ;;  %v1821_v18 = vld [vmem:[#allocation2 + $0x18] sm:$0xff]  ;;  %v1878_v55 = vrot.slane %v1862_v47, 1  ;;  %v5796_v48 = vadd.f32 %v5780_v14, %v1908_v58 }
 0x194   : > { %1781 = vst.msk [vmem:[#allocation2 + $0x28] sm:$0xff] %vm963_vm1, %v7590_v31 }
 0x195   : > { %1901 = vst.msk [vmem:[#allocation2 + $0x8] sm:$0x7f] %vm1809_vm4, %v1893_v52  ;;  %v1737_v60 = vld [vmem:[#allocation2 + $0x38] sm:$0xff]  ;;  %v1838_v52 = vadd.f32 %v1830_v26, %v1821_v18 }
 0x196   : > { %1814 = vst.msk [vmem:[#allocation2 + $0x21] sm:$0x7f] %vm1809_vm4, %v1805_v29  ;;  %v1748_v29 = vadd.f32 %v5469_v27, %v1737_v60  ;;  %v1831_v60 = vmul.f32 %v5575_v25, %v5738_v30 }
 0x197   : > { %1927 = vst.msk [vmem:[#allocation2] sm:$0xff] %vm963_vm1, %v7590_v31 }
 0x198   : > { %1783 = vst.msk [vmem:[#allocation2 + $0x38] sm:$0xff] %vm963_vm1, %v7590_v31  ;;  %v1853_v36 = vld [vmem:[#allocation2 + $0x10] sm:$0x7f]  ;;  %vm1756_vm10 = vcmp.gt.f32.partialorder %v1748_v29, 0.0  ;;  %v1767_v47 = vmul.f32 %v5480_v13, %v1748_v29 }
 0x199   : > { %v1736_v49 = vld [vmem:[#allocation2 + $0x30] sm:$0xff]  ;;  %1846 = vst.msk [vmem:[#allocation2 + $0x18] sm:$0xff] %vm963_vm1, %v1838_v52  ;;  %v1894_v37 = vadd.f32 %v1878_v55, %v1853_v36  ;;  %v1863_v55 = vmul.f32 %v5626_v7, %v5696_v54  ;;  %v2039_v54 = vmul.f32 %v5799_v42, %v5796_v48 }
 0x19a   : > { %v1747_v5 = vadd.f32 %v5469_v27, %v1736_v49  ;;  %1782 = vst.msk [vmem:[#allocation2 + $0x30] sm:$0xff] %vm963_vm1, %v7590_v31  ;;  %v5811_v52 = vsel %vm1756_vm10, %v1748_v29, %v1767_v47 }
 0x19b   : > { %v1789_v26 = vld [vmem:[#allocation2 + $0x29] sm:$0x7f]  ;;  %1902 = vst.msk [vmem:[#allocation2 + $0x10] sm:$0x7f] %vm1809_vm4, %v1894_v37  ;;  %v1879_v9 = vrot.slane %v1863_v55, 1  ;;  %v1832_v55 = vmul.f32 %v5575_v25, %v5782_v53 }
 0x19c   : > { %v1806_v18 = vadd.f32 %v1798_v38, %v1789_v26  ;;  %v1909_v58 = vld [vmem:[#allocation2 + $0x8] sm:$0xff]  ;;  %vm1755_vm11 = vcmp.gt.f32.partialorder %v1747_v5, 0.0  ;;  %v1766_v27 = vmul.f32 %v5480_v13, %v1747_v5  ;;  %v1800_v38 = vmul.f32 %v5494_v10, %v5811_v52 }
 0x19d   : > { %v1822_v36 = vld [vmem:[#allocation2 + $0x20] sm:$0xff]  ;;  %1928 = vst.msk [vmem:[#allocation2 + $0x8] sm:$0xff] %vm963_vm1, %v7590_v31  ;;  %v5823_v13 = vadd.f32 %v5780_v14, %v1909_v58 }
 0x19e   : > { %1815 = vst.msk [vmem:[#allocation2 + $0x29] sm:$0x7f] %vm1809_vm4, %v1806_v18  ;;  %v1839_v49 = vadd.f32 %v1831_v60, %v1822_v36  ;;  %v2030_v26 = vld [vmem:[#allocation2 + $0x2] sm:$0x3f]  ;;  %v5820_v37 = vsel %vm1755_vm11, %v1747_v5, %v1766_v27  ;;  %v1864_v5 = vmul.f32 %v5626_v7, %v5738_v30 }
 0x19f   : > { %v1791_v29 = vld [vmem:[#allocation2 + $0x39] sm:$0x7f]  ;;  %v1799_v47 = vmul.f32 %v5494_v10, %v5820_v37  ;;  %v2047_v59 = vadd.f32 %v2039_v54, %v2030_v26  ;;  %v2040_v10 = vmul.f32 %v5799_v42, %v5823_v13 }
 0x1a0   : > { %1847 = vst.msk [vmem:[#allocation2 + $0x20] sm:$0xff] %vm963_vm1, %v1839_v49  ;;  %v1808_v18 = vadd.f32 %v1800_v38, %v1791_v29  ;;  %v1854_v60 = vld [vmem:[#allocation2 + $0x18] sm:$0x7f]  ;;  %v5838_v38 = vperm.slane %v5785_v51, 1  ;;  %v1880_v54 = vrot.slane %v1864_v5, 1  ;;  %v1865_v5 = vmul.f32 %v5626_v7, %v5782_v53 }
 0x1a1   : > { %v1790_v36 = vld [vmem:[#allocation2 + $0x31] sm:$0x7f]  ;;  %v1895_v27 = vadd.f32 %v1879_v9, %v1854_v60  ;;  %2055 = vst.msk [vmem:[#allocation2 + $0x2] sm:$0x3f] %vm1955_vm12, %v2047_v59  ;;  %v5842_v9 = vld [vmem:[%s4912_s3] sm:$0x7] }
 0x1a2   : > { %v1807_v58 = vadd.f32 %v1799_v47, %v1790_v36  ;;  %1817 = vst.msk [vmem:[#allocation2 + $0x39] sm:$0x7f] %vm1809_vm4, %v1808_v18  ;;  %v1910_v4 = vld [vmem:[#allocation2 + $0x10] sm:$0xff]  ;;  %v5849_v18 = vperm.slane %v5842_v9, 0  ;;  %v2072_v60 = vmul.f32 %v5838_v38, %v5796_v48 }
 0x1a3   : > { %1903 = vst.msk [vmem:[#allocation2 + $0x18] sm:$0x7f] %vm1809_vm4, %v1895_v27  ;;  %v1834_v27 = vmul.f32 %v5575_v25, %v5811_v52 }
 0x1a4   : > { %v2031_v49 = vld [vmem:[#allocation2 + $0xa] sm:$0x3f]  ;;  %1816 = vst.msk [vmem:[#allocation2 + $0x31] sm:$0x7f] %vm1809_vm4, %v1807_v58 }
 0x1a5   : > { %v1823_v59 = vld [vmem:[#allocation2 + $0x28] sm:$0xff]  ;;  %v2048_v30 = vadd.f32 %v2040_v10, %v2031_v49  ;;  %1929 = vst.msk [vmem:[#allocation2 + $0x10] sm:$0xff] %vm963_vm1, %v7590_v31  ;;  %v5861_v49 = vperm.slane %v5785_v51, 2  ;;  %v1881_v51 = vrot.slane %v1865_v5, 1  ;;  %v1866_v5 = vmul.f32 %v5626_v7, %v5820_v37 }
 0x1a6   : > { %v1840_v26 = vadd.f32 %v1832_v55, %v1823_v59  ;;  %v1833_v59 = vmul.f32 %v5575_v25, %v5820_v37 }
 0x1a7   : > { %v1855_v29 = vld [vmem:[#allocation2 + $0x20] sm:$0x7f]  ;;  %2056 = vst.msk [vmem:[#allocation2 + $0xa] sm:$0x3f] %vm1955_vm12, %v2048_v30  ;;  %v1882_v37 = vrot.slane %v1866_v5, 1 }
 0x1a8   : > { %1848 = vst.msk [vmem:[#allocation2 + $0x28] sm:$0xff] %vm963_vm1, %v1840_v26  ;;  %v1896_v47 = vadd.f32 %v1880_v54, %v1855_v29  ;;  %v2063_v36 = vld [vmem:[#allocation2] sm:$0xff]  ;;  %v1943_v26 = vmul.f32 %v5849_v18, %v5796_v48  ;;  %v2073_v29 = vmul.f32 %v5838_v38, %v5823_v13 }
 0x1a9   : > { %v2080_v58 = vadd.f32 %v2072_v60, %v2063_v36  ;;  %v1825_v10 = vld [vmem:[#allocation2 + $0x38] sm:$0xff] }
 0x1aa   : > { %1904 = vst.msk [vmem:[#allocation2 + $0x20] sm:$0x7f] %vm1809_vm4, %v1896_v47  ;;  %v5858_v55 = vld [vmem:[#allocation2 + $0x18] sm:$0xff]  ;;  %v1842_v30 = vadd.f32 %v1834_v27, %v1825_v10  ;;  %v2105_v27 = vmul.f32 %v5861_v49, %v5796_v48 }
 0x1ab   : > { %1930 = vst.msk [vmem:[#allocation2 + $0x18] sm:$0xff] %vm963_vm1, %v7590_v31  ;;  %v1824_v53 = vld [vmem:[#allocation2 + $0x30] sm:$0xff] }
 0x1ac   : > { %v1936_v54 = vld [vmem:[#allocation2 + $0x12] sm:$0x3f]  ;;  %2088 = vst.msk [vmem:[#allocation2] sm:$0xff] %vm963_vm1, %v2080_v58  ;;  %v1841_v47 = vadd.f32 %v1833_v59, %v1824_v53  ;;  %v1867_v58 = vmul.f32 %v5626_v7, %v5811_v52  ;;  %v1944_v59 = vmul.f32 %v5849_v18, %v5823_v13  ;;  %v2121_v53 = vrot.slane %v2105_v27, 2 }
 0x1ad   : > { %v1949_v60 = vadd.f32 %v1943_v26, %v1936_v54  ;;  %1850 = vst.msk [vmem:[#allocation2 + $0x38] sm:$0xff] %vm963_vm1, %v1842_v30  ;;  %v5888_v30 = vperm.slane %v5842_v9, 1  ;;  %v2106_v52 = vmul.f32 %v5861_v49, %v5823_v13  ;;  %v5895_v7 = vadd.f32 %v5780_v14, %v1910_v4 }
 0x1ae   : > { %v2064_v36 = vld [vmem:[#allocation2 + $0x8] sm:$0xff]  ;;  %1849 = vst.msk [vmem:[#allocation2 + $0x30] sm:$0xff] %vm963_vm1, %v1841_v47  ;;  %v1883_v47 = vrot.slane %v1867_v58, 1  ;;  %v5903_v4 = vperm.slane %v5842_v9, 2 }
 0x1af   : > { %v1856_v25 = vld [vmem:[#allocation2 + $0x28] sm:$0x7f]  ;;  %v2081_v10 = vadd.f32 %v2073_v29, %v2064_v36  ;;  %1956 = vst.msk [vmem:[#allocation2 + $0x12] sm:$0x3f] %vm1955_vm12, %v1949_v60  ;;  %v1969_v36 = vmul.f32 %v5888_v30, %v5796_v48  ;;  %v2041_v56 = vmul.f32 %v5799_v42, %v5895_v7 }
 0x1b0   : > { %v1897_v17 = vadd.f32 %v1881_v51, %v1856_v25  ;;  %v1626_v60 = vld [vmem:[%s4912_s3 + $0x8] sm:$0x7] }
 0x1b1   : > { %v5879_v1 = vld [vmem:[#allocation2 + $0x20] sm:$0xff]  ;;  %2089 = vst.msk [vmem:[#allocation2 + $0x8] sm:$0xff] %vm963_vm1, %v2081_v10 }
 0x1b2   : > { %1905 = vst.msk [vmem:[#allocation2 + $0x28] sm:$0x7f] %vm1809_vm4, %v1897_v17  ;;  %v1937_v26 = vld [vmem:[#allocation2 + $0x1a] sm:$0x3f] }
 0x1b3   : > { %1931 = vst.msk [vmem:[#allocation2 + $0x20] sm:$0xff] %vm963_vm1, %v7590_v31  ;;  %v1950_v54 = vadd.f32 %v1944_v59, %v1937_v26  ;;  %v2096_v29 = vld [vmem:[#allocation2] sm:$0x3f]  ;;  %v2122_v59 = vrot.slane %v2106_v52, 2 }
 0x1b4   : > { %v2137_v17 = vadd.f32 %v2121_v53, %v2096_v29  ;;  %v1858_v51 = vld [vmem:[#allocation2 + $0x38] sm:$0x7f]  ;;  %v5906_v29 = vperm.slane %v1626_v60, 0 }
 0x1b5   : > { %1957 = vst.msk [vmem:[#allocation2 + $0x1a] sm:$0x3f] %vm1955_vm12, %v1950_v54  ;;  %v1857_v25 = vld [vmem:[#allocation2 + $0x30] sm:$0x7f]  ;;  %v1899_v27 = vadd.f32 %v1883_v47, %v1858_v51  ;;  %v1945_v47 = vmul.f32 %v5849_v18, %v5895_v7  ;;  %v5921_v51 = vadd.f32 %v5780_v14, %v5858_v55 }
 0x1b6   : > { %v1962_v10 = vld [vmem:[#allocation2 + $0x10] sm:$0xff]  ;;  %2145 = vst.msk [vmem:[#allocation2] sm:$0x3f] %vm1955_vm12, %v2137_v17  ;;  %v1898_v26 = vadd.f32 %v1882_v37, %v1857_v25  ;;  %v1970_v17 = vmul.f32 %v5888_v30, %v5823_v13  ;;  %v1994_v37 = vmul.f32 %v5903_v4, %v5796_v48  ;;  %v2160_v25 = vmul.f32 %v5906_v29, %v5895_v7 }
 0x1b7   : > { %v1975_v58 = vadd.f32 %v1969_v36, %v1962_v10  ;;  %1907 = vst.msk [vmem:[#allocation2 + $0x38] sm:$0x7f] %vm1809_vm4, %v1899_v27  ;;  %v5927_v48 = vperm.slane %v1626_v60, 1 }
 0x1b8   : > { %v2097_v53 = vld [vmem:[#allocation2 + $0x8] sm:$0x3f]  ;;  %1906 = vst.msk [vmem:[#allocation2 + $0x30] sm:$0x7f] %vm1809_vm4, %v1898_v26 }
 0x1b9   : > { %v1913_v5 = vld [vmem:[#allocation2 + $0x28] sm:$0xff]  ;;  %v2138_v54 = vadd.f32 %v2122_v59, %v2097_v53  ;;  %1981 = vst.msk [vmem:[#allocation2 + $0x10] sm:$0xff] %vm963_vm1, %v1975_v58  ;;  %v2006_v58 = vrot.slane %v1994_v37, 2  ;;  %v5929_v53 = vperm.slane %v1626_v60, 2  ;;  %v1946_v37 = vmul.f32 %v5849_v18, %v5921_v51 }
 0x1ba   : > { %v1938_v52 = vld [vmem:[#allocation2 + $0x22] sm:$0x3f]  ;;  %1932 = vst.msk [vmem:[#allocation2 + $0x28] sm:$0xff] %vm963_vm1, %v7590_v31  ;;  %v2186_v15 = vmul.f32 %v5927_v48, %v5921_v51 }
 0x1bb   : > { %v1951_v9 = vadd.f32 %v1945_v47, %v1938_v52  ;;  %2146 = vst.msk [vmem:[#allocation2 + $0x8] sm:$0x3f] %vm1955_vm12, %v2138_v54  ;;  %v1995_v52 = vmul.f32 %v5903_v4, %v5823_v13 }
 0x1bc   : > { %v1963_v36 = vld [vmem:[#allocation2 + $0x18] sm:$0xff] }
 0x1bd   : > { %1958 = vst.msk [vmem:[#allocation2 + $0x22] sm:$0x3f] %vm1955_vm12, %v1951_v9  ;;  %v1976_v27 = vadd.f32 %v1970_v17, %v1963_v36  ;;  %v2153_v10 = vld [vmem:[#allocation2 + $0x2] sm:$0x3f]  ;;  %v2161_v9 = vmul.f32 %v5906_v29, %v5921_v51 }
 0x1be   : > { %v2166_v59 = vadd.f32 %v2160_v25, %v2153_v10  ;;  %v1915_v26 = vld [vmem:[#allocation2 + $0x38] sm:$0xff] }
 0x1bf   : > { %1982 = vst.msk [vmem:[#allocation2 + $0x18] sm:$0xff] %vm963_vm1, %v1976_v27  ;;  %v1914_v54 = vld [vmem:[#allocation2 + $0x30] sm:$0xff]  ;;  %v1926_v55 = vadd.f32 %v5780_v14, %v1915_v26 }
 0x1c0   : > { %v1987_v47 = vld [vmem:[#allocation2 + $0x10] sm:$0x3f]  ;;  %2172 = vst.msk [vmem:[#allocation2 + $0x2] sm:$0x3f] %vm1955_vm12, %v2166_v59  ;;  %v5938_v17 = vadd.f32 %v5780_v14, %v1914_v54  ;;  %v1971_v59 = vmul.f32 %v5888_v30, %v5895_v7 }
 0x1c1   : > { %v2018_v60 = vadd.f32 %v2006_v58, %v1987_v47  ;;  %1933 = vst.msk [vmem:[#allocation2 + $0x30] sm:$0xff] %vm963_vm1, %v7590_v31  ;;  %v1939_v36 = vld [vmem:[#allocation2 + $0x2a] sm:$0x3f]  ;;  %v5945_v25 = vmul.f32 %v5906_v29, %v1926_v55  ;;  %v5948_v13 = vmul.f32 %v5927_v48, %v1926_v55  ;;  %v5951_v27 = vmul.f32 %v5929_v53, %v1926_v55 }
 0x1c2   : > { %v2154_v10 = vld [vmem:[#allocation2 + $0xa] sm:$0x3f]  ;;  %v1952_v26 = vadd.f32 %v1946_v37, %v1939_v36  ;;  %1934 = vst.msk [vmem:[#allocation2 + $0x38] sm:$0xff] %vm963_vm1, %v7590_v31  ;;  %v5959_v58 = vadd.f32 %v5780_v14, %v5879_v1  ;;  %v5964_v57 = vmul.f32 %v5799_v42, %v5938_v17  ;;  %v5968_v40 = vmul.f32 %v5838_v38, %v5938_v17 }
 0x1c3   : > { %2024 = vst.msk [vmem:[#allocation2 + $0x10] sm:$0x3f] %vm1955_vm12, %v2018_v60  ;;  %v2167_v54 = vadd.f32 %v2161_v9, %v2154_v10  ;;  %v5971_v37 = vadd.f32 %v5780_v14, %v1913_v5  ;;  %v5976_v1 = vmul.f32 %v5861_v49, %v5938_v17  ;;  %v5979_v9 = vmul.f32 %v5799_v42, %v1926_v55 }
 0x1c4   : > { %v1964_v47 = vld [vmem:[#allocation2 + $0x20] sm:$0xff]  ;;  %1959 = vst.msk [vmem:[#allocation2 + $0x2a] sm:$0x3f] %vm1955_vm12, %v1952_v26  ;;  %v2007_v60 = vrot.slane %v1995_v52, 2  ;;  %v5983_v10 = vmul.f32 %v5838_v38, %v1926_v55  ;;  %v5986_v50 = vmul.f32 %v5861_v49, %v1926_v55  ;;  %v2185_v5 = vmul.f32 %v5927_v48, %v5895_v7 }
 0x1c5   : > { %v1977_v36 = vadd.f32 %v1971_v59, %v1964_v47  ;;  %2173 = vst.msk [vmem:[#allocation2 + $0xa] sm:$0x3f] %vm1955_vm12, %v2167_v54  ;;  %v1947_v47 = vmul.f32 %v5849_v18, %v5959_v58  ;;  %v1996_v54 = vmul.f32 %v5903_v4, %v5895_v7  ;;  %v1948_v55 = vmul.f32 %v5849_v18, %v5971_v37 }
 0x1c6   : > { %v1988_v14 = vld [vmem:[#allocation2 + $0x18] sm:$0x3f]  ;;  %v2210_v18 = vmul.f32 %v5929_v53, %v5895_v7 }
 0x1c7   : > { %1983 = vst.msk [vmem:[#allocation2 + $0x20] sm:$0xff] %vm963_vm1, %v1977_v36  ;;  %v2019_v59 = vadd.f32 %v2007_v60, %v1988_v14  ;;  %v2178_v26 = vld [vmem:[#allocation2] sm:$0xff]  ;;  %v1972_v14 = vmul.f32 %v5888_v30, %v5921_v51 }
 0x1c8   : > { %v2191_v52 = vadd.f32 %v2185_v5, %v2178_v26  ;;  %v1940_v20 = vld [vmem:[#allocation2 + $0x32] sm:$0x3f] }
 0x1c9   : > { %2025 = vst.msk [vmem:[#allocation2 + $0x18] sm:$0x3f] %vm1955_vm12, %v2019_v59  ;;  %v1953_v46 = vadd.f32 %v1947_v47, %v1940_v20  ;;  %v1941_v36 = vld [vmem:[#allocation2 + $0x3a] sm:$0x3f]  ;;  %v2008_v20 = vrot.slane %v1996_v54, 2  ;;  %v1997_v54 = vmul.f32 %v5903_v4, %v5921_v51 }
 0x1ca   : > { %v2032_v60 = vld [vmem:[#allocation2 + $0x12] sm:$0x3f]  ;;  %2197 = vst.msk [vmem:[#allocation2] sm:$0xff] %vm963_vm1, %v2191_v52  ;;  %v1954_v5 = vadd.f32 %v1948_v55, %v1941_v36 }
 0x1cb   : > { %v2049_v26 = vadd.f32 %v2041_v56, %v2032_v60  ;;  %v1965_v33 = vld [vmem:[#allocation2 + $0x28] sm:$0xff]  ;;  %1960 = vst.msk [vmem:[#allocation2 + $0x32] sm:$0x3f] %vm1955_vm12, %v1953_v46  ;;  %v2042_v56 = vmul.f32 %v5799_v42, %v5921_v51  ;;  %v2222_v46 = vrot.slane %v2210_v18, 2  ;;  %v2074_v18 = vmul.f32 %v5838_v38, %v5895_v7 }
 0x1cc   : > { %v2179_v59 = vld [vmem:[#allocation2 + $0x8] sm:$0xff]  ;;  %v1978_v47 = vadd.f32 %v1972_v14, %v1965_v33  ;;  %1961 = vst.msk [vmem:[#allocation2 + $0x3a] sm:$0x3f] %vm1955_vm12, %v1954_v5  ;;  %v2211_v14 = vmul.f32 %v5929_v53, %v5921_v51 }
 0x1cd   : > { %2057 = vst.msk [vmem:[#allocation2 + $0x12] sm:$0x3f] %vm1955_vm12, %v2049_v26  ;;  %v2192_v52 = vadd.f32 %v2186_v15, %v2179_v59  ;;  %v1973_v15 = vmul.f32 %v5888_v30, %v5959_v58  ;;  %v1974_v26 = vmul.f32 %v5888_v30, %v5971_v37 }
 0x1ce   : > { %v1989_v2 = vld [vmem:[#allocation2 + $0x20] sm:$0x3f]  ;;  %1984 = vst.msk [vmem:[#allocation2 + $0x28] sm:$0xff] %vm963_vm1, %v1978_v47 }
 0x1cf   : > { %v2020_v55 = vadd.f32 %v2008_v20, %v1989_v2  ;;  %2198 = vst.msk [vmem:[#allocation2 + $0x8] sm:$0xff] %vm963_vm1, %v2192_v52  ;;  %v2009_v52 = vrot.slane %v1997_v54, 2 }
 0x1d0   : > { %v2033_v36 = vld [vmem:[#allocation2 + $0x1a] sm:$0x3f] }
 0x1d1   : > { %v2050_v33 = vadd.f32 %v2042_v56, %v2033_v36  ;;  %v2203_v60 = vld [vmem:[#allocation2] sm:$0x3f]  ;;  %2026 = vst.msk [vmem:[#allocation2 + $0x20] sm:$0x3f] %vm1955_vm12, %v2020_v55 }
 0x1d2   : > { %v2234_v2 = vadd.f32 %v2222_v46, %v2203_v60  ;;  %v1966_v5 = vld [vmem:[#allocation2 + $0x30] sm:$0xff]  ;;  %v2223_v46 = vrot.slane %v2211_v14, 2  ;;  %v2075_v14 = vmul.f32 %v5838_v38, %v5921_v51 }
 0x1d3   : > { %2058 = vst.msk [vmem:[#allocation2 + $0x1a] sm:$0x3f] %vm1955_vm12, %v2050_v33  ;;  %v1979_v59 = vadd.f32 %v1973_v15, %v1966_v5  ;;  %v1967_v20 = vld [vmem:[#allocation2 + $0x38] sm:$0xff]  ;;  %v2043_v33 = vmul.f32 %v5799_v42, %v5959_v58  ;;  %v1998_v15 = vmul.f32 %v5903_v4, %v5959_v58  ;;  %v1999_v5 = vmul.f32 %v5903_v4, %v5971_v37 }
 0x1d4   : > { %v2065_v47 = vld [vmem:[#allocation2 + $0x10] sm:$0xff]  ;;  %2240 = vst.msk [vmem:[#allocation2] sm:$0x3f] %vm1955_vm12, %v2234_v2  ;;  %v1980_v55 = vadd.f32 %v1974_v26, %v1967_v20  ;;  %v2107_v26 = vmul.f32 %v5861_v49, %v5895_v7 }
 0x1d5   : > { %v2082_v56 = vadd.f32 %v2074_v18, %v2065_v47  ;;  %v1990_v36 = vld [vmem:[#allocation2 + $0x28] sm:$0x3f]  ;;  %1985 = vst.msk [vmem:[#allocation2 + $0x30] sm:$0xff] %vm963_vm1, %v1979_v59 }
 0x1d6   : > { %v2021_v60 = vadd.f32 %v2009_v52, %v1990_v36  ;;  %1986 = vst.msk [vmem:[#allocation2 + $0x38] sm:$0xff] %vm963_vm1, %v1980_v55  ;;  %v2204_v30 = vld [vmem:[#allocation2 + $0x8] sm:$0x3f]  ;;  %v2010_v52 = vrot.slane %v1998_v15, 2  ;;  %v2011_v55 = vrot.slane %v1999_v5, 2 }
 0x1d7   : > { %2090 = vst.msk [vmem:[#allocation2 + $0x10] sm:$0xff] %vm963_vm1, %v2082_v56  ;;  %v2235_v2 = vadd.f32 %v2223_v46, %v2204_v30  ;;  %v2123_v56 = vrot.slane %v2107_v26, 2 }
 0x1d8   : > { %v2034_v54 = vld [vmem:[#allocation2 + $0x22] sm:$0x3f]  ;;  %2027 = vst.msk [vmem:[#allocation2 + $0x28] sm:$0x3f] %vm1955_vm12, %v2021_v60  ;;  %v2044_v60 = vmul.f32 %v5799_v42, %v5971_v37  ;;  %v2490_v42 = vmul.f32 %v5445_v6, %v5407_v63 }
 0x1d9   : > { %v2051_v18 = vadd.f32 %v2043_v33, %v2034_v54  ;;  %2241 = vst.msk [vmem:[#allocation2 + $0x8] sm:$0x3f] %vm1955_vm12, %v2235_v2  ;;  %v2108_v33 = vmul.f32 %v5861_v49, %v5921_v51 }
 0x1da   : > { %v2066_v59 = vld [vmem:[#allocation2 + $0x18] sm:$0xff] }
 0x1db   : > { %v2083_v20 = vadd.f32 %v2075_v14, %v2066_v59  ;;  %v2246_v47 = vld [vmem:[#allocation2] sm:$0xff]  ;;  %2059 = vst.msk [vmem:[#allocation2 + $0x22] sm:$0x3f] %vm1955_vm12, %v2051_v18  ;;  %v2076_v14 = vmul.f32 %v5838_v38, %v5959_v58  ;;  %v2124_v26 = vrot.slane %v2108_v33, 2 }
 0x1dc   : > { %4754 = vmatmul.msk.f32.vlgmr.msra.gmra.mxu1 %vm963_vm1, %v2246_v47  ;;  %2397 = vst.msk [vmem:[#allocation2] sm:$0xff] %vm963_vm1, %v7590_v31  ;;  %v1991_v4 = vld [vmem:[#allocation2 + $0x30] sm:$0x3f] }
 0x1dd   : > { %2091 = vst.msk [vmem:[#allocation2 + $0x18] sm:$0xff] %vm963_vm1, %v2083_v20  ;;  %v2022_v7 = vadd.f32 %v2010_v52, %v1991_v4  ;;  %v1992_v36 = vld [vmem:[#allocation2 + $0x38] sm:$0x3f] }
 0x1de   : > { %v2098_v46 = vld [vmem:[#allocation2 + $0x10] sm:$0x3f]  ;;  %v2023_v30 = vadd.f32 %v2011_v55, %v1992_v36  ;;  %v2162_v55 = vmul.f32 %v5906_v29, %v5959_v58 }
 0x1df   : > { %v2139_v15 = vadd.f32 %v2123_v56, %v2098_v46  ;;  %v2035_v2 = vld [vmem:[#allocation2 + $0x2a] sm:$0x3f]  ;;  %2028 = vst.msk [vmem:[#allocation2 + $0x30] sm:$0x3f] %vm1955_vm12, %v2022_v7  ;;  %v2109_v56 = vmul.f32 %v5861_v49, %v5959_v58 }
 0x1e0   : > { %v2052_v54 = vadd.f32 %v2044_v60, %v2035_v2  ;;  %2029 = vst.msk [vmem:[#allocation2 + $0x38] sm:$0x3f] %vm1955_vm12, %v2023_v30  ;;  %v2247_v5 = vld [vmem:[#allocation2 + $0x8] sm:$0xff]  ;;  %v2460_v60 = vmul.f32 %v5448_v22, %v5407_v63  ;;  %v2077_v2 = vmul.f32 %v5838_v38, %v5971_v37 }
 0x1e1   : > { %2147 = vst.msk [vmem:[#allocation2 + $0x10] sm:$0x3f] %vm1955_vm12, %v2139_v15 }
 0x1e2   : > { %2398 = vst.msk [vmem:[#allocation2 + $0x8] sm:$0xff] %vm963_vm1, %v7590_v31  ;;  %v2067_v51 = vld [vmem:[#allocation2 + $0x20] sm:$0xff] }
 0x1e3   : > { %v2481_v18 = vld [vmem:[#allocation2] sm:$0xff]  ;;  %v2084_v59 = vadd.f32 %v2076_v14, %v2067_v51  ;;  %2060 = vst.msk [vmem:[#allocation2 + $0x2a] sm:$0x3f] %vm1955_vm12, %v2052_v54  ;;  %v2163_v51 = vmul.f32 %v5906_v29, %v5971_v37 }
 0x1e4   : > { %v2099_v20 = vld [vmem:[#allocation2 + $0x18] sm:$0x3f]  ;;  %v2498_v47 = vadd.f32 %v2490_v42, %v2481_v18  ;;  %4755 = vmatmul.msk.f32.gmra.mxu1 %vm963_vm1, %v2247_v5  ;;  %v2522_v42 = vmul.f32 %v5497_v44, %v5419_v34 }
 0x1e5   : > { %v2140_v52 = vadd.f32 %v2124_v26, %v2099_v20  ;;  %2092 = vst.msk [vmem:[#allocation2 + $0x20] sm:$0xff] %vm963_vm1, %v2084_v59 }
 0x1e6   : > { %2506 = vst.msk [vmem:[#allocation2] sm:$0xff] %vm963_vm1, %v2498_v47  ;;  %v2036_v4 = vld [vmem:[#allocation2 + $0x32] sm:$0x3f]  ;;  %v2110_v47 = vmul.f32 %v5861_v49, %v5971_v37 }
 0x1e7   : > { %2148 = vst.msk [vmem:[#allocation2 + $0x18] sm:$0x3f] %vm1955_vm12, %v2140_v52  ;;  %v2053_v7 = vadd.f32 %v5964_v57, %v2036_v4  ;;  %v2037_v36 = vld [vmem:[#allocation2 + $0x3a] sm:$0x3f]  ;;  %v2125_v57 = vrot.slane %v2109_v56, 2  ;;  %v2187_v4 = vmul.f32 %v5927_v48, %v5959_v58 }
 0x1e8   : > { %v2155_v46 = vld [vmem:[#allocation2 + $0x12] sm:$0x3f]  ;;  %v2054_v30 = vadd.f32 %v5979_v9, %v2037_v36  ;;  %v2126_v49 = vrot.slane %v2110_v47, 2 }
 0x1e9   : > { %v2168_v33 = vadd.f32 %v2162_v55, %v2155_v46  ;;  %v2452_v15 = vld [vmem:[#allocation2 + $0x8] sm:$0xff]  ;;  %2061 = vst.msk [vmem:[#allocation2 + $0x32] sm:$0x3f] %vm1955_vm12, %v2053_v7  ;;  %v2491_v7 = vmul.f32 %v5445_v6, %v5419_v34  ;;  %v2550_v6 = vmul.f32 %v5544_v12, %v5438_v61 }
 0x1ea   : > { %v2467_v54 = vadd.f32 %v2460_v60, %v2452_v15  ;;  %v2068_v5 = vld [vmem:[#allocation2 + $0x28] sm:$0xff]  ;;  %2062 = vst.msk [vmem:[#allocation2 + $0x3a] sm:$0x3f] %vm1955_vm12, %v2054_v30 }
 0x1eb   : > { %2174 = vst.msk [vmem:[#allocation2 + $0x12] sm:$0x3f] %vm1955_vm12, %v2168_v33  ;;  %v2085_v14 = vadd.f32 %v2077_v2, %v2068_v5  ;;  %v2212_v5 = vmul.f32 %v5929_v53, %v5959_v58 }
 0x1ec   : > { %2474 = vst.msk [vmem:[#allocation2 + $0x8] sm:$0xff] %vm963_vm1, %v2467_v54  ;;  %v2100_v9 = vld [vmem:[#allocation2 + $0x20] sm:$0x3f] }
 0x1ed   : > { %v2514_v38 = vld [vmem:[#allocation2] sm:$0xff]  ;;  %v2141_v26 = vadd.f32 %v2125_v57, %v2100_v9  ;;  %2093 = vst.msk [vmem:[#allocation2 + $0x28] sm:$0xff] %vm963_vm1, %v2085_v14  ;;  %v2188_v57 = vmul.f32 %v5927_v48, %v5971_v37 }
 0x1ee   : > { %v2156_v18 = vld [vmem:[#allocation2 + $0x1a] sm:$0x3f]  ;;  %v2529_v59 = vadd.f32 %v2522_v42, %v2514_v38 }
 0x1ef   : > { %v2169_v20 = vadd.f32 %v2163_v51, %v2156_v18  ;;  %2149 = vst.msk [vmem:[#allocation2 + $0x20] sm:$0x3f] %vm1955_vm12, %v2141_v26  ;;  %v2127_v51 = vrot.slane %v5976_v1, 2  ;;  %v2128_v26 = vrot.slane %v5986_v50, 2  ;;  %v2224_v18 = vrot.slane %v2212_v5, 2 }
 0x1f0   : > { %2536 = vst.msk [vmem:[#allocation2] sm:$0xff] %vm963_vm1, %v2529_v59  ;;  %v2069_v52 = vld [vmem:[#allocation2 + $0x30] sm:$0xff]  ;;  %v2213_v1 = vmul.f32 %v5929_v53, %v5971_v37  ;;  %v2189_v50 = vmul.f32 %v5927_v48, %v5938_v17 }
 0x1f1   : > { %2175 = vst.msk [vmem:[#allocation2 + $0x1a] sm:$0x3f] %vm1955_vm12, %v2169_v20  ;;  %v2086_v55 = vadd.f32 %v5968_v40, %v2069_v52  ;;  %v2070_v56 = vld [vmem:[#allocation2 + $0x38] sm:$0xff]  ;;  %v2164_v40 = vmul.f32 %v5906_v29, %v5938_v17  ;;  %v2523_v20 = vmul.f32 %v5497_v44, %v5438_v61 }
 0x1f2   : > { %v2180_v36 = vld [vmem:[#allocation2 + $0x10] sm:$0xff]  ;;  %v2087_v46 = vadd.f32 %v5983_v10, %v2070_v56 }
 0x1f3   : > { %v2482_v60 = vld [vmem:[#allocation2 + $0x8] sm:$0xff]  ;;  %v2193_v30 = vadd.f32 %v2187_v4, %v2180_v36  ;;  %2094 = vst.msk [vmem:[#allocation2 + $0x30] sm:$0xff] %vm963_vm1, %v2086_v55  ;;  %v2574_v36 = vmul.f32 %v5603_v62, %v5475_v0 }
 0x1f4   : > { %v2499_v33 = vadd.f32 %v2491_v7, %v2482_v60  ;;  %v2101_v15 = vld [vmem:[#allocation2 + $0x28] sm:$0x3f]  ;;  %2095 = vst.msk [vmem:[#allocation2 + $0x38] sm:$0xff] %vm963_vm1, %v2087_v46  ;;  %v2225_v60 = vrot.slane %v2213_v1, 2 }
 0x1f5   : > { %2199 = vst.msk [vmem:[#allocation2 + $0x10] sm:$0xff] %vm963_vm1, %v2193_v30  ;;  %v2142_v2 = vadd.f32 %v2126_v49, %v2101_v15 }
 0x1f6   : > { %2507 = vst.msk [vmem:[#allocation2 + $0x8] sm:$0xff] %vm963_vm1, %v2499_v33  ;;  %v2157_v10 = vld [vmem:[#allocation2 + $0x22] sm:$0x3f] }
 0x1f7   : > { %v2543_v54 = vld [vmem:[#allocation2] sm:$0xff]  ;;  %v2170_v14 = vadd.f32 %v2164_v40, %v2157_v10  ;;  %2150 = vst.msk [vmem:[#allocation2 + $0x28] sm:$0x3f] %vm1955_vm12, %v2142_v2  ;;  %v2214_v40 = vmul.f32 %v5929_v53, %v5938_v17 }
 0x1f8   : > { %v2556_v42 = vadd.f32 %v2550_v6, %v2543_v54  ;;  %v2181_v9 = vld [vmem:[#allocation2 + $0x18] sm:$0xff]  ;;  %v2551_v6 = vmul.f32 %v5544_v12, %v5475_v0  ;;  %v2395_v54 = vld [vmem:[%s4942_s6] sm:$0x1] }
 0x1f9   : > { %v2194_v29 = vadd.f32 %v2188_v57, %v2181_v9  ;;  %2176 = vst.msk [vmem:[#allocation2 + $0x22] sm:$0x3f] %vm1955_vm12, %v2170_v14  ;;  %v4828_v12 = vld [vmem:[%s4932_s24] sm:$0x7f]  ;;  %v2226_v9 = vrot.slane %v2214_v40, 2 }
 0x1fa   : > { %2562 = vst.msk [vmem:[#allocation2] sm:$0xff] %vm963_vm1, %v2556_v42  ;;  %v2102_v38 = vld [vmem:[#allocation2 + $0x30] sm:$0x3f]  ;;  %v6150_v14 = vperm.slane %v4828_v12, 1  ;;  %v6152_v42 = vperm.slane %v4828_v12, 0 }
 0x1fb   : > { %2200 = vst.msk [vmem:[#allocation2 + $0x18] sm:$0xff] %vm963_vm1, %v2194_v29  ;;  %v2143_v58 = vadd.f32 %v2127_v51, %v2102_v38  ;;  %v2103_v59 = vld [vmem:[#allocation2 + $0x38] sm:$0x3f]  ;;  %v6156_v51 = vld [vmem:[%s4947_s12] sm:$0x7f]  ;;  %v6158_v38 = vperm.slane %v2395_v54, 0 }
 0x1fc   : > { %v2205_v47 = vld [vmem:[#allocation2 + $0x10] sm:$0x3f]  ;;  %v2144_v52 = vadd.f32 %v2128_v26, %v2103_v59  ;;  %v6201_v12 = vperm.slane %v6156_v51, 1 }
 0x1fd   : > { %v2515_v4 = vld [vmem:[#allocation2 + $0x8] sm:$0xff]  ;;  %v2236_v55 = vadd.f32 %v2224_v18, %v2205_v47  ;;  %2151 = vst.msk [vmem:[#allocation2 + $0x30] sm:$0x3f] %vm1955_vm12, %v2143_v58  ;;  %v6168_v47 = vperm.slane %v6156_v51, 0 }
 0x1fe   : > { %v2530_v56 = vadd.f32 %v2523_v20, %v2515_v4  ;;  %v2158_v7 = vld [vmem:[#allocation2 + $0x2a] sm:$0x3f]  ;;  %2152 = vst.msk [vmem:[#allocation2 + $0x38] sm:$0x3f] %vm1955_vm12, %v2144_v52  ;;  %v2434_v52 = vmul.f32 %v6150_v14, %v5407_v63 }
 0x1ff   : > { %2242 = vst.msk [vmem:[#allocation2 + $0x10] sm:$0x3f] %vm1955_vm12, %v2236_v55  ;;  %v2171_v44 = vadd.f32 %v5945_v25, %v2158_v7  ;;  %v2394_v25 = vld [vmem:[%s4937_s30] sm:$0x1]  ;;  %v2416_v7 = vmul.f32 %v6152_v42, %v5527_v19 }
 0x200   : > { %2537 = vst.msk [vmem:[#allocation2 + $0x8] sm:$0xff] %vm963_vm1, %v2530_v56  ;;  %v2182_v37 = vld [vmem:[#allocation2 + $0x20] sm:$0xff]  ;;  %v6145_v57 = vperm.slane %v2394_v25, 0 }
 0x201   : > { %v2568_v46 = vld [vmem:[#allocation2] sm:$0xff]  ;;  %v2195_v30 = vadd.f32 %v2189_v50, %v2182_v37  ;;  %2177 = vst.msk [vmem:[#allocation2 + $0x2a] sm:$0x3f] %vm1955_vm12, %v2171_v44  ;;  %v2575_v37 = vmul.f32 %v5603_v62, %v5527_v19  ;;  %v2412_v62 = vmul.f32 %v6152_v42, %v5407_v63 }
 0x202   : > { %v2579_v49 = vadd.f32 %v2574_v36, %v2568_v46  ;;  %v2206_v33 = vld [vmem:[#allocation2 + $0x18] sm:$0x3f] }
 0x203   : > { %v2237_v15 = vadd.f32 %v2225_v60, %v2206_v33  ;;  %2201 = vst.msk [vmem:[#allocation2 + $0x20] sm:$0xff] %vm963_vm1, %v2195_v30 }
 0x204   : > { %2584 = vst.msk [vmem:[#allocation2] sm:$0xff] %vm963_vm1, %v2579_v49  ;;  %v6129_v48 = vld [vmem:[#allocation2 + $0x30] sm:$0xff]  ;;  %v2227_v49 = vrot.slane %v5951_v27, 2  ;;  %v2438_v27 = vmul.f32 %v6150_v14, %v5527_v19 }
 0x205   : > { %2243 = vst.msk [vmem:[#allocation2 + $0x18] sm:$0x3f] %vm1955_vm12, %v2237_v15  ;;  %v6135_v2 = vld [vmem:[#allocation2 + $0x38] sm:$0xff] }
 0x206   : > { %v2248_v10 = vld [vmem:[#allocation2 + $0x10] sm:$0xff]  ;;  %2403 = vst.msk [vmem:[#allocation2 + $0x30] sm:$0xff] %vm963_vm1, %v7590_v31 }
 0x207   : > { %v2544_v5 = vld [vmem:[#allocation2 + $0x8] sm:$0xff]  ;;  %4756 = vmatmul.msk.f32.gmra.mxu1 %vm963_vm1, %v2248_v10  ;;  %2399 = vst.msk [vmem:[#allocation2 + $0x10] sm:$0xff] %vm963_vm1, %v7590_v31 }
 0x208   : > { %v2557_v53 = vadd.f32 %v2551_v6, %v2544_v5  ;;  %v2183_v17 = vld [vmem:[#allocation2 + $0x28] sm:$0xff]  ;;  %2404 = vst.msk [vmem:[#allocation2 + $0x38] sm:$0xff] %vm963_vm1, %v7590_v31 }
 0x209   : > { %v2196_v29 = vadd.f32 %v5948_v13, %v2183_v17  ;;  %v2415_v13 = vmul.f32 %v6152_v42, %v5475_v0 }
 0x20a   : > { %2563 = vst.msk [vmem:[#allocation2 + $0x8] sm:$0xff] %vm963_vm1, %v2557_v53  ;;  %v2207_v26 = vld [vmem:[#allocation2 + $0x20] sm:$0x3f]  ;;  %v2461_v53 = vmul.f32 %v5448_v22, %v5419_v34 }
 0x20b   : > { %v2589_v18 = vld [vmem:[#allocation2] sm:$0xff]  ;;  %v2238_v58 = vadd.f32 %v2226_v9, %v2207_v26  ;;  %2202 = vst.msk [vmem:[#allocation2 + $0x28] sm:$0xff] %vm963_vm1, %v2196_v29  ;;  %v2439_v26 = vmul.f32 %v6150_v14, %v5577_v3 }
 0x20c   : > { %v2600_v59 = vadd.f32 %v6145_v57, %v2589_v18  ;;  %2635 = vst.msk [vmem:[#allocation2] sm:$0xff] %vm963_vm1, %v7590_v31  ;;  %v2249_v20 = vld [vmem:[#allocation2 + $0x18] sm:$0xff] }
 0x20d   : > { %2400 = vst.msk [vmem:[#allocation2 + $0x18] sm:$0xff] %vm963_vm1, %v7590_v31  ;;  %v2409_v4 = vld [vmem:[#allocation2 + $0x30] sm:$0xff] }
 0x20e   : > { %vm2608_vm13 = vcmp.gt.f32.partialorder %v2600_v59, 0.0  ;;  %v2619_v55 = vmul.f32 %v6158_v38, %v2600_v59  ;;  %v2427_v1 = vld [vmem:[#allocation2 + $0x10] sm:$0xff]  ;;  %2244 = vst.msk [vmem:[#allocation2 + $0x20] sm:$0x3f] %vm1955_vm12, %v2238_v58  ;;  %v2420_v56 = vadd.f32 %v2415_v13, %v2409_v4 }
 0x20f   : > { %v2440_v50 = vadd.f32 %v2434_v52, %v2427_v1  ;;  %4757 = vmatmul.msk.f32.gmra.mxu1 %vm963_vm1, %v2249_v20  ;;  %v2410_v44 = vld [vmem:[#allocation2 + $0x38] sm:$0xff]  ;;  %v2435_v1 = vmul.f32 %v6150_v14, %v5419_v34 }
 0x210   : > { %v6179_v36 = vsel %vm2608_vm13, %v2600_v59, %v2619_v55  ;;  %2425 = vst.msk [vmem:[#allocation2 + $0x30] sm:$0xff] %vm963_vm1, %v2420_v56  ;;  %v2421_v46 = vadd.f32 %v2416_v7, %v2410_v44  ;;  %v2413_v44 = vmul.f32 %v6152_v42, %v5419_v34 }
 0x211   : > { %v2652_v60 = vmul.f32 %v6168_v47, %v6179_v36  ;;  %v2569_v30 = vld [vmem:[#allocation2 + $0x8] sm:$0xff]  ;;  %2446 = vst.msk [vmem:[#allocation2 + $0x10] sm:$0xff] %vm963_vm1, %v2440_v50  ;;  %v2686_v13 = vmul.f32 %v6201_v12, %v6179_v36 }
 0x212   : > { %v2580_v33 = vadd.f32 %v2575_v37, %v2569_v30  ;;  %v2208_v15 = vld [vmem:[#allocation2 + $0x28] sm:$0x3f]  ;;  %2426 = vst.msk [vmem:[#allocation2 + $0x38] sm:$0xff] %vm963_vm1, %v2421_v46 }
 0x213   : > { %v2643_v25 = vld [vmem:[#allocation2 + $0x3] sm:$0x1f]  ;;  %v2239_v40 = vadd.f32 %v2227_v49, %v2208_v15  ;;  %v2465_v49 = vmul.f32 %v5448_v22, %v5577_v3 }
 0x214   : > { %v2660_v6 = vadd.f32 %v2652_v60, %v2643_v25  ;;  %2585 = vst.msk [vmem:[#allocation2 + $0x8] sm:$0xff] %vm963_vm1, %v2580_v33  ;;  %v2406_v10 = vld [vmem:[#allocation2 + $0x18] sm:$0xff]  ;;  %v6232_v25 = vperm.slane %v6156_v51, 2 }
 0x215   : > { %v2417_v54 = vadd.f32 %v2412_v62, %v2406_v10  ;;  %v2250_v5 = vld [vmem:[#allocation2 + $0x20] sm:$0xff]  ;;  %2245 = vst.msk [vmem:[#allocation2 + $0x28] sm:$0x3f] %vm1955_vm12, %v2239_v40 }
 0x216   : > { %2669 = vst.msk [vmem:[#allocation2 + $0x3] sm:$0x1f] %vm2668_vm14, %v2660_v6 }
 0x217   : > { %2422 = vst.msk [vmem:[#allocation2 + $0x18] sm:$0xff] %vm963_vm1, %v2417_v54  ;;  %4758 = vmatmul.msk.f32.gmra.mxu1 %vm963_vm1, %v2250_v5  ;;  %v2431_v17 = vld [vmem:[#allocation2 + $0x30] sm:$0xff]  ;;  %v2414_v54 = vmul.f32 %v6152_v42, %v5438_v61 }
 0x218   : > { %v2453_v9 = vld [vmem:[#allocation2 + $0x10] sm:$0xff]  ;;  %2401 = vst.msk [vmem:[#allocation2 + $0x20] sm:$0xff] %vm963_vm1, %v7590_v31  ;;  %v2444_v29 = vadd.f32 %v2438_v27, %v2431_v17 }
 0x219   : > { %v2468_v18 = vadd.f32 %v2461_v53, %v2453_v9  ;;  %v2432_v58 = vld [vmem:[#allocation2 + $0x38] sm:$0xff]  ;;  %v2466_v53 = vmul.f32 %v5448_v22, %v5636_v28  ;;  %v2436_v22 = vmul.f32 %v6150_v14, %v5438_v61 }
 0x21a   : > { %2450 = vst.msk [vmem:[#allocation2 + $0x30] sm:$0xff] %vm963_vm1, %v2444_v29  ;;  %v2445_v59 = vadd.f32 %v2439_v26, %v2432_v58  ;;  %v2719_v29 = vmul.f32 %v6232_v25, %v6179_v36 }
 0x21b   : > { %v2590_v20 = vld [vmem:[#allocation2 + $0x8] sm:$0xff]  ;;  %2475 = vst.msk [vmem:[#allocation2 + $0x10] sm:$0xff] %vm963_vm1, %v2468_v18 }
 0x21c   : > { %v2601_v52 = vadd.f32 %v6145_v57, %v2590_v20  ;;  %2636 = vst.msk [vmem:[#allocation2 + $0x8] sm:$0xff] %vm963_vm1, %v7590_v31  ;;  %v2251_v4 = vld [vmem:[#allocation2 + $0x28] sm:$0xff] }
 0x21d   : > { %v2677_v55 = vld [vmem:[#allocation2 + $0x2] sm:$0x3f]  ;;  %2402 = vst.msk [vmem:[#allocation2 + $0x28] sm:$0xff] %vm963_vm1, %v7590_v31 }
 0x21e   : > { %v2694_v56 = vadd.f32 %v2686_v13, %v2677_v55  ;;  %vm2609_vm15 = vcmp.gt.f32.partialorder %v2601_v52, 0.0  ;;  %v2620_v7 = vmul.f32 %v6158_v38, %v2601_v52  ;;  %v2428_v50 = vld [vmem:[#allocation2 + $0x18] sm:$0xff]  ;;  %2451 = vst.msk [vmem:[#allocation2 + $0x38] sm:$0xff] %vm963_vm1, %v2445_v59 }
 0x21f   : > { %v2441_v37 = vadd.f32 %v2435_v1, %v2428_v50  ;;  %v2407_v46 = vld [vmem:[#allocation2 + $0x20] sm:$0xff]  ;;  %4759 = vmatmul.msk.f32.gmra.mxu1 %vm963_vm1, %v2251_v4 }
 0x220   : > { %2702 = vst.msk [vmem:[#allocation2 + $0x2] sm:$0x3f] %vm1955_vm12, %v2694_v56  ;;  %v6224_v60 = vsel %vm2609_vm15, %v2601_v52, %v2620_v7  ;;  %v2418_v30 = vadd.f32 %v2413_v44, %v2407_v46  ;;  %v6255_v52 = vperm.slane %v6156_v51, 3  ;;  %v2437_v56 = vmul.f32 %v6150_v14, %v5475_v0 }
 0x221   : > { %v2653_v33 = vmul.f32 %v6168_v47, %v6224_v60  ;;  %2447 = vst.msk [vmem:[#allocation2 + $0x18] sm:$0xff] %vm963_vm1, %v2441_v37  ;;  %v2457_v15 = vld [vmem:[#allocation2 + $0x30] sm:$0xff] }
 0x222   : > { %v2483_v62 = vld [vmem:[#allocation2 + $0x10] sm:$0xff]  ;;  %2423 = vst.msk [vmem:[#allocation2 + $0x20] sm:$0xff] %vm963_vm1, %v2418_v30  ;;  %v2472_v40 = vadd.f32 %v2465_v49, %v2457_v15  ;;  %v6274_v30 = vperm.slane %v6156_v51, 4 }
 0x223   : > { %v2644_v6 = vld [vmem:[#allocation2 + $0xb] sm:$0x1f]  ;;  %v2500_v10 = vadd.f32 %v5459_v8, %v2483_v62 }
 0x224   : > { %v2661_v5 = vadd.f32 %v2653_v33, %v2644_v6  ;;  %v2408_v27 = vld [vmem:[#allocation2 + $0x28] sm:$0xff]  ;;  %2479 = vst.msk [vmem:[#allocation2 + $0x30] sm:$0xff] %vm963_vm1, %v2472_v40  ;;  %v2785_v62 = vmul.f32 %v6274_v30, %v6179_v36  ;;  %v2720_v40 = vmul.f32 %v6232_v25, %v6224_v60 }
 0x225   : > { %2508 = vst.msk [vmem:[#allocation2 + $0x10] sm:$0xff] %vm963_vm1, %v2500_v10  ;;  %v2419_v17 = vadd.f32 %v2414_v54, %v2408_v27  ;;  %v2458_v9 = vld [vmem:[#allocation2 + $0x38] sm:$0xff] }
 0x226   : > { %2670 = vst.msk [vmem:[#allocation2 + $0xb] sm:$0x1f] %vm2668_vm14, %v2661_v5  ;;  %v2473_v8 = vadd.f32 %v2466_v53, %v2458_v9 }
 0x227   : > { %v2710_v26 = vld [vmem:[#allocation2 + $0x1] sm:$0x7f]  ;;  %2424 = vst.msk [vmem:[#allocation2 + $0x28] sm:$0xff] %vm963_vm1, %v2419_v17  ;;  %4760 = vmatmul.msk.f32.gmra.mxu1 %vm963_vm1, %v6129_v48  ;;  %v2687_v48 = vmul.f32 %v6201_v12, %v6224_v60  ;;  %v2801_v17 = vrot.slane %v2785_v62, 1 }
 0x228   : > { %v2727_v42 = vadd.f32 %v2719_v29, %v2710_v26  ;;  %v2454_v18 = vld [vmem:[#allocation2 + $0x18] sm:$0xff]  ;;  %2480 = vst.msk [vmem:[#allocation2 + $0x38] sm:$0xff] %vm963_vm1, %v2473_v8 }
 0x229   : > { %v2469_v58 = vadd.f32 %v5463_v23, %v2454_v18  ;;  %v2429_v59 = vld [vmem:[#allocation2 + $0x20] sm:$0xff] }
 0x22a   : > { %2735 = vst.msk [vmem:[#allocation2 + $0x1] sm:$0x7f] %vm1809_vm4, %v2727_v42  ;;  %v2442_v20 = vadd.f32 %v2436_v22, %v2429_v59 }
 0x22b   : > { %2476 = vst.msk [vmem:[#allocation2 + $0x18] sm:$0xff] %vm963_vm1, %v2469_v58  ;;  %v2487_v13 = vld [vmem:[#allocation2 + $0x30] sm:$0xff] }
 0x22c   : > { %v2516_v4 = vld [vmem:[#allocation2 + $0x10] sm:$0xff]  ;;  %2448 = vst.msk [vmem:[#allocation2 + $0x20] sm:$0xff] %vm963_vm1, %v2442_v20  ;;  %v2504_v55 = vadd.f32 %v5691_v21, %v2487_v13  ;;  %v2752_v21 = vmul.f32 %v6255_v52, %v6179_v36  ;;  %v2753_v20 = vmul.f32 %v6255_v52, %v6224_v60 }
 0x22d   : > { %v2678_v1 = vld [vmem:[#allocation2 + $0xa] sm:$0x3f]  ;;  %v2531_v23 = vadd.f32 %v5508_v16, %v2516_v4  ;;  %v7598_v4 = vld [vmem:[#allocation22_spill] sm:$0xff] }
 0x22e   : > { %v2695_v7 = vadd.f32 %v2687_v48, %v2678_v1  ;;  %v2430_v50 = vld [vmem:[#allocation2 + $0x28] sm:$0xff]  ;;  %2512 = vst.msk [vmem:[#allocation2 + $0x30] sm:$0xff] %vm963_vm1, %v2504_v55 }
 0x22f   : > { %2538 = vst.msk [vmem:[#allocation2 + $0x10] sm:$0xff] %vm963_vm1, %v2531_v23  ;;  %v2443_v44 = vadd.f32 %v2437_v56, %v2430_v50  ;;  %4761 = vmatmul.msk.f32.gmra.mxu1 %vm963_vm1, %v6135_v2  ;;  %v2488_v37 = vld [vmem:[#allocation2 + $0x38] sm:$0xff] }
 0x230   : > { %2703 = vst.msk [vmem:[#allocation2 + $0xa] sm:$0x3f] %vm1955_vm12, %v2695_v7  ;;  %v2505_v16 = vadd.f32 %v5762_v39, %v2488_v37  ;;  %v7599_v7 = vld [vmem:[#allocation23_spill] sm:$0xff] }
 0x231   : > { %v2743_v46 = vld [vmem:[#allocation2] sm:$0xff]  ;;  %2449 = vst.msk [vmem:[#allocation2 + $0x28] sm:$0xff] %vm963_vm1, %v2443_v44 }
 0x232   : > { %v2760_v14 = vadd.f32 %v2752_v21, %v2743_v46  ;;  %v2484_v49 = vld [vmem:[#allocation2 + $0x18] sm:$0xff]  ;;  %2513 = vst.msk [vmem:[#allocation2 + $0x38] sm:$0xff] %vm963_vm1, %v2505_v16 }
 0x233   : > { %v2501_v2 = vadd.f32 %v5512_v24, %v2484_v49  ;;  %v2455_v33 = vld [vmem:[#allocation2 + $0x20] sm:$0xff] }
 0x234   : > { %2768 = vst.msk [vmem:[#allocation2] sm:$0xff] %vm963_vm1, %v2760_v14  ;;  %v2470_v15 = vadd.f32 %v5516_v11, %v2455_v33  ;;  %v2786_v33 = vmul.f32 %v6274_v30, %v6224_v60 }
 0x235   : > { %2509 = vst.msk [vmem:[#allocation2 + $0x18] sm:$0xff] %vm963_vm1, %v2501_v2  ;;  %v2520_v39 = vld [vmem:[#allocation2 + $0x30] sm:$0xff]  ;;  %v6327_v2 = vperm.slane %v6156_v51, 6 }
 0x236   : > { %v2545_v6 = vld [vmem:[#allocation2 + $0x10] sm:$0xff]  ;;  %2477 = vst.msk [vmem:[#allocation2 + $0x20] sm:$0xff] %vm963_vm1, %v2470_v15  ;;  %v2535_v10 = vadd.f32 %v5757_v32, %v2520_v39 }
 0x237   : > { %v2711_v24 = vld [vmem:[#allocation2 + $0x9] sm:$0x7f]  ;;  %v2558_v54 = vadd.f32 %v5556_v35, %v2545_v6  ;;  %v6295_v35 = vperm.slane %v6156_v51, 5  ;;  %v7600_v39 = vld [vmem:[#allocation21_spill] sm:$0xff]  ;;  %v2899_v51 = vmul.f32 %v6327_v2, %v6179_v36 }
 0x238   : > { %v2728_v5 = vadd.f32 %v2720_v40, %v2711_v24  ;;  %v2456_v27 = vld [vmem:[#allocation2 + $0x28] sm:$0xff]  ;;  %2542 = vst.msk [vmem:[#allocation2 + $0x30] sm:$0xff] %vm963_vm1, %v2535_v10 }
 0x239   : > { %2564 = vst.msk [vmem:[#allocation2 + $0x10] sm:$0xff] %vm963_vm1, %v2558_v54  ;;  %v2471_v11 = vadd.f32 %v5564_v45, %v2456_v27  ;;  %v2596_v53 = vld [vmem:[#allocation2 + $0x38] sm:$0xff]  ;;  %v2842_v59 = vmul.f32 %v6295_v35, %v6179_v36  ;;  %v7601_v6 = vld [vmem:[#allocation20_spill] sm:$0xff] }
 0x23a   : > { %2736 = vst.msk [vmem:[#allocation2 + $0x9] sm:$0x7f] %vm1809_vm4, %v2728_v5  ;;  %v2607_v9 = vadd.f32 %v6145_v57, %v2596_v53  ;;  %v2802_v5 = vrot.slane %v2786_v33, 1  ;;  %v6367_v33 = vld [vmem:[%s7603_s15] ss:$0 sm:$0xff]  ;;  %s7637_s15 = sld [smem:[#allocation14_spill]] }
 0x23b   : > { %v2776_v29 = vld [vmem:[#allocation2] sm:$0x7f]  ;;  %2478 = vst.msk [vmem:[#allocation2 + $0x28] sm:$0xff] %vm963_vm1, %v2471_v11  ;;  %v2858_v37 = vrot.slane %v2842_v59, 2 }
 0x23c   : > { %v2817_v32 = vadd.f32 %v2801_v17, %v2776_v29  ;;  %v2517_v8 = vld [vmem:[#allocation2 + $0x18] sm:$0xff]  ;;  %vm2615_vm2 = vcmp.gt.f32.partialorder %v2607_v9, 0.0  ;;  %v2626_v26 = vmul.f32 %v6158_v38, %v2607_v9  ;;  %2642 = vst.msk [vmem:[#allocation2 + $0x38] sm:$0xff] %vm963_vm1, %v7590_v31 }
 0x23d   : > { %v2532_v45 = vadd.f32 %v5552_v41, %v2517_v8  ;;  %v2485_v42 = vld [vmem:[#allocation2 + $0x20] sm:$0xff] }
 0x23e   : > { %2825 = vst.msk [vmem:[#allocation2] sm:$0x7f] %vm1809_vm4, %v2817_v32  ;;  %v2502_v18 = vadd.f32 %v5560_v43, %v2485_v42  ;;  %v6303_v22 = vsel %vm2615_vm2, %v2607_v9, %v2626_v26  ;;  %v7602_v32 = vld [vmem:[#allocation29_spill] sm:$0xff] }
 0x23f   : > { %2539 = vst.msk [vmem:[#allocation2 + $0x18] sm:$0xff] %vm963_vm1, %v2532_v45  ;;  %v2595_v58 = vld [vmem:[#allocation2 + $0x30] sm:$0xff]  ;;  %v2659_v48 = vmul.f32 %v6168_v47, %v6303_v22  ;;  %v2693_v29 = vmul.f32 %v6201_v12, %v6303_v22  ;;  %v2915_v45 = vrot.slane %v2899_v51, 3 }
 0x240   : > { %v2570_v13 = vld [vmem:[#allocation2 + $0x10] sm:$0xff]  ;;  %2510 = vst.msk [vmem:[#allocation2 + $0x20] sm:$0xff] %vm963_vm1, %v2502_v18  ;;  %v2606_v41 = vadd.f32 %v6145_v57, %v2595_v58 }
 0x241   : > { %v2744_v43 = vld [vmem:[#allocation2 + $0x8] sm:$0xff]  ;;  %v2581_v55 = vadd.f32 %v7598_v4, %v2570_v13  ;;  %2641 = vst.msk [vmem:[#allocation2 + $0x30] sm:$0xff] %vm963_vm1, %v7590_v31  ;;  %v7604_v4 = vld [vmem:[#allocation31_spill] sm:$0xff] }
 0x242   : > { %v2761_v1 = vadd.f32 %v2753_v20, %v2744_v43  ;;  %v2486_v23 = vld [vmem:[#allocation2 + $0x28] sm:$0xff]  ;;  %vm2614_vm3 = vcmp.gt.f32.partialorder %v2606_v41, 0.0  ;;  %v2625_v56 = vmul.f32 %v6158_v38, %v2606_v41  ;;  %v2843_v20 = vmul.f32 %v6295_v35, %v6224_v60 }
 0x243   : > { %2586 = vst.msk [vmem:[#allocation2 + $0x10] sm:$0xff] %vm963_vm1, %v2581_v55  ;;  %v2503_v50 = vadd.f32 %v7599_v7, %v2486_v23  ;;  %v2650_v44 = vld [vmem:[#allocation2 + $0x3b] sm:$0x1f] }
 0x244   : > { %2769 = vst.msk [vmem:[#allocation2 + $0x8] sm:$0xff] %vm963_vm1, %v2761_v1  ;;  %v6321_v21 = vsel %vm2614_vm3, %v2606_v41, %v2625_v56  ;;  %v2667_v16 = vadd.f32 %v2659_v48, %v2650_v44  ;;  %v7606_v1 = vld [vmem:[#allocation30_spill] sm:$0xff]  ;;  %v2859_v44 = vrot.slane %v2843_v20, 2 }
 0x245   : > { %v2833_v46 = vld [vmem:[#allocation2] sm:$0x3f]  ;;  %2511 = vst.msk [vmem:[#allocation2 + $0x28] sm:$0xff] %vm963_vm1, %v2503_v50  ;;  %v2658_v14 = vmul.f32 %v6168_v47, %v6321_v21  ;;  %v2692_v56 = vmul.f32 %v6201_v12, %v6321_v21 }
 0x246   : > { %v2874_v49 = vadd.f32 %v2858_v37, %v2833_v46  ;;  %v2546_v15 = vld [vmem:[#allocation2 + $0x18] sm:$0xff]  ;;  %2676 = vst.msk [vmem:[#allocation2 + $0x3b] sm:$0x1f] %vm2668_vm14, %v2667_v16 }
 0x247   : > { %v2559_v62 = vadd.f32 %v7600_v39, %v2546_v15  ;;  %v2518_v40 = vld [vmem:[#allocation2 + $0x20] sm:$0xff]  ;;  %v7609_v39 = vld [vmem:[#allocation40_spill] sm:$0xff] }
 0x248   : > { %2882 = vst.msk [vmem:[#allocation2] sm:$0x3f] %vm1955_vm12, %v2874_v49  ;;  %v2533_v10 = vadd.f32 %v7601_v6, %v2518_v40  ;;  %v2649_v24 = vld [vmem:[#allocation2 + $0x33] sm:$0x1f]  ;;  %v2726_v49 = vmul.f32 %v6232_v25, %v6303_v22  ;;  %v2396_v15 = vld [vmem:[%s7605_s16] sm:$0x1]  ;;  %v2900_v6 = vmul.f32 %v6327_v2, %v6224_v60 }
 0x249   : > { %2565 = vst.msk [vmem:[#allocation2 + $0x18] sm:$0xff] %vm963_vm1, %v2559_v62  ;;  %v2666_v54 = vadd.f32 %v2658_v14, %v2649_v24  ;;  %v6376_v24 = vld [vmem:[%s7607_s18] ss:$0 sm:$0xff]  ;;  %s4782_s16 = sshll.u32 %s7639_s10, 4 }
 0x24a   : > { %v2591_v27 = vld [vmem:[#allocation2 + $0x10] sm:$0xff]  ;;  %2540 = vst.msk [vmem:[#allocation2 + $0x20] sm:$0xff] %vm963_vm1, %v2533_v10  ;;  %v2916_v60 = vrot.slane %v2900_v6, 3  ;;  %s902_s18 = scalar_lea.vmem %s5022_s4, %s4782_s16 }
 0x24b   : > { %v2777_v11 = vld [vmem:[#allocation2 + $0x8] sm:$0x7f]  ;;  %v2602_v53 = vadd.f32 %v6145_v57, %v2591_v27  ;;  %2637 = vst.msk [vmem:[#allocation2 + $0x10] sm:$0xff] %vm963_vm1, %v7590_v31 }
 0x24c   : > { %v2818_v17 = vadd.f32 %v2802_v5, %v2777_v11  ;;  %v2519_v9 = vld [vmem:[#allocation2 + $0x28] sm:$0xff]  ;;  %2675 = vst.msk [vmem:[#allocation2 + $0x33] sm:$0x1f] %vm2668_vm14, %v2666_v54  ;;  %v6379_v5 = vperm.slane %v2396_v15, 0  ;;  %v6384_v11 = vld [vmem:[%s7608_s22 + $0x4] sm:$0x7] }
 0x24d   : > { %vm2610_vm5 = vcmp.gt.f32.partialorder %v2602_v53, 0.0  ;;  %v2621_v36 = vmul.f32 %v6158_v38, %v2602_v53  ;;  %v2534_v8 = vadd.f32 %v7602_v32, %v2519_v9  ;;  %v2684_v26 = vld [vmem:[#allocation2 + $0x3a] sm:$0x3f] }
 0x24e   : > { %2826 = vst.msk [vmem:[#allocation2 + $0x8] sm:$0x7f] %vm1809_vm4, %v2818_v17  ;;  %v2701_v42 = vadd.f32 %v2693_v29, %v2684_v26  ;;  %v2725_v26 = vmul.f32 %v6232_v25, %v6321_v21 }
 0x24f   : > { %v2890_v18 = vld [vmem:[#allocation2] sm:$0x1f]  ;;  %v6348_v58 = vsel %vm2610_vm5, %v2602_v53, %v2621_v36  ;;  %2541 = vst.msk [vmem:[#allocation2 + $0x28] sm:$0xff] %vm963_vm1, %v2534_v8 }
 0x250   : > { %v2931_v59 = vadd.f32 %v2915_v45, %v2890_v18  ;;  %v2654_v13 = vmul.f32 %v6168_v47, %v6348_v58  ;;  %v2571_v41 = vld [vmem:[#allocation2 + $0x18] sm:$0xff]  ;;  %2709 = vst.msk [vmem:[#allocation2 + $0x3a] sm:$0x3f] %vm1955_vm12, %v2701_v42  ;;  %v2688_v53 = vmul.f32 %v6201_v12, %v6348_v58  ;;  %v6400_v42 = vperm.slane %v6384_v11, 0 }
 0x251   : > { %v2547_v48 = vld [vmem:[#allocation2 + $0x20] sm:$0xff]  ;;  %v2582_v55 = vadd.f32 %v7604_v4, %v2571_v41  ;;  %v2721_v6 = vmul.f32 %v6232_v25, %v6348_v58 }
 0x252   : > { %2939 = vst.msk [vmem:[#allocation2] sm:$0x1f] %vm2668_vm14, %v2931_v59  ;;  %v2645_v43 = vld [vmem:[#allocation2 + $0x13] sm:$0x1f]  ;;  %v2560_v23 = vadd.f32 %v7606_v1, %v2547_v48 }
 0x253   : > { %v2662_v7 = vadd.f32 %v2654_v13, %v2645_v43  ;;  %v2683_v50 = vld [vmem:[#allocation2 + $0x32] sm:$0x3f]  ;;  %2587 = vst.msk [vmem:[#allocation2 + $0x18] sm:$0xff] %vm963_vm1, %v2582_v55 }
 0x254   : > { %v2700_v37 = vadd.f32 %v2692_v56, %v2683_v50  ;;  %2566 = vst.msk [vmem:[#allocation2 + $0x20] sm:$0xff] %vm963_vm1, %v2560_v23  ;;  %v7610_v59 = vld [vmem:[#allocation41_spill] sm:$0xff]  ;;  %v2759_v23 = vmul.f32 %v6255_v52, %v6303_v22 }
 0x255   : > { %v2834_v16 = vld [vmem:[#allocation2 + $0x8] sm:$0x3f]  ;;  %2671 = vst.msk [vmem:[#allocation2 + $0x13] sm:$0x1f] %vm2668_vm14, %v2662_v7 }
 0x256   : > { %v2875_v46 = vadd.f32 %v2859_v44, %v2834_v16  ;;  %v2548_v14 = vld [vmem:[#allocation2 + $0x28] sm:$0xff]  ;;  %2708 = vst.msk [vmem:[#allocation2 + $0x32] sm:$0x3f] %vm1955_vm12, %v2700_v37 }
 0x257   : > { %v2561_v62 = vadd.f32 %v7609_v39, %v2548_v14  ;;  %v2717_v40 = vld [vmem:[#allocation2 + $0x39] sm:$0x7f] }
 0x258   : > { %2883 = vst.msk [vmem:[#allocation2 + $0x8] sm:$0x3f] %vm1955_vm12, %v2875_v46  ;;  %v2734_v10 = vadd.f32 %v2726_v49, %v2717_v40 }
 0x259   : > { %2567 = vst.msk [vmem:[#allocation2 + $0x28] sm:$0xff] %vm963_vm1, %v2561_v62  ;;  %v2303_v54 = vpop.f32.mrf.mxu1  ;;  %v2947_v51 = vld [vmem:[#allocation2] sm:$0xff] }
 0x25a   : > { %2742 = vst.msk [vmem:[#allocation2 + $0x39] sm:$0x7f] %vm1809_vm4, %v2734_v10  ;;  %v2304_v27 = vadd.f32 %v6367_v33, %v2303_v54  ;;  %v2592_v17 = vld [vmem:[#allocation2 + $0x18] sm:$0xff]  ;;  %v6397_v45 = vadd.f32 %v6379_v5, %v2947_v51 }
 0x25b   : > { %2966 = vst.msk [vmem:[#allocation2] sm:$0xff] %vm963_vm1, %v7590_v31  ;;  %v2603_v29 = vadd.f32 %v6145_v57, %v2592_v17  ;;  %v2572_v8 = vld [vmem:[#allocation2 + $0x20] sm:$0xff] }
 0x25c   : > { %v2679_v9 = vld [vmem:[#allocation2 + $0x12] sm:$0x3f]  ;;  %2638 = vst.msk [vmem:[#allocation2 + $0x18] sm:$0xff] %vm963_vm1, %v7590_v31  ;;  %vm2328_vm6 = vcmp.gt.f32.partialorder %v2304_v27, 0.0  ;;  %v2339_v36 = vmul.f32 %v6376_v24, %v2304_v27  ;;  %v2583_v20 = vadd.f32 %v7610_v59, %v2572_v8  ;;  %v3048_v37 = vmul.f32 %v6400_v42, %v6397_v45 }
 0x25d   : > { %v2696_v32 = vadd.f32 %v2688_v53, %v2679_v9  ;;  %vm2611_vm7 = vcmp.gt.f32.partialorder %v2603_v29, 0.0  ;;  %v2622_v18 = vmul.f32 %v6158_v38, %v2603_v29  ;;  %v2716_v13 = vld [vmem:[#allocation2 + $0x31] sm:$0x7f]  ;;  %v6440_v8 = vperm.slane %v6384_v11, 1 }
 0x25e   : > { %v2347_v41 = vsel %vm2328_vm6, %v2304_v27, %v2339_v36  ;;  %v2733_v43 = vadd.f32 %v2725_v26, %v2716_v13  ;;  %2588 = vst.msk [vmem:[#allocation2 + $0x20] sm:$0xff] %vm963_vm1, %v2583_v20  ;;  %v2792_v27 = vmul.f32 %v6274_v30, %v6303_v22 }
 0x25f   : > { %v2891_v48 = vld [vmem:[#allocation2 + $0x8] sm:$0x1f]  ;;  %2704 = vst.msk [vmem:[#allocation2 + $0x12] sm:$0x3f] %vm1955_vm12, %v2696_v32  ;;  %2355 = vxpose.xlu0.b32.start [1/8] (short) (narrow) %v2347_v41, 8  ;;  %v6405_v55 = vsel %vm2611_vm7, %v2603_v29, %v2622_v18  ;;  %v2758_v32 = vmul.f32 %v6255_v52, %v6321_v21 }
 0x260   : > { %v2932_v4 = vadd.f32 %v2916_v60, %v2891_v48  ;;  %v2594_v1 = vld [vmem:[#allocation2 + $0x28] sm:$0xff]  ;;  %v2655_v56 = vmul.f32 %v6168_v47, %v6405_v55  ;;  %2741 = vst.msk [vmem:[#allocation2 + $0x31] sm:$0x7f] %vm1809_vm4, %v2733_v43  ;;  %v2808_v59 = vrot.slane %v2792_v27, 1  ;;  %v2689_v41 = vmul.f32 %v6201_v12, %v6405_v55 }
 0x261   : > { %v2605_v7 = vadd.f32 %v6145_v57, %v2594_v1  ;;  %2640 = vst.msk [vmem:[#allocation2 + $0x28] sm:$0xff] %vm963_vm1, %v7590_v31  ;;  %v2750_v50 = vld [vmem:[#allocation2 + $0x38] sm:$0xff]  ;;  %v2306_v44 = vpop.f32.mrf.mxu1 }
 0x262   : > { %2940 = vst.msk [vmem:[#allocation2 + $0x8] sm:$0x1f] %vm2668_vm14, %v2932_v4  ;;  %v2767_v16 = vadd.f32 %v2759_v23, %v2750_v50  ;;  %v2307_v46 = vadd.f32 %v6367_v33, %v2306_v44  ;;  %v3039_v14 = vld [vmem:[#allocation2 + $0x4] sm:$0xf]  ;;  %v3081_v23 = vmul.f32 %v6440_v8, %v6397_v45  ;;  %v2754_v50 = vmul.f32 %v6255_v52, %v6348_v58 }
 0x263   : > { %v2646_v49 = vld [vmem:[#allocation2 + $0x1b] sm:$0x1f]  ;;  %vm2613_vm9 = vcmp.gt.f32.partialorder %v2605_v7, 0.0  ;;  %v2624_v15 = vmul.f32 %v6158_v38, %v2605_v7  ;;  %v3056_v39 = vadd.f32 %v3048_v37, %v3039_v14  ;;  %v2791_v44 = vmul.f32 %v6274_v30, %v6321_v21 }
 0x264   : > { %v2663_v62 = vadd.f32 %v2655_v56, %v2646_v49  ;;  %2775 = vst.msk [vmem:[#allocation2 + $0x38] sm:$0xff] %vm963_vm1, %v2767_v16  ;;  %vm2329_vm10 = vcmp.gt.f32.partialorder %v2307_v46, 0.0  ;;  %v2340_v40 = vmul.f32 %v6376_v24, %v2307_v46  ;;  %v2849_v14 = vmul.f32 %v6295_v35, %v6303_v22 }
 0x265   : > { %v6425_v10 = vsel %vm2613_vm9, %v2605_v7, %v2624_v15  ;;  %3064 = vst.msk [vmem:[#allocation2 + $0x4] sm:$0xf] %vm2988_vm8, %v3056_v39  ;;  %v2593_v60 = vld [vmem:[#allocation2 + $0x20] sm:$0xff] }
 0x266   : > { %v2712_v54 = vld [vmem:[#allocation2 + $0x11] sm:$0x7f]  ;;  %2672 = vst.msk [vmem:[#allocation2 + $0x1b] sm:$0x1f] %vm2668_vm14, %v2663_v62  ;;  %v2657_v51 = vmul.f32 %v6168_v47, %v6425_v10  ;;  %v2348_v53 = vsel %vm2329_vm10, %v2307_v46, %v2340_v40  ;;  %v2604_v29 = vadd.f32 %v6145_v57, %v2593_v60  ;;  %v6464_v46 = vperm.slane %v6384_v11, 2 }
 0x267   : > { %v2729_v17 = vadd.f32 %v2721_v6, %v2712_v54  ;;  %2356 = vxpose.xlu0.b32.cont [2/8] (short) (narrow) %v2348_v53, 8  ;;  %2639 = vst.msk [vmem:[#allocation2 + $0x20] sm:$0xff] %vm963_vm1, %v7590_v31  ;;  %v2749_v18 = vld [vmem:[#allocation2 + $0x30] sm:$0xff]  ;;  %v2691_v39 = vmul.f32 %v6201_v12, %v6425_v10  ;;  %v2807_v54 = vrot.slane %v2791_v44, 1  ;;  %v2865_v53 = vrot.slane %v2849_v14, 2 }
 0x268   : > { %v2648_v9 = vld [vmem:[#allocation2 + $0x2b] sm:$0x1f]  ;;  %vm2612_vm11 = vcmp.gt.f32.partialorder %v2604_v29, 0.0  ;;  %v2623_v20 = vmul.f32 %v6158_v38, %v2604_v29  ;;  %v2766_v57 = vadd.f32 %v2758_v32, %v2749_v18  ;;  %v2787_v60 = vmul.f32 %v6274_v30, %v6348_v58 }
 0x269   : > { %2737 = vst.msk [vmem:[#allocation2 + $0x11] sm:$0x7f] %vm1809_vm4, %v2729_v17  ;;  %v2665_v36 = vadd.f32 %v2657_v51, %v2648_v9  ;;  %v2948_v26 = vld [vmem:[#allocation2 + $0x8] sm:$0xff]  ;;  %v3114_v51 = vmul.f32 %v6464_v46, %v6397_v45  ;;  %vm3735_vm10 = vcmask 24576  }
 0x26a   : > { %2967 = vst.msk [vmem:[#allocation2 + $0x8] sm:$0xff] %vm963_vm1, %v7590_v31  ;;  %v6448_v43 = vsel %vm2612_vm11, %v2604_v29, %v2623_v20  ;;  %v6456_v56 = vadd.f32 %v6379_v5, %v2948_v26 }
 0x26b   : > { %2674 = vst.msk [vmem:[#allocation2 + $0x2b] sm:$0x1f] %vm2668_vm14, %v2665_v36  ;;  %v2783_v13 = vld [vmem:[#allocation2 + $0x38] sm:$0x7f]  ;;  %v2656_v38 = vmul.f32 %v6168_v47, %v6448_v43  ;;  %v2722_v36 = vmul.f32 %v6232_v25, %v6405_v55  ;;  %v3130_v18 = vrot.slane %v3114_v51, 4  ;;  %v2690_v20 = vmul.f32 %v6201_v12, %v6448_v43 }
 0x26c   : > { %v2824_v48 = vadd.f32 %v2808_v59, %v2783_v13  ;;  %v3072_v4 = vld [vmem:[#allocation2] sm:$0xff]  ;;  %2774 = vst.msk [vmem:[#allocation2 + $0x30] sm:$0xff] %vm963_vm1, %v2766_v57  ;;  %v3049_v40 = vmul.f32 %v6400_v42, %v6456_v56  ;;  %v2803_v13 = vrot.slane %v2787_v60, 1  ;;  %v3082_v44 = vmul.f32 %v6440_v8, %v6456_v56 }
 0x26d   : > { %v2680_v1 = vld [vmem:[#allocation2 + $0x1a] sm:$0x3f]  ;;  %v3089_v16 = vadd.f32 %v3081_v23, %v3072_v4  ;;  %v3115_v51 = vmul.f32 %v6464_v46, %v6456_v56 }
 0x26e   : > { %v2697_v7 = vadd.f32 %v2689_v41, %v2680_v1  ;;  %2832 = vst.msk [vmem:[#allocation2 + $0x38] sm:$0x7f] %vm1809_vm4, %v2824_v48  ;;  %v2647_v37 = vld [vmem:[#allocation2 + $0x23] sm:$0x1f]  ;;  %v2848_v41 = vmul.f32 %v6295_v35, %v6321_v21  ;;  %v2906_v1 = vmul.f32 %v6327_v2, %v6303_v22 }
 0x26f   : > { %v2664_v49 = vadd.f32 %v2656_v38, %v2647_v37  ;;  %3097 = vst.msk [vmem:[#allocation2] sm:$0xff] %vm963_vm1, %v3089_v16 }
 0x270   : > { %v2745_v47 = vld [vmem:[#allocation2 + $0x10] sm:$0xff]  ;;  %2705 = vst.msk [vmem:[#allocation2 + $0x1a] sm:$0x3f] %vm1955_vm12, %v2697_v7  ;;  %v2724_v7 = vmul.f32 %v6232_v25, %v6425_v10  ;;  %v2864_v16 = vrot.slane %v2848_v41, 2  ;;  %v2922_v22 = vrot.slane %v2906_v1, 3 }
 0x271   : > { %v2762_v15 = vadd.f32 %v2754_v50, %v2745_v47  ;;  %v3040_v62 = vld [vmem:[#allocation2 + $0xc] sm:$0xf]  ;;  %2673 = vst.msk [vmem:[#allocation2 + $0x23] sm:$0x1f] %vm2668_vm14, %v2664_v49 }
 0x272   : > { %v2682_v6 = vld [vmem:[#allocation2 + $0x2a] sm:$0x3f]  ;;  %v3057_v27 = vadd.f32 %v3049_v40, %v3040_v62 }
 0x273   : > { %2770 = vst.msk [vmem:[#allocation2 + $0x10] sm:$0xff] %vm963_vm1, %v2762_v15  ;;  %v2699_v11 = vadd.f32 %v2691_v39, %v2682_v6  ;;  %v2782_v17 = vld [vmem:[#allocation2 + $0x30] sm:$0x7f]  ;;  %v2844_v15 = vmul.f32 %v6295_v35, %v6348_v58  ;;  %v2755_v6 = vmul.f32 %v6255_v52, %v6405_v55 }
 0x274   : > { %v2823_v29 = vadd.f32 %v2807_v54, %v2782_v17  ;;  %3065 = vst.msk [vmem:[#allocation2 + $0xc] sm:$0xf] %vm2988_vm8, %v3057_v27  ;;  %v2723_v54 = vmul.f32 %v6232_v25, %v6448_v43  ;;  %v2905_v17 = vmul.f32 %v6327_v2, %v6321_v21 }
 0x275   : > { %2707 = vst.msk [vmem:[#allocation2 + $0x2a] sm:$0x3f] %vm1955_vm12, %v2699_v11  ;;  %v2840_v9 = vld [vmem:[#allocation2 + $0x38] sm:$0x3f] }
 0x276   : > { %v2881_v32 = vadd.f32 %v2865_v53, %v2840_v9  ;;  %2831 = vst.msk [vmem:[#allocation2 + $0x30] sm:$0x7f] %vm1809_vm4, %v2823_v29  ;;  %v3105_v57 = vld [vmem:[#allocation2] sm:$0xf]  ;;  %v2860_v53 = vrot.slane %v2844_v15, 2  ;;  %v2921_v21 = vrot.slane %v2905_v17, 3 }
 0x277   : > { %v2713_v26 = vld [vmem:[#allocation2 + $0x19] sm:$0x7f]  ;;  %v3146_v4 = vadd.f32 %v3130_v18, %v3105_v57 }
 0x278   : > { %v2730_v59 = vadd.f32 %v2722_v36, %v2713_v26  ;;  %2889 = vst.msk [vmem:[#allocation2 + $0x38] sm:$0x3f] %vm1955_vm12, %v2881_v32  ;;  %v2681_v48 = vld [vmem:[#allocation2 + $0x22] sm:$0x3f]  ;;  %v2757_v26 = vmul.f32 %v6255_v52, %v6425_v10 }
 0x279   : > { %v2698_v38 = vadd.f32 %v2690_v20, %v2681_v48  ;;  %3154 = vst.msk [vmem:[#allocation2] sm:$0xf] %vm2988_vm8, %v3146_v4  ;;  %v2788_v20 = vmul.f32 %v6274_v30, %v6405_v55 }
 0x27a   : > { %2738 = vst.msk [vmem:[#allocation2 + $0x19] sm:$0x7f] %vm1809_vm4, %v2730_v59  ;;  %v2778_v23 = vld [vmem:[#allocation2 + $0x10] sm:$0x7f]  ;;  %v3131_v59 = vrot.slane %v3115_v51, 4 }
 0x27b   : > { %v2819_v12 = vadd.f32 %v2803_v13, %v2778_v23  ;;  %2706 = vst.msk [vmem:[#allocation2 + $0x22] sm:$0x3f] %vm1955_vm12, %v2698_v38  ;;  %v3073_v47 = vld [vmem:[#allocation2 + $0x8] sm:$0xff]  ;;  %v2901_v23 = vmul.f32 %v6327_v2, %v6348_v58  ;;  %v3233_v51 = vld [vmem:[%s7611_s23] sm:$0xf] }
 0x27c   : > { %v2715_v50 = vld [vmem:[#allocation2 + $0x29] sm:$0x7f]  ;;  %v3090_v14 = vadd.f32 %v3082_v44, %v3073_v47  ;;  %4762 = vmatpush.msk.msra.mxu2 %vm988_vm0, %v3233_v51 }
 0x27d   : > { %v2732_v37 = vadd.f32 %v2724_v7, %v2715_v50  ;;  %2827 = vst.msk [vmem:[#allocation2 + $0x10] sm:$0x7f] %vm1809_vm4, %v2819_v12  ;;  %v2839_v49 = vld [vmem:[#allocation2 + $0x30] sm:$0x3f]  ;;  %v2804_v7 = vrot.slane %v2788_v20, 1  ;;  %v2790_v12 = vmul.f32 %v6274_v30, %v6425_v10 }
 0x27e   : > { %v2880_v62 = vadd.f32 %v2864_v16, %v2839_v49  ;;  %3098 = vst.msk [vmem:[#allocation2 + $0x8] sm:$0xff] %vm963_vm1, %v3090_v14  ;;  %v2756_v16 = vmul.f32 %v6255_v52, %v6448_v43  ;;  %v2917_v14 = vrot.slane %v2901_v23, 3 }
 0x27f   : > { %2740 = vst.msk [vmem:[#allocation2 + $0x29] sm:$0x7f] %vm1809_vm4, %v2732_v37  ;;  %v2897_v39 = vld [vmem:[#allocation2 + $0x38] sm:$0x1f] }
 0x280   : > { %v2938_v40 = vadd.f32 %v2922_v22, %v2897_v39  ;;  %2888 = vst.msk [vmem:[#allocation2 + $0x30] sm:$0x3f] %vm1955_vm12, %v2880_v62  ;;  %v2806_v39 = vrot.slane %v2790_v12, 1 }
 0x281   : > { %v2746_v11 = vld [vmem:[#allocation2 + $0x18] sm:$0xff] }
 0x282   : > { %2946 = vst.msk [vmem:[#allocation2 + $0x38] sm:$0x1f] %vm2668_vm14, %v2938_v40  ;;  %v2763_v27 = vadd.f32 %v2755_v6, %v2746_v11  ;;  %v2714_v60 = vld [vmem:[#allocation2 + $0x21] sm:$0x7f]  ;;  %v2845_v6 = vmul.f32 %v6295_v35, %v6405_v55 }
 0x283   : > { %v2731_v29 = vadd.f32 %v2723_v54, %v2714_v60 }
 0x284   : > { %v2309_v9 = vpop.f32.mrf.mxu1  ;;  %v2835_v36 = vld [vmem:[#allocation2 + $0x10] sm:$0x3f]  ;;  %2771 = vst.msk [vmem:[#allocation2 + $0x18] sm:$0xff] %vm963_vm1, %v2763_v27  ;;  %v2789_v27 = vmul.f32 %v6274_v30, %v6448_v43  ;;  %v2861_v60 = vrot.slane %v2845_v6, 2 }
 0x285   : > { %v2310_v32 = vadd.f32 %v6367_v33, %v2309_v9  ;;  %v2876_v25 = vadd.f32 %v2860_v53, %v2835_v36  ;;  %2739 = vst.msk [vmem:[#allocation2 + $0x21] sm:$0x7f] %vm1809_vm4, %v2731_v29  ;;  %v3106_v41 = vld [vmem:[#allocation2 + $0x8] sm:$0xf]  ;;  %v2847_v29 = vmul.f32 %v6295_v35, %v6425_v10 }
 0x286   : > { %v2748_v18 = vld [vmem:[#allocation2 + $0x28] sm:$0xff]  ;;  %v3147_v48 = vadd.f32 %v3131_v59, %v3106_v41  ;;  %v2805_v36 = vrot.slane %v2789_v27, 1  ;;  %v2903_v27 = vmul.f32 %v6327_v2, %v6448_v43 }
 0x287   : > { %vm2330_vm13 = vcmp.gt.f32.partialorder %v2310_v32, 0.0  ;;  %v2341_v57 = vmul.f32 %v6376_v24, %v2310_v32  ;;  %v2765_v13 = vadd.f32 %v2757_v26, %v2748_v18  ;;  %2884 = vst.msk [vmem:[#allocation2 + $0x10] sm:$0x3f] %vm1955_vm12, %v2876_v25  ;;  %v2896_v4 = vld [vmem:[#allocation2 + $0x30] sm:$0x1f] }
 0x288   : > { %v2937_v38 = vadd.f32 %v2921_v21, %v2896_v4  ;;  %3155 = vst.msk [vmem:[#allocation2 + $0x8] sm:$0xf] %vm2988_vm8, %v3147_v48  ;;  %v6557_v18 = vld [vmem:[%s7608_s22] sm:$0x7]  ;;  %v2863_v21 = vrot.slane %v2847_v29, 2  ;;  %v2902_v4 = vmul.f32 %v6327_v2, %v6405_v55 }
 0x289   : > { %v2349_v1 = vsel %vm2330_vm13, %v2310_v32, %v2341_v57  ;;  %2773 = vst.msk [vmem:[#allocation2 + $0x28] sm:$0xff] %vm963_vm1, %v2765_v13  ;;  %v6530_v44 = vld [vmem:[#allocation2 + $0x38] sm:$0xff]  ;;  %v6562_v41 = vperm.slane %v6557_v18, 0  ;;  %vm3769_vm13 = vcmask 25600  }
 0x28a   : > { %2357 = vxpose.xlu0.b32.cont [3/8] (short) (narrow) %v2349_v1, 8  ;;  %2945 = vst.msk [vmem:[#allocation2 + $0x30] sm:$0x1f] %vm2668_vm14, %v2937_v38 }
 0x28b   : > { %v2779_v50 = vld [vmem:[#allocation2 + $0x18] sm:$0x7f]  ;;  %2973 = vst.msk [vmem:[#allocation2 + $0x38] sm:$0xff] %vm963_vm1, %v7590_v31 }
 0x28c   : > { %v2312_v37 = vpop.f32.mrf.mxu1  ;;  %v2820_v47 = vadd.f32 %v2804_v7, %v2779_v50  ;;  %v2747_v22 = vld [vmem:[#allocation2 + $0x20] sm:$0xff]  ;;  %v2846_v7 = vmul.f32 %v6295_v35, %v6448_v43 }
 0x28d   : > { %v2313_v58 = vadd.f32 %v6367_v33, %v2312_v37  ;;  %v2764_v49 = vadd.f32 %v2756_v16, %v2747_v22  ;;  %v2918_v16 = vrot.slane %v2902_v4, 3 }
 0x28e   : > { %2828 = vst.msk [vmem:[#allocation2 + $0x18] sm:$0x7f] %vm1809_vm4, %v2820_v47  ;;  %v2892_v62 = vld [vmem:[#allocation2 + $0x10] sm:$0x1f]  ;;  %v2904_v47 = vmul.f32 %v6327_v2, %v6425_v10  ;;  %v2862_v22 = vrot.slane %v2846_v7, 2 }
 0x28f   : > { %vm2331_vm15 = vcmp.gt.f32.partialorder %v2313_v58, 0.0  ;;  %v2342_v15 = vmul.f32 %v6376_v24, %v2313_v58  ;;  %2772 = vst.msk [vmem:[#allocation2 + $0x20] sm:$0xff] %vm963_vm1, %v2764_v49  ;;  %v2933_v40 = vadd.f32 %v2917_v14, %v2892_v62 }
 0x290   : > { %v2781_v52 = vld [vmem:[#allocation2 + $0x28] sm:$0x7f] }
 0x291   : > { %v2350_v11 = vsel %vm2331_vm15, %v2313_v58, %v2342_v15  ;;  %v2822_v54 = vadd.f32 %v2806_v39, %v2781_v52  ;;  %2941 = vst.msk [vmem:[#allocation2 + $0x10] sm:$0x1f] %vm2668_vm14, %v2933_v40  ;;  %v6548_v53 = vld [vmem:[#allocation2 + $0x30] sm:$0xff]  ;;  %v2920_v52 = vrot.slane %v2904_v47, 3 }
 0x292   : > { %2358 = vxpose.xlu0.b32.cont [4/8] (short) (narrow) %v2350_v11, 8  ;;  %2972 = vst.msk [vmem:[#allocation2 + $0x30] sm:$0xff] %vm963_vm1, %v7590_v31  ;;  %v6586_v11 = vperm.slane %v6557_v18, 1 }
 0x293   : > { %2830 = vst.msk [vmem:[#allocation2 + $0x28] sm:$0x7f] %vm1809_vm4, %v2822_v54 }
 0x294   : > { %v2315_v17 = vpop.f32.mrf.mxu1 }
 0x295   : > { %v2316_v9 = vadd.f32 %v6367_v33, %v2315_v17  ;;  %v2836_v30 = vld [vmem:[#allocation2 + $0x18] sm:$0x3f] }
 0x296   : > { %v2877_v32 = vadd.f32 %v2861_v60, %v2836_v30  ;;  %v2780_v25 = vld [vmem:[#allocation2 + $0x20] sm:$0x7f] }
 0x297   : > { %vm2332_vm2 = vcmp.gt.f32.partialorder %v2316_v9, 0.0  ;;  %v2343_v26 = vmul.f32 %v6376_v24, %v2316_v9  ;;  %v2821_v59 = vadd.f32 %v2805_v36, %v2780_v25  ;;  %v2978_v25 = vld [vmem:[#allocation2 + $0x3c] sm:$0xf] }
 0x298   : > { %2885 = vst.msk [vmem:[#allocation2 + $0x18] sm:$0x3f] %vm1955_vm12, %v2877_v32  ;;  %v2949_v57 = vld [vmem:[#allocation2 + $0x10] sm:$0xff]  ;;  %v2919_v32 = vrot.slane %v2903_v27, 3 }
 0x299   : > { %v2351_v20 = vsel %vm2332_vm2, %v2316_v9, %v2343_v26  ;;  %2829 = vst.msk [vmem:[#allocation2 + $0x20] sm:$0x7f] %vm1809_vm4, %v2821_v59  ;;  %v6565_v48 = vadd.f32 %v6379_v5, %v2949_v57  ;;  %v2977_v38 = vld [vmem:[#allocation2 + $0x34] sm:$0xf]  ;;  %v6609_v57 = vadd.f32 %v6379_v5, %v6548_v53  ;;  %vm3803_vm2 = vcmask 26624  }
 0x29a   : > { %2359 = vxpose.xlu0.b32.cont [5/8] (short) (narrow) %v2351_v20, 8  ;;  %v2838_v13 = vld [vmem:[#allocation2 + $0x28] sm:$0x3f]  ;;  %2968 = vst.msk [vmem:[#allocation2 + $0x10] sm:$0xff] %vm963_vm1, %v7590_v31 }
 0x29b   : > { %v2879_v1 = vadd.f32 %v2863_v21, %v2838_v13  ;;  %v2982_v12 = vmul.f32 %v6562_v41, %v6565_v48  ;;  %v3050_v15 = vmul.f32 %v6400_v42, %v6565_v48  ;;  %v3000_v17 = vmul.f32 %v6586_v11, %v6565_v48  ;;  %v6605_v20 = vld [vmem:[%s7608_s22 + $0x8] sm:$0x7] }
 0x29c   : > { %v2318_v23 = vpop.f32.mrf.mxu1  ;;  %v3083_v43 = vmul.f32 %v6440_v8, %v6565_v48 }
 0x29d   : > { %v2319_v50 = vadd.f32 %v6367_v33, %v2318_v23  ;;  %2887 = vst.msk [vmem:[#allocation2 + $0x28] sm:$0x3f] %vm1955_vm12, %v2879_v1  ;;  %v2986_v37 = vadd.f32 %v2982_v12, %v2977_v38  ;;  %v6614_v1 = vperm.slane %v6557_v18, 2 }
 0x29f   : > { %vm2333_vm3 = vcmp.gt.f32.partialorder %v2319_v50, 0.0  ;;  %v2344_v55 = vmul.f32 %v6376_v24, %v2319_v50  ;;  %v2893_v58 = vld [vmem:[#allocation2 + $0x18] sm:$0x1f]  ;;  %2991 = vst.msk [vmem:[#allocation2 + $0x34] sm:$0xf] %vm2988_vm8, %v2986_v37  ;;  %v6622_v37 = vperm.slane %v6605_v20, 0 }
 0x2a0   : > { %v2934_v35 = vadd.f32 %v2918_v16, %v2893_v58  ;;  %v2837_v49 = vld [vmem:[#allocation2 + $0x20] sm:$0x3f] }
 0x2a1   : > { %v2352_v14 = vsel %vm2333_vm3, %v2319_v50, %v2344_v55  ;;  %v2878_v39 = vadd.f32 %v2862_v22, %v2837_v49  ;;  %v3041_v62 = vld [vmem:[#allocation2 + $0x14] sm:$0xf]  ;;  %v3017_v50 = vmul.f32 %v6614_v1, %v6565_v48  ;;  %v3163_v22 = vld [vmem:[#allocation2 + $0xc] sm:$0xf] }
 0x2a2   : > { %2360 = vxpose.xlu0.b32.cont [6/8] (short) (narrow) %v2352_v14, 8  ;;  %2942 = vst.msk [vmem:[#allocation2 + $0x18] sm:$0x1f] %vm2668_vm14, %v2934_v35  ;;  %v3058_v40 = vadd.f32 %v3050_v15, %v3041_v62  ;;  %v3116_v14 = vmul.f32 %v6464_v46, %v6565_v48 }
 0x2a3   : > { %2886 = vst.msk [vmem:[#allocation2 + $0x20] sm:$0x3f] %vm1955_vm12, %v2878_v39  ;;  %v3025_v15 = vrot.slane %v3017_v50, 4 }
 0x2a4   : > { %v2321_v6 = vpop.f32.mrf.mxu1  ;;  %v2895_v10 = vld [vmem:[#allocation2 + $0x28] sm:$0x1f]  ;;  %3066 = vst.msk [vmem:[#allocation2 + $0x14] sm:$0xf] %vm2988_vm8, %v3058_v40 }
 0x2a5   : > { %v2322_v54 = vadd.f32 %v6367_v33, %v2321_v6  ;;  %v2936_v51 = vadd.f32 %v2920_v52, %v2895_v10  ;;  %v2981_v6 = vmul.f32 %v6562_v41, %v6456_v56 }
 0x2a6   : > { %v2995_v9 = vld [vmem:[#allocation2 + $0x30] sm:$0xff] }
 0x2a7   : > { %vm2334_vm5 = vcmp.gt.f32.partialorder %v2322_v54, 0.0  ;;  %v2345_v60 = vmul.f32 %v6376_v24, %v2322_v54  ;;  %2944 = vst.msk [vmem:[#allocation2 + $0x28] sm:$0x1f] %vm2668_vm14, %v2936_v51  ;;  %v3004_v29 = vadd.f32 %v3000_v17, %v2995_v9 }
 0x2a9   : > { %v2353_v30 = vsel %vm2334_vm5, %v2322_v54, %v2345_v60  ;;  %v2950_v36 = vld [vmem:[#allocation2 + $0x18] sm:$0xff]  ;;  %3008 = vst.msk [vmem:[#allocation2 + $0x30] sm:$0xff] %vm963_vm1, %v3004_v29  ;;  %v3132_v54 = vrot.slane %v3116_v14, 4  ;;  %v3169_v60 = vmul.f32 %v6622_v37, %v6609_v57  ;;  %v3016_v14 = vmul.f32 %v6614_v1, %v6456_v56 }
 0x2aa   : > { %2361 = vxpose.xlu0.b32.cont [7/8] (short) (narrow) %v2353_v30, 8  ;;  %v6598_v26 = vadd.f32 %v6379_v5, %v2950_v36  ;;  %v2894_v2 = vld [vmem:[#allocation2 + $0x20] sm:$0x1f]  ;;  %2969 = vst.msk [vmem:[#allocation2 + $0x18] sm:$0xff] %vm963_vm1, %v7590_v31 }
 0x2ab   : > { %v2935_v21 = vadd.f32 %v2919_v32, %v2894_v2  ;;  %v3074_v13 = vld [vmem:[#allocation2 + $0x10] sm:$0xff]  ;;  %v3162_v36 = vld [vmem:[#allocation2 + $0x4] sm:$0xf]  ;;  %v6657_v32 = vperm.slane %v6605_v20, 1 }
 0x2ac   : > { %v2324_v59 = vpop.f32.mrf.mxu1  ;;  %v2983_v4 = vmul.f32 %v6562_v41, %v6598_v26  ;;  %v3091_v23 = vadd.f32 %v3083_v43, %v3074_v13  ;;  %v3001_v30 = vmul.f32 %v6586_v11, %v6598_v26  ;;  %v2980_v13 = vmul.f32 %v6562_v41, %v6397_v45 }
 0x2ad   : > { %v2325_v38 = vadd.f32 %v6367_v33, %v2324_v59  ;;  %2943 = vst.msk [vmem:[#allocation2 + $0x20] sm:$0x1f] %vm2668_vm14, %v2935_v21  ;;  %v3054_v33 = vmul.f32 %v6400_v42, %v6609_v57  ;;  %v2999_v41 = vmul.f32 %v6586_v11, %v6456_v56 }
 0x2ae   : > { %v2952_v7 = vld [vmem:[#allocation2 + $0x28] sm:$0xff]  ;;  %v2987_v12 = vadd.f32 %v2983_v4, %v2978_v25  ;;  %3099 = vst.msk [vmem:[#allocation2 + $0x10] sm:$0xff] %vm963_vm1, %v3091_v23 }
 0x2af   : > { %vm2335_vm6 = vcmp.gt.f32.partialorder %v2325_v38, 0.0  ;;  %v2346_v53 = vmul.f32 %v6376_v24, %v2325_v38  ;;  %v6625_v16 = vadd.f32 %v6379_v5, %v2952_v7  ;;  %2971 = vst.msk [vmem:[#allocation2 + $0x28] sm:$0xff] %vm963_vm1, %v7590_v31  ;;  %v3051_v24 = vmul.f32 %v6400_v42, %v6598_v26 }
 0x2b0   : > { %v3045_v47 = vld [vmem:[#allocation2 + $0x34] sm:$0xf]  ;;  %2992 = vst.msk [vmem:[#allocation2 + $0x3c] sm:$0xf] %vm2988_vm8, %v2987_v12  ;;  %v3012_v58 = vld [vmem:[#allocation2 + $0x30] sm:$0xf]  ;;  %v3084_v7 = vmul.f32 %v6440_v8, %v6598_v26 }
 0x2b1   : > { %v2354_v18 = vsel %vm2335_vm6, %v2325_v38, %v2346_v53  ;;  %v3168_v55 = vmul.f32 %v6622_v37, %v6625_v16  ;;  %v3062_v35 = vadd.f32 %v3054_v33, %v3045_v47  ;;  %v3042_v49 = vld [vmem:[#allocation2 + $0x1c] sm:$0xf]  ;;  %v3033_v52 = vadd.f32 %v3025_v15, %v3012_v58 }
 0x2b2   : > { %2362 = vxpose.xlu0.b32.end [8/8] (short) (narrow) %v2354_v18, 8  ;;  %v3059_v62 = vadd.f32 %v3051_v24, %v3042_v49  ;;  %v3185_v21 = vmul.f32 %v6657_v32, %v6625_v16  ;;  %v3087_v53 = vmul.f32 %v6440_v8, %v6609_v57  ;;  %v6673_v33 = vperm.slane %v6605_v20, 2 }
 0x2b3   : > { %v3172_v39 = vadd.f32 %v3168_v55, %v3163_v22  ;;  %3070 = vst.msk [vmem:[#allocation2 + $0x34] sm:$0xf] %vm2988_vm8, %v3062_v35  ;;  %v6681_v24 = vadd.f32 %v6379_v5, %v6530_v44  ;;  %v3117_v44 = vmul.f32 %v6464_v46, %v6598_v26  ;;  %v3120_v15 = vmul.f32 %v6464_v46, %v6609_v57 }
 0x2b4   : > { %v2951_v40 = vld [vmem:[#allocation2 + $0x20] sm:$0xff]  ;;  %3067 = vst.msk [vmem:[#allocation2 + $0x1c] sm:$0xf] %vm2988_vm8, %v3059_v62  ;;  %v3202_v20 = vmul.f32 %v6673_v33, %v6625_v16 }
 0x2b5   : > { %3176 = vst.msk [vmem:[#allocation2 + $0xc] sm:$0xf] %vm2988_vm8, %v3172_v39  ;;  %v6644_v10 = vadd.f32 %v6379_v5, %v2951_v40  ;;  %v3107_v27 = vld [vmem:[#allocation2 + $0x10] sm:$0xf]  ;;  %v3164_v17 = vld [vmem:[#allocation2 + $0x14] sm:$0xf]  ;;  %v3186_v5 = vmul.f32 %v6657_v32, %v6609_v57 }
 0x2b6   : > { %2970 = vst.msk [vmem:[#allocation2 + $0x20] sm:$0xff] %vm963_vm1, %v7590_v31  ;;  %v2976_v48 = vld [vmem:[#allocation2 + $0x2c] sm:$0xf]  ;;  %v3148_v2 = vadd.f32 %v3132_v54, %v3107_v27  ;;  %v3173_v43 = vadd.f32 %v3169_v60, %v3164_v17  ;;  %v3210_v56 = vrot.slane %v3202_v20, 4  ;;  %v3024_v27 = vrot.slane %v3016_v14, 4 }
 0x2b7   : > { %v2985_v51 = vadd.f32 %v2981_v6, %v2976_v48  ;;  %v3167_v9 = vmul.f32 %v6622_v37, %v6644_v10  ;;  %v2996_v29 = vld [vmem:[#allocation2 + $0x38] sm:$0xff]  ;;  %3037 = vst.msk [vmem:[#allocation2 + $0x30] sm:$0xf] %vm2988_vm8, %v3033_v52  ;;  %v3184_v35 = vmul.f32 %v6657_v32, %v6644_v10  ;;  %v3055_v52 = vmul.f32 %v6400_v42, %v6681_v24 }
 0x2b8   : > { %v3005_v59 = vadd.f32 %v3001_v30, %v2996_v29  ;;  %3156 = vst.msk [vmem:[#allocation2 + $0x10] sm:$0xf] %vm2988_vm8, %v3148_v2  ;;  %v2998_v48 = vmul.f32 %v6586_v11, %v6397_v45  ;;  %v3170_v29 = vmul.f32 %v6622_v37, %v6681_v24  ;;  %v3136_v30 = vrot.slane %v3120_v15, 4 }
 0x2b9   : > { %2990 = vst.msk [vmem:[#allocation2 + $0x2c] sm:$0xf] %vm2988_vm8, %v2985_v51  ;;  %v3171_v25 = vadd.f32 %v3167_v9, %v3162_v36  ;;  %v3133_v9 = vrot.slane %v3117_v44, 4  ;;  %v3201_v36 = vmul.f32 %v6673_v33, %v6644_v10 }
 0x2ba   : > { %3177 = vst.msk [vmem:[#allocation2 + $0x14] sm:$0xf] %vm2988_vm8, %v3173_v43  ;;  %v3203_v43 = vmul.f32 %v6673_v33, %v6609_v57 }
 0x2bb   : > { %3175 = vst.msk [vmem:[#allocation2 + $0x4] sm:$0xf] %vm2988_vm8, %v3171_v25  ;;  %v3075_v50 = vld [vmem:[#allocation2 + $0x18] sm:$0xff] }
 0x2bc   : > { %v3180_v4 = vld [vmem:[#allocation2 + $0x8] sm:$0xff]  ;;  %3009 = vst.msk [vmem:[#allocation2 + $0x38] sm:$0xff] %vm963_vm1, %v3005_v59  ;;  %v3092_v18 = vadd.f32 %v3084_v7, %v3075_v50  ;;  %v3053_v59 = vmul.f32 %v6400_v42, %v6625_v16  ;;  %v3209_v50 = vrot.slane %v3201_v36, 4  ;;  %v3119_v36 = vmul.f32 %v6464_v46, %v6625_v16 }
 0x2bd   : > { %v2975_v38 = vld [vmem:[#allocation2 + $0x24] sm:$0xf]  ;;  %v3189_v23 = vadd.f32 %v3185_v21, %v3180_v4  ;;  %v3018_v4 = vmul.f32 %v6614_v1, %v6598_v26  ;;  %v3211_v26 = vrot.slane %v3203_v43, 4 }
 0x2be   : > { %v2984_v12 = vadd.f32 %v2980_v13, %v2975_v38  ;;  %v3078_v55 = vld [vmem:[#allocation2 + $0x30] sm:$0xff]  ;;  %3100 = vst.msk [vmem:[#allocation2 + $0x18] sm:$0xff] %vm963_vm1, %v3092_v18 }
 0x2bf   : > { %3193 = vst.msk [vmem:[#allocation2 + $0x8] sm:$0xff] %vm963_vm1, %v3189_v23  ;;  %v3095_v58 = vadd.f32 %v3087_v53, %v3078_v55  ;;  %v3015_v53 = vmul.f32 %v6614_v1, %v6397_v45  ;;  %v3026_v55 = vrot.slane %v3018_v4, 4 }
 0x2c0   : > { %2989 = vst.msk [vmem:[#allocation2 + $0x24] sm:$0xf] %vm2988_vm8, %v2984_v12  ;;  %v2994_v47 = vld [vmem:[#allocation2 + $0x28] sm:$0xff] }
 0x2c1   : > { %v3003_v22 = vadd.f32 %v2999_v41, %v2994_v47  ;;  %3103 = vst.msk [vmem:[#allocation2 + $0x30] sm:$0xff] %vm963_vm1, %v3095_v58  ;;  %v3181_v62 = vld [vmem:[#allocation2 + $0x10] sm:$0xff]  ;;  %v3023_v1 = vrot.slane %v3015_v53, 4 }
 0x2c2   : > { %v3179_v49 = vld [vmem:[#allocation2] sm:$0xff]  ;;  %v3190_v40 = vadd.f32 %v3186_v5, %v3181_v62  ;;  %v3187_v5 = vmul.f32 %v6657_v32, %v6681_v24  ;;  %v3086_v62 = vmul.f32 %v6440_v8, %v6625_v16  ;;  %v3135_v16 = vrot.slane %v3119_v36, 4 }
 0x2c3   : > { %3007 = vst.msk [vmem:[#allocation2 + $0x28] sm:$0xff] %vm963_vm1, %v3003_v22  ;;  %v3188_v39 = vadd.f32 %v3184_v35, %v3179_v49  ;;  %v3046_v6 = vld [vmem:[#allocation2 + $0x3c] sm:$0xf]  ;;  %v3013_v41 = vld [vmem:[#allocation2 + $0x38] sm:$0xf]  ;;  %v3052_v35 = vmul.f32 %v6400_v42, %v6644_v10 }
 0x2c4   : > { %v3063_v51 = vadd.f32 %v3055_v52, %v3046_v6  ;;  %3194 = vst.msk [vmem:[#allocation2 + $0x10] sm:$0xff] %vm963_vm1, %v3190_v40  ;;  %v3034_v20 = vadd.f32 %v3026_v55, %v3013_v41  ;;  %v7612_v6 = vld [vmem:[#allocation24_spill] sm:$0xff] }
 0x2c5   : > { %3192 = vst.msk [vmem:[#allocation2] sm:$0xff] %vm963_vm1, %v3188_v39  ;;  %v3108_v11 = vld [vmem:[#allocation2 + $0x18] sm:$0xf]  ;;  %v3165_v25 = vld [vmem:[#allocation2 + $0x1c] sm:$0xf] }
 0x2c6   : > { %v3197_v54 = vld [vmem:[#allocation2 + $0x8] sm:$0xf]  ;;  %3071 = vst.msk [vmem:[#allocation2 + $0x3c] sm:$0xf] %vm2988_vm8, %v3063_v51  ;;  %v3149_v21 = vadd.f32 %v3133_v9, %v3108_v11  ;;  %v3174_v13 = vadd.f32 %v3170_v29, %v3165_v25  ;;  %v3204_v51 = vmul.f32 %v6673_v33, %v6681_v24  ;;  %v3088_v29 = vmul.f32 %v6440_v8, %v6681_v24 }
 0x2c7   : > { %v2993_v17 = vld [vmem:[#allocation2 + $0x20] sm:$0xff]  ;;  %v3218_v60 = vadd.f32 %v3210_v56, %v3197_v54  ;;  %3038 = vst.msk [vmem:[#allocation2 + $0x38] sm:$0xf] %vm2988_vm8, %v3034_v20  ;;  %v3085_v33 = vmul.f32 %v6440_v8, %v6644_v10 }
 0x2c8   : > { %v3002_v2 = vadd.f32 %v2998_v48, %v2993_v17  ;;  %v3111_v37 = vld [vmem:[#allocation2 + $0x30] sm:$0xf]  ;;  %3157 = vst.msk [vmem:[#allocation2 + $0x18] sm:$0xf] %vm2988_vm8, %v3149_v21  ;;  %v3484_v48 = vmul.f32 %v7612_v6, %v5407_v63  ;;  %v3212_v43 = vrot.slane %v3204_v51, 4 }
 0x2c9   : > { %3222 = vst.msk [vmem:[#allocation2 + $0x8] sm:$0xf] %vm2988_vm8, %v3218_v60  ;;  %v3152_v12 = vadd.f32 %v3136_v30, %v3111_v37  ;;  %v6751_v60 = vld [vmem:[%s4977_s27] sm:$0xff] }
 0x2ca   : > { %v3044_v38 = vld [vmem:[#allocation2 + $0x2c] sm:$0xf]  ;;  %3006 = vst.msk [vmem:[#allocation2 + $0x20] sm:$0xff] %vm963_vm1, %v3002_v2  ;;  %v3011_v23 = vld [vmem:[#allocation2 + $0x28] sm:$0xf]  ;;  %v3392_v9 = vperm.slane %v6751_v60, 1 }
 0x2cb   : > { %v3061_v57 = vadd.f32 %v3053_v59, %v3044_v38  ;;  %v3032_v7 = vadd.f32 %v3024_v27, %v3011_v23  ;;  %3178 = vst.msk [vmem:[#allocation2 + $0x1c] sm:$0xf] %vm2988_vm8, %v3174_v13  ;;  %v3198_v58 = vld [vmem:[#allocation2 + $0x10] sm:$0xf]  ;;  %v7613_v13 = vld [vmem:[#allocation15_spill] sm:$0xff] }
 0x2cc   : > { %v3196_v18 = vld [vmem:[#allocation2] sm:$0xf]  ;;  %v3219_v22 = vadd.f32 %v3211_v26, %v3198_v58  ;;  %3160 = vst.msk [vmem:[#allocation2 + $0x30] sm:$0xf] %vm2988_vm8, %v3152_v12  ;;  %v3393_v21 = vmul.f32 %v3392_v9, %v5407_v63  ;;  %v3514_v37 = vmul.f32 %v7613_v13, %v5407_v63  ;;  %v3515_v41 = vmul.f32 %v7613_v13, %v5419_v34 }
 0x2cd   : > { %3069 = vst.msk [vmem:[#allocation2 + $0x2c] sm:$0xf] %vm2988_vm8, %v3061_v57  ;;  %v3217_v47 = vadd.f32 %v3209_v50, %v3196_v18  ;;  %v3121_v57 = vmul.f32 %v6464_v46, %v6681_v24  ;;  %v7614_v12 = vld [vmem:[#allocation39_spill] sm:$0xff]  ;;  %v3118_v26 = vmul.f32 %v6464_v46, %v6644_v10 }
 0x2ce   : > { %3036 = vst.msk [vmem:[#allocation2 + $0x28] sm:$0xf] %vm2988_vm8, %v3032_v7  ;;  %v3079_v30 = vld [vmem:[#allocation2 + $0x38] sm:$0xff]  ;;  %v3458_v50 = vmul.f32 %v7614_v12, %v5407_v63 }
 0x2cf   : > { %3221 = vst.msk [vmem:[#allocation2] sm:$0xf] %vm2988_vm8, %v3217_v47  ;;  %v3096_v2 = vadd.f32 %v3088_v29, %v3079_v30 }
 0x2d0   : > { %v3226_v45 = vld [vmem:[#allocation2 + $0x8] sm:$0xff]  ;;  %3223 = vst.msk [vmem:[#allocation2 + $0x10] sm:$0xf] %vm2988_vm8, %v3219_v22  ;;  %v3137_v22 = vrot.slane %v3121_v57, 4 }
 0x2d1   : > { %3376 = vst.msk [vmem:[#allocation2 + $0x8] sm:$0xff] %vm963_vm1, %v7590_v31  ;;  %v3010_v14 = vld [vmem:[#allocation2 + $0x20] sm:$0xf]  ;;  %v3043_v49 = vld [vmem:[#allocation2 + $0x24] sm:$0xf] }
 0x2d2   : > { %v3031_v44 = vadd.f32 %v3023_v1, %v3010_v14  ;;  %v3060_v15 = vadd.f32 %v3052_v35, %v3043_v49  ;;  %v3182_v39 = vld [vmem:[#allocation2 + $0x18] sm:$0xff]  ;;  %3104 = vst.msk [vmem:[#allocation2 + $0x38] sm:$0xff] %vm963_vm1, %v3096_v2  ;;  %v3134_v35 = vrot.slane %v3118_v26, 4 }
 0x2d3   : > { %v3191_v42 = vadd.f32 %v3187_v5, %v3182_v39  ;;  %v6738_v40 = vld [vmem:[#allocation2 + $0x30] sm:$0xff] }
 0x2d4   : > { %3035 = vst.msk [vmem:[#allocation2 + $0x20] sm:$0xf] %vm2988_vm8, %v3031_v44  ;;  %v7615_v5 = vld [vmem:[#allocation17_spill] sm:$0xff] }
 0x2d5   : > { %3068 = vst.msk [vmem:[#allocation2 + $0x24] sm:$0xf] %vm2988_vm8, %v3060_v15  ;;  %v3077_v52 = vld [vmem:[#allocation2 + $0x28] sm:$0xff]  ;;  %v3546_v44 = vmul.f32 %v7615_v5, %v5419_v34 }
 0x2d6   : > { %3195 = vst.msk [vmem:[#allocation2 + $0x18] sm:$0xff] %vm963_vm1, %v3191_v42  ;;  %v3094_v56 = vadd.f32 %v3086_v62, %v3077_v52  ;;  %v3225_v32 = vld [vmem:[#allocation2] sm:$0xff]  ;;  %v3485_v52 = vmul.f32 %v7612_v6, %v5419_v34 }
 0x2d7   : > { %3381 = vst.msk [vmem:[#allocation2 + $0x30] sm:$0xff] %vm963_vm1, %v7590_v31  ;;  %4763 = vmatmul.msk.f32.vlgmr.msra.gmra.mxu2 %vm963_vm1, %v3225_v32  ;;  %v3227_v17 = vld [vmem:[#allocation2 + $0x10] sm:$0xff] }
 0x2d8   : > { %3375 = vst.msk [vmem:[#allocation2] sm:$0xff] %vm963_vm1, %v7590_v31  ;;  %v3476_v54 = vld [vmem:[#allocation2 + $0x8] sm:$0xff] }
 0x2d9   : > { %v3491_v27 = vadd.f32 %v3484_v48, %v3476_v54  ;;  %3102 = vst.msk [vmem:[#allocation2 + $0x28] sm:$0xff] %vm963_vm1, %v3094_v56  ;;  %v3112_v20 = vld [vmem:[#allocation2 + $0x38] sm:$0xf]  ;;  %v6800_v56 = vperm.slane %v6751_v60, 4  ;;  %v3547_v48 = vmul.f32 %v7615_v5, %v5438_v61 }
 0x2da   : > { %3377 = vst.msk [vmem:[#allocation2 + $0x10] sm:$0xff] %vm963_vm1, %v7590_v31  ;;  %v3153_v46 = vadd.f32 %v3137_v22, %v3112_v20 }
 0x2db   : > { %3498 = vst.msk [vmem:[#allocation2 + $0x8] sm:$0xff] %vm963_vm1, %v3491_v27  ;;  %v3436_v29 = vmul.f32 %v6800_v56, %v5407_v63 }
 0x2dc   : > { %v3076_v11 = vld [vmem:[#allocation2 + $0x20] sm:$0xff]  ;;  %3161 = vst.msk [vmem:[#allocation2 + $0x38] sm:$0xf] %vm2988_vm8, %v3153_v46 }
 0x2dd   : > { %v3199_v25 = vld [vmem:[#allocation2 + $0x18] sm:$0xf]  ;;  %v3093_v59 = vadd.f32 %v3085_v33, %v3076_v11 }
 0x2de   : > { %v3220_v4 = vadd.f32 %v3212_v43, %v3199_v25  ;;  %v3390_v38 = vld [vmem:[#allocation2 + $0x30] sm:$0xff]  ;;  %v6822_v43 = vperm.slane %v6751_v60, 3 }
 0x2df   : > { %v3505_v8 = vld [vmem:[#allocation2] sm:$0xff]  ;;  %3101 = vst.msk [vmem:[#allocation2 + $0x20] sm:$0xff] %vm963_vm1, %v3093_v59  ;;  %v3395_v23 = vadd.f32 %v3393_v21, %v3390_v38  ;;  %4764 = vmatmul.msk.f32.gmra.mxu2 %vm963_vm1, %v3226_v45  ;;  %v6786_v45 = vperm.slane %v6751_v60, 2  ;;  %v7616_v25 = vld [vmem:[#allocation25_spill] sm:$0xff] }
 0x2e0   : > { %v3522_v7 = vadd.f32 %v3514_v37, %v3505_v8  ;;  %3224 = vst.msk [vmem:[#allocation2 + $0x18] sm:$0xf] %vm2988_vm8, %v3220_v4  ;;  %v3110_v53 = vld [vmem:[#allocation2 + $0x28] sm:$0xf]  ;;  %v3574_v59 = vmul.f32 %v7616_v25, %v5438_v61  ;;  %v3385_v37 = vperm.slane %v6751_v60, 0  ;;  %v3420_v38 = vmul.f32 %v6822_v43, %v5438_v61 }
 0x2e1   : > { %v3451_v18 = vld [vmem:[#allocation2 + $0x10] sm:$0xff]  ;;  %v3151_v55 = vadd.f32 %v3135_v16, %v3110_v53  ;;  %3397 = vst.msk [vmem:[#allocation2 + $0x30] sm:$0xff] %vm963_vm1, %v3395_v23  ;;  %v3405_v49 = vmul.f32 %v6786_v45, %v5419_v34  ;;  %v3404_v11 = vmul.f32 %v6786_v45, %v5407_v63  ;;  %v3516_v16 = vmul.f32 %v7613_v13, %v5438_v61 }
 0x2e2   : > { %3530 = vst.msk [vmem:[#allocation2] sm:$0xff] %vm963_vm1, %v3522_v7  ;;  %v3506_v24 = vld [vmem:[#allocation2 + $0x8] sm:$0xff]  ;;  %v3464_v47 = vadd.f32 %v3458_v50, %v3451_v18  ;;  %v3575_v7 = vmul.f32 %v7616_v25, %v5475_v0  ;;  %v3386_v26 = vmul.f32 %v3385_v37, %v5407_v63 }
 0x2e3   : > { %v3523_v58 = vadd.f32 %v3515_v41, %v3506_v24  ;;  %3159 = vst.msk [vmem:[#allocation2 + $0x28] sm:$0xf] %vm2988_vm8, %v3151_v55  ;;  %v6813_v30 = vld [vmem:[#allocation2 + $0x38] sm:$0xff]  ;;  %v3418_v24 = vmul.f32 %v6822_v43, %v5407_v63  ;;  %v3419_v63 = vmul.f32 %v6822_v43, %v5419_v34 }
 0x2e4   : > { %3470 = vst.msk [vmem:[#allocation2 + $0x10] sm:$0xff] %vm963_vm1, %v3464_v47 }
 0x2e5   : > { %3531 = vst.msk [vmem:[#allocation2 + $0x8] sm:$0xff] %vm963_vm1, %v3523_v58  ;;  %v3459_v58 = vmul.f32 %v7614_v12, %v5419_v34 }
 0x2e6   : > { %v3109_v10 = vld [vmem:[#allocation2 + $0x20] sm:$0xf]  ;;  %3382 = vst.msk [vmem:[#allocation2 + $0x38] sm:$0xff] %vm963_vm1, %v7590_v31 }
 0x2e7   : > { %v3228_v1 = vld [vmem:[#allocation2 + $0x18] sm:$0xff]  ;;  %v3150_v14 = vadd.f32 %v3134_v35, %v3109_v10  ;;  %4765 = vmatmul.msk.f32.gmra.mxu2 %vm963_vm1, %v3227_v17 }
 0x2e8   : > { %3378 = vst.msk [vmem:[#allocation2 + $0x18] sm:$0xff] %vm963_vm1, %v7590_v31  ;;  %v3401_v15 = vld [vmem:[#allocation2 + $0x30] sm:$0xff] }
 0x2e9   : > { %v3538_v39 = vld [vmem:[#allocation2] sm:$0xff]  ;;  %3158 = vst.msk [vmem:[#allocation2 + $0x20] sm:$0xf] %vm2988_vm8, %v3150_v14  ;;  %v3408_v42 = vadd.f32 %v3405_v49, %v3401_v15  ;;  %v3439_v15 = vmul.f32 %v6800_v56, %v5475_v0 }
 0x2ea   : > { %v3553_v62 = vadd.f32 %v3546_v44, %v3538_v39  ;;  %v6802_v32 = vld [vmem:[#allocation2 + $0x28] sm:$0xff] }
 0x2eb   : > { %v3477_v54 = vld [vmem:[#allocation2 + $0x10] sm:$0xff]  ;;  %3380 = vst.msk [vmem:[#allocation2 + $0x28] sm:$0xff] %vm963_vm1, %v7590_v31 }
 0x2ec   : > { %3560 = vst.msk [vmem:[#allocation2] sm:$0xff] %vm963_vm1, %v3553_v62  ;;  %v3539_v51 = vld [vmem:[#allocation2 + $0x8] sm:$0xff]  ;;  %v3492_v27 = vadd.f32 %v3485_v52, %v3477_v54 }
 0x2ed   : > { %v3554_v17 = vadd.f32 %v3547_v48, %v3539_v51  ;;  %3411 = vst.msk [vmem:[#allocation2 + $0x30] sm:$0xff] %vm963_vm1, %v3408_v42  ;;  %v3384_v47 = vld [vmem:[#allocation2 + $0x38] sm:$0xff]  ;;  %v3548_v42 = vmul.f32 %v7615_v5, %v5475_v0 }
 0x2ee   : > { %3499 = vst.msk [vmem:[#allocation2 + $0x10] sm:$0xff] %vm963_vm1, %v3492_v27  ;;  %v3387_v20 = vadd.f32 %v3386_v26, %v3384_v47  ;;  %v3406_v47 = vmul.f32 %v6786_v45, %v5438_v61 }
 0x2ef   : > { %3561 = vst.msk [vmem:[#allocation2 + $0x8] sm:$0xff] %vm963_vm1, %v3554_v17  ;;  %v3430_v33 = vld [vmem:[#allocation2 + $0x18] sm:$0xff]  ;;  %4766 = vmatmul.msk.f32.gmra.mxu2 %vm963_vm1, %v3228_v1 }
 0x2f0   : > { %v3441_v36 = vadd.f32 %v3436_v29, %v3430_v33  ;;  %v3229_v2 = vld [vmem:[#allocation2 + $0x20] sm:$0xff]  ;;  %3388 = vst.msk [vmem:[#allocation2 + $0x38] sm:$0xff] %vm963_vm1, %v3387_v20  ;;  %v7617_v1 = vld [vmem:[#allocation34_spill] sm:$0xff]  ;;  %v3394_v29 = vmul.f32 %v3392_v9, %v5419_v34  ;;  %v3517_v20 = vmul.f32 %v7613_v13, %v5475_v0 }
 0x2f1   : > { %3379 = vst.msk [vmem:[#allocation2 + $0x20] sm:$0xff] %vm963_vm1, %v7590_v31  ;;  %v3598_v14 = vmul.f32 %v7617_v1, %v5475_v0  ;;  %v3599_v48 = vmul.f32 %v7617_v1, %v5527_v19 }
 0x2f2   : > { %3446 = vst.msk [vmem:[#allocation2 + $0x18] sm:$0xff] %vm963_vm1, %v3441_v36  ;;  %v3400_v21 = vld [vmem:[#allocation2 + $0x28] sm:$0xff]  ;;  %v3437_v36 = vmul.f32 %v6800_v56, %v5419_v34 }
 0x2f3   : > { %v3567_v4 = vld [vmem:[#allocation2] sm:$0xff]  ;;  %v3407_v8 = vadd.f32 %v3404_v11, %v3400_v21  ;;  %v6871_v11 = vld [vmem:[%s4977_s27 + $0x8] sm:$0x7f]  ;;  %v3486_v21 = vmul.f32 %v7612_v6, %v5438_v61 }
 0x2f4   : > { %v3580_v23 = vadd.f32 %v3574_v59, %v3567_v4  ;;  %v3415_v57 = vld [vmem:[#allocation2 + $0x30] sm:$0xff]  ;;  %v6874_v59 = vperm.slane %v6871_v11, 3  ;;  %v3438_v4 = vmul.f32 %v6800_v56, %v5438_v61 }
 0x2f5   : > { %v3507_v50 = vld [vmem:[#allocation2 + $0x10] sm:$0xff]  ;;  %3410 = vst.msk [vmem:[#allocation2 + $0x28] sm:$0xff] %vm963_vm1, %v3407_v8  ;;  %v3424_v53 = vadd.f32 %v3420_v38, %v3415_v57 }
 0x2f6   : > { %3586 = vst.msk [vmem:[#allocation2] sm:$0xff] %vm963_vm1, %v3580_v23  ;;  %v3568_v41 = vld [vmem:[#allocation2 + $0x8] sm:$0xff]  ;;  %v3524_v18 = vadd.f32 %v3516_v16, %v3507_v50  ;;  %v3618_v38 = vmul.f32 %v6874_v59, %v5527_v19  ;;  %v3462_v23 = vmul.f32 %v7614_v12, %v5527_v19 }
 0x2f7   : > { %v3581_v55 = vadd.f32 %v3575_v7, %v3568_v41  ;;  %3428 = vst.msk [vmem:[#allocation2 + $0x30] sm:$0xff] %vm963_vm1, %v3424_v53  ;;  %4767 = vmatmul.msk.f32.gmra.mxu2 %vm963_vm1, %v3229_v2  ;;  %v3391_v2 = vld [vmem:[#allocation2 + $0x38] sm:$0xff]  ;;  %v3576_v7 = vmul.f32 %v7616_v25, %v5527_v19  ;;  %v3619_v41 = vmul.f32 %v6874_v59, %v5577_v3 }
 0x2f8   : > { %3532 = vst.msk [vmem:[#allocation2 + $0x10] sm:$0xff] %vm963_vm1, %v3524_v18  ;;  %v3413_v22 = vld [vmem:[#allocation2 + $0x20] sm:$0xff]  ;;  %v3396_v60 = vadd.f32 %v3394_v29, %v3391_v2  ;;  %v3487_v29 = vmul.f32 %v7612_v6, %v5475_v0  ;;  %v3549_v2 = vmul.f32 %v7615_v5, %v5527_v19  ;;  %v3520_v5 = vmul.f32 %v7613_v13, %v5636_v28 }
 0x2f9   : > { %3587 = vst.msk [vmem:[#allocation2 + $0x8] sm:$0xff] %vm963_vm1, %v3581_v55  ;;  %v3452_v35 = vld [vmem:[#allocation2 + $0x18] sm:$0xff]  ;;  %v3422_v46 = vadd.f32 %v3418_v24, %v3413_v22  ;;  %v3460_v22 = vmul.f32 %v7614_v12, %v5438_v61  ;;  %v3461_v61 = vmul.f32 %v7614_v12, %v5475_v0 }
 0x2fa   : > { %v3465_v10 = vadd.f32 %v3459_v58, %v3452_v35  ;;  %3398 = vst.msk [vmem:[#allocation2 + $0x38] sm:$0xff] %vm963_vm1, %v3396_v60  ;;  %v6905_v35 = vperm.slane %v6871_v11, 4 }
 0x2fb   : > { %3426 = vst.msk [vmem:[#allocation2 + $0x20] sm:$0xff] %vm963_vm1, %v3422_v46 }
 0x2fc   : > { %3471 = vst.msk [vmem:[#allocation2 + $0x18] sm:$0xff] %vm963_vm1, %v3465_v10  ;;  %v3414_v49 = vld [vmem:[#allocation2 + $0x28] sm:$0xff] }
 0x2fd   : > { %v3592_v44 = vld [vmem:[#allocation2] sm:$0xff]  ;;  %v3423_v39 = vadd.f32 %v3419_v63, %v3414_v49  ;;  %v3634_v49 = vmul.f32 %v6905_v35, %v5577_v3 }
 0x2fe   : > { %v3603_v62 = vadd.f32 %v3598_v14, %v3592_v44  ;;  %v3433_v52 = vld [vmem:[#allocation2 + $0x30] sm:$0xff] }
 0x2ff   : > { %v3540_v54 = vld [vmem:[#allocation2 + $0x10] sm:$0xff]  ;;  %3427 = vst.msk [vmem:[#allocation2 + $0x28] sm:$0xff] %vm963_vm1, %v3423_v39  ;;  %v3444_v51 = vadd.f32 %v3439_v15, %v3433_v52  ;;  %4768 = vmatmul.msk.f32.gmra.mxu2 %vm963_vm1, %v6802_v32  ;;  %v3489_v39 = vmul.f32 %v7612_v6, %v5577_v3 }
 0x300   : > { %3608 = vst.msk [vmem:[#allocation2] sm:$0xff] %vm963_vm1, %v3603_v62  ;;  %v3593_v27 = vld [vmem:[#allocation2 + $0x8] sm:$0xff]  ;;  %v3555_v17 = vadd.f32 %v3548_v42, %v3540_v54  ;;  %v3600_v62 = vmul.f32 %v7617_v1, %v5577_v3 }
 0x301   : > { %v3604_v33 = vadd.f32 %v3599_v48, %v3593_v27  ;;  %3449 = vst.msk [vmem:[#allocation2 + $0x30] sm:$0xff] %vm963_vm1, %v3444_v51  ;;  %v3635_v48 = vmul.f32 %v6905_v35, %v5636_v28  ;;  %v3421_v27 = vmul.f32 %v6822_v43, %v5475_v0 }
 0x302   : > { %3562 = vst.msk [vmem:[#allocation2 + $0x10] sm:$0xff] %vm963_vm1, %v3555_v17  ;;  %v3431_v32 = vld [vmem:[#allocation2 + $0x20] sm:$0xff] }
 0x303   : > { %3609 = vst.msk [vmem:[#allocation2 + $0x8] sm:$0xff] %vm963_vm1, %v3604_v33  ;;  %v3478_v9 = vld [vmem:[#allocation2 + $0x18] sm:$0xff]  ;;  %v3442_v37 = vadd.f32 %v3437_v36, %v3431_v32 }
 0x304   : > { %v3493_v34 = vadd.f32 %v3486_v21, %v3478_v9  ;;  %v3645_v21 = vperm.slane %v6871_v11, 5 }
 0x305   : > { %3447 = vst.msk [vmem:[#allocation2 + $0x20] sm:$0xff] %vm963_vm1, %v3442_v37 }
 0x306   : > { %3500 = vst.msk [vmem:[#allocation2 + $0x18] sm:$0xff] %vm963_vm1, %v3493_v34  ;;  %v3432_v8 = vld [vmem:[#allocation2 + $0x28] sm:$0xff]  ;;  %v3646_v0 = vmul.f32 %v3645_v21, %v5636_v28  ;;  %v7618_v34 = vld [vmem:[#allocation26_spill] sm:$0xff] }
 0x307   : > { %v3613_v16 = vld [vmem:[#allocation2] sm:$0xff]  ;;  %v3443_v57 = vadd.f32 %v3438_v4, %v3432_v8  ;;  %4769 = vmatmul.msk.f32.gmra.mxu2 %vm963_vm1, %v6738_v40  ;;  %v3402_v40 = vld [vmem:[#allocation2 + $0x38] sm:$0xff]  ;;  %v3620_v8 = vmul.f32 %v6874_v59, %v5636_v28 }
 0x308   : > { %v3622_v50 = vadd.f32 %v3618_v38, %v3613_v16  ;;  %v3455_v53 = vld [vmem:[#allocation2 + $0x30] sm:$0xff]  ;;  %v3409_v10 = vadd.f32 %v3406_v47, %v3402_v40  ;;  %v3653_v47 = vperm.slane %v6871_v11, 6  ;;  %v7623_v11 = vld [vmem:[#allocation18_spill] sm:$0xff] }
 0x309   : > { %v3569_v18 = vld [vmem:[#allocation2 + $0x10] sm:$0xff]  ;;  %3448 = vst.msk [vmem:[#allocation2 + $0x28] sm:$0xff] %vm963_vm1, %v3443_v57  ;;  %v3468_v26 = vadd.f32 %v3462_v23, %v3455_v53  ;;  %v7619_v57 = vld [vmem:[#allocation32_spill] sm:$0xff] }
 0x30a   : > { %3626 = vst.msk [vmem:[#allocation2] sm:$0xff] %vm963_vm1, %v3622_v50  ;;  %v3614_v55 = vld [vmem:[#allocation2 + $0x8] sm:$0xff]  ;;  %v3582_v24 = vadd.f32 %v3576_v7, %v3569_v18  ;;  %v3647_v7 = vmul.f32 %v3645_v21, %v7619_v57  ;;  %v6985_v21 = vld [vmem:[%s7624_s1] sm:$0xff] }
 0x30b   : > { %v3623_v58 = vadd.f32 %v3619_v41, %v3614_v55  ;;  %3474 = vst.msk [vmem:[#allocation2 + $0x30] sm:$0xff] %vm963_vm1, %v3468_v26  ;;  %v3440_v41 = vmul.f32 %v6800_v56, %v5527_v19  ;;  %v7622_v56 = vld [vmem:[#allocation16_spill] sm:$0xff] }
 0x30c   : > { %3588 = vst.msk [vmem:[#allocation2 + $0x10] sm:$0xff] %vm963_vm1, %v3582_v24  ;;  %v3453_v46 = vld [vmem:[#allocation2 + $0x20] sm:$0xff]  ;;  %v3577_v24 = vmul.f32 %v7616_v25, %v5577_v3 }
 0x30d   : > { %3627 = vst.msk [vmem:[#allocation2 + $0x8] sm:$0xff] %vm963_vm1, %v3623_v58  ;;  %v3508_v45 = vld [vmem:[#allocation2 + $0x18] sm:$0xff]  ;;  %v3466_v63 = vadd.f32 %v3460_v22, %v3453_v46  ;;  %v3654_v46 = vmul.f32 %v3653_v47, %v7619_v57  ;;  %v3372_v25 = vld [vmem:[%s7620_s26] sm:$0x1] }
 0x30e   : > { %v3525_v14 = vadd.f32 %v3517_v20, %v3508_v45  ;;  %3412 = vst.msk [vmem:[#allocation2 + $0x38] sm:$0xff] %vm963_vm1, %v3409_v10 }
 0x30f   : > { %3472 = vst.msk [vmem:[#allocation2 + $0x20] sm:$0xff] %vm963_vm1, %v3466_v63  ;;  %4770 = vmatmul.msk.f32.gmra.mxu2 %vm963_vm1, %v6813_v30  ;;  %v3373_v63 = vld [vmem:[%s7621_s28] sm:$0x1] }
 0x310   : > { %3533 = vst.msk [vmem:[#allocation2 + $0x18] sm:$0xff] %vm963_vm1, %v3525_v14  ;;  %v3454_v44 = vld [vmem:[#allocation2 + $0x28] sm:$0xff] }
 0x311   : > { %v3630_v15 = vld [vmem:[#allocation2] sm:$0xff]  ;;  %v3467_v42 = vadd.f32 %v3461_v61, %v3454_v44  ;;  %v3636_v61 = vmul.f32 %v6905_v35, %v7619_v57  ;;  %v3601_v35 = vmul.f32 %v7617_v1, %v5636_v28 }
 0x312   : > { %v3637_v12 = vadd.f32 %v3634_v49, %v3630_v15  ;;  %v3481_v52 = vld [vmem:[#allocation2 + $0x30] sm:$0xff]  ;;  %v6967_v49 = vperm.slane %v3372_v25, 0 }
 0x313   : > { %v3594_v54 = vld [vmem:[#allocation2 + $0x10] sm:$0xff]  ;;  %3473 = vst.msk [vmem:[#allocation2 + $0x28] sm:$0xff] %vm963_vm1, %v3467_v42  ;;  %v3496_v51 = vadd.f32 %v3489_v39, %v3481_v52 }
 0x314   : > { %3640 = vst.msk [vmem:[#allocation2] sm:$0xff] %vm963_vm1, %v3637_v12  ;;  %v3605_v30 = vadd.f32 %v3600_v62, %v3594_v54  ;;  %v3631_v17 = vld [vmem:[#allocation2 + $0x8] sm:$0xff]  ;;  %v6970_v62 = vperm.slane %v3373_v63, 0  ;;  %v7625_v54 = vld [vmem:[#allocation42_spill] sm:$0xff]  ;;  %v7032_v63 = vperm.slane %v6985_v21, 2 }
 0x315   : > { %3503 = vst.msk [vmem:[#allocation2 + $0x30] sm:$0xff] %vm963_vm1, %v3496_v51  ;;  %v3416_v33 = vld [vmem:[#allocation2 + $0x38] sm:$0xff]  ;;  %v3638_v36 = vadd.f32 %v3635_v48, %v3631_v17 }
 0x316   : > { %3610 = vst.msk [vmem:[#allocation2 + $0x10] sm:$0xff] %vm963_vm1, %v3605_v30  ;;  %v3479_v32 = vld [vmem:[#allocation2 + $0x20] sm:$0xff]  ;;  %v3425_v60 = vadd.f32 %v3421_v27, %v3416_v33  ;;  %v7627_v33 = vld [vmem:[#allocation36_spill] sm:$0xff] }
 0x317   : > { %v3541_v9 = vld [vmem:[#allocation2 + $0x18] sm:$0xff]  ;;  %v3494_v37 = vadd.f32 %v3487_v29, %v3479_v32  ;;  %3641 = vst.msk [vmem:[#allocation2 + $0x8] sm:$0xff] %vm963_vm1, %v3638_v36  ;;  %v7626_v30 = vld [vmem:[#allocation19_spill] sm:$0xff] }
 0x318   : > { %v3556_v43 = vadd.f32 %v3549_v2, %v3541_v9  ;;  %3429 = vst.msk [vmem:[#allocation2 + $0x38] sm:$0xff] %vm963_vm1, %v3425_v60 }
 0x319   : > { %3501 = vst.msk [vmem:[#allocation2 + $0x20] sm:$0xff] %vm963_vm1, %v3494_v37 }
 0x31a   : > { %3563 = vst.msk [vmem:[#allocation2 + $0x18] sm:$0xff] %vm963_vm1, %v3556_v43  ;;  %v3480_v6 = vld [vmem:[#allocation2 + $0x28] sm:$0xff] }
 0x31b   : > { %v3495_v4 = vadd.f32 %v7618_v34, %v3480_v6  ;;  %v3643_v38 = vld [vmem:[#allocation2] sm:$0xff] }
 0x31c   : > { %v3648_v16 = vadd.f32 %v3646_v0, %v3643_v38  ;;  %v3511_v23 = vld [vmem:[#allocation2 + $0x30] sm:$0xff]  ;;  %v7628_v34 = vld [vmem:[#allocation27_spill] sm:$0xff] }
 0x31d   : > { %3502 = vst.msk [vmem:[#allocation2 + $0x28] sm:$0xff] %vm963_vm1, %v3495_v4  ;;  %v3615_v50 = vld [vmem:[#allocation2 + $0x10] sm:$0xff]  ;;  %v3528_v53 = vadd.f32 %v3520_v5, %v3511_v23 }
 0x31e   : > { %3650 = vst.msk [vmem:[#allocation2] sm:$0xff] %vm963_vm1, %v3648_v16  ;;  %v3644_v13 = vld [vmem:[#allocation2 + $0x8] sm:$0xff]  ;;  %v3624_v18 = vadd.f32 %v3620_v8, %v3615_v50  ;;  %v7010_v50 = vperm.slane %v6985_v21, 1 }
 0x31f   : > { %v3434_v26 = vld [vmem:[#allocation2 + $0x38] sm:$0xff]  ;;  %v3649_v55 = vadd.f32 %v3647_v7, %v3644_v13  ;;  %3536 = vst.msk [vmem:[#allocation2 + $0x30] sm:$0xff] %vm963_vm1, %v3528_v53 }
 0x320   : > { %v3509_v58 = vld [vmem:[#allocation2 + $0x20] sm:$0xff]  ;;  %v3445_v22 = vadd.f32 %v3440_v41, %v3434_v26  ;;  %3628 = vst.msk [vmem:[#allocation2 + $0x10] sm:$0xff] %vm963_vm1, %v3624_v18  ;;  %v3621_v41 = vmul.f32 %v6874_v59, %v7619_v57  ;;  %v7630_v59 = vld [vmem:[#allocation33_spill] sm:$0xff] }
 0x321   : > { %v3570_v19 = vld [vmem:[#allocation2 + $0x18] sm:$0xff]  ;;  %v3526_v40 = vadd.f32 %v7622_v56, %v3509_v58  ;;  %3651 = vst.msk [vmem:[#allocation2 + $0x8] sm:$0xff] %vm963_vm1, %v3649_v55  ;;  %v7629_v58 = vld [vmem:[#allocation28_spill] sm:$0xff] }
 0x322   : > { %v3583_v20 = vadd.f32 %v3577_v24, %v3570_v19  ;;  %3450 = vst.msk [vmem:[#allocation2 + $0x38] sm:$0xff] %vm963_vm1, %v3445_v22 }
 0x323   : > { %3534 = vst.msk [vmem:[#allocation2 + $0x20] sm:$0xff] %vm963_vm1, %v3526_v40 }
 0x324   : > { %3589 = vst.msk [vmem:[#allocation2 + $0x18] sm:$0xff] %vm963_vm1, %v3583_v20  ;;  %v3510_v3 = vld [vmem:[#allocation2 + $0x28] sm:$0xff] }
 0x325   : > { %v3527_v10 = vadd.f32 %v7623_v11, %v3510_v3  ;;  %v3652_v45 = vld [vmem:[#allocation2] sm:$0xff] }
 0x326   : > { %v3655_v14 = vadd.f32 %v3654_v46, %v3652_v45  ;;  %v3544_v39 = vld [vmem:[#allocation2 + $0x30] sm:$0xff] }
 0x327   : > { %3535 = vst.msk [vmem:[#allocation2 + $0x28] sm:$0xff] %vm963_vm1, %v3527_v10  ;;  %v3632_v44 = vld [vmem:[#allocation2 + $0x10] sm:$0xff]  ;;  %v3559_v36 = vadd.f32 %v7627_v33, %v3544_v39 }
 0x328   : > { %3656 = vst.msk [vmem:[#allocation2] sm:$0xff] %vm963_vm1, %v3655_v14  ;;  %v3658_v15 = vld [vmem:[#allocation2 + $0x8] sm:$0xff]  ;;  %v3639_v52 = vadd.f32 %v3636_v61, %v3632_v44  ;;  %v7631_v44 = vld [vmem:[#allocation37_spill] sm:$0xff] }
 0x329   : > { %v3456_v42 = vld [vmem:[#allocation2 + $0x38] sm:$0xff]  ;;  %v3669_v12 = vadd.f32 %v6967_v49, %v3658_v15  ;;  %3704 = vst.msk [vmem:[#allocation2 + $0x8] sm:$0xff] %vm963_vm1, %v7590_v31 }
 0x32a   : > { %v3542_v48 = vld [vmem:[#allocation2 + $0x20] sm:$0xff]  ;;  %v3469_v51 = vadd.f32 %v7625_v54, %v3456_v42  ;;  %3642 = vst.msk [vmem:[#allocation2 + $0x10] sm:$0xff] %vm963_vm1, %v3639_v52 }
 0x32b   : > { %v3557_v27 = vadd.f32 %v7626_v30, %v3542_v48  ;;  %vm3677_vm7 = vcmp.gt.f32.partialorder %v3669_v12, 0.0  ;;  %v3688_v17 = vmul.f32 %v6970_v62, %v3669_v12  ;;  %v3595_v29 = vld [vmem:[#allocation2 + $0x18] sm:$0xff]  ;;  %3566 = vst.msk [vmem:[#allocation2 + $0x30] sm:$0xff] %vm963_vm1, %v3559_v36 }
 0x32c   : > { %3475 = vst.msk [vmem:[#allocation2 + $0x38] sm:$0xff] %vm963_vm1, %v3469_v51  ;;  %v3606_v2 = vadd.f32 %v3601_v35, %v3595_v29  ;;  %v7632_v30 = vld [vmem:[#allocation38_spill] sm:$0xff] }
 0x32d   : > { %3564 = vst.msk [vmem:[#allocation2 + $0x20] sm:$0xff] %vm963_vm1, %v3557_v27  ;;  %v6987_v28 = vsel %vm3677_vm7, %v3669_v12, %v3688_v17 }
 0x32e   : > { %v3720_v1 = vmul.f32 %v6987_v28, %v6985_v21  ;;  %3611 = vst.msk [vmem:[#allocation2 + $0x18] sm:$0xff] %vm963_vm1, %v3606_v2  ;;  %v3543_v43 = vld [vmem:[#allocation2 + $0x28] sm:$0xff]  ;;  %v3754_v18 = vmul.f32 %v7010_v50, %v6987_v28  ;;  %v3788_v14 = vmul.f32 %v7032_v63, %v6987_v28 }
 0x32f   : > { %v3657_v32 = vld [vmem:[#allocation2] sm:$0xff]  ;;  %v3558_v4 = vadd.f32 %v7628_v34, %v3543_v43  ;;  %v7062_v43 = vperm.slane %v6985_v21, 3 }
 0x330   : > { %v3668_v60 = vadd.f32 %v6967_v49, %v3657_v32  ;;  %3703 = vst.msk [vmem:[#allocation2] sm:$0xff] %vm963_vm1, %v7590_v31  ;;  %v3712_v9 = vld [vmem:[#allocation2 + $0xf] sm:$0x1] }
 0x331   : > { %v3728_v37 = vadd.f32 %v3720_v1, %v3712_v9  ;;  %v3659_v6 = vld [vmem:[#allocation2 + $0x10] sm:$0xff]  ;;  %3565 = vst.msk [vmem:[#allocation2 + $0x28] sm:$0xff] %vm963_vm1, %v3558_v4  ;;  %v3822_v4 = vmul.f32 %v7062_v43, %v6987_v28 }
 0x332   : > { %vm3676_vm9 = vcmp.gt.f32.partialorder %v3668_v60, 0.0  ;;  %v3687_v0 = vmul.f32 %v6970_v62, %v3668_v60  ;;  %3705 = vst.msk [vmem:[#allocation2 + $0x10] sm:$0xff] %vm963_vm1, %v7590_v31  ;;  %v3663_v8 = vld [vmem:[#allocation2 + $0x30] sm:$0xff]  ;;  %v3670_v23 = vadd.f32 %v6967_v49, %v3659_v6 }
 0x333   : > { %3737 = vst.msk [vmem:[#allocation2 + $0xf] sm:$0x1] %vm3735_vm10, %v3728_v37  ;;  %v3482_v19 = vld [vmem:[#allocation2 + $0x38] sm:$0xff]  ;;  %v3674_v25 = vadd.f32 %v6967_v49, %v3663_v8 }
 0x334   : > { %v6998_v5 = vsel %vm3676_vm9, %v3668_v60, %v3687_v0  ;;  %3709 = vst.msk [vmem:[#allocation2 + $0x30] sm:$0xff] %vm963_vm1, %v7590_v31  ;;  %v3571_v13 = vld [vmem:[#allocation2 + $0x20] sm:$0xff]  ;;  %vm3678_vm11 = vcmp.gt.f32.partialorder %v3670_v23, 0.0  ;;  %v3689_v55 = vmul.f32 %v6970_v62, %v3670_v23  ;;  %v3497_v57 = vadd.f32 %v7630_v59, %v3482_v19 }
 0x335   : > { %v3719_v38 = vmul.f32 %v6998_v5, %v6985_v21  ;;  %v3616_v53 = vld [vmem:[#allocation2 + $0x18] sm:$0xff]  ;;  %v3584_v22 = vadd.f32 %v7629_v58, %v3571_v13  ;;  %v3753_v46 = vmul.f32 %v7010_v50, %v6998_v5  ;;  %vm3682_vm15 = vcmp.gt.f32.partialorder %v3674_v25, 0.0 }
 0x336   : > { %v3625_v24 = vadd.f32 %v3621_v41, %v3616_v53  ;;  %v7019_v56 = vsel %vm3678_vm11, %v3670_v23, %v3689_v55  ;;  %3504 = vst.msk [vmem:[#allocation2 + $0x38] sm:$0xff] %vm963_vm1, %v3497_v57  ;;  %v3693_v39 = vmul.f32 %v6970_v62, %v3674_v25  ;;  %v3787_v1 = vmul.f32 %v7032_v63, %v6998_v5 }
 0x337   : > { %v3711_v16 = vld [vmem:[#allocation2 + $0x7] sm:$0x1]  ;;  %v3721_v20 = vmul.f32 %v7019_v56, %v6985_v21  ;;  %3590 = vst.msk [vmem:[#allocation2 + $0x20] sm:$0xff] %vm963_vm1, %v3584_v22  ;;  %v3755_v29 = vmul.f32 %v7010_v50, %v7019_v56  ;;  %v3789_v13 = vmul.f32 %v7032_v63, %v7019_v56 }
 0x338   : > { %v3727_v7 = vadd.f32 %v3719_v38, %v3711_v16  ;;  %3629 = vst.msk [vmem:[#allocation2 + $0x18] sm:$0xff] %vm963_vm1, %v3625_v24  ;;  %v3572_v10 = vld [vmem:[#allocation2 + $0x28] sm:$0xff]  ;;  %v7044_v48 = vsel %vm3682_vm15, %v3674_v25, %v3693_v39  ;;  %v7107_v39 = vld [vmem:[%s7634_s0] ss:$0 sm:$0xff] }
 0x339   : > { %v3713_v40 = vld [vmem:[#allocation2 + $0x17] sm:$0x1]  ;;  %v3585_v15 = vadd.f32 %v7631_v44, %v3572_v10  ;;  %v3725_v17 = vmul.f32 %v7044_v48, %v6985_v21  ;;  %v3759_v41 = vmul.f32 %v7010_v50, %v7044_v48 }
 0x33a   : > { %3736 = vst.msk [vmem:[#allocation2 + $0x7] sm:$0x1] %vm3735_vm10, %v3727_v7  ;;  %v3745_v26 = vld [vmem:[#allocation2 + $0xe] sm:$0x3]  ;;  %v3729_v3 = vadd.f32 %v3721_v20, %v3713_v40  ;;  %v7092_v20 = vperm.slane %v6985_v21, 4 }
 0x33b   : > { %v3762_v47 = vadd.f32 %v3754_v18, %v3745_v26  ;;  %3591 = vst.msk [vmem:[#allocation2 + $0x28] sm:$0xff] %vm963_vm1, %v3585_v15  ;;  %v3717_v54 = vld [vmem:[#allocation2 + $0x37] sm:$0x1] }
 0x33c   : > { %3738 = vst.msk [vmem:[#allocation2 + $0x17] sm:$0x1] %vm3735_vm10, %v3729_v3  ;;  %v3733_v2 = vadd.f32 %v3725_v17, %v3717_v54  ;;  %v3855_v10 = vmul.f32 %v7092_v20, %v6987_v28 }
 0x33d   : > { %3771 = vst.msk [vmem:[#allocation2 + $0xe] sm:$0x3] %vm3769_vm13, %v3762_v47  ;;  %v3821_v47 = vmul.f32 %v7062_v43, %v6998_v5 }
 0x33e   : > { %v3596_v35 = vld [vmem:[#allocation2 + $0x20] sm:$0xff]  ;;  %3742 = vst.msk [vmem:[#allocation2 + $0x37] sm:$0x1] %vm3735_vm10, %v3733_v2 }
 0x33f   : > { %v3660_v61 = vld [vmem:[#allocation2 + $0x18] sm:$0xff]  ;;  %v3607_v27 = vadd.f32 %v7632_v30, %v3596_v35  ;;  %v3823_v35 = vmul.f32 %v7062_v43, %v7019_v56 }
 0x340   : > { %v3671_v12 = vadd.f32 %v6967_v49, %v3660_v61  ;;  %3706 = vst.msk [vmem:[#allocation2 + $0x18] sm:$0xff] %vm963_vm1, %v7590_v31 }
 0x341   : > { %v3744_v11 = vld [vmem:[#allocation2 + $0x6] sm:$0x3]  ;;  %3612 = vst.msk [vmem:[#allocation2 + $0x20] sm:$0xff] %vm963_vm1, %v3607_v27  ;;  %v3854_v27 = vmul.f32 %v7092_v20, %v6998_v5 }
 0x342   : > { %v3761_v45 = vadd.f32 %v3753_v46, %v3744_v11  ;;  %vm3679_vm3 = vcmp.gt.f32.partialorder %v3671_v12, 0.0  ;;  %v3690_v51 = vmul.f32 %v6970_v62, %v3671_v12  ;;  %v3662_v34 = vld [vmem:[#allocation2 + $0x28] sm:$0xff]  ;;  %v7098_v11 = vld [vmem:[%s7633_s2] ss:$0 sm:$0xff] }
 0x343   : > { %v3746_v33 = vld [vmem:[#allocation2 + $0x16] sm:$0x3]  ;;  %v3673_v8 = vadd.f32 %v6967_v49, %v3662_v34  ;;  %3708 = vst.msk [vmem:[#allocation2 + $0x28] sm:$0xff] %vm963_vm1, %v7590_v31 }
 0x344   : > { %3770 = vst.msk [vmem:[#allocation2 + $0x6] sm:$0x3] %vm3769_vm13, %v3761_v45  ;;  %v3779_v42 = vld [vmem:[#allocation2 + $0xd] sm:$0x7]  ;;  %v7053_v36 = vsel %vm3679_vm3, %v3671_v12, %v3690_v51  ;;  %v3763_v32 = vadd.f32 %v3755_v29, %v3746_v33 }
 0x345   : > { %v3796_v52 = vadd.f32 %v3788_v14, %v3779_v42  ;;  %v3722_v60 = vmul.f32 %v7053_v36, %v6985_v21  ;;  %v3692_v53 = vmul.f32 %v6970_v62, %v3673_v8  ;;  %vm3681_vm5 = vcmp.gt.f32.partialorder %v3673_v8, 0.0  ;;  %v3750_v18 = vld [vmem:[#allocation2 + $0x36] sm:$0x3] }
 0x346   : > { %3772 = vst.msk [vmem:[#allocation2 + $0x16] sm:$0x3] %vm3769_vm13, %v3763_v32  ;;  %v3767_v24 = vadd.f32 %v3759_v41, %v3750_v18  ;;  %v3756_v19 = vmul.f32 %v7010_v50, %v7053_v36  ;;  %v3790_v33 = vmul.f32 %v7032_v63, %v7053_v36 }
 0x347   : > { %3805 = vst.msk [vmem:[#allocation2 + $0xd] sm:$0x7] %vm3803_vm2, %v3796_v52  ;;  %v3714_v0 = vld [vmem:[#allocation2 + $0x1f] sm:$0x1]  ;;  %v7088_v59 = vsel %vm3681_vm5, %v3673_v8, %v3692_v53 }
 0x348   : > { %v3730_v6 = vadd.f32 %v3722_v60, %v3714_v0  ;;  %v3661_v23 = vld [vmem:[#allocation2 + $0x20] sm:$0xff]  ;;  %3776 = vst.msk [vmem:[#allocation2 + $0x36] sm:$0x3] %vm3769_vm13, %v3767_v24  ;;  %v3724_v14 = vmul.f32 %v7088_v59, %v6985_v21  ;;  %v7121_v60 = vperm.slane %v6985_v21, 5  ;;  %v3512_v8 = vld [vmem:[#allocation2 + $0x38] sm:$0xff] }
 0x349   : > { %v3672_v7 = vadd.f32 %v6967_v49, %v3661_v23  ;;  %3707 = vst.msk [vmem:[#allocation2 + $0x20] sm:$0xff] %vm963_vm1, %v7590_v31 }
 0x34a   : > { %3739 = vst.msk [vmem:[#allocation2 + $0x1f] sm:$0x1] %vm3735_vm10, %v3730_v6  ;;  %v3716_v15 = vld [vmem:[#allocation2 + $0x2f] sm:$0x1]  ;;  %v3888_v34 = vmul.f32 %v7121_v60, %v6987_v28 }
 0x34b   : > { %v3778_v9 = vld [vmem:[#allocation2 + $0x5] sm:$0x7]  ;;  %vm3680_vm6 = vcmp.gt.f32.partialorder %v3672_v7, 0.0  ;;  %v3691_v55 = vmul.f32 %v6970_v62, %v3672_v7  ;;  %v3732_v54 = vadd.f32 %v3724_v14, %v3716_v15 }
 0x34c   : > { %v3795_v37 = vadd.f32 %v3787_v1, %v3778_v9 }
 0x34d   : > { %v3780_v26 = vld [vmem:[#allocation2 + $0x15] sm:$0x7]  ;;  %v7086_v40 = vsel %vm3680_vm6, %v3672_v7, %v3691_v55  ;;  %3741 = vst.msk [vmem:[#allocation2 + $0x2f] sm:$0x1] %vm3735_vm10, %v3732_v54 }
 0x34e   : > { %3804 = vst.msk [vmem:[#allocation2 + $0x5] sm:$0x7] %vm3803_vm2, %v3795_v37  ;;  %v3813_v38 = vld [vmem:[#allocation2 + $0xc] sm:$0xf]  ;;  %v3797_v58 = vadd.f32 %v3789_v13, %v3780_v26  ;;  %v3723_v3 = vmul.f32 %v7086_v40, %v6985_v21  ;;  %v3793_v37 = vmul.f32 %v7032_v63, %v7044_v48  ;;  %v3757_v6 = vmul.f32 %v7010_v50, %v7086_v40  ;;  %v7635_v26 = vld [vmem:[#allocation35_spill] sm:$0xff] }
 0x34f   : > { %v3830_v16 = vadd.f32 %v3822_v4, %v3813_v38  ;;  %v3784_v2 = vld [vmem:[#allocation2 + $0x35] sm:$0x7]  ;;  %v3758_v13 = vmul.f32 %v7010_v50, %v7088_v59  ;;  %v3529_v55 = vadd.f32 %v7635_v26, %v3512_v8  ;;  %v3825_v26 = vmul.f32 %v7062_v43, %v7086_v40 }
 0x350   : > { %3806 = vst.msk [vmem:[#allocation2 + $0x15] sm:$0x7] %vm3803_vm2, %v3797_v58  ;;  %v3715_v45 = vld [vmem:[#allocation2 + $0x27] sm:$0x1]  ;;  %v3801_v38 = vadd.f32 %v3793_v37, %v3784_v2  ;;  %v3889_v37 = vmul.f32 %v7121_v60, %v7019_v56 }
 0x351   : > { %3838 = vst.msk [vmem:[#allocation2 + $0xc] sm:$0xf] %vm2988_vm8, %v3830_v16  ;;  %v3747_v46 = vld [vmem:[#allocation2 + $0x1e] sm:$0x3]  ;;  %v3731_v44 = vadd.f32 %v3723_v3, %v3715_v45  ;;  %v7149_v45 = vperm.slane %v6985_v21, 6 }
 0x352   : > { %v3764_v25 = vadd.f32 %v3756_v19, %v3747_v46  ;;  %3810 = vst.msk [vmem:[#allocation2 + $0x35] sm:$0x7] %vm3803_vm2, %v3801_v38 }
 0x353   : > { %3740 = vst.msk [vmem:[#allocation2 + $0x27] sm:$0x1] %vm3735_vm10, %v3731_v44 }
 0x354   : > { %3773 = vst.msk [vmem:[#allocation2 + $0x1e] sm:$0x3] %vm3769_vm13, %v3764_v25  ;;  %v3749_v18 = vld [vmem:[#allocation2 + $0x2e] sm:$0x3]  ;;  %v3824_v25 = vmul.f32 %v7062_v43, %v7053_v36 }
 0x355   : > { %v3812_v22 = vld [vmem:[#allocation2 + $0x4] sm:$0xf]  ;;  %v3766_v58 = vadd.f32 %v3758_v13, %v3749_v18  ;;  %3537 = vst.msk [vmem:[#allocation2 + $0x38] sm:$0xff] %vm963_vm1, %v3529_v55  ;;  %v3860_v13 = vmul.f32 %v7092_v20, %v7044_v48 }
 0x356   : > { %v3829_v57 = vadd.f32 %v3821_v47, %v3812_v22  ;;  %v3856_v47 = vmul.f32 %v7092_v20, %v7019_v56 }
 0x357   : > { %v3814_v51 = vld [vmem:[#allocation2 + $0x14] sm:$0xf]  ;;  %3775 = vst.msk [vmem:[#allocation2 + $0x2e] sm:$0x3] %vm3769_vm13, %v3766_v58 }
 0x358   : > { %3837 = vst.msk [vmem:[#allocation2 + $0x4] sm:$0xf] %vm2988_vm8, %v3829_v57  ;;  %v3846_v61 = vld [vmem:[#allocation2 + $0xb] sm:$0x1f]  ;;  %v3831_v17 = vadd.f32 %v3823_v35, %v3814_v51  ;;  %v3887_v57 = vmul.f32 %v7121_v60, %v6998_v5  ;;  %v3921_v35 = vmul.f32 %v7149_v45, %v6987_v28 }
 0x359   : > { %v3863_v42 = vadd.f32 %v3855_v10, %v3846_v61  ;;  %v3827_v61 = vmul.f32 %v7062_v43, %v7044_v48 }
 0x35a   : > { %v3282_v12 = vpop.f32.mrf.mxu2  ;;  %3839 = vst.msk [vmem:[#allocation2 + $0x14] sm:$0xf] %vm2988_vm8, %v3831_v17  ;;  %v3748_v4 = vld [vmem:[#allocation2 + $0x26] sm:$0x3] }
 0x35b   : > { %v3283_v52 = vadd.f32 %v7098_v11, %v3282_v12  ;;  %3871 = vst.msk [vmem:[#allocation2 + $0xb] sm:$0x1f] %vm2668_vm14, %v3863_v42  ;;  %v3781_v9 = vld [vmem:[#allocation2 + $0x1d] sm:$0x7]  ;;  %v3765_v7 = vadd.f32 %v3757_v6, %v3748_v4  ;;  %v3791_v42 = vmul.f32 %v7032_v63, %v7086_v40  ;;  %v3818_v12 = vld [vmem:[#allocation2 + $0x34] sm:$0xf]  ;;  %v3920_v4 = vmul.f32 %v7149_v45, %v6998_v5 }
 0x35c   : > { %v3798_v0 = vadd.f32 %v3790_v33, %v3781_v9  ;;  %v3835_v51 = vadd.f32 %v3827_v61, %v3818_v12  ;;  %v3792_v33 = vmul.f32 %v7032_v63, %v7088_v59  ;;  %v3664_v2 = vld [vmem:[#allocation2 + $0x38] sm:$0xff]  ;;  %v3826_v61 = vmul.f32 %v7062_v43, %v7088_v59 }
 0x35d   : > { %vm3307_vm7 = vcmp.gt.f32.partialorder %v3283_v52, 0.0  ;;  %v3318_v30 = vmul.f32 %v7107_v39, %v3283_v52  ;;  %3774 = vst.msk [vmem:[#allocation2 + $0x26] sm:$0x3] %vm3769_vm13, %v3765_v7 }
 0x35e   : > { %3807 = vst.msk [vmem:[#allocation2 + $0x1d] sm:$0x7] %vm3803_vm2, %v3798_v0 }
 0x35f   : > { %v3845_v29 = vld [vmem:[#allocation2 + $0x3] sm:$0x1f]  ;;  %v3326_v1 = vsel %vm3307_vm7, %v3283_v52, %v3318_v30  ;;  %3843 = vst.msk [vmem:[#allocation2 + $0x34] sm:$0xf] %vm2988_vm8, %v3835_v51 }
 0x360   : > { %v3862_v32 = vadd.f32 %v3854_v27, %v3845_v29  ;;  %3334 = vxpose.xlu1.b32.start [1/8] (short) (narrow) %v3326_v1, 8  ;;  %v3783_v1 = vld [vmem:[#allocation2 + $0x2d] sm:$0x7]  ;;  %3710 = vst.msk [vmem:[#allocation2 + $0x38] sm:$0xff] %vm963_vm1, %v7590_v31 }
 0x361   : > { %v3847_v22 = vld [vmem:[#allocation2 + $0x13] sm:$0x1f]  ;;  %v3800_v0 = vadd.f32 %v3792_v33, %v3783_v1  ;;  %v3890_v33 = vmul.f32 %v7121_v60, %v7053_v36 }
 0x362   : > { %3870 = vst.msk [vmem:[#allocation2 + $0x3] sm:$0x1f] %vm2668_vm14, %v3862_v32  ;;  %v3285_v16 = vpop.f32.mrf.mxu2  ;;  %v3879_v23 = vld [vmem:[#allocation2 + $0xa] sm:$0x3f]  ;;  %v3864_v46 = vadd.f32 %v3856_v47, %v3847_v22  ;;  %v3675_v32 = vadd.f32 %v6967_v49, %v3664_v2 }
 0x363   : > { %v3286_v53 = vadd.f32 %v7098_v11, %v3285_v16  ;;  %v3896_v41 = vadd.f32 %v3888_v34, %v3879_v23  ;;  %3809 = vst.msk [vmem:[#allocation2 + $0x2d] sm:$0x7] %vm3803_vm2, %v3800_v0  ;;  %v3857_v16 = vmul.f32 %v7092_v20, %v7053_v36 }
 0x364   : > { %3872 = vst.msk [vmem:[#allocation2 + $0x13] sm:$0x1f] %vm2668_vm14, %v3864_v46  ;;  %v3782_v54 = vld [vmem:[#allocation2 + $0x25] sm:$0x7]  ;;  %vm3683_vm15 = vcmp.gt.f32.partialorder %v3675_v32, 0.0  ;;  %v3694_v34 = vmul.f32 %v6970_v62, %v3675_v32 }
 0x365   : > { %vm3308_vm9 = vcmp.gt.f32.partialorder %v3286_v53, 0.0  ;;  %v3319_v24 = vmul.f32 %v7107_v39, %v3286_v53  ;;  %3904 = vst.msk [vmem:[#allocation2 + $0xa] sm:$0x3f] %vm1955_vm12, %v3896_v41  ;;  %v3815_v14 = vld [vmem:[#allocation2 + $0x1c] sm:$0xf]  ;;  %v3799_v27 = vadd.f32 %v3791_v42, %v3782_v54  ;;  %v3922_v42 = vmul.f32 %v7149_v45, %v7019_v56 }
 0x366   : > { %v3832_v15 = vadd.f32 %v3824_v25, %v3815_v14  ;;  %v7178_v23 = vsel %vm3683_vm15, %v3675_v32, %v3694_v34  ;;  %v3851_v55 = vld [vmem:[#allocation2 + $0x33] sm:$0x1f]  ;;  %v4446_v14 = vld [vmem:[%s5007_s19] sm:$0xf] }
 0x367   : > { %v3327_v19 = vsel %vm3308_vm9, %v3286_v53, %v3319_v24  ;;  %3808 = vst.msk [vmem:[#allocation2 + $0x25] sm:$0x7] %vm3803_vm2, %v3799_v27  ;;  %v7182_v53 = vperm.slane %v6985_v21, 7  ;;  %v3726_v24 = vmul.f32 %v7178_v23, %v6985_v21  ;;  %v3718_v21 = vld [vmem:[#allocation2 + $0x3f] sm:$0x1]  ;;  %4771 = vmatpush.msk.msra.mxu3 %vm988_vm0, %v4446_v14  ;;  %v3923_v14 = vmul.f32 %v7149_v45, %v7053_v36 }
 0x368   : > { %3335 = vxpose.xlu1.b32.cont [2/8] (short) (narrow) %v3327_v19, 8  ;;  %3840 = vst.msk [vmem:[#allocation2 + $0x1c] sm:$0xf] %vm2988_vm8, %v3832_v15  ;;  %v3868_v19 = vadd.f32 %v3860_v13, %v3851_v55  ;;  %vm2387_vm9 = vcmask 519168  }
 0x369   : > { %v3878_v3 = vld [vmem:[#allocation2 + $0x2] sm:$0x3f]  ;;  %v3954_v58 = vmul.f32 %v7182_v53, %v6987_v28 }
 0x36a   : > { %v3895_v10 = vadd.f32 %v3887_v57, %v3878_v3  ;;  %v3288_v44 = vpop.f32.mrf.mxu2  ;;  %v7196_v57 = vld [vmem:[%s7624_s1 + $0x8] sm:$0x7f]  ;;  %3876 = vst.msk [vmem:[#allocation2 + $0x33] sm:$0x1f] %vm2668_vm14, %v3868_v19 }
 0x36b   : > { %v3289_v52 = vadd.f32 %v7098_v11, %v3288_v44  ;;  %v3880_v6 = vld [vmem:[#allocation2 + $0x12] sm:$0x3f]  ;;  %v3734_v44 = vadd.f32 %v3726_v24, %v3718_v21  ;;  %v7205_v15 = vperm.slane %v7196_v57, 0  ;;  %v3817_v12 = vld [vmem:[#allocation2 + $0x2c] sm:$0xf]  ;;  %v7234_v13 = vperm.slane %v7196_v57, 1 }
 0x36c   : > { %3903 = vst.msk [vmem:[#allocation2 + $0x2] sm:$0x3f] %vm1955_vm12, %v3895_v10  ;;  %v3912_v30 = vld [vmem:[#allocation2 + $0x9] sm:$0x7f]  ;;  %v3897_v38 = vadd.f32 %v3889_v37, %v3880_v6  ;;  %v3834_v54 = vadd.f32 %v3826_v61, %v3817_v12  ;;  %v3926_v12 = vmul.f32 %v7149_v45, %v7044_v48 }
 0x36d   : > { %vm3309_vm11 = vcmp.gt.f32.partialorder %v3289_v52, 0.0  ;;  %v3320_v17 = vmul.f32 %v7107_v39, %v3289_v52  ;;  %v3929_v29 = vadd.f32 %v3921_v35, %v3912_v30  ;;  %v3953_v30 = vmul.f32 %v7182_v53, %v6998_v5  ;;  %3743 = vst.msk [vmem:[#allocation2 + $0x3f] sm:$0x1] %vm3735_vm10, %v3734_v44 }
 0x36e   : > { %3905 = vst.msk [vmem:[#allocation2 + $0x12] sm:$0x3f] %vm1955_vm12, %v3897_v38  ;;  %v3816_v22 = vld [vmem:[#allocation2 + $0x24] sm:$0xf]  ;;  %v3987_v27 = vmul.f32 %v7205_v15, %v6987_v28 }
 0x36f   : > { %v3328_v9 = vsel %vm3309_vm11, %v3289_v52, %v3320_v17  ;;  %3937 = vst.msk [vmem:[#allocation2 + $0x9] sm:$0x7f] %vm1809_vm4, %v3929_v29  ;;  %v3848_v41 = vld [vmem:[#allocation2 + $0x1b] sm:$0x1f]  ;;  %v3833_v3 = vadd.f32 %v3825_v26, %v3816_v22  ;;  %v3859_v26 = vmul.f32 %v7092_v20, %v7088_v59 }
 0x370   : > { %3336 = vxpose.xlu1.b32.cont [3/8] (short) (narrow) %v3328_v9, 8  ;;  %v3865_v18 = vadd.f32 %v3857_v16, %v3848_v41  ;;  %3842 = vst.msk [vmem:[#allocation2 + $0x2c] sm:$0xf] %vm2988_vm8, %v3834_v54  ;;  %v3893_v9 = vmul.f32 %v7121_v60, %v7044_v48  ;;  %v4003_v34 = vrot.slane %v3987_v27, 1 }
 0x371   : > { %3841 = vst.msk [vmem:[#allocation2 + $0x24] sm:$0xf] %vm2988_vm8, %v3833_v3  ;;  %v3884_v0 = vld [vmem:[#allocation2 + $0x32] sm:$0x3f] }
 0x372   : > { %v3291_v49 = vpop.f32.mrf.mxu2  ;;  %3873 = vst.msk [vmem:[#allocation2 + $0x1b] sm:$0x1f] %vm2668_vm14, %v3865_v18 }
 0x373   : > { %v3911_v8 = vld [vmem:[#allocation2 + $0x1] sm:$0x7f]  ;;  %v3292_v7 = vadd.f32 %v7098_v11, %v3291_v49  ;;  %v3858_v49 = vmul.f32 %v7092_v20, %v7086_v40 }
 0x374   : > { %v3928_v62 = vadd.f32 %v3920_v4, %v3911_v8  ;;  %v3901_v4 = vadd.f32 %v3893_v9, %v3884_v0  ;;  %v3986_v8 = vmul.f32 %v7205_v15, %v6998_v5  ;;  %v3751_v55 = vld [vmem:[#allocation2 + $0x3e] sm:$0x3]  ;;  %v3794_v9 = vmul.f32 %v7032_v63, %v7178_v23 }
 0x375   : > { %vm3310_vm3 = vcmp.gt.f32.partialorder %v3292_v7, 0.0  ;;  %v3321_v47 = vmul.f32 %v7107_v39, %v3292_v7  ;;  %v3913_v35 = vld [vmem:[#allocation2 + $0x11] sm:$0x7f] }
 0x376   : > { %3936 = vst.msk [vmem:[#allocation2 + $0x1] sm:$0x7f] %vm1809_vm4, %v3928_v62  ;;  %v3945_v46 = vld [vmem:[#allocation2 + $0x8] sm:$0xff]  ;;  %v3930_v17 = vadd.f32 %v3922_v42, %v3913_v35  ;;  %v3760_v62 = vmul.f32 %v7010_v50, %v7178_v23  ;;  %v4044_v50 = vmul.f32 %v7234_v13, %v6987_v28 }
 0x377   : > { %v3329_v25 = vsel %vm3310_vm3, %v3292_v7, %v3321_v47  ;;  %v3962_v10 = vadd.f32 %v3954_v58, %v3945_v46  ;;  %3909 = vst.msk [vmem:[#allocation2 + $0x32] sm:$0x3f] %vm1955_vm12, %v3901_v4  ;;  %v3955_v47 = vmul.f32 %v7182_v53, %v7019_v56  ;;  %v3850_v58 = vld [vmem:[#allocation2 + $0x2b] sm:$0x1f] }
 0x378   : > { %3337 = vxpose.xlu1.b32.cont [4/8] (short) (narrow) %v3329_v25, 8  ;;  %3938 = vst.msk [vmem:[#allocation2 + $0x11] sm:$0x7f] %vm1809_vm4, %v3930_v17  ;;  %v3849_v7 = vld [vmem:[#allocation2 + $0x23] sm:$0x1f]  ;;  %v3768_v22 = vadd.f32 %v3760_v62, %v3751_v55  ;;  %v3867_v46 = vadd.f32 %v3859_v26, %v3850_v58  ;;  %v4002_v25 = vrot.slane %v3986_v8, 1  ;;  %v3956_v55 = vmul.f32 %v7182_v53, %v7053_v36 }
 0x379   : > { %3970 = vst.msk [vmem:[#allocation2 + $0x8] sm:$0xff] %vm963_vm1, %v3962_v10  ;;  %v3881_v32 = vld [vmem:[#allocation2 + $0x1a] sm:$0x3f]  ;;  %v3866_v18 = vadd.f32 %v3858_v49, %v3849_v7  ;;  %v4060_v54 = vrot.slane %v4044_v50, 2  ;;  %v3959_v58 = vmul.f32 %v7182_v53, %v7044_v48 }
 0x37a   : > { %v3294_v52 = vpop.f32.mrf.mxu2  ;;  %v3898_v37 = vadd.f32 %v3890_v33, %v3881_v32  ;;  %3777 = vst.msk [vmem:[#allocation2 + $0x3e] sm:$0x3] %vm3769_vm13, %v3768_v22 }
 0x37b   : > { %v3295_v51 = vadd.f32 %v7098_v11, %v3294_v52  ;;  %3874 = vst.msk [vmem:[#allocation2 + $0x23] sm:$0x1f] %vm2668_vm14, %v3866_v18 }
 0x37c   : > { %3906 = vst.msk [vmem:[#allocation2 + $0x1a] sm:$0x3f] %vm1955_vm12, %v3898_v37  ;;  %v7266_v37 = vperm.slane %v7196_v57, 2 }
 0x37d   : > { %v3944_v29 = vld [vmem:[#allocation2] sm:$0xff]  ;;  %vm3311_vm0 = vcmp.gt.f32.partialorder %v3295_v51, 0.0  ;;  %v3322_v2 = vmul.f32 %v7107_v39, %v3295_v51  ;;  %3875 = vst.msk [vmem:[#allocation2 + $0x2b] sm:$0x1f] %vm2668_vm14, %v3867_v46 }
 0x37e   : > { %v3961_v1 = vadd.f32 %v3953_v30, %v3944_v29  ;;  %v3917_v35 = vld [vmem:[#allocation2 + $0x31] sm:$0x7f]  ;;  %v3891_v29 = vmul.f32 %v7121_v60, %v7086_v40 }
 0x37f   : > { %v3330_v6 = vsel %vm3311_vm0, %v3295_v51, %v3322_v2  ;;  %v3946_v19 = vld [vmem:[#allocation2 + $0x10] sm:$0xff]  ;;  %v3988_v51 = vmul.f32 %v7205_v15, %v7019_v56  ;;  %v3934_v30 = vadd.f32 %v3926_v12, %v3917_v35  ;;  %v4043_v2 = vmul.f32 %v7234_v13, %v6998_v5 }
 0x380   : > { %3969 = vst.msk [vmem:[#allocation2] sm:$0xff] %vm963_vm1, %v3961_v1  ;;  %3338 = vxpose.xlu1.b32.cont [5/8] (short) (narrow) %v3330_v6, 8  ;;  %v3978_v38 = vld [vmem:[#allocation2 + $0x8] sm:$0x7f]  ;;  %v3963_v10 = vadd.f32 %v3955_v47, %v3946_v19  ;;  %v3892_v6 = vmul.f32 %v7121_v60, %v7088_v59  ;;  %v3828_v12 = vmul.f32 %v7062_v43, %v7178_v23 }
 0x381   : > { %v4019_v16 = vadd.f32 %v4003_v34, %v3978_v38  ;;  %3942 = vst.msk [vmem:[#allocation2 + $0x31] sm:$0x7f] %vm1809_vm4, %v3934_v30  ;;  %v3785_v34 = vld [vmem:[#allocation2 + $0x3d] sm:$0x7]  ;;  %v4004_v38 = vrot.slane %v3988_v51, 1  ;;  %v4059_v62 = vrot.slane %v4043_v2, 2  ;;  %v3989_v35 = vmul.f32 %v7205_v15, %v7053_v36 }
 0x382   : > { %v3297_v41 = vpop.f32.mrf.mxu2  ;;  %3971 = vst.msk [vmem:[#allocation2 + $0x10] sm:$0xff] %vm963_vm1, %v3963_v10  ;;  %v3882_v32 = vld [vmem:[#allocation2 + $0x22] sm:$0x3f]  ;;  %v3802_v8 = vadd.f32 %v3794_v9, %v3785_v34  ;;  %v3925_v51 = vmul.f32 %v7149_v45, %v7088_v59 }
 0x383   : > { %v3298_v24 = vadd.f32 %v7098_v11, %v3297_v41  ;;  %4027 = vst.msk [vmem:[#allocation2 + $0x8] sm:$0x7f] %vm1809_vm4, %v4019_v16  ;;  %v3914_v42 = vld [vmem:[#allocation2 + $0x19] sm:$0x7f]  ;;  %v3899_v0 = vadd.f32 %v3891_v29, %v3882_v32  ;;  %v4101_v41 = vmul.f32 %v7266_v37, %v6987_v28  ;;  %v3992_v29 = vmul.f32 %v7205_v15, %v7044_v48 }
 0x384   : > { %v3931_v52 = vadd.f32 %v3923_v14, %v3914_v42  ;;  %v3883_v49 = vld [vmem:[#allocation2 + $0x2a] sm:$0x3f]  ;;  %3811 = vst.msk [vmem:[#allocation2 + $0x3d] sm:$0x7] %vm3803_vm2, %v3802_v8 }
 0x385   : > { %vm3312_vm5 = vcmp.gt.f32.partialorder %v3298_v24, 0.0  ;;  %v3323_v3 = vmul.f32 %v7107_v39, %v3298_v24  ;;  %3907 = vst.msk [vmem:[#allocation2 + $0x22] sm:$0x3f] %vm1955_vm12, %v3899_v0  ;;  %v3900_v63 = vadd.f32 %v3892_v6, %v3883_v49  ;;  %v4005_v6 = vrot.slane %v3989_v35, 1 }
 0x386   : > { %3939 = vst.msk [vmem:[#allocation2 + $0x19] sm:$0x7f] %vm1809_vm4, %v3931_v52  ;;  %v7296_v52 = vperm.slane %v7196_v57, 3 }
 0x387   : > { %v3977_v21 = vld [vmem:[#allocation2] sm:$0x7f]  ;;  %v3331_v61 = vsel %vm3312_vm5, %v3298_v24, %v3323_v3  ;;  %3908 = vst.msk [vmem:[#allocation2 + $0x2a] sm:$0x3f] %vm1955_vm12, %v3900_v63  ;;  %v4117_v3 = vrot.slane %v4101_v41, 3  ;;  %v4102_v63 = vmul.f32 %v7266_v37, %v7019_v56  ;;  %v3957_v41 = vmul.f32 %v7182_v53, %v7086_v40 }
 0x388   : > { %v4018_v44 = vadd.f32 %v4002_v25, %v3977_v21  ;;  %3339 = vxpose.xlu1.b32.cont [6/8] (short) (narrow) %v3331_v61, 8  ;;  %v3950_v19 = vld [vmem:[#allocation2 + $0x30] sm:$0xff]  ;;  %v4045_v25 = vmul.f32 %v7234_v13, %v7019_v56  ;;  %v4100_v21 = vmul.f32 %v7266_v37, %v6998_v5  ;;  %v3924_v61 = vmul.f32 %v7149_v45, %v7086_v40 }
 0x389   : > { %v3979_v16 = vld [vmem:[#allocation2 + $0x10] sm:$0x7f]  ;;  %v3967_v10 = vadd.f32 %v3959_v58, %v3950_v19  ;;  %v4158_v32 = vmul.f32 %v7296_v52, %v6987_v28  ;;  %v7327_v19 = vperm.slane %v7196_v57, 4 }
 0x38a   : > { %4026 = vst.msk [vmem:[#allocation2] sm:$0x7f] %vm1809_vm4, %v4018_v44  ;;  %v3300_v27 = vpop.f32.mrf.mxu2  ;;  %v4035_v17 = vld [vmem:[#allocation2 + $0x8] sm:$0x3f]  ;;  %v4020_v18 = vadd.f32 %v4004_v38, %v3979_v16  ;;  %v4008_v38 = vrot.slane %v3992_v29, 1  ;;  %v4159_v29 = vmul.f32 %v7296_v52, %v7019_v56 }
 0x38b   : > { %v3301_v33 = vadd.f32 %v7098_v11, %v3300_v27  ;;  %v4076_v1 = vadd.f32 %v4060_v54, %v4035_v17  ;;  %3975 = vst.msk [vmem:[#allocation2 + $0x30] sm:$0xff] %vm963_vm1, %v3967_v10  ;;  %v3819_v30 = vld [vmem:[#allocation2 + $0x3c] sm:$0xf]  ;;  %v4174_v16 = vrot.slane %v4158_v32, 4 }
 0x38c   : > { %4028 = vst.msk [vmem:[#allocation2 + $0x10] sm:$0x7f] %vm1809_vm4, %v4020_v18  ;;  %v3915_v42 = vld [vmem:[#allocation2 + $0x21] sm:$0x7f]  ;;  %v3836_v43 = vadd.f32 %v3828_v12, %v3819_v30  ;;  %v4157_v18 = vmul.f32 %v7296_v52, %v6998_v5  ;;  %v3990_v12 = vmul.f32 %v7205_v15, %v7086_v40 }
 0x38d   : > { %vm3313_vm6 = vcmp.gt.f32.partialorder %v3301_v33, 0.0  ;;  %v3324_v4 = vmul.f32 %v7107_v39, %v3301_v33  ;;  %4084 = vst.msk [vmem:[#allocation2 + $0x8] sm:$0x3f] %vm1955_vm12, %v4076_v1  ;;  %v3947_v47 = vld [vmem:[#allocation2 + $0x18] sm:$0xff]  ;;  %v3932_v54 = vadd.f32 %v3924_v61, %v3915_v42  ;;  %v4116_v1 = vrot.slane %v4100_v21, 3 }
 0x38e   : > { %v3964_v50 = vadd.f32 %v3956_v55, %v3947_v47  ;;  %v3916_v17 = vld [vmem:[#allocation2 + $0x29] sm:$0x7f]  ;;  %3844 = vst.msk [vmem:[#allocation2 + $0x3c] sm:$0xf] %vm2988_vm8, %v3836_v43  ;;  %v4046_v47 = vmul.f32 %v7234_v13, %v7053_v36  ;;  %v4215_v61 = vmul.f32 %v7327_v19, %v6987_v28 }
 0x38f   : > { %v3332_v7 = vsel %vm3313_vm6, %v3301_v33, %v3324_v4  ;;  %3940 = vst.msk [vmem:[#allocation2 + $0x21] sm:$0x7f] %vm1809_vm4, %v3932_v54  ;;  %v3933_v2 = vadd.f32 %v3925_v51, %v3916_v17 }
 0x390   : > { %3340 = vxpose.xlu1.b32.cont [7/8] (short) (narrow) %v3332_v7, 8  ;;  %3972 = vst.msk [vmem:[#allocation2 + $0x18] sm:$0xff] %vm963_vm1, %v3964_v50  ;;  %v4062_v42 = vrot.slane %v4046_v47, 2  ;;  %v4231_v17 = vrot.slane %v4215_v61, 5  ;;  %v4047_v47 = vmul.f32 %v7234_v13, %v7086_v40 }
 0x391   : > { %v4034_v26 = vld [vmem:[#allocation2] sm:$0x3f]  ;;  %3941 = vst.msk [vmem:[#allocation2 + $0x29] sm:$0x7f] %vm1809_vm4, %v3933_v2  ;;  %v4006_v2 = vrot.slane %v3990_v12, 1  ;;  %v3927_v12 = vmul.f32 %v7149_v45, %v7178_v23 }
 0x392   : > { %v4075_v24 = vadd.f32 %v4059_v62, %v4034_v26  ;;  %v3303_v22 = vpop.f32.mrf.mxu2  ;;  %v3983_v8 = vld [vmem:[#allocation2 + $0x30] sm:$0x7f]  ;;  %v4063_v61 = vrot.slane %v4047_v47, 2 }
 0x393   : > { %v3304_v46 = vadd.f32 %v7098_v11, %v3303_v22  ;;  %v4036_v33 = vld [vmem:[#allocation2 + $0x10] sm:$0x3f]  ;;  %v4024_v7 = vadd.f32 %v4008_v38, %v3983_v8  ;;  %v3958_v22 = vmul.f32 %v7182_v53, %v7088_v59  ;;  %v4175_v8 = vrot.slane %v4159_v29, 4 }
 0x394   : > { %4083 = vst.msk [vmem:[#allocation2] sm:$0x3f] %vm1955_vm12, %v4075_v24  ;;  %v4092_v14 = vld [vmem:[#allocation2 + $0x8] sm:$0x1f]  ;;  %v3861_v24 = vmul.f32 %v7092_v20, %v7178_v23  ;;  %v4163_v29 = vmul.f32 %v7296_v52, %v7044_v48 }
 0x395   : > { %vm3314_vm7 = vcmp.gt.f32.partialorder %v3304_v46, 0.0  ;;  %v3325_v44 = vmul.f32 %v7107_v39, %v3304_v46  ;;  %v4133_v11 = vadd.f32 %v4117_v3, %v4092_v14  ;;  %v4061_v39 = vrot.slane %v4045_v25, 2  ;;  %4032 = vst.msk [vmem:[#allocation2 + $0x30] sm:$0x7f] %vm1809_vm4, %v4024_v7  ;;  %v3852_v50 = vld [vmem:[#allocation2 + $0x3b] sm:$0x1f] }
 0x396   : > { %v3948_v55 = vld [vmem:[#allocation2 + $0x20] sm:$0xff]  ;;  %v4049_v25 = vmul.f32 %v7234_v13, %v7044_v48  ;;  %v3869_v10 = vadd.f32 %v3861_v24, %v3852_v50  ;;  %v4173_v14 = vrot.slane %v4157_v18, 4 }
 0x397   : > { %v3333_v27 = vsel %vm3314_vm7, %v3304_v46, %v3325_v44  ;;  %4141 = vst.msk [vmem:[#allocation2 + $0x8] sm:$0x1f] %vm2668_vm14, %v4133_v11  ;;  %v4077_v9 = vadd.f32 %v4061_v39, %v4036_v33  ;;  %v3980_v4 = vld [vmem:[#allocation2 + $0x18] sm:$0x7f]  ;;  %v3965_v58 = vadd.f32 %v3957_v41, %v3948_v55  ;;  %v4118_v46 = vrot.slane %v4102_v63, 3 }
 0x398   : > { %3341 = vxpose.xlu1.b32.end [8/8] (short) (narrow) %v3333_v27, 8  ;;  %v4021_v49 = vadd.f32 %v4005_v6, %v3980_v4  ;;  %v3949_v3 = vld [vmem:[#allocation2 + $0x28] sm:$0xff]  ;;  %3877 = vst.msk [vmem:[#allocation2 + $0x3b] sm:$0x1f] %vm2668_vm14, %v3869_v10  ;;  %v4065_v51 = vrot.slane %v4049_v25, 2  ;;  %v3991_v27 = vmul.f32 %v7205_v15, %v7088_v59  ;;  %v4103_v6 = vmul.f32 %v7266_v37, %v7053_v36 }
 0x399   : > { %4085 = vst.msk [vmem:[#allocation2 + $0x10] sm:$0x3f] %vm1955_vm12, %v4077_v9  ;;  %v3966_v21 = vadd.f32 %v3958_v22, %v3949_v3  ;;  %v4106_v63 = vmul.f32 %v7266_v37, %v7044_v48  ;;  %v4048_v3 = vmul.f32 %v7234_v13, %v7088_v59 }
 0x39a   : > { %4029 = vst.msk [vmem:[#allocation2 + $0x18] sm:$0x7f] %vm1809_vm4, %v4021_v49  ;;  %v4007_v4 = vrot.slane %v3991_v27, 1  ;;  %v7354_v49 = vperm.slane %v7196_v57, 5  ;;  %v4119_v24 = vrot.slane %v4103_v6, 3  ;;  %v7381_v27 = vrot.slane %v7196_v57, 7 }
 0x39b   : > { %v4091_v0 = vld [vmem:[#allocation2] sm:$0x1f]  ;;  %3973 = vst.msk [vmem:[#allocation2 + $0x20] sm:$0xff] %vm963_vm1, %v3965_v58  ;;  %v4122_v50 = vrot.slane %v4106_v63, 3 }
 0x39c   : > { %v4132_v34 = vadd.f32 %v4116_v1, %v4091_v0  ;;  %3974 = vst.msk [vmem:[#allocation2 + $0x28] sm:$0xff] %vm963_vm1, %v3966_v21  ;;  %v4040_v39 = vld [vmem:[#allocation2 + $0x30] sm:$0x3f]  ;;  %v4214_v1 = vmul.f32 %v7327_v19, %v6998_v5  ;;  %v3894_v0 = vmul.f32 %v7121_v60, %v7178_v23  ;;  %v4272_v18 = vmul.f32 %v7354_v49, %v6987_v28 }
 0x39d   : > { %v4081_v43 = vadd.f32 %v4065_v51, %v4040_v39  ;;  %v4064_v51 = vrot.slane %v4048_v3, 2  ;;  %v4273_v63 = vmul.f32 %v7354_v49, %v7019_v56 }
 0x39e   : > { %4140 = vst.msk [vmem:[#allocation2] sm:$0x1f] %vm2668_vm14, %v4132_v34  ;;  %v4149_v62 = vld [vmem:[#allocation2 + $0x8] sm:$0xf]  ;;  %v4230_v41 = vrot.slane %v4214_v1, 5  ;;  %v4288_v10 = vrot.slane %v4272_v18, 6  ;;  %v4331_v1 = vmul.f32 %v7381_v27, %v6987_v28 }
 0x39f   : > { %v4190_v26 = vadd.f32 %v4174_v16, %v4149_v62  ;;  %4089 = vst.msk [vmem:[#allocation2 + $0x30] sm:$0x3f] %vm1955_vm12, %v4081_v43  ;;  %v3885_v38 = vld [vmem:[#allocation2 + $0x3a] sm:$0x3f] }
 0x3a0   : > { %v4093_v20 = vld [vmem:[#allocation2 + $0x10] sm:$0x1f]  ;;  %v3902_v7 = vadd.f32 %v3894_v0, %v3885_v38  ;;  %v4104_v0 = vmul.f32 %v7266_v37, %v7086_v40 }
 0x3a1   : > { %4198 = vst.msk [vmem:[#allocation2 + $0x8] sm:$0xf] %vm2988_vm8, %v4190_v26  ;;  %v4134_v44 = vadd.f32 %v4118_v46, %v4093_v20  ;;  %v4037_v54 = vld [vmem:[#allocation2 + $0x18] sm:$0x3f]  ;;  %v4216_v20 = vmul.f32 %v7327_v19, %v7019_v56 }
 0x3a2   : > { %v4078_v30 = vadd.f32 %v4062_v42, %v4037_v54  ;;  %v3981_v9 = vld [vmem:[#allocation2 + $0x20] sm:$0x7f]  ;;  %3910 = vst.msk [vmem:[#allocation2 + $0x3a] sm:$0x3f] %vm1955_vm12, %v3902_v7 }
 0x3a3   : > { %4142 = vst.msk [vmem:[#allocation2 + $0x10] sm:$0x1f] %vm2668_vm14, %v4134_v44  ;;  %v4022_v34 = vadd.f32 %v4006_v2, %v3981_v9  ;;  %v3982_v16 = vld [vmem:[#allocation2 + $0x28] sm:$0x7f]  ;;  %v4271_v44 = vmul.f32 %v7354_v49, %v6998_v5  ;;  %v4232_v39 = vrot.slane %v4216_v20, 5 }
 0x3a4   : > { %4086 = vst.msk [vmem:[#allocation2 + $0x18] sm:$0x3f] %vm1955_vm12, %v4078_v30  ;;  %v4023_v60 = vadd.f32 %v4007_v4, %v3982_v16  ;;  %v4179_v4 = vrot.slane %v4163_v29, 4  ;;  %v4347_v16 = vrot.slane %v4331_v1, 7  ;;  %v3371_v1 = vld [vmem:[%s7637_s15 + $0x4] sm:$0x7] }
 0x3a5   : > { %v4148_v11 = vld [vmem:[#allocation2] sm:$0xf]  ;;  %4030 = vst.msk [vmem:[#allocation2 + $0x20] sm:$0x7f] %vm1809_vm4, %v4022_v34  ;;  %v4287_v2 = vrot.slane %v4271_v44, 6 }
 0x3a6   : > { %v4189_v35 = vadd.f32 %v4173_v14, %v4148_v11  ;;  %4031 = vst.msk [vmem:[#allocation2 + $0x28] sm:$0x7f] %vm1809_vm4, %v4023_v60  ;;  %v4097_v25 = vld [vmem:[#allocation2 + $0x30] sm:$0x1f]  ;;  %v4120_v60 = vrot.slane %v4104_v0, 3 }
 0x3a7   : > { %v4138_v21 = vadd.f32 %v4122_v50, %v4097_v25  ;;  %v4289_v50 = vrot.slane %v4273_v63, 6 }
 0x3a8   : > { %4197 = vst.msk [vmem:[#allocation2] sm:$0xf] %vm2988_vm8, %v4189_v35  ;;  %v4206_v33 = vld [vmem:[#allocation2 + $0x8] sm:$0x7]  ;;  %v4160_v35 = vmul.f32 %v7296_v52, %v7053_v36 }
 0x3a9   : > { %v4247_v32 = vadd.f32 %v4231_v17, %v4206_v33  ;;  %4146 = vst.msk [vmem:[#allocation2 + $0x30] sm:$0x1f] %vm2668_vm14, %v4138_v21  ;;  %v3918_v30 = vld [vmem:[#allocation2 + $0x39] sm:$0x7f] }
 0x3aa   : > { %v4150_v62 = vld [vmem:[#allocation2 + $0x10] sm:$0xf]  ;;  %v3935_v43 = vadd.f32 %v3927_v12, %v3918_v30  ;;  %v4176_v9 = vrot.slane %v4160_v35, 4  ;;  %v3993_v35 = vmul.f32 %v7205_v15, %v7178_v23 }
 0x3ab   : > { %4255 = vst.msk [vmem:[#allocation2 + $0x8] sm:$0x7] %vm3803_vm2, %v4247_v32  ;;  %v4191_v26 = vadd.f32 %v4175_v8, %v4150_v62  ;;  %v4094_v22 = vld [vmem:[#allocation2 + $0x18] sm:$0x1f]  ;;  %v4105_v8 = vmul.f32 %v7266_v37, %v7088_v59 }
 0x3ac   : > { %v4135_v46 = vadd.f32 %v4119_v24, %v4094_v22  ;;  %v4038_v42 = vld [vmem:[#allocation2 + $0x20] sm:$0x3f]  ;;  %3943 = vst.msk [vmem:[#allocation2 + $0x39] sm:$0x7f] %vm1809_vm4, %v3935_v43  ;;  %v4217_v24 = vmul.f32 %v7327_v19, %v7053_v36 }
 0x3ad   : > { %4199 = vst.msk [vmem:[#allocation2 + $0x10] sm:$0xf] %vm2988_vm8, %v4191_v26  ;;  %v4079_v54 = vadd.f32 %v4063_v61, %v4038_v42  ;;  %v4039_v17 = vld [vmem:[#allocation2 + $0x28] sm:$0x3f]  ;;  %v4161_v61 = vmul.f32 %v7296_v52, %v7086_v40  ;;  %v4162_v42 = vmul.f32 %v7296_v52, %v7088_v59 }
 0x3ae   : > { %4143 = vst.msk [vmem:[#allocation2 + $0x18] sm:$0x1f] %vm2668_vm14, %v4135_v46  ;;  %v4080_v45 = vadd.f32 %v4064_v51, %v4039_v17 }
 0x3af   : > { %v4205_v55 = vld [vmem:[#allocation2] sm:$0x7]  ;;  %4087 = vst.msk [vmem:[#allocation2 + $0x20] sm:$0x3f] %vm1955_vm12, %v4079_v54  ;;  %v4177_v43 = vrot.slane %v4161_v61, 4  ;;  %v4178_v15 = vrot.slane %v4162_v42, 4  ;;  %v4336_v42 = vmul.f32 %v7381_v27, %v7044_v48 }
 0x3b0   : > { %v4246_v58 = vadd.f32 %v4230_v41, %v4205_v55  ;;  %4088 = vst.msk [vmem:[#allocation2 + $0x28] sm:$0x3f] %vm1955_vm12, %v4080_v45  ;;  %v4154_v28 = vld [vmem:[#allocation2 + $0x30] sm:$0xf]  ;;  %v4330_v41 = vmul.f32 %v7381_v27, %v6998_v5  ;;  %v3960_v55 = vmul.f32 %v7182_v53, %v7178_v23  ;;  %v4220_v5 = vmul.f32 %v7327_v19, %v7044_v48  ;;  %v3374_v54 = vld [vmem:[%s7636_s11] sm:$0x1] }
 0x3b1   : > { %v4195_v7 = vadd.f32 %v4179_v4, %v4154_v28  ;;  %v7437_v28 = vperm.slane %v3371_v1, 1 }
 0x3b2   : > { %4254 = vst.msk [vmem:[#allocation2] sm:$0x7] %vm3803_vm2, %v4246_v58  ;;  %v4263_v14 = vld [vmem:[#allocation2 + $0x8] sm:$0x3]  ;;  %v4121_v58 = vrot.slane %v4105_v8, 3  ;;  %v4346_v53 = vrot.slane %v4330_v41, 7  ;;  %v4277_v8 = vmul.f32 %v7354_v49, %v7044_v48 }
 0x3b3   : > { %v4304_v11 = vadd.f32 %v4288_v10, %v4263_v14  ;;  %4203 = vst.msk [vmem:[#allocation2 + $0x30] sm:$0xf] %vm2988_vm8, %v4195_v7  ;;  %v3951_v22 = vld [vmem:[#allocation2 + $0x38] sm:$0xff]  ;;  %v4233_v14 = vrot.slane %v4217_v24, 5  ;;  %v4236_v12 = vrot.slane %v4220_v5, 5  ;;  %v4219_v24 = vmul.f32 %v7327_v19, %v7088_v59 }
 0x3b4   : > { %v4207_v33 = vld [vmem:[#allocation2 + $0x10] sm:$0x7]  ;;  %v3968_v3 = vadd.f32 %v3960_v55, %v3951_v22 }
 0x3b5   : > { %4312 = vst.msk [vmem:[#allocation2 + $0x8] sm:$0x3] %vm3769_vm13, %v4304_v11  ;;  %v4248_v32 = vadd.f32 %v4232_v39, %v4207_v33  ;;  %v4151_v34 = vld [vmem:[#allocation2 + $0x18] sm:$0xf]  ;;  %v4332_v39 = vmul.f32 %v7381_v27, %v7019_v56  ;;  %v7425_v33 = vperm.slane %v3374_v54, 0  ;;  %v4275_v54 = vmul.f32 %v7354_v49, %v7086_v40 }
 0x3b6   : > { %v4192_v38 = vadd.f32 %v4176_v9, %v4151_v34  ;;  %v4095_v26 = vld [vmem:[#allocation2 + $0x20] sm:$0x1f]  ;;  %3976 = vst.msk [vmem:[#allocation2 + $0x38] sm:$0xff] %vm963_vm1, %v3968_v3 }
 0x3b7   : > { %4256 = vst.msk [vmem:[#allocation2 + $0x10] sm:$0x7] %vm3803_vm2, %v4248_v32  ;;  %v4136_v47 = vadd.f32 %v4120_v60, %v4095_v26  ;;  %v4096_v46 = vld [vmem:[#allocation2 + $0x28] sm:$0x1f]  ;;  %v4274_v32 = vmul.f32 %v7354_v49, %v7053_v36  ;;  %v4348_v0 = vrot.slane %v4332_v39, 7 }
 0x3b8   : > { %4200 = vst.msk [vmem:[#allocation2 + $0x18] sm:$0xf] %vm2988_vm8, %v4192_v38  ;;  %v4137_v10 = vadd.f32 %v4121_v58, %v4096_v46 }
 0x3b9   : > { %v4262_v57 = vld [vmem:[#allocation2] sm:$0x3]  ;;  %4144 = vst.msk [vmem:[#allocation2 + $0x20] sm:$0x1f] %vm2668_vm14, %v4136_v47  ;;  %v4290_v7 = vrot.slane %v4274_v32, 6  ;;  %v4293_v47 = vrot.slane %v4277_v8, 6 }
 0x3ba   : > { %v4303_v6 = vadd.f32 %v4287_v2, %v4262_v57  ;;  %4145 = vst.msk [vmem:[#allocation2 + $0x28] sm:$0x1f] %vm2668_vm14, %v4137_v10  ;;  %v4211_v30 = vld [vmem:[#allocation2 + $0x30] sm:$0x7]  ;;  %v4009_v2 = vrot.slane %v3993_v35, 1 }
 0x3bb   : > { %v4252_v17 = vadd.f32 %v4236_v12, %v4211_v30  ;;  %v4107_v30 = vmul.f32 %v7266_v37, %v7178_v23 }
 0x3bc   : > { %4311 = vst.msk [vmem:[#allocation2] sm:$0x3] %vm3769_vm13, %v4303_v6  ;;  %v4320_v62 = vld [vmem:[#allocation2 + $0x8] sm:$0x1] }
 0x3bd   : > { %v4363_v18 = vadd.f32 %v4347_v16, %v4320_v62  ;;  %4260 = vst.msk [vmem:[#allocation2 + $0x30] sm:$0x7] %vm3803_vm2, %v4252_v17  ;;  %v3984_v56 = vld [vmem:[#allocation2 + $0x38] sm:$0x7f]  ;;  %v4218_v62 = vmul.f32 %v7327_v19, %v7086_v40  ;;  %v4352_v17 = vrot.slane %v4336_v42, 7  ;;  %v4123_v1 = vrot.slane %v4107_v30, 3 }
 0x3be   : > { %v4264_v25 = vld [vmem:[#allocation2 + $0x10] sm:$0x3]  ;;  %v4025_v34 = vadd.f32 %v4009_v2, %v3984_v56 }
 0x3bf   : > { %4371 = vst.msk [vmem:[#allocation2 + $0x8] sm:$0x1] %vm3735_vm10, %v4363_v18  ;;  %v4305_v20 = vadd.f32 %v4289_v50, %v4264_v25  ;;  %v4208_v11 = vld [vmem:[#allocation2 + $0x18] sm:$0x7]  ;;  %v4050_v18 = vmul.f32 %v7234_v13, %v7178_v23  ;;  %v4234_v46 = vrot.slane %v4218_v62, 5  ;;  %v4333_v25 = vmul.f32 %v7381_v27, %v7053_v36 }
 0x3c0   : > { %v4249_v51 = vadd.f32 %v4233_v14, %v4208_v11  ;;  %v4152_v45 = vld [vmem:[#allocation2 + $0x20] sm:$0xf]  ;;  %4033 = vst.msk [vmem:[#allocation2 + $0x38] sm:$0x7f] %vm1809_vm4, %v4025_v34 }
 0x3c1   : > { %4313 = vst.msk [vmem:[#allocation2 + $0x10] sm:$0x3] %vm3769_vm13, %v4305_v20  ;;  %v4193_v57 = vadd.f32 %v4177_v43, %v4152_v45  ;;  %v4153_v6 = vld [vmem:[#allocation2 + $0x28] sm:$0xf]  ;;  %v4066_v13 = vrot.slane %v4050_v18, 2  ;;  %v4349_v36 = vrot.slane %v4333_v25, 7  ;;  %v4276_v45 = vmul.f32 %v7354_v49, %v7088_v59 }
 0x3c2   : > { %4257 = vst.msk [vmem:[#allocation2 + $0x18] sm:$0x7] %vm3803_vm2, %v4249_v51  ;;  %v4194_v38 = vadd.f32 %v4178_v15, %v4153_v6  ;;  %v4291_v43 = vrot.slane %v4275_v54, 6  ;;  %v4221_v25 = vmul.f32 %v7327_v19, %v7178_v23 }
 0x3c3   : > { %v4319_v21 = vld [vmem:[#allocation2] sm:$0x1]  ;;  %4201 = vst.msk [vmem:[#allocation2 + $0x20] sm:$0xf] %vm2988_vm8, %v4193_v57  ;;  %v4292_v34 = vrot.slane %v4276_v45, 6 }
 0x3c4   : > { %v4362_v44 = vadd.f32 %v4346_v53, %v4319_v21  ;;  %4202 = vst.msk [vmem:[#allocation2 + $0x28] sm:$0xf] %vm2988_vm8, %v4194_v38  ;;  %v4268_v50 = vld [vmem:[#allocation2 + $0x30] sm:$0x3]  ;;  %v4235_v53 = vrot.slane %v4219_v24, 5  ;;  %v4334_v38 = vmul.f32 %v7381_v27, %v7086_v40  ;;  %v4335_v40 = vmul.f32 %v7381_v27, %v7088_v59 }
 0x3c5   : > { %v4309_v5 = vadd.f32 %v4293_v47, %v4268_v50 }
 0x3c6   : > { %4370 = vst.msk [vmem:[#allocation2] sm:$0x1] %vm3735_vm10, %v4362_v44  ;;  %v4379_v29 = vld [vmem:[#allocation2 + $0x8] sm:$0xff]  ;;  %v4351_v50 = vrot.slane %v4335_v40, 7 }
 0x3c7   : > { %4398 = vst.msk [vmem:[#allocation2 + $0x8] sm:$0xff] %vm963_vm1, %v7590_v31  ;;  %v4390_v9 = vadd.f32 %v7425_v33, %v4379_v29  ;;  %v4041_v20 = vld [vmem:[#allocation2 + $0x38] sm:$0x3f] }
 0x3c8   : > { %v4321_v4 = vld [vmem:[#allocation2 + $0x10] sm:$0x1]  ;;  %4317 = vst.msk [vmem:[#allocation2 + $0x30] sm:$0x3] %vm3769_vm13, %v4309_v5  ;;  %v4082_v61 = vadd.f32 %v4066_v13, %v4041_v20 }
 0x3c9   : > { %v4364_v16 = vadd.f32 %v4348_v0, %v4321_v4  ;;  %v4415_v60 = vmul.f32 %v7437_v28, %v4390_v9  ;;  %v4265_v41 = vld [vmem:[#allocation2 + $0x18] sm:$0x3] }
 0x3ca   : > { %v4306_v55 = vadd.f32 %v4290_v7, %v4265_v41  ;;  %v4209_v3 = vld [vmem:[#allocation2 + $0x20] sm:$0x7]  ;;  %4090 = vst.msk [vmem:[#allocation2 + $0x38] sm:$0x3f] %vm1955_vm12, %v4082_v61 }
 0x3cb   : > { %4372 = vst.msk [vmem:[#allocation2 + $0x10] sm:$0x1] %vm3735_vm10, %v4364_v16  ;;  %v4250_v10 = vadd.f32 %v4234_v46, %v4209_v3  ;;  %v4210_v14 = vld [vmem:[#allocation2 + $0x28] sm:$0x7] }
 0x3cc   : > { %4314 = vst.msk [vmem:[#allocation2 + $0x18] sm:$0x3] %vm3769_vm13, %v4306_v55  ;;  %v4251_v11 = vadd.f32 %v4235_v53, %v4210_v14 }
 0x3cd   : > { %v4378_v63 = vld [vmem:[#allocation2] sm:$0xff]  ;;  %4258 = vst.msk [vmem:[#allocation2 + $0x20] sm:$0x7] %vm3803_vm2, %v4250_v10 }
 0x3ce   : > { %4397 = vst.msk [vmem:[#allocation2] sm:$0xff] %vm963_vm1, %v7590_v31  ;;  %v4406_v26 = vld [vmem:[#allocation2 + $0x8] sm:$0xff]  ;;  %v4389_v58 = vadd.f32 %v7425_v33, %v4378_v63  ;;  %v4164_v63 = vmul.f32 %v7296_v52, %v7178_v23 }
 0x3cf   : > { %v4423_v22 = vadd.f32 %v4415_v60, %v4406_v26  ;;  %4259 = vst.msk [vmem:[#allocation2 + $0x28] sm:$0x7] %vm3803_vm2, %v4251_v11  ;;  %v4325_v29 = vld [vmem:[#allocation2 + $0x30] sm:$0x1]  ;;  %v4350_v60 = vrot.slane %v4334_v38, 7  ;;  %v4278_v11 = vmul.f32 %v7354_v49, %v7178_v23  ;;  %v4337_v49 = vmul.f32 %v7381_v27, %v7178_v23 }
 0x3d0   : > { %v4414_v21 = vmul.f32 %v7437_v28, %v4389_v58  ;;  %v4368_v15 = vadd.f32 %v4352_v17, %v4325_v29  ;;  %v4180_v18 = vrot.slane %v4164_v63, 4 }
 0x3d1   : > { %4431 = vst.msk [vmem:[#allocation2 + $0x8] sm:$0xff] %vm963_vm1, %v4423_v22  ;;  %v4098_v37 = vld [vmem:[#allocation2 + $0x38] sm:$0x1f]  ;;  %v4353_v45 = vrot.slane %v4337_v49, 7 }
 0x3d2   : > { %v4380_v35 = vld [vmem:[#allocation2 + $0x10] sm:$0xff]  ;;  %4376 = vst.msk [vmem:[#allocation2 + $0x30] sm:$0x1] %vm3735_vm10, %v4368_v15  ;;  %v4139_v9 = vadd.f32 %v4123_v1, %v4098_v37 }
 0x3d3   : > { %4399 = vst.msk [vmem:[#allocation2 + $0x10] sm:$0xff] %vm963_vm1, %v7590_v31  ;;  %v4322_v51 = vld [vmem:[#allocation2 + $0x18] sm:$0x1]  ;;  %v4391_v39 = vadd.f32 %v7425_v33, %v4380_v35 }
 0x3d4   : > { %v4365_v48 = vadd.f32 %v4349_v36, %v4322_v51  ;;  %v4266_v2 = vld [vmem:[#allocation2 + $0x20] sm:$0x3]  ;;  %4147 = vst.msk [vmem:[#allocation2 + $0x38] sm:$0x1f] %vm2668_vm14, %v4139_v9  ;;  %v4294_v51 = vrot.slane %v4278_v11, 6 }
 0x3d5   : > { %v4405_v44 = vld [vmem:[#allocation2] sm:$0xff]  ;;  %v4416_v32 = vmul.f32 %v7437_v28, %v4391_v39  ;;  %v4307_v57 = vadd.f32 %v4291_v43, %v4266_v2 }
 0x3d6   : > { %v4422_v12 = vadd.f32 %v4414_v21, %v4405_v44  ;;  %4373 = vst.msk [vmem:[#allocation2 + $0x18] sm:$0x1] %vm3735_vm10, %v4365_v48  ;;  %v4267_v4 = vld [vmem:[#allocation2 + $0x28] sm:$0x3]  ;;  %v4237_v21 = vrot.slane %v4221_v25, 5 }
 0x3d7   : > { %4315 = vst.msk [vmem:[#allocation2 + $0x20] sm:$0x3] %vm3769_vm13, %v4307_v57  ;;  %v4308_v8 = vadd.f32 %v4292_v34, %v4267_v4 }
 0x3d8   : > { %4430 = vst.msk [vmem:[#allocation2] sm:$0xff] %vm963_vm1, %v4422_v12  ;;  %v4439_v26 = vld [vmem:[#allocation2 + $0x8] sm:$0xff] }
 0x3d9   : > { %4316 = vst.msk [vmem:[#allocation2 + $0x28] sm:$0x3] %vm3769_vm13, %v4308_v8  ;;  %v4384_v7 = vld [vmem:[#allocation2 + $0x30] sm:$0xff] }
 0x3da   : > { %v4407_v56 = vld [vmem:[#allocation2 + $0x10] sm:$0xff]  ;;  %4403 = vst.msk [vmem:[#allocation2 + $0x30] sm:$0xff] %vm963_vm1, %v7590_v31  ;;  %v4395_v52 = vadd.f32 %v7425_v33, %v4384_v7 }
 0x3db   : > { %v4424_v6 = vadd.f32 %v4416_v32, %v4407_v56  ;;  %v4155_v24 = vld [vmem:[#allocation2 + $0x38] sm:$0xf] }
 0x3dc   : > { %v4196_v47 = vadd.f32 %v4180_v18, %v4155_v24  ;;  %v4420_v59 = vmul.f32 %v7437_v28, %v4395_v52 }
 0x3dd   : > { %4432 = vst.msk [vmem:[#allocation2 + $0x10] sm:$0xff] %vm963_vm1, %v4424_v6  ;;  %v4381_v16 = vld [vmem:[#allocation2 + $0x18] sm:$0xff]  ;;  %v4827_v6 = vld [vmem:[%s5017_s14] ss:$0 sm:$0xff] }
 0x3de   : > { %4400 = vst.msk [vmem:[#allocation2 + $0x18] sm:$0xff] %vm963_vm1, %v7590_v31  ;;  %v4392_v62 = vadd.f32 %v7425_v33, %v4381_v16  ;;  %v4323_v41 = vld [vmem:[#allocation2 + $0x20] sm:$0x1] }
 0x3df   : > { %v4438_v0 = vld [vmem:[#allocation2] sm:$0xff]  ;;  %v4366_v55 = vadd.f32 %v4350_v60, %v4323_v41  ;;  %4204 = vst.msk [vmem:[#allocation2 + $0x38] sm:$0xf] %vm2988_vm8, %v4196_v47 }
 0x3e0   : > { %4772 = vmatmul.msk.f32.vlgmr.msra.gmra.mxu3 %vm963_vm1, %v4438_v0  ;;  %v4417_v58 = vmul.f32 %v7437_v28, %v4392_v62  ;;  %v4324_v5 = vld [vmem:[#allocation2 + $0x28] sm:$0x1]  ;;  %v4826_v0 = vld [vmem:[%s5012_s20] ss:$0 sm:$0xff] }
 0x3e1   : > { %4374 = vst.msk [vmem:[#allocation2 + $0x20] sm:$0x1] %vm3735_vm10, %v4366_v55  ;;  %v4367_v3 = vadd.f32 %v4351_v50, %v4324_v5  ;;  %v4411_v13 = vld [vmem:[#allocation2 + $0x30] sm:$0xff] }
 0x3e2   : > { %v4428_v10 = vadd.f32 %v4420_v59, %v4411_v13 }
 0x3e3   : > { %4375 = vst.msk [vmem:[#allocation2 + $0x28] sm:$0x1] %vm3735_vm10, %v4367_v3 }
 0x3e4   : > { %v4440_v53 = vld [vmem:[#allocation2 + $0x10] sm:$0xff]  ;;  %4436 = vst.msk [vmem:[#allocation2 + $0x30] sm:$0xff] %vm963_vm1, %v4428_v10 }
 0x3e5   : > { %v4408_v22 = vld [vmem:[#allocation2 + $0x18] sm:$0xff] }
 0x3e6   : > { %v4425_v46 = vadd.f32 %v4417_v58, %v4408_v22  ;;  %v4212_v14 = vld [vmem:[#allocation2 + $0x38] sm:$0x7] }
 0x3e7   : > { %v4253_v61 = vadd.f32 %v4237_v21, %v4212_v14  ;;  %v2371_v14 = vpop.trf.xlu0 }
 0x3e8   : > { %4773 = vmatmul.msk.f32.gmra.mxu3 %vm963_vm1, %v4439_v26  ;;  %4433 = vst.msk [vmem:[#allocation2 + $0x18] sm:$0xff] %vm963_vm1, %v4425_v46  ;;  %v4382_v20 = vld [vmem:[#allocation2 + $0x20] sm:$0xff] }
 0x3e9   : > { %4401 = vst.msk [vmem:[#allocation2 + $0x20] sm:$0xff] %vm963_vm1, %v7590_v31  ;;  %v4393_v44 = vadd.f32 %v7425_v33, %v4382_v20 }
 0x3ea   : > { %4261 = vst.msk [vmem:[#allocation2 + $0x38] sm:$0x7] %vm3803_vm2, %v4253_v61  ;;  %v4383_v19 = vld [vmem:[#allocation2 + $0x28] sm:$0xff] }
 0x3eb   : > { %4402 = vst.msk [vmem:[#allocation2 + $0x28] sm:$0xff] %vm963_vm1, %v7590_v31  ;;  %v4418_v12 = vmul.f32 %v7437_v28, %v4393_v44  ;;  %v4394_v36 = vadd.f32 %v7425_v33, %v4383_v19  ;;  %v4444_v57 = vld [vmem:[#allocation2 + $0x30] sm:$0xff] }
 0x3ec   : > { %2388 = vst.msk [vmem:[%s902_s18] sm:$0xf] %vm2387_vm9, %v2371_v14 }
 0x3ed   : > { %v4419_v39 = vmul.f32 %v7437_v28, %v4394_v36 }
 0x3ef   : > { %v4441_v42 = vld [vmem:[#allocation2 + $0x18] sm:$0xff] }
 0x3f0   : > { %4774 = vmatmul.msk.f32.gmra.mxu3 %vm963_vm1, %v4440_v53  ;;  %v4409_v35 = vld [vmem:[#allocation2 + $0x20] sm:$0xff] }
 0x3f1   : > { %v4426_v54 = vadd.f32 %v4418_v12, %v4409_v35  ;;  %v4269_v30 = vld [vmem:[#allocation2 + $0x38] sm:$0x3] }
 0x3f2   : > { %v4310_v48 = vadd.f32 %v4294_v51, %v4269_v30  ;;  %v4410_v17 = vld [vmem:[#allocation2 + $0x28] sm:$0xff] }
 0x3f3   : > { %4434 = vst.msk [vmem:[#allocation2 + $0x20] sm:$0xff] %vm963_vm1, %v4426_v54  ;;  %v4427_v29 = vadd.f32 %v4419_v39, %v4410_v17 }
 0x3f4   : > { %4318 = vst.msk [vmem:[#allocation2 + $0x38] sm:$0x3] %vm3769_vm13, %v4310_v48 }
 0x3f5   : > { %4435 = vst.msk [vmem:[#allocation2 + $0x28] sm:$0xff] %vm963_vm1, %v4427_v29 }
 0x3f8   : > { %4775 = vmatmul.msk.f32.gmra.mxu3 %vm963_vm1, %v4441_v42 }
 0x3fa   : > { %v4442_v43 = vld [vmem:[#allocation2 + $0x20] sm:$0xff] }
 0x3fb   : > { %v4326_v15 = vld [vmem:[#allocation2 + $0x38] sm:$0x1] }
 0x3fc   : > { %v4369_v2 = vadd.f32 %v4353_v45, %v4326_v15  ;;  %v4443_v1 = vld [vmem:[#allocation2 + $0x28] sm:$0xff] }
 0x3fe   : > { %4377 = vst.msk [vmem:[#allocation2 + $0x38] sm:$0x1] %vm3735_vm10, %v4369_v2 }
 0x400   : > { %4776 = vmatmul.msk.f32.gmra.mxu3 %vm963_vm1, %v4442_v43 }
 0x404   : > { %v3350_v21 = vpop.trf.xlu1 }
 0x405   : > { %v4385_v32 = vld [vmem:[#allocation2 + $0x38] sm:$0xff]  ;;  %3366 = vst.msk [vmem:[%s902_s18 + $0x4] sm:$0xf] %vm2387_vm9, %v3350_v21 }
 0x406   : > { %4404 = vst.msk [vmem:[#allocation2 + $0x38] sm:$0xff] %vm963_vm1, %v7590_v31  ;;  %v4396_v23 = vadd.f32 %v7425_v33, %v4385_v32 }
 0x408   : > { %4777 = vmatmul.msk.f32.gmra.mxu3 %vm963_vm1, %v4443_v1  ;;  %v4421_v27 = vmul.f32 %v7437_v28, %v4396_v23 }
 0x40d   : > { %v4412_v37 = vld [vmem:[#allocation2 + $0x38] sm:$0xff] }
 0x40e   : > { %v4429_v56 = vadd.f32 %v4421_v27, %v4412_v37 }
 0x410   : > { %4778 = vmatmul.msk.f32.gmra.mxu3 %vm963_vm1, %v4444_v57  ;;  %4437 = vst.msk [vmem:[#allocation2 + $0x38] sm:$0xff] %vm963_vm1, %v4429_v56 }
 0x417   : > { %v4445_v9 = vld [vmem:[#allocation2 + $0x38] sm:$0xff] }
 0x418   : > { %4779 = vmatmul.msk.f32.gmra.mxu3 %vm963_vm1, %v4445_v9 }
 0x463   : > { %v4495_v34 = vpop.f32.mrf.mxu3 }
 0x464   : > { %v4496_v4 = vadd.f32 %v4826_v0, %v4495_v34 }
 0x466   : > { %vm4520_vm4 = vcmp.gt.f32.partialorder %v4496_v4, 0.0  ;;  %v4531_v31 = vmul.f32 %v4827_v6, %v4496_v4 }
 0x468   : > { %v4539_v38 = vsel %vm4520_vm4, %v4496_v4, %v4531_v31 }
 0x469   : > { %4547 = vxpose.xlu2.b32.start [1/8] (short) (narrow) %v4539_v38, 8 }
 0x46b   : > { %v4498_v33 = vpop.f32.mrf.mxu3 }
 0x46c   : > { %v4499_v8 = vadd.f32 %v4826_v0, %v4498_v33 }
 0x46e   : > { %vm4521_vm12 = vcmp.gt.f32.partialorder %v4499_v8, 0.0  ;;  %v4532_v16 = vmul.f32 %v4827_v6, %v4499_v8 }
 0x470   : > { %v4540_v28 = vsel %vm4521_vm12, %v4499_v8, %v4532_v16 }
 0x471   : > { %4548 = vxpose.xlu2.b32.cont [2/8] (short) (narrow) %v4540_v28, 8 }
 0x473   : > { %v4501_v63 = vpop.f32.mrf.mxu3 }
 0x474   : > { %v4502_v7 = vadd.f32 %v4826_v0, %v4501_v63 }
 0x476   : > { %vm4522_vm14 = vcmp.gt.f32.partialorder %v4502_v7, 0.0  ;;  %v4533_v62 = vmul.f32 %v4827_v6, %v4502_v7 }
 0x478   : > { %v4541_v60 = vsel %vm4522_vm14, %v4502_v7, %v4533_v62 }
 0x479   : > { %4549 = vxpose.xlu2.b32.cont [3/8] (short) (narrow) %v4541_v60, 8 }
 0x47b   : > { %v4504_v41 = vpop.f32.mrf.mxu3 }
 0x47c   : > { %v4505_v40 = vadd.f32 %v4826_v0, %v4504_v41 }
 0x47e   : > { %vm4523_vm1 = vcmp.gt.f32.partialorder %v4505_v40, 0.0  ;;  %v4534_v18 = vmul.f32 %v4827_v6, %v4505_v40 }
 0x480   : > { %v4542_v26 = vsel %vm4523_vm1, %v4505_v40, %v4534_v18 }
 0x481   : > { %4550 = vxpose.xlu2.b32.cont [4/8] (short) (narrow) %v4542_v26, 8 }
 0x483   : > { %v4507_v55 = vpop.f32.mrf.mxu3 }
 0x484   : > { %v4508_v52 = vadd.f32 %v4826_v0, %v4507_v55 }
 0x486   : > { %vm4524_vm8 = vcmp.gt.f32.partialorder %v4508_v52, 0.0  ;;  %v4535_v24 = vmul.f32 %v4827_v6, %v4508_v52 }
 0x488   : > { %v4543_v47 = vsel %vm4524_vm8, %v4508_v52, %v4535_v24 }
 0x489   : > { %4551 = vxpose.xlu2.b32.cont [5/8] (short) (narrow) %v4543_v47, 8 }
 0x48b   : > { %v4510_v58 = vpop.f32.mrf.mxu3 }
 0x48c   : > { %v4511_v22 = vadd.f32 %v4826_v0, %v4510_v58 }
 0x48e   : > { %vm4525_vm10 = vcmp.gt.f32.partialorder %v4511_v22, 0.0  ;;  %v4536_v50 = vmul.f32 %v4827_v6, %v4511_v22 }
 0x490   : > { %v4544_v46 = vsel %vm4525_vm10, %v4511_v22, %v4536_v50 }
 0x491   : > { %4552 = vxpose.xlu2.b32.cont [6/8] (short) (narrow) %v4544_v46, 8 }
 0x493   : > { %v4513_v5 = vpop.f32.mrf.mxu3 }
 0x494   : > { %v4514_v59 = vadd.f32 %v4826_v0, %v4513_v5 }
 0x496   : > { %vm4526_vm13 = vcmp.gt.f32.partialorder %v4514_v59, 0.0  ;;  %v4537_v3 = vmul.f32 %v4827_v6, %v4514_v59 }
 0x498   : > { %v4545_v13 = vsel %vm4526_vm13, %v4514_v59, %v4537_v3 }
 0x499   : > { %4553 = vxpose.xlu2.b32.cont [7/8] (short) (narrow) %v4545_v13, 8 }
 0x49b   : > { %v4516_v25 = vpop.f32.mrf.mxu3 }
 0x49c   : > { %v4517_v10 = vadd.f32 %v4826_v0, %v4516_v25 }
 0x49e   : > { %vm4527_vm2 = vcmp.gt.f32.partialorder %v4517_v10, 0.0  ;;  %v4538_v53 = vmul.f32 %v4827_v6, %v4517_v10 }
 0x4a0   : > { %v4546_v20 = vsel %vm4527_vm2, %v4517_v10, %v4538_v53 }
 0x4a1   : > { %4554 = vxpose.xlu2.b32.end [8/8] (short) (narrow) %v4546_v20, 8 }
 0x502   : > { %v4563_v61 = vpop.trf.xlu2 }
 0x503   : > { %4579 = vst.msk [vmem:[%s902_s18 + $0x8] sm:$0xf] %vm2387_vm9, %v4563_v61 }
 0x504 PF: > { %s69_s7 = sadd.s32 1, %s4837_s7  }
 0x505   : > { %p66_p4 = scmp.ge.s32.totalorder %s69_s7, 4  }
 0x507   :  { %68 = sbr.rel (!%p66_p4) target bundleno = 47 (0x2f), region = 202 }

</bundles_post_ra>
